<compile_context>
chip_gen: v7x
topology: tpu7x:2x2x1
jax: 0.10.0
libtpu: 0.0.40
codegen_flags: <defaults>
</compile_context>

<pallas_src>
import math

import jax
import jax.numpy as jnp
from jax import lax
from jax.experimental import pallas as pl
from jax.experimental.pallas import tpu as pltpu

_EPS = 1e-5  # torch.nn.LayerNorm default eps


# ----------------------------- in-kernel helpers -----------------------------

def _layernorm(x, gamma, beta):
    mean = jnp.mean(x, axis=-1, keepdims=True)
    var = jnp.mean((x - mean) ** 2, axis=-1, keepdims=True)
    return (x - mean) * lax.rsqrt(var + _EPS) * gamma + beta


def _gelu_exact(x):
    # torch.nn.GELU() default (erf-based, exact)
    return 0.5 * x * (1.0 + lax.erf(x * (1.0 / math.sqrt(2.0))))


def _n_branch_args(project_out):
    return 15 if project_out else 13


# ------------------------------ branch compute --------------------------------

def _run_branch(other_ref, self_ref, wrefs, out_ref, *, bb, n_self, n_other,
                heads, dim_head, project_out):
    """out = ViT_block([Linear(mean(LN(other))); self])[1:], written channel-major."""
    dh = dim_head
    inner = heads * dh
    scale = float(dh) ** -0.5

    # ---- hoisted weight loads (read each ref exactly once) -------------------
    it = iter(wrefs)
    og, ob = next(it)[...], next(it)[...]          # other-branch LN
    lw, lb = next(it)[...], next(it)[...]          # other -> self Linear
    ln1g, ln1b = next(it)[...], next(it)[...]
    wqkv = next(it)[...]                           # (D, 3*inner), fused QKV
    if project_out:
        wo_ref, bo = next(it), next(it)[...]
        wo_heads = [wo_ref[h] for h in range(heads)]   # per-head (dh, D) slices
    ln2g, ln2b = next(it)[...], next(it)[...]
    w1, b1 = next(it)[...], next(it)[...]
    w2, b2 = next(it)[...], next(it)[...]

    # ---- in-kernel layout change: channel-major (D, N) -> token-major rows ---
    o_rows = [jnp.transpose(other_ref[i].astype(jnp.float32)) for i in range(bb)]
    x_rows = [jnp.transpose(self_ref[i].astype(jnp.float32)) for i in range(bb)]
    O = o_rows[0] if bb == 1 else jnp.concatenate(o_rows, axis=0)   # (bb*No, Do)
    X = x_rows[0] if bb == 1 else jnp.concatenate(x_rows, axis=0)   # (bb*N,  D)

    # ---- cross token per batch element: LN(other) -> mean -> Linear -> LN1 -> QKV
    On = _layernorm(O, og, ob)
    qkv_tok = []
    for i in range(bb):
        pooled = jnp.mean(On[i * n_other:(i + 1) * n_other], axis=0, keepdims=True)
        tok = jnp.dot(pooled, lw, preferred_element_type=jnp.float32) + lb   # (1, D)
        tn = _layernorm(tok, ln1g, ln1b)
        qkv_tok.append(jnp.dot(tn, wqkv, preferred_element_type=jnp.float32))  # (1, 3I)

    # ---- PreNorm + multi-head self-attention (token only enters K/V) ---------
    Xn = _layernorm(X, ln1g, ln1b)
    qkv = jnp.dot(Xn, wqkv, preferred_element_type=jnp.float32)      # (bb*N, 3*inner)

    att_parts = []
    for i in range(bb):
        r0 = i * n_self
        att_i = None
        for h in range(heads):
            qs, ks, vs = h * dh, inner + h * dh, 2 * inner + h * dh
            q = qkv[r0:r0 + n_self, qs:qs + dh] * scale
            k = qkv[r0:r0 + n_self, ks:ks + dh]
            v = qkv[r0:r0 + n_self, vs:vs + dh]
            kt = qkv_tok[i][:, ks:ks + dh]                           # (1, dh)
            vt = qkv_tok[i][:, vs:vs + dh]                           # (1, dh)

            # q @ k^T without an explicit transpose (contract on dim 1)
            dots = lax.dot_general(q, k, (((1,), (1,)), ((), ())),
                                   preferred_element_type=jnp.float32)   # (N, N)
            dots_t = jnp.sum(q * kt, axis=-1, keepdims=True)             # (N, 1)

            m = jnp.maximum(jnp.max(dots, axis=-1, keepdims=True), dots_t)
            p = jnp.exp(dots - m)
            pt = jnp.exp(dots_t - m)
            inv = pl.reciprocal(jnp.sum(p, axis=-1, keepdims=True) + pt,
                                approx=True)                             # EUP slot
            oh = (jnp.dot(p, v, preferred_element_type=jnp.float32) + pt * vt) * inv

            if project_out:
                c = jnp.dot(oh, wo_heads[h], preferred_element_type=jnp.float32)
                att_i = c if att_i is None else att_i + c
            else:
                att_i = oh   # vit-pytorch rule: heads == 1 and dim_head == dim
        att_parts.append(att_i)

    att = att_parts[0] if bb == 1 else jnp.concatenate(att_parts, axis=0)
    if project_out:
        att = att + bo
    X = X + att

    # ---- PreNorm + GELU MLP + residual ---------------------------------------
    Xn2 = _layernorm(X, ln2g, ln2b)
    h1 = _gelu_exact(jnp.dot(Xn2, w1, preferred_element_type=jnp.float32) + b1)
    X = X + jnp.dot(h1, w2, preferred_element_type=jnp.float32) + b2

    # ---- store lane-dense, channel-major (D, N): fuses the output transpose --
    for i in range(bb):
        out_ref[i] = jnp.transpose(X[i * n_self:(i + 1) * n_self]).astype(out_ref.dtype)


def _make_kernel(cfg_s, cfg_l, bb):
    n_s = _n_branch_args(cfg_s["project_out"])
    n_l = _n_branch_args(cfg_l["project_out"])

    def kernel(*refs):
        e_ref, r_ref = refs[0], refs[1]
        ws = refs[2:2 + n_s]
        wl = refs[2 + n_s:2 + n_s + n_l]
        r_out_ref = refs[2 + n_s + n_l]
        e_out_ref = refs[3 + n_s + n_l]
        # branch s: transformer_s over r, cross token from e (norm_l / linear_l)
        _run_branch(e_ref, r_ref, ws, r_out_ref, bb=bb, **cfg_s)
        # branch l: transformer_l over e, cross token from r (norm_s / linear_s)
        _run_branch(r_ref, e_ref, wl, e_out_ref, bb=bb, **cfg_l)

    return kernel


# ------------------------------ pallas wrapper --------------------------------

def _full_spec(shape):
    nd = len(shape)
    return pl.BlockSpec(shape, lambda b, _nd=nd: (0,) * _nd)


def _branch_args_specs(other_ln, other_lin, tp):
    d_o, d = other_lin["w"].shape
    heads, dh = tp["heads"], tp["dim_head"]
    m = tp["ff1"]["w"].shape[1]
    args = [
        other_ln["g"].reshape(1, d_o), other_ln["b"].reshape(1, d_o),
        other_lin["w"], other_lin["b"].reshape(1, d),
        tp["ln1"]["g"].reshape(1, d), tp["ln1"]["b"].reshape(1, d),
        tp["wqkv"],
    ]
    if tp["project_out"]:
        args += [tp["out"]["w"].reshape(heads, dh, d), tp["out"]["b"].reshape(1, d)]
    args += [
        tp["ln2"]["g"].reshape(1, d), tp["ln2"]["b"].reshape(1, d),
        tp["ff1"]["w"], tp["ff1"]["b"].reshape(1, m),
        tp["ff2"]["w"], tp["ff2"]["b"].reshape(1, d),
    ]
    specs = [_full_spec(a.shape) for a in args]
    return args, specs


def _batch_block(batch):
    """Fold the whole (tiny) batch into one grid step on single-TC chips;
    keep a per-element parallel batch grid on dual-TC v7x."""
    kind = ""
    try:
        kind = jax.devices()[0].device_kind.lower()
    except Exception:
        pass
    if "v7" in kind and batch > 1:
        return 1                      # spread batch across the 2 TensorCores
    bb = min(batch, 8)                # working set is tens of KB; fold batch
    while batch % bb:
        bb -= 1
    return bb


# -------------------------------- Cross_Att -----------------------------------

def cross_att(e, r, params):
    b, c_e, h_e, w_e = e.shape          # c_e == dim_l
    _, c_r, h_r, w_r = r.shape          # c_r == dim_s
    n_e, n_r = h_e * w_e, h_r * w_r

    # Free reshapes only (no XLA transposes); layout change happens in-kernel.
    e_cn = e.reshape(b, c_e, n_e)
    r_cn = r.reshape(b, c_r, n_r)

    bb = _batch_block(b)

    tps, tpl = params["transformer_s"], params["transformer_l"]
    args_s, specs_s = _branch_args_specs(params["norm_l"], params["linear_l"], tps)
    args_l, specs_l = _branch_args_specs(params["norm_s"], params["linear_s"], tpl)

    cfg_s = dict(n_self=n_r, n_other=n_e, heads=tps["heads"],
                 dim_head=tps["dim_head"], project_out=tps["project_out"])
    cfg_l = dict(n_self=n_e, n_other=n_r, heads=tpl["heads"],
                 dim_head=tpl["dim_head"], project_out=tpl["project_out"])
    for cfg in (cfg_s, cfg_l):
        if not cfg["project_out"]:
            assert cfg["heads"] == 1, "project_out=False requires heads==1"

    kern = _make_kernel(cfg_s, cfg_l, bb)

    in_specs = ([pl.BlockSpec((bb, c_e, n_e), lambda i: (i, 0, 0)),
                 pl.BlockSpec((bb, c_r, n_r), lambda i: (i, 0, 0))]
                + specs_s + specs_l)
    out_shape = (jax.ShapeDtypeStruct((b, c_r, n_r), r.dtype),
                 jax.ShapeDtypeStruct((b, c_e, n_e), e.dtype))
    out_specs = (pl.BlockSpec((bb, c_r, n_r), lambda i: (i, 0, 0)),
                 pl.BlockSpec((bb, c_e, n_e), lambda i: (i, 0, 0)))

    r_new_cn, e_new_cn = pl.pallas_call(
        kern,
        out_shape=out_shape,
        grid=(b // bb,),
        in_specs=in_specs,
        out_specs=out_specs,
        compiler_params=pltpu.CompilerParams(dimension_semantics=("parallel",)),
    )(e_cn, r_cn, *args_s, *args_l)

    e_out = e_new_cn.reshape(b, c_e, h_e, w_e)
    r_out = r_new_cn.reshape(b, c_r, h_r, w_r)
    return e_out, r_out


# ----------------------------- deterministic init ------------------------------

def init_params(key, dim_s, dim_l):
    keys = jax.random.split(key, 4)

    def dense(k, din, dout):
        return {"w": 0.02 * jax.random.normal(k, (din, dout), jnp.float32),
                "b": jnp.zeros((dout,), jnp.float32)}

    def ln(d):
        return {"g": jnp.ones((d,), jnp.float32), "b": jnp.zeros((d,), jnp.float32)}

    def transformer(k, dim, heads, dim_head, mlp_dim):
        inner = heads * dim_head
        project_out = not (heads == 1 and dim_head == dim)  # vit-pytorch rule
        k1, k2, k3, k4 = jax.random.split(k, 4)
        out = dense(k2, inner, dim) if project_out else None  # Identity otherwise
        return {"ln1": ln(dim),
                "wqkv": 0.02 * jax.random.normal(k1, (dim, 3 * inner), jnp.float32),
                "out": out,
                "ln2": ln(dim),
                "ff1": dense(k3, dim, mlp_dim),
                "ff2": dense(k4, mlp_dim, dim),
                "heads": heads, "dim_head": dim_head, "project_out": project_out}

    return {
        "norm_s": ln(dim_s), "norm_l": ln(dim_l),
        "linear_s": dense(keys[0], dim_s, dim_l),
        "linear_l": dense(keys[1], dim_l, dim_s),
        "transformer_s": transformer(keys[2], dim_s, heads=3, dim_head=32, mlp_dim=128),
        "transformer_l": transformer(keys[3], dim_l, heads=1, dim_head=64, mlp_dim=256),
    }


# ----------------------------------- main --------------------------------------

if __name__ == "__main__":
    B, dim_s, dim_l, H, W = 2, 16, 32, 8, 8

    key = jax.random.PRNGKey(0)
    k_e, k_r, k_p = jax.random.split(key, 3)
    e = jax.random.normal(k_e, (B, dim_l, H, W), jnp.float32)   # norm_l / transformer_l
    r = jax.random.normal(k_r, (B, dim_s, H, W), jnp.float32)   # norm_s / transformer_s
    params = init_params(k_p, dim_s, dim_l)

    fn = jax.jit(lambda e_, r_: cross_att(e_, r_, params))
    e_out, r_out = fn(e, r)
    jax.block_until_ready((e_out, r_out))

    assert e_out.shape == e.shape and r_out.shape == r.shape
    assert e_out.dtype == jnp.float32 and r_out.dtype == jnp.float32
    assert bool(jnp.all(jnp.isfinite(e_out))) and bool(jnp.all(jnp.isfinite(r_out)))
    print("KERNEL_OK")
</pallas_src>

<mosaic_0001>
module attributes {stable_mosaic.version = 11 : i64} {
  func.func @kernel(%arg0: i32, %arg1: memref<2x32x64xf32, #tpu.memory_space<vmem>>, %arg2: memref<2x16x64xf32, #tpu.memory_space<vmem>>, %arg3: memref<1x32xf32, #tpu.memory_space<vmem>>, %arg4: memref<1x32xf32, #tpu.memory_space<vmem>>, %arg5: memref<32x16xf32, #tpu.memory_space<vmem>>, %arg6: memref<1x16xf32, #tpu.memory_space<vmem>>, %arg7: memref<1x16xf32, #tpu.memory_space<vmem>>, %arg8: memref<1x16xf32, #tpu.memory_space<vmem>>, %arg9: memref<16x288xf32, #tpu.memory_space<vmem>>, %arg10: memref<3x32x16xf32, #tpu.memory_space<vmem>>, %arg11: memref<1x16xf32, #tpu.memory_space<vmem>>, %arg12: memref<1x16xf32, #tpu.memory_space<vmem>>, %arg13: memref<1x16xf32, #tpu.memory_space<vmem>>, %arg14: memref<16x128xf32, #tpu.memory_space<vmem>>, %arg15: memref<1x128xf32, #tpu.memory_space<vmem>>, %arg16: memref<128x16xf32, #tpu.memory_space<vmem>>, %arg17: memref<1x16xf32, #tpu.memory_space<vmem>>, %arg18: memref<1x16xf32, #tpu.memory_space<vmem>>, %arg19: memref<1x16xf32, #tpu.memory_space<vmem>>, %arg20: memref<16x32xf32, #tpu.memory_space<vmem>>, %arg21: memref<1x32xf32, #tpu.memory_space<vmem>>, %arg22: memref<1x32xf32, #tpu.memory_space<vmem>>, %arg23: memref<1x32xf32, #tpu.memory_space<vmem>>, %arg24: memref<32x192xf32, #tpu.memory_space<vmem>>, %arg25: memref<1x64x32xf32, #tpu.memory_space<vmem>>, %arg26: memref<1x32xf32, #tpu.memory_space<vmem>>, %arg27: memref<1x32xf32, #tpu.memory_space<vmem>>, %arg28: memref<1x32xf32, #tpu.memory_space<vmem>>, %arg29: memref<32x256xf32, #tpu.memory_space<vmem>>, %arg30: memref<1x256xf32, #tpu.memory_space<vmem>>, %arg31: memref<256x32xf32, #tpu.memory_space<vmem>>, %arg32: memref<1x32xf32, #tpu.memory_space<vmem>>, %arg33: memref<2x16x64xf32, #tpu.memory_space<vmem>>, %arg34: memref<2x32x64xf32, #tpu.memory_space<vmem>>) attributes {dimension_semantics = [#tpu.dimension_semantics<parallel>], iteration_bounds = array<i64: 1>, scalar_prefetch = 0 : i64, scratch_operands = 0 : i64, tpu.core_type = #tpu.core_type<tc>, window_params = [{transform_indices = @transform_0, window_bounds = array<i64: 2, 32, 64>}, {transform_indices = @transform_1, window_bounds = array<i64: 2, 16, 64>}, {pipeline_mode = #tpu.pipeline_mode<synchronous>, transform_indices = @transform_2, window_bounds = array<i64: 1, 32>}, {pipeline_mode = #tpu.pipeline_mode<synchronous>, transform_indices = @transform_3, window_bounds = array<i64: 1, 32>}, {pipeline_mode = #tpu.pipeline_mode<synchronous>, transform_indices = @transform_4, window_bounds = array<i64: 32, 16>}, {pipeline_mode = #tpu.pipeline_mode<synchronous>, transform_indices = @transform_5, window_bounds = array<i64: 1, 16>}, {pipeline_mode = #tpu.pipeline_mode<synchronous>, transform_indices = @transform_6, window_bounds = array<i64: 1, 16>}, {pipeline_mode = #tpu.pipeline_mode<synchronous>, transform_indices = @transform_7, window_bounds = array<i64: 1, 16>}, {pipeline_mode = #tpu.pipeline_mode<synchronous>, transform_indices = @transform_8, window_bounds = array<i64: 16, 288>}, {pipeline_mode = #tpu.pipeline_mode<synchronous>, transform_indices = @transform_9, window_bounds = array<i64: 3, 32, 16>}, {pipeline_mode = #tpu.pipeline_mode<synchronous>, transform_indices = @transform_10, window_bounds = array<i64: 1, 16>}, {pipeline_mode = #tpu.pipeline_mode<synchronous>, transform_indices = @transform_11, window_bounds = array<i64: 1, 16>}, {pipeline_mode = #tpu.pipeline_mode<synchronous>, transform_indices = @transform_12, window_bounds = array<i64: 1, 16>}, {pipeline_mode = #tpu.pipeline_mode<synchronous>, transform_indices = @transform_13, window_bounds = array<i64: 16, 128>}, {pipeline_mode = #tpu.pipeline_mode<synchronous>, transform_indices = @transform_14, window_bounds = array<i64: 1, 128>}, {pipeline_mode = #tpu.pipeline_mode<synchronous>, transform_indices = @transform_15, window_bounds = array<i64: 128, 16>}, {pipeline_mode = #tpu.pipeline_mode<synchronous>, transform_indices = @transform_16, window_bounds = array<i64: 1, 16>}, {pipeline_mode = #tpu.pipeline_mode<synchronous>, transform_indices = @transform_17, window_bounds = array<i64: 1, 16>}, {pipeline_mode = #tpu.pipeline_mode<synchronous>, transform_indices = @transform_18, window_bounds = array<i64: 1, 16>}, {pipeline_mode = #tpu.pipeline_mode<synchronous>, transform_indices = @transform_19, window_bounds = array<i64: 16, 32>}, {pipeline_mode = #tpu.pipeline_mode<synchronous>, transform_indices = @transform_20, window_bounds = array<i64: 1, 32>}, {pipeline_mode = #tpu.pipeline_mode<synchronous>, transform_indices = @transform_21, window_bounds = array<i64: 1, 32>}, {pipeline_mode = #tpu.pipeline_mode<synchronous>, transform_indices = @transform_22, window_bounds = array<i64: 1, 32>}, {pipeline_mode = #tpu.pipeline_mode<synchronous>, transform_indices = @transform_23, window_bounds = array<i64: 32, 192>}, {pipeline_mode = #tpu.pipeline_mode<synchronous>, transform_indices = @transform_24, window_bounds = array<i64: 1, 64, 32>}, {pipeline_mode = #tpu.pipeline_mode<synchronous>, transform_indices = @transform_25, window_bounds = array<i64: 1, 32>}, {pipeline_mode = #tpu.pipeline_mode<synchronous>, transform_indices = @transform_26, window_bounds = array<i64: 1, 32>}, {pipeline_mode = #tpu.pipeline_mode<synchronous>, transform_indices = @transform_27, window_bounds = array<i64: 1, 32>}, {pipeline_mode = #tpu.pipeline_mode<synchronous>, transform_indices = @transform_28, window_bounds = array<i64: 32, 256>}, {pipeline_mode = #tpu.pipeline_mode<synchronous>, transform_indices = @transform_29, window_bounds = array<i64: 1, 256>}, {pipeline_mode = #tpu.pipeline_mode<synchronous>, transform_indices = @transform_30, window_bounds = array<i64: 256, 32>}, {pipeline_mode = #tpu.pipeline_mode<synchronous>, transform_indices = @transform_31, window_bounds = array<i64: 1, 32>}, {transform_indices = @transform_32, window_bounds = array<i64: 2, 16, 64>}, {transform_indices = @transform_33, window_bounds = array<i64: 2, 32, 64>}]} {
    %c0 = arith.constant 0 : index
    %c0_0 = arith.constant 0 : index
    %0 = vector.load %arg3[%c0, %c0_0] : memref<1x32xf32, #tpu.memory_space<vmem>>, vector<1x32xf32>
    %c0_1 = arith.constant 0 : index
    %c0_2 = arith.constant 0 : index
    %1 = vector.load %arg4[%c0_1, %c0_2] : memref<1x32xf32, #tpu.memory_space<vmem>>, vector<1x32xf32>
    %c0_3 = arith.constant 0 : index
    %c0_4 = arith.constant 0 : index
    %2 = vector.load %arg5[%c0_3, %c0_4] : memref<32x16xf32, #tpu.memory_space<vmem>>, vector<32x16xf32>
    %c0_5 = arith.constant 0 : index
    %c0_6 = arith.constant 0 : index
    %3 = vector.load %arg6[%c0_5, %c0_6] : memref<1x16xf32, #tpu.memory_space<vmem>>, vector<1x16xf32>
    %c0_7 = arith.constant 0 : index
    %c0_8 = arith.constant 0 : index
    %4 = vector.load %arg7[%c0_7, %c0_8] : memref<1x16xf32, #tpu.memory_space<vmem>>, vector<1x16xf32>
    %c0_9 = arith.constant 0 : index
    %c0_10 = arith.constant 0 : index
    %5 = vector.load %arg8[%c0_9, %c0_10] : memref<1x16xf32, #tpu.memory_space<vmem>>, vector<1x16xf32>
    %c0_11 = arith.constant 0 : index
    %c0_12 = arith.constant 0 : index
    %6 = vector.load %arg9[%c0_11, %c0_12] : memref<16x288xf32, #tpu.memory_space<vmem>>, vector<16x288xf32>
    %c0_13 = arith.constant 0 : index
    %c0_14 = arith.constant 0 : index
    %7 = vector.load %arg11[%c0_13, %c0_14] : memref<1x16xf32, #tpu.memory_space<vmem>>, vector<1x16xf32>
    %c0_15 = arith.constant 0 : index
    %c0_16 = arith.constant 0 : index
    %c0_17 = arith.constant 0 : index
    %8 = vector.load %arg10[%c0_15, %c0_16, %c0_17] : memref<3x32x16xf32, #tpu.memory_space<vmem>>, vector<1x32x16xf32>
    %9 = vector.shape_cast %8 : vector<1x32x16xf32> to vector<32x16xf32>
    %c1 = arith.constant 1 : index
    %c0_18 = arith.constant 0 : index
    %c0_19 = arith.constant 0 : index
    %10 = vector.load %arg10[%c1, %c0_18, %c0_19] : memref<3x32x16xf32, #tpu.memory_space<vmem>>, vector<1x32x16xf32>
    %11 = vector.shape_cast %10 : vector<1x32x16xf32> to vector<32x16xf32>
    %c2 = arith.constant 2 : index
    %c0_20 = arith.constant 0 : index
    %c0_21 = arith.constant 0 : index
    %12 = vector.load %arg10[%c2, %c0_20, %c0_21] : memref<3x32x16xf32, #tpu.memory_space<vmem>>, vector<1x32x16xf32>
    %13 = vector.shape_cast %12 : vector<1x32x16xf32> to vector<32x16xf32>
    %c0_22 = arith.constant 0 : index
    %c0_23 = arith.constant 0 : index
    %14 = vector.load %arg12[%c0_22, %c0_23] : memref<1x16xf32, #tpu.memory_space<vmem>>, vector<1x16xf32>
    %c0_24 = arith.constant 0 : index
    %c0_25 = arith.constant 0 : index
    %15 = vector.load %arg13[%c0_24, %c0_25] : memref<1x16xf32, #tpu.memory_space<vmem>>, vector<1x16xf32>
    %c0_26 = arith.constant 0 : index
    %c0_27 = arith.constant 0 : index
    %16 = vector.load %arg14[%c0_26, %c0_27] : memref<16x128xf32, #tpu.memory_space<vmem>>, vector<16x128xf32>
    %c0_28 = arith.constant 0 : index
    %c0_29 = arith.constant 0 : index
    %17 = vector.load %arg15[%c0_28, %c0_29] : memref<1x128xf32, #tpu.memory_space<vmem>>, vector<1x128xf32>
    %c0_30 = arith.constant 0 : index
    %c0_31 = arith.constant 0 : index
    %18 = vector.load %arg16[%c0_30, %c0_31] : memref<128x16xf32, #tpu.memory_space<vmem>>, vector<128x16xf32>
    %c0_32 = arith.constant 0 : index
    %c0_33 = arith.constant 0 : index
    %19 = vector.load %arg17[%c0_32, %c0_33] : memref<1x16xf32, #tpu.memory_space<vmem>>, vector<1x16xf32>
    %c0_34 = arith.constant 0 : index
    %c0_35 = arith.constant 0 : index
    %c0_36 = arith.constant 0 : index
    %20 = vector.load %arg1[%c0_34, %c0_35, %c0_36] : memref<2x32x64xf32, #tpu.memory_space<vmem>>, vector<1x32x64xf32>
    %21 = vector.shape_cast %20 : vector<1x32x64xf32> to vector<32x64xf32>
    %22 = tpu.transpose %21, [1, 0] : vector<32x64xf32> -> vector<64x32xf32>
    %c1_37 = arith.constant 1 : index
    %c0_38 = arith.constant 0 : index
    %c0_39 = arith.constant 0 : index
    %23 = vector.load %arg1[%c1_37, %c0_38, %c0_39] : memref<2x32x64xf32, #tpu.memory_space<vmem>>, vector<1x32x64xf32>
    %24 = vector.shape_cast %23 : vector<1x32x64xf32> to vector<32x64xf32>
    %25 = tpu.transpose %24, [1, 0] : vector<32x64xf32> -> vector<64x32xf32>
    %c0_40 = arith.constant 0 : index
    %c0_41 = arith.constant 0 : index
    %c0_42 = arith.constant 0 : index
    %26 = vector.load %arg2[%c0_40, %c0_41, %c0_42] : memref<2x16x64xf32, #tpu.memory_space<vmem>>, vector<1x16x64xf32>
    %27 = vector.shape_cast %26 : vector<1x16x64xf32> to vector<16x64xf32>
    %28 = tpu.transpose %27, [1, 0] : vector<16x64xf32> -> vector<64x16xf32>
    %c1_43 = arith.constant 1 : index
    %c0_44 = arith.constant 0 : index
    %c0_45 = arith.constant 0 : index
    %29 = vector.load %arg2[%c1_43, %c0_44, %c0_45] : memref<2x16x64xf32, #tpu.memory_space<vmem>>, vector<1x16x64xf32>
    %30 = vector.shape_cast %29 : vector<1x16x64xf32> to vector<16x64xf32>
    %31 = tpu.transpose %30, [1, 0] : vector<16x64xf32> -> vector<64x16xf32>
    %32 = tpu.concatenate %22, %25 in 0 : vector<64x32xf32>, vector<64x32xf32> -> vector<128x32xf32>
    %33 = tpu.concatenate %28, %31 in 0 : vector<64x16xf32>, vector<64x16xf32> -> vector<128x16xf32>
    %cst = arith.constant dense<0.000000e+00> : vector<128xf32>
    %34 = vector.multi_reduction <add>, %32, %cst [1] : vector<128x32xf32> to vector<128xf32>
    %35 = vector.shape_cast %34 : vector<128xf32> to vector<128x1xf32>
    %cst_46 = arith.constant 3.200000e+01 : f32
    %36 = vector.broadcast %cst_46 : f32 to vector<128x1xf32>
    %37 = arith.divf %35, %36 : vector<128x1xf32>
    %38 = vector.broadcast %37 : vector<128x1xf32> to vector<128x32xf32>
    %39 = arith.subf %32, %38 : vector<128x32xf32>
    %40 = arith.mulf %39, %39 : vector<128x32xf32>
    %cst_47 = arith.constant dense<0.000000e+00> : vector<128xf32>
    %41 = vector.multi_reduction <add>, %40, %cst_47 [1] : vector<128x32xf32> to vector<128xf32>
    %42 = vector.shape_cast %41 : vector<128xf32> to vector<128x1xf32>
    %cst_48 = arith.constant 3.200000e+01 : f32
    %43 = vector.broadcast %cst_48 : f32 to vector<128x1xf32>
    %44 = arith.divf %42, %43 : vector<128x1xf32>
    %45 = vector.broadcast %37 : vector<128x1xf32> to vector<128x32xf32>
    %46 = arith.subf %32, %45 : vector<128x32xf32>
    %cst_49 = arith.constant 9.99999974E-6 : f32
    %47 = vector.broadcast %cst_49 : f32 to vector<128x1xf32>
    %48 = arith.addf %44, %47 : vector<128x1xf32>
    %49 = math.rsqrt %48 : vector<128x1xf32>
    %50 = vector.broadcast %49 : vector<128x1xf32> to vector<128x32xf32>
    %51 = arith.mulf %46, %50 : vector<128x32xf32>
    %52 = vector.broadcast %0 : vector<1x32xf32> to vector<128x32xf32>
    %53 = arith.mulf %51, %52 : vector<128x32xf32>
    %54 = vector.broadcast %1 : vector<1x32xf32> to vector<128x32xf32>
    %55 = arith.addf %53, %54 : vector<128x32xf32>
    %56 = vector.extract_strided_slice %55 {offsets = [0, 0], sizes = [64, 32], strides = [1, 1]} : vector<128x32xf32> to vector<64x32xf32>
    %cst_50 = arith.constant dense<0.000000e+00> : vector<32xf32>
    %57 = vector.multi_reduction <add>, %56, %cst_50 [0] : vector<64x32xf32> to vector<32xf32>
    %58 = vector.shape_cast %57 : vector<32xf32> to vector<1x32xf32>
    %cst_51 = arith.constant 6.400000e+01 : f32
    %59 = vector.broadcast %cst_51 : f32 to vector<1x32xf32>
    %60 = arith.divf %58, %59 : vector<1x32xf32>
    %cst_52 = arith.constant dense<0.000000e+00> : vector<1x16xf32>
    %61 = tpu.matmul %60, %2, %cst_52 {dimension_numbers = #tpu.dot_dimension_numbers<[1], [0], [0], [1], [0, 0, 1, 1], [], []>} : vector<1x32xf32>, vector<32x16xf32>, vector<1x16xf32> -> vector<1x16xf32>
    %62 = arith.addf %61, %3 : vector<1x16xf32>
    %cst_53 = arith.constant dense<0.000000e+00> : vector<1xf32>
    %63 = vector.multi_reduction <add>, %62, %cst_53 [1] : vector<1x16xf32> to vector<1xf32>
    %64 = vector.shape_cast %63 : vector<1xf32> to vector<1x1xf32>
    %cst_54 = arith.constant 1.600000e+01 : f32
    %65 = vector.broadcast %cst_54 : f32 to vector<1x1xf32>
    %66 = arith.divf %64, %65 : vector<1x1xf32>
    %67 = vector.broadcast %66 : vector<1x1xf32> to vector<1x16xf32>
    %68 = arith.subf %62, %67 : vector<1x16xf32>
    %69 = arith.mulf %68, %68 : vector<1x16xf32>
    %cst_55 = arith.constant dense<0.000000e+00> : vector<1xf32>
    %70 = vector.multi_reduction <add>, %69, %cst_55 [1] : vector<1x16xf32> to vector<1xf32>
    %71 = vector.shape_cast %70 : vector<1xf32> to vector<1x1xf32>
    %cst_56 = arith.constant 1.600000e+01 : f32
    %72 = vector.broadcast %cst_56 : f32 to vector<1x1xf32>
    %73 = arith.divf %71, %72 : vector<1x1xf32>
    %74 = vector.broadcast %66 : vector<1x1xf32> to vector<1x16xf32>
    %75 = arith.subf %62, %74 : vector<1x16xf32>
    %cst_57 = arith.constant 9.99999974E-6 : f32
    %76 = vector.broadcast %cst_57 : f32 to vector<1x1xf32>
    %77 = arith.addf %73, %76 : vector<1x1xf32>
    %78 = math.rsqrt %77 : vector<1x1xf32>
    %79 = vector.broadcast %78 : vector<1x1xf32> to vector<1x16xf32>
    %80 = arith.mulf %75, %79 : vector<1x16xf32>
    %81 = arith.mulf %80, %4 : vector<1x16xf32>
    %82 = arith.addf %81, %5 : vector<1x16xf32>
    %cst_58 = arith.constant dense<0.000000e+00> : vector<1x288xf32>
    %83 = tpu.matmul %82, %6, %cst_58 {dimension_numbers = #tpu.dot_dimension_numbers<[1], [0], [0], [1], [0, 0, 1, 1], [], []>} : vector<1x16xf32>, vector<16x288xf32>, vector<1x288xf32> -> vector<1x288xf32>
    %84 = vector.extract_strided_slice %55 {offsets = [64, 0], sizes = [64, 32], strides = [1, 1]} : vector<128x32xf32> to vector<64x32xf32>
    %cst_59 = arith.constant dense<0.000000e+00> : vector<32xf32>
    %85 = vector.multi_reduction <add>, %84, %cst_59 [0] : vector<64x32xf32> to vector<32xf32>
    %86 = vector.shape_cast %85 : vector<32xf32> to vector<1x32xf32>
    %cst_60 = arith.constant 6.400000e+01 : f32
    %87 = vector.broadcast %cst_60 : f32 to vector<1x32xf32>
    %88 = arith.divf %86, %87 : vector<1x32xf32>
    %cst_61 = arith.constant dense<0.000000e+00> : vector<1x16xf32>
    %89 = tpu.matmul %88, %2, %cst_61 {dimension_numbers = #tpu.dot_dimension_numbers<[1], [0], [0], [1], [0, 0, 1, 1], [], []>} : vector<1x32xf32>, vector<32x16xf32>, vector<1x16xf32> -> vector<1x16xf32>
    %90 = arith.addf %89, %3 : vector<1x16xf32>
    %cst_62 = arith.constant dense<0.000000e+00> : vector<1xf32>
    %91 = vector.multi_reduction <add>, %90, %cst_62 [1] : vector<1x16xf32> to vector<1xf32>
    %92 = vector.shape_cast %91 : vector<1xf32> to vector<1x1xf32>
    %cst_63 = arith.constant 1.600000e+01 : f32
    %93 = vector.broadcast %cst_63 : f32 to vector<1x1xf32>
    %94 = arith.divf %92, %93 : vector<1x1xf32>
    %95 = vector.broadcast %94 : vector<1x1xf32> to vector<1x16xf32>
    %96 = arith.subf %90, %95 : vector<1x16xf32>
    %97 = arith.mulf %96, %96 : vector<1x16xf32>
    %cst_64 = arith.constant dense<0.000000e+00> : vector<1xf32>
    %98 = vector.multi_reduction <add>, %97, %cst_64 [1] : vector<1x16xf32> to vector<1xf32>
    %99 = vector.shape_cast %98 : vector<1xf32> to vector<1x1xf32>
    %cst_65 = arith.constant 1.600000e+01 : f32
    %100 = vector.broadcast %cst_65 : f32 to vector<1x1xf32>
    %101 = arith.divf %99, %100 : vector<1x1xf32>
    %102 = vector.broadcast %94 : vector<1x1xf32> to vector<1x16xf32>
    %103 = arith.subf %90, %102 : vector<1x16xf32>
    %cst_66 = arith.constant 9.99999974E-6 : f32
    %104 = vector.broadcast %cst_66 : f32 to vector<1x1xf32>
    %105 = arith.addf %101, %104 : vector<1x1xf32>
    %106 = math.rsqrt %105 : vector<1x1xf32>
    %107 = vector.broadcast %106 : vector<1x1xf32> to vector<1x16xf32>
    %108 = arith.mulf %103, %107 : vector<1x16xf32>
    %109 = arith.mulf %108, %4 : vector<1x16xf32>
    %110 = arith.addf %109, %5 : vector<1x16xf32>
    %cst_67 = arith.constant dense<0.000000e+00> : vector<1x288xf32>
    %111 = tpu.matmul %110, %6, %cst_67 {dimension_numbers = #tpu.dot_dimension_numbers<[1], [0], [0], [1], [0, 0, 1, 1], [], []>} : vector<1x16xf32>, vector<16x288xf32>, vector<1x288xf32> -> vector<1x288xf32>
    %cst_68 = arith.constant dense<0.000000e+00> : vector<128xf32>
    %112 = vector.multi_reduction <add>, %33, %cst_68 [1] : vector<128x16xf32> to vector<128xf32>
    %113 = vector.shape_cast %112 : vector<128xf32> to vector<128x1xf32>
    %cst_69 = arith.constant 1.600000e+01 : f32
    %114 = vector.broadcast %cst_69 : f32 to vector<128x1xf32>
    %115 = arith.divf %113, %114 : vector<128x1xf32>
    %116 = vector.broadcast %115 : vector<128x1xf32> to vector<128x16xf32>
    %117 = arith.subf %33, %116 : vector<128x16xf32>
    %118 = arith.mulf %117, %117 : vector<128x16xf32>
    %cst_70 = arith.constant dense<0.000000e+00> : vector<128xf32>
    %119 = vector.multi_reduction <add>, %118, %cst_70 [1] : vector<128x16xf32> to vector<128xf32>
    %120 = vector.shape_cast %119 : vector<128xf32> to vector<128x1xf32>
    %cst_71 = arith.constant 1.600000e+01 : f32
    %121 = vector.broadcast %cst_71 : f32 to vector<128x1xf32>
    %122 = arith.divf %120, %121 : vector<128x1xf32>
    %123 = vector.broadcast %115 : vector<128x1xf32> to vector<128x16xf32>
    %124 = arith.subf %33, %123 : vector<128x16xf32>
    %cst_72 = arith.constant 9.99999974E-6 : f32
    %125 = vector.broadcast %cst_72 : f32 to vector<128x1xf32>
    %126 = arith.addf %122, %125 : vector<128x1xf32>
    %127 = math.rsqrt %126 : vector<128x1xf32>
    %128 = vector.broadcast %127 : vector<128x1xf32> to vector<128x16xf32>
    %129 = arith.mulf %124, %128 : vector<128x16xf32>
    %130 = vector.broadcast %4 : vector<1x16xf32> to vector<128x16xf32>
    %131 = arith.mulf %129, %130 : vector<128x16xf32>
    %132 = vector.broadcast %5 : vector<1x16xf32> to vector<128x16xf32>
    %133 = arith.addf %131, %132 : vector<128x16xf32>
    %cst_73 = arith.constant dense<0.000000e+00> : vector<128x288xf32>
    %134 = tpu.matmul %133, %6, %cst_73 {dimension_numbers = #tpu.dot_dimension_numbers<[1], [0], [0], [1], [0, 0, 1, 1], [], []>} : vector<128x16xf32>, vector<16x288xf32>, vector<128x288xf32> -> vector<128x288xf32>
    %135 = vector.extract_strided_slice %134 {offsets = [0, 0], sizes = [64, 32], strides = [1, 1]} : vector<128x288xf32> to vector<64x32xf32>
    %cst_74 = arith.constant 0.176776692 : f32
    %136 = vector.broadcast %cst_74 : f32 to vector<64x32xf32>
    %137 = arith.mulf %135, %136 : vector<64x32xf32>
    %138 = vector.extract_strided_slice %134 {offsets = [0, 96], sizes = [64, 32], strides = [1, 1]} : vector<128x288xf32> to vector<64x32xf32>
    %139 = vector.extract_strided_slice %134 {offsets = [0, 192], sizes = [64, 32], strides = [1, 1]} : vector<128x288xf32> to vector<64x32xf32>
    %140 = vector.extract_strided_slice %83 {offsets = [0, 96], sizes = [1, 32], strides = [1, 1]} : vector<1x288xf32> to vector<1x32xf32>
    %141 = vector.extract_strided_slice %83 {offsets = [0, 192], sizes = [1, 32], strides = [1, 1]} : vector<1x288xf32> to vector<1x32xf32>
    %cst_75 = arith.constant dense<0.000000e+00> : vector<64x64xf32>
    %142 = tpu.matmul %137, %138, %cst_75 {dimension_numbers = #tpu.dot_dimension_numbers<[1], [1], [0], [0], [0, 0, 1, 0], [], []>} : vector<64x32xf32>, vector<64x32xf32>, vector<64x64xf32> -> vector<64x64xf32>
    %143 = vector.broadcast %140 : vector<1x32xf32> to vector<64x32xf32>
    %144 = arith.mulf %137, %143 : vector<64x32xf32>
    %cst_76 = arith.constant dense<0.000000e+00> : vector<64xf32>
    %145 = vector.multi_reduction <add>, %144, %cst_76 [1] : vector<64x32xf32> to vector<64xf32>
    %146 = vector.shape_cast %145 : vector<64xf32> to vector<64x1xf32>
    %cst_77 = arith.constant dense<0xFF800000> : vector<64xf32>
    %147 = vector.multi_reduction <maximumf>, %142, %cst_77 [1] : vector<64x64xf32> to vector<64xf32>
    %148 = vector.shape_cast %147 : vector<64xf32> to vector<64x1xf32>
    %149 = arith.maximumf %148, %146 : vector<64x1xf32>
    %150 = vector.broadcast %149 : vector<64x1xf32> to vector<64x64xf32>
    %151 = arith.subf %142, %150 : vector<64x64xf32>
    %152 = math.exp %151 : vector<64x64xf32>
    %153 = arith.subf %146, %149 : vector<64x1xf32>
    %154 = math.exp %153 : vector<64x1xf32>
    %cst_78 = arith.constant dense<0.000000e+00> : vector<64xf32>
    %155 = vector.multi_reduction <add>, %152, %cst_78 [1] : vector<64x64xf32> to vector<64xf32>
    %156 = vector.shape_cast %155 : vector<64xf32> to vector<64x1xf32>
    %157 = arith.addf %156, %154 : vector<64x1xf32>
    %158 = tpu.reciprocal %157 {approx = true} : vector<64x1xf32> -> vector<64x1xf32>
    %cst_79 = arith.constant dense<0.000000e+00> : vector<64x32xf32>
    %159 = tpu.matmul %152, %139, %cst_79 {dimension_numbers = #tpu.dot_dimension_numbers<[1], [0], [0], [1], [0, 0, 1, 1], [], []>} : vector<64x64xf32>, vector<64x32xf32>, vector<64x32xf32> -> vector<64x32xf32>
    %160 = vector.broadcast %154 : vector<64x1xf32> to vector<64x32xf32>
    %161 = vector.broadcast %141 : vector<1x32xf32> to vector<64x32xf32>
    %162 = arith.mulf %160, %161 : vector<64x32xf32>
    %163 = arith.addf %159, %162 : vector<64x32xf32>
    %164 = vector.broadcast %158 : vector<64x1xf32> to vector<64x32xf32>
    %165 = arith.mulf %163, %164 : vector<64x32xf32>
    %cst_80 = arith.constant dense<0.000000e+00> : vector<64x16xf32>
    %166 = tpu.matmul %165, %9, %cst_80 {dimension_numbers = #tpu.dot_dimension_numbers<[1], [0], [0], [1], [0, 0, 1, 1], [], []>} : vector<64x32xf32>, vector<32x16xf32>, vector<64x16xf32> -> vector<64x16xf32>
    %167 = vector.extract_strided_slice %134 {offsets = [0, 32], sizes = [64, 32], strides = [1, 1]} : vector<128x288xf32> to vector<64x32xf32>
    %cst_81 = arith.constant 0.176776692 : f32
    %168 = vector.broadcast %cst_81 : f32 to vector<64x32xf32>
    %169 = arith.mulf %167, %168 : vector<64x32xf32>
    %170 = vector.extract_strided_slice %134 {offsets = [0, 128], sizes = [64, 32], strides = [1, 1]} : vector<128x288xf32> to vector<64x32xf32>
    %171 = vector.extract_strided_slice %134 {offsets = [0, 224], sizes = [64, 32], strides = [1, 1]} : vector<128x288xf32> to vector<64x32xf32>
    %172 = vector.extract_strided_slice %83 {offsets = [0, 128], sizes = [1, 32], strides = [1, 1]} : vector<1x288xf32> to vector<1x32xf32>
    %173 = vector.extract_strided_slice %83 {offsets = [0, 224], sizes = [1, 32], strides = [1, 1]} : vector<1x288xf32> to vector<1x32xf32>
    %cst_82 = arith.constant dense<0.000000e+00> : vector<64x64xf32>
    %174 = tpu.matmul %169, %170, %cst_82 {dimension_numbers = #tpu.dot_dimension_numbers<[1], [1], [0], [0], [0, 0, 1, 0], [], []>} : vector<64x32xf32>, vector<64x32xf32>, vector<64x64xf32> -> vector<64x64xf32>
    %175 = vector.broadcast %172 : vector<1x32xf32> to vector<64x32xf32>
    %176 = arith.mulf %169, %175 : vector<64x32xf32>
    %cst_83 = arith.constant dense<0.000000e+00> : vector<64xf32>
    %177 = vector.multi_reduction <add>, %176, %cst_83 [1] : vector<64x32xf32> to vector<64xf32>
    %178 = vector.shape_cast %177 : vector<64xf32> to vector<64x1xf32>
    %cst_84 = arith.constant dense<0xFF800000> : vector<64xf32>
    %179 = vector.multi_reduction <maximumf>, %174, %cst_84 [1] : vector<64x64xf32> to vector<64xf32>
    %180 = vector.shape_cast %179 : vector<64xf32> to vector<64x1xf32>
    %181 = arith.maximumf %180, %178 : vector<64x1xf32>
    %182 = vector.broadcast %181 : vector<64x1xf32> to vector<64x64xf32>
    %183 = arith.subf %174, %182 : vector<64x64xf32>
    %184 = math.exp %183 : vector<64x64xf32>
    %185 = arith.subf %178, %181 : vector<64x1xf32>
    %186 = math.exp %185 : vector<64x1xf32>
    %cst_85 = arith.constant dense<0.000000e+00> : vector<64xf32>
    %187 = vector.multi_reduction <add>, %184, %cst_85 [1] : vector<64x64xf32> to vector<64xf32>
    %188 = vector.shape_cast %187 : vector<64xf32> to vector<64x1xf32>
    %189 = arith.addf %188, %186 : vector<64x1xf32>
    %190 = tpu.reciprocal %189 {approx = true} : vector<64x1xf32> -> vector<64x1xf32>
    %cst_86 = arith.constant dense<0.000000e+00> : vector<64x32xf32>
    %191 = tpu.matmul %184, %171, %cst_86 {dimension_numbers = #tpu.dot_dimension_numbers<[1], [0], [0], [1], [0, 0, 1, 1], [], []>} : vector<64x64xf32>, vector<64x32xf32>, vector<64x32xf32> -> vector<64x32xf32>
    %192 = vector.broadcast %186 : vector<64x1xf32> to vector<64x32xf32>
    %193 = vector.broadcast %173 : vector<1x32xf32> to vector<64x32xf32>
    %194 = arith.mulf %192, %193 : vector<64x32xf32>
    %195 = arith.addf %191, %194 : vector<64x32xf32>
    %196 = vector.broadcast %190 : vector<64x1xf32> to vector<64x32xf32>
    %197 = arith.mulf %195, %196 : vector<64x32xf32>
    %cst_87 = arith.constant dense<0.000000e+00> : vector<64x16xf32>
    %198 = tpu.matmul %197, %11, %cst_87 {dimension_numbers = #tpu.dot_dimension_numbers<[1], [0], [0], [1], [0, 0, 1, 1], [], []>} : vector<64x32xf32>, vector<32x16xf32>, vector<64x16xf32> -> vector<64x16xf32>
    %199 = arith.addf %166, %198 : vector<64x16xf32>
    %200 = vector.extract_strided_slice %134 {offsets = [0, 64], sizes = [64, 32], strides = [1, 1]} : vector<128x288xf32> to vector<64x32xf32>
    %cst_88 = arith.constant 0.176776692 : f32
    %201 = vector.broadcast %cst_88 : f32 to vector<64x32xf32>
    %202 = arith.mulf %200, %201 : vector<64x32xf32>
    %203 = vector.extract_strided_slice %134 {offsets = [0, 160], sizes = [64, 32], strides = [1, 1]} : vector<128x288xf32> to vector<64x32xf32>
    %204 = vector.extract_strided_slice %134 {offsets = [0, 256], sizes = [64, 32], strides = [1, 1]} : vector<128x288xf32> to vector<64x32xf32>
    %205 = vector.extract_strided_slice %83 {offsets = [0, 160], sizes = [1, 32], strides = [1, 1]} : vector<1x288xf32> to vector<1x32xf32>
    %206 = vector.extract_strided_slice %83 {offsets = [0, 256], sizes = [1, 32], strides = [1, 1]} : vector<1x288xf32> to vector<1x32xf32>
    %cst_89 = arith.constant dense<0.000000e+00> : vector<64x64xf32>
    %207 = tpu.matmul %202, %203, %cst_89 {dimension_numbers = #tpu.dot_dimension_numbers<[1], [1], [0], [0], [0, 0, 1, 0], [], []>} : vector<64x32xf32>, vector<64x32xf32>, vector<64x64xf32> -> vector<64x64xf32>
    %208 = vector.broadcast %205 : vector<1x32xf32> to vector<64x32xf32>
    %209 = arith.mulf %202, %208 : vector<64x32xf32>
    %cst_90 = arith.constant dense<0.000000e+00> : vector<64xf32>
    %210 = vector.multi_reduction <add>, %209, %cst_90 [1] : vector<64x32xf32> to vector<64xf32>
    %211 = vector.shape_cast %210 : vector<64xf32> to vector<64x1xf32>
    %cst_91 = arith.constant dense<0xFF800000> : vector<64xf32>
    %212 = vector.multi_reduction <maximumf>, %207, %cst_91 [1] : vector<64x64xf32> to vector<64xf32>
    %213 = vector.shape_cast %212 : vector<64xf32> to vector<64x1xf32>
    %214 = arith.maximumf %213, %211 : vector<64x1xf32>
    %215 = vector.broadcast %214 : vector<64x1xf32> to vector<64x64xf32>
    %216 = arith.subf %207, %215 : vector<64x64xf32>
    %217 = math.exp %216 : vector<64x64xf32>
    %218 = arith.subf %211, %214 : vector<64x1xf32>
    %219 = math.exp %218 : vector<64x1xf32>
    %cst_92 = arith.constant dense<0.000000e+00> : vector<64xf32>
    %220 = vector.multi_reduction <add>, %217, %cst_92 [1] : vector<64x64xf32> to vector<64xf32>
    %221 = vector.shape_cast %220 : vector<64xf32> to vector<64x1xf32>
    %222 = arith.addf %221, %219 : vector<64x1xf32>
    %223 = tpu.reciprocal %222 {approx = true} : vector<64x1xf32> -> vector<64x1xf32>
    %cst_93 = arith.constant dense<0.000000e+00> : vector<64x32xf32>
    %224 = tpu.matmul %217, %204, %cst_93 {dimension_numbers = #tpu.dot_dimension_numbers<[1], [0], [0], [1], [0, 0, 1, 1], [], []>} : vector<64x64xf32>, vector<64x32xf32>, vector<64x32xf32> -> vector<64x32xf32>
    %225 = vector.broadcast %219 : vector<64x1xf32> to vector<64x32xf32>
    %226 = vector.broadcast %206 : vector<1x32xf32> to vector<64x32xf32>
    %227 = arith.mulf %225, %226 : vector<64x32xf32>
    %228 = arith.addf %224, %227 : vector<64x32xf32>
    %229 = vector.broadcast %223 : vector<64x1xf32> to vector<64x32xf32>
    %230 = arith.mulf %228, %229 : vector<64x32xf32>
    %cst_94 = arith.constant dense<0.000000e+00> : vector<64x16xf32>
    %231 = tpu.matmul %230, %13, %cst_94 {dimension_numbers = #tpu.dot_dimension_numbers<[1], [0], [0], [1], [0, 0, 1, 1], [], []>} : vector<64x32xf32>, vector<32x16xf32>, vector<64x16xf32> -> vector<64x16xf32>
    %232 = arith.addf %199, %231 : vector<64x16xf32>
    %233 = vector.extract_strided_slice %134 {offsets = [64, 0], sizes = [64, 32], strides = [1, 1]} : vector<128x288xf32> to vector<64x32xf32>
    %cst_95 = arith.constant 0.176776692 : f32
    %234 = vector.broadcast %cst_95 : f32 to vector<64x32xf32>
    %235 = arith.mulf %233, %234 : vector<64x32xf32>
    %236 = vector.extract_strided_slice %134 {offsets = [64, 96], sizes = [64, 32], strides = [1, 1]} : vector<128x288xf32> to vector<64x32xf32>
    %237 = vector.extract_strided_slice %134 {offsets = [64, 192], sizes = [64, 32], strides = [1, 1]} : vector<128x288xf32> to vector<64x32xf32>
    %238 = vector.extract_strided_slice %111 {offsets = [0, 96], sizes = [1, 32], strides = [1, 1]} : vector<1x288xf32> to vector<1x32xf32>
    %239 = vector.extract_strided_slice %111 {offsets = [0, 192], sizes = [1, 32], strides = [1, 1]} : vector<1x288xf32> to vector<1x32xf32>
    %cst_96 = arith.constant dense<0.000000e+00> : vector<64x64xf32>
    %240 = tpu.matmul %235, %236, %cst_96 {dimension_numbers = #tpu.dot_dimension_numbers<[1], [1], [0], [0], [0, 0, 1, 0], [], []>} : vector<64x32xf32>, vector<64x32xf32>, vector<64x64xf32> -> vector<64x64xf32>
    %241 = vector.broadcast %238 : vector<1x32xf32> to vector<64x32xf32>
    %242 = arith.mulf %235, %241 : vector<64x32xf32>
    %cst_97 = arith.constant dense<0.000000e+00> : vector<64xf32>
    %243 = vector.multi_reduction <add>, %242, %cst_97 [1] : vector<64x32xf32> to vector<64xf32>
    %244 = vector.shape_cast %243 : vector<64xf32> to vector<64x1xf32>
    %cst_98 = arith.constant dense<0xFF800000> : vector<64xf32>
    %245 = vector.multi_reduction <maximumf>, %240, %cst_98 [1] : vector<64x64xf32> to vector<64xf32>
    %246 = vector.shape_cast %245 : vector<64xf32> to vector<64x1xf32>
    %247 = arith.maximumf %246, %244 : vector<64x1xf32>
    %248 = vector.broadcast %247 : vector<64x1xf32> to vector<64x64xf32>
    %249 = arith.subf %240, %248 : vector<64x64xf32>
    %250 = math.exp %249 : vector<64x64xf32>
    %251 = arith.subf %244, %247 : vector<64x1xf32>
    %252 = math.exp %251 : vector<64x1xf32>
    %cst_99 = arith.constant dense<0.000000e+00> : vector<64xf32>
    %253 = vector.multi_reduction <add>, %250, %cst_99 [1] : vector<64x64xf32> to vector<64xf32>
    %254 = vector.shape_cast %253 : vector<64xf32> to vector<64x1xf32>
    %255 = arith.addf %254, %252 : vector<64x1xf32>
    %256 = tpu.reciprocal %255 {approx = true} : vector<64x1xf32> -> vector<64x1xf32>
    %cst_100 = arith.constant dense<0.000000e+00> : vector<64x32xf32>
    %257 = tpu.matmul %250, %237, %cst_100 {dimension_numbers = #tpu.dot_dimension_numbers<[1], [0], [0], [1], [0, 0, 1, 1], [], []>} : vector<64x64xf32>, vector<64x32xf32>, vector<64x32xf32> -> vector<64x32xf32>
    %258 = vector.broadcast %252 : vector<64x1xf32> to vector<64x32xf32>
    %259 = vector.broadcast %239 : vector<1x32xf32> to vector<64x32xf32>
    %260 = arith.mulf %258, %259 : vector<64x32xf32>
    %261 = arith.addf %257, %260 : vector<64x32xf32>
    %262 = vector.broadcast %256 : vector<64x1xf32> to vector<64x32xf32>
    %263 = arith.mulf %261, %262 : vector<64x32xf32>
    %cst_101 = arith.constant dense<0.000000e+00> : vector<64x16xf32>
    %264 = tpu.matmul %263, %9, %cst_101 {dimension_numbers = #tpu.dot_dimension_numbers<[1], [0], [0], [1], [0, 0, 1, 1], [], []>} : vector<64x32xf32>, vector<32x16xf32>, vector<64x16xf32> -> vector<64x16xf32>
    %265 = vector.extract_strided_slice %134 {offsets = [64, 32], sizes = [64, 32], strides = [1, 1]} : vector<128x288xf32> to vector<64x32xf32>
    %cst_102 = arith.constant 0.176776692 : f32
    %266 = vector.broadcast %cst_102 : f32 to vector<64x32xf32>
    %267 = arith.mulf %265, %266 : vector<64x32xf32>
    %268 = vector.extract_strided_slice %134 {offsets = [64, 128], sizes = [64, 32], strides = [1, 1]} : vector<128x288xf32> to vector<64x32xf32>
    %269 = vector.extract_strided_slice %134 {offsets = [64, 224], sizes = [64, 32], strides = [1, 1]} : vector<128x288xf32> to vector<64x32xf32>
    %270 = vector.extract_strided_slice %111 {offsets = [0, 128], sizes = [1, 32], strides = [1, 1]} : vector<1x288xf32> to vector<1x32xf32>
    %271 = vector.extract_strided_slice %111 {offsets = [0, 224], sizes = [1, 32], strides = [1, 1]} : vector<1x288xf32> to vector<1x32xf32>
    %cst_103 = arith.constant dense<0.000000e+00> : vector<64x64xf32>
    %272 = tpu.matmul %267, %268, %cst_103 {dimension_numbers = #tpu.dot_dimension_numbers<[1], [1], [0], [0], [0, 0, 1, 0], [], []>} : vector<64x32xf32>, vector<64x32xf32>, vector<64x64xf32> -> vector<64x64xf32>
    %273 = vector.broadcast %270 : vector<1x32xf32> to vector<64x32xf32>
    %274 = arith.mulf %267, %273 : vector<64x32xf32>
    %cst_104 = arith.constant dense<0.000000e+00> : vector<64xf32>
    %275 = vector.multi_reduction <add>, %274, %cst_104 [1] : vector<64x32xf32> to vector<64xf32>
    %276 = vector.shape_cast %275 : vector<64xf32> to vector<64x1xf32>
    %cst_105 = arith.constant dense<0xFF800000> : vector<64xf32>
    %277 = vector.multi_reduction <maximumf>, %272, %cst_105 [1] : vector<64x64xf32> to vector<64xf32>
    %278 = vector.shape_cast %277 : vector<64xf32> to vector<64x1xf32>
    %279 = arith.maximumf %278, %276 : vector<64x1xf32>
    %280 = vector.broadcast %279 : vector<64x1xf32> to vector<64x64xf32>
    %281 = arith.subf %272, %280 : vector<64x64xf32>
    %282 = math.exp %281 : vector<64x64xf32>
    %283 = arith.subf %276, %279 : vector<64x1xf32>
    %284 = math.exp %283 : vector<64x1xf32>
    %cst_106 = arith.constant dense<0.000000e+00> : vector<64xf32>
    %285 = vector.multi_reduction <add>, %282, %cst_106 [1] : vector<64x64xf32> to vector<64xf32>
    %286 = vector.shape_cast %285 : vector<64xf32> to vector<64x1xf32>
    %287 = arith.addf %286, %284 : vector<64x1xf32>
    %288 = tpu.reciprocal %287 {approx = true} : vector<64x1xf32> -> vector<64x1xf32>
    %cst_107 = arith.constant dense<0.000000e+00> : vector<64x32xf32>
    %289 = tpu.matmul %282, %269, %cst_107 {dimension_numbers = #tpu.dot_dimension_numbers<[1], [0], [0], [1], [0, 0, 1, 1], [], []>} : vector<64x64xf32>, vector<64x32xf32>, vector<64x32xf32> -> vector<64x32xf32>
    %290 = vector.broadcast %284 : vector<64x1xf32> to vector<64x32xf32>
    %291 = vector.broadcast %271 : vector<1x32xf32> to vector<64x32xf32>
    %292 = arith.mulf %290, %291 : vector<64x32xf32>
    %293 = arith.addf %289, %292 : vector<64x32xf32>
    %294 = vector.broadcast %288 : vector<64x1xf32> to vector<64x32xf32>
    %295 = arith.mulf %293, %294 : vector<64x32xf32>
    %cst_108 = arith.constant dense<0.000000e+00> : vector<64x16xf32>
    %296 = tpu.matmul %295, %11, %cst_108 {dimension_numbers = #tpu.dot_dimension_numbers<[1], [0], [0], [1], [0, 0, 1, 1], [], []>} : vector<64x32xf32>, vector<32x16xf32>, vector<64x16xf32> -> vector<64x16xf32>
    %297 = arith.addf %264, %296 : vector<64x16xf32>
    %298 = vector.extract_strided_slice %134 {offsets = [64, 64], sizes = [64, 32], strides = [1, 1]} : vector<128x288xf32> to vector<64x32xf32>
    %cst_109 = arith.constant 0.176776692 : f32
    %299 = vector.broadcast %cst_109 : f32 to vector<64x32xf32>
    %300 = arith.mulf %298, %299 : vector<64x32xf32>
    %301 = vector.extract_strided_slice %134 {offsets = [64, 160], sizes = [64, 32], strides = [1, 1]} : vector<128x288xf32> to vector<64x32xf32>
    %302 = vector.extract_strided_slice %134 {offsets = [64, 256], sizes = [64, 32], strides = [1, 1]} : vector<128x288xf32> to vector<64x32xf32>
    %303 = vector.extract_strided_slice %111 {offsets = [0, 160], sizes = [1, 32], strides = [1, 1]} : vector<1x288xf32> to vector<1x32xf32>
    %304 = vector.extract_strided_slice %111 {offsets = [0, 256], sizes = [1, 32], strides = [1, 1]} : vector<1x288xf32> to vector<1x32xf32>
    %cst_110 = arith.constant dense<0.000000e+00> : vector<64x64xf32>
    %305 = tpu.matmul %300, %301, %cst_110 {dimension_numbers = #tpu.dot_dimension_numbers<[1], [1], [0], [0], [0, 0, 1, 0], [], []>} : vector<64x32xf32>, vector<64x32xf32>, vector<64x64xf32> -> vector<64x64xf32>
    %306 = vector.broadcast %303 : vector<1x32xf32> to vector<64x32xf32>
    %307 = arith.mulf %300, %306 : vector<64x32xf32>
    %cst_111 = arith.constant dense<0.000000e+00> : vector<64xf32>
    %308 = vector.multi_reduction <add>, %307, %cst_111 [1] : vector<64x32xf32> to vector<64xf32>
    %309 = vector.shape_cast %308 : vector<64xf32> to vector<64x1xf32>
    %cst_112 = arith.constant dense<0xFF800000> : vector<64xf32>
    %310 = vector.multi_reduction <maximumf>, %305, %cst_112 [1] : vector<64x64xf32> to vector<64xf32>
    %311 = vector.shape_cast %310 : vector<64xf32> to vector<64x1xf32>
    %312 = arith.maximumf %311, %309 : vector<64x1xf32>
    %313 = vector.broadcast %312 : vector<64x1xf32> to vector<64x64xf32>
    %314 = arith.subf %305, %313 : vector<64x64xf32>
    %315 = math.exp %314 : vector<64x64xf32>
    %316 = arith.subf %309, %312 : vector<64x1xf32>
    %317 = math.exp %316 : vector<64x1xf32>
    %cst_113 = arith.constant dense<0.000000e+00> : vector<64xf32>
    %318 = vector.multi_reduction <add>, %315, %cst_113 [1] : vector<64x64xf32> to vector<64xf32>
    %319 = vector.shape_cast %318 : vector<64xf32> to vector<64x1xf32>
    %320 = arith.addf %319, %317 : vector<64x1xf32>
    %321 = tpu.reciprocal %320 {approx = true} : vector<64x1xf32> -> vector<64x1xf32>
    %cst_114 = arith.constant dense<0.000000e+00> : vector<64x32xf32>
    %322 = tpu.matmul %315, %302, %cst_114 {dimension_numbers = #tpu.dot_dimension_numbers<[1], [0], [0], [1], [0, 0, 1, 1], [], []>} : vector<64x64xf32>, vector<64x32xf32>, vector<64x32xf32> -> vector<64x32xf32>
    %323 = vector.broadcast %317 : vector<64x1xf32> to vector<64x32xf32>
    %324 = vector.broadcast %304 : vector<1x32xf32> to vector<64x32xf32>
    %325 = arith.mulf %323, %324 : vector<64x32xf32>
    %326 = arith.addf %322, %325 : vector<64x32xf32>
    %327 = vector.broadcast %321 : vector<64x1xf32> to vector<64x32xf32>
    %328 = arith.mulf %326, %327 : vector<64x32xf32>
    %cst_115 = arith.constant dense<0.000000e+00> : vector<64x16xf32>
    %329 = tpu.matmul %328, %13, %cst_115 {dimension_numbers = #tpu.dot_dimension_numbers<[1], [0], [0], [1], [0, 0, 1, 1], [], []>} : vector<64x32xf32>, vector<32x16xf32>, vector<64x16xf32> -> vector<64x16xf32>
    %330 = arith.addf %297, %329 : vector<64x16xf32>
    %331 = tpu.concatenate %232, %330 in 0 : vector<64x16xf32>, vector<64x16xf32> -> vector<128x16xf32>
    %332 = vector.broadcast %7 : vector<1x16xf32> to vector<128x16xf32>
    %333 = arith.addf %331, %332 : vector<128x16xf32>
    %334 = arith.addf %33, %333 : vector<128x16xf32>
    %cst_116 = arith.constant dense<0.000000e+00> : vector<128xf32>
    %335 = vector.multi_reduction <add>, %334, %cst_116 [1] : vector<128x16xf32> to vector<128xf32>
    %336 = vector.shape_cast %335 : vector<128xf32> to vector<128x1xf32>
    %cst_117 = arith.constant 1.600000e+01 : f32
    %337 = vector.broadcast %cst_117 : f32 to vector<128x1xf32>
    %338 = arith.divf %336, %337 : vector<128x1xf32>
    %339 = vector.broadcast %338 : vector<128x1xf32> to vector<128x16xf32>
    %340 = arith.subf %334, %339 : vector<128x16xf32>
    %341 = arith.mulf %340, %340 : vector<128x16xf32>
    %cst_118 = arith.constant dense<0.000000e+00> : vector<128xf32>
    %342 = vector.multi_reduction <add>, %341, %cst_118 [1] : vector<128x16xf32> to vector<128xf32>
    %343 = vector.shape_cast %342 : vector<128xf32> to vector<128x1xf32>
    %cst_119 = arith.constant 1.600000e+01 : f32
    %344 = vector.broadcast %cst_119 : f32 to vector<128x1xf32>
    %345 = arith.divf %343, %344 : vector<128x1xf32>
    %346 = vector.broadcast %338 : vector<128x1xf32> to vector<128x16xf32>
    %347 = arith.subf %334, %346 : vector<128x16xf32>
    %cst_120 = arith.constant 9.99999974E-6 : f32
    %348 = vector.broadcast %cst_120 : f32 to vector<128x1xf32>
    %349 = arith.addf %345, %348 : vector<128x1xf32>
    %350 = math.rsqrt %349 : vector<128x1xf32>
    %351 = vector.broadcast %350 : vector<128x1xf32> to vector<128x16xf32>
    %352 = arith.mulf %347, %351 : vector<128x16xf32>
    %353 = vector.broadcast %14 : vector<1x16xf32> to vector<128x16xf32>
    %354 = arith.mulf %352, %353 : vector<128x16xf32>
    %355 = vector.broadcast %15 : vector<1x16xf32> to vector<128x16xf32>
    %356 = arith.addf %354, %355 : vector<128x16xf32>
    %cst_121 = arith.constant dense<0.000000e+00> : vector<128x128xf32>
    %357 = tpu.matmul %356, %16, %cst_121 {dimension_numbers = #tpu.dot_dimension_numbers<[1], [0], [0], [1], [0, 0, 1, 1], [], []>} : vector<128x16xf32>, vector<16x128xf32>, vector<128x128xf32> -> vector<128x128xf32>
    %358 = vector.broadcast %17 : vector<1x128xf32> to vector<128x128xf32>
    %359 = arith.addf %357, %358 : vector<128x128xf32>
    %cst_122 = arith.constant 5.000000e-01 : f32
    %360 = vector.broadcast %cst_122 : f32 to vector<128x128xf32>
    %361 = arith.mulf %360, %359 : vector<128x128xf32>
    %cst_123 = arith.constant 0.707106769 : f32
    %362 = vector.broadcast %cst_123 : f32 to vector<128x128xf32>
    %363 = arith.mulf %359, %362 : vector<128x128xf32>
    %364 = math.erf %363 : vector<128x128xf32>
    %cst_124 = arith.constant 1.000000e+00 : f32
    %365 = vector.broadcast %cst_124 : f32 to vector<128x128xf32>
    %366 = arith.addf %365, %364 : vector<128x128xf32>
    %367 = arith.mulf %361, %366 : vector<128x128xf32>
    %cst_125 = arith.constant dense<0.000000e+00> : vector<128x16xf32>
    %368 = tpu.matmul %367, %18, %cst_125 {dimension_numbers = #tpu.dot_dimension_numbers<[1], [0], [0], [1], [0, 0, 1, 1], [], []>} : vector<128x128xf32>, vector<128x16xf32>, vector<128x16xf32> -> vector<128x16xf32>
    %369 = arith.addf %334, %368 : vector<128x16xf32>
    %370 = vector.broadcast %19 : vector<1x16xf32> to vector<128x16xf32>
    %371 = arith.addf %369, %370 : vector<128x16xf32>
    %372 = vector.extract_strided_slice %371 {offsets = [0, 0], sizes = [64, 16], strides = [1, 1]} : vector<128x16xf32> to vector<64x16xf32>
    %373 = tpu.transpose %372, [1, 0] : vector<64x16xf32> -> vector<16x64xf32>
    %c0_126 = arith.constant 0 : index
    %c0_127 = arith.constant 0 : index
    %c0_128 = arith.constant 0 : index
    %374 = vector.load %arg33[%c0_126, %c0_127, %c0_128] : memref<2x16x64xf32, #tpu.memory_space<vmem>>, vector<1x16x64xf32>
    %375 = vector.shape_cast %374 : vector<1x16x64xf32> to vector<16x64xf32>
    %376 = vector.shape_cast %373 : vector<16x64xf32> to vector<1x16x64xf32>
    tpu.vector_store %arg33[%c0_126, %c0_127, %c0_128], %376 {strides = array<i32>} : memref<2x16x64xf32, #tpu.memory_space<vmem>>, vector<1x16x64xf32>,
    %377 = vector.extract_strided_slice %371 {offsets = [64, 0], sizes = [64, 16], strides = [1, 1]} : vector<128x16xf32> to vector<64x16xf32>
    %378 = tpu.transpose %377, [1, 0] : vector<64x16xf32> -> vector<16x64xf32>
    %c1_129 = arith.constant 1 : index
    %c0_130 = arith.constant 0 : index
    %c0_131 = arith.constant 0 : index
    %379 = vector.load %arg33[%c1_129, %c0_130, %c0_131] : memref<2x16x64xf32, #tpu.memory_space<vmem>>, vector<1x16x64xf32>
    %380 = vector.shape_cast %379 : vector<1x16x64xf32> to vector<16x64xf32>
    %381 = vector.shape_cast %378 : vector<16x64xf32> to vector<1x16x64xf32>
    tpu.vector_store %arg33[%c1_129, %c0_130, %c0_131], %381 {strides = array<i32>} : memref<2x16x64xf32, #tpu.memory_space<vmem>>, vector<1x16x64xf32>,
    %c0_132 = arith.constant 0 : index
    %c0_133 = arith.constant 0 : index
    %382 = vector.load %arg18[%c0_132, %c0_133] : memref<1x16xf32, #tpu.memory_space<vmem>>, vector<1x16xf32>
    %c0_134 = arith.constant 0 : index
    %c0_135 = arith.constant 0 : index
    %383 = vector.load %arg19[%c0_134, %c0_135] : memref<1x16xf32, #tpu.memory_space<vmem>>, vector<1x16xf32>
    %c0_136 = arith.constant 0 : index
    %c0_137 = arith.constant 0 : index
    %384 = vector.load %arg20[%c0_136, %c0_137] : memref<16x32xf32, #tpu.memory_space<vmem>>, vector<16x32xf32>
    %c0_138 = arith.constant 0 : index
    %c0_139 = arith.constant 0 : index
    %385 = vector.load %arg21[%c0_138, %c0_139] : memref<1x32xf32, #tpu.memory_space<vmem>>, vector<1x32xf32>
    %c0_140 = arith.constant 0 : index
    %c0_141 = arith.constant 0 : index
    %386 = vector.load %arg22[%c0_140, %c0_141] : memref<1x32xf32, #tpu.memory_space<vmem>>, vector<1x32xf32>
    %c0_142 = arith.constant 0 : index
    %c0_143 = arith.constant 0 : index
    %387 = vector.load %arg23[%c0_142, %c0_143] : memref<1x32xf32, #tpu.memory_space<vmem>>, vector<1x32xf32>
    %c0_144 = arith.constant 0 : index
    %c0_145 = arith.constant 0 : index
    %388 = vector.load %arg24[%c0_144, %c0_145] : memref<32x192xf32, #tpu.memory_space<vmem>>, vector<32x192xf32>
    %c0_146 = arith.constant 0 : index
    %c0_147 = arith.constant 0 : index
    %389 = vector.load %arg26[%c0_146, %c0_147] : memref<1x32xf32, #tpu.memory_space<vmem>>, vector<1x32xf32>
    %c0_148 = arith.constant 0 : index
    %c0_149 = arith.constant 0 : index
    %c0_150 = arith.constant 0 : index
    %390 = vector.load %arg25[%c0_148, %c0_149, %c0_150] : memref<1x64x32xf32, #tpu.memory_space<vmem>>, vector<1x64x32xf32>
    %391 = vector.shape_cast %390 : vector<1x64x32xf32> to vector<64x32xf32>
    %c0_151 = arith.constant 0 : index
    %c0_152 = arith.constant 0 : index
    %392 = vector.load %arg27[%c0_151, %c0_152] : memref<1x32xf32, #tpu.memory_space<vmem>>, vector<1x32xf32>
    %c0_153 = arith.constant 0 : index
    %c0_154 = arith.constant 0 : index
    %393 = vector.load %arg28[%c0_153, %c0_154] : memref<1x32xf32, #tpu.memory_space<vmem>>, vector<1x32xf32>
    %c0_155 = arith.constant 0 : index
    %c0_156 = arith.constant 0 : index
    %394 = vector.load %arg29[%c0_155, %c0_156] : memref<32x256xf32, #tpu.memory_space<vmem>>, vector<32x256xf32>
    %c0_157 = arith.constant 0 : index
    %c0_158 = arith.constant 0 : index
    %395 = vector.load %arg30[%c0_157, %c0_158] : memref<1x256xf32, #tpu.memory_space<vmem>>, vector<1x256xf32>
    %c0_159 = arith.constant 0 : index
    %c0_160 = arith.constant 0 : index
    %396 = vector.load %arg31[%c0_159, %c0_160] : memref<256x32xf32, #tpu.memory_space<vmem>>, vector<256x32xf32>
    %c0_161 = arith.constant 0 : index
    %c0_162 = arith.constant 0 : index
    %397 = vector.load %arg32[%c0_161, %c0_162] : memref<1x32xf32, #tpu.memory_space<vmem>>, vector<1x32xf32>
    %c0_163 = arith.constant 0 : index
    %c0_164 = arith.constant 0 : index
    %c0_165 = arith.constant 0 : index
    %398 = vector.load %arg2[%c0_163, %c0_164, %c0_165] : memref<2x16x64xf32, #tpu.memory_space<vmem>>, vector<1x16x64xf32>
    %399 = vector.shape_cast %398 : vector<1x16x64xf32> to vector<16x64xf32>
    %400 = tpu.transpose %399, [1, 0] : vector<16x64xf32> -> vector<64x16xf32>
    %c1_166 = arith.constant 1 : index
    %c0_167 = arith.constant 0 : index
    %c0_168 = arith.constant 0 : index
    %401 = vector.load %arg2[%c1_166, %c0_167, %c0_168] : memref<2x16x64xf32, #tpu.memory_space<vmem>>, vector<1x16x64xf32>
    %402 = vector.shape_cast %401 : vector<1x16x64xf32> to vector<16x64xf32>
    %403 = tpu.transpose %402, [1, 0] : vector<16x64xf32> -> vector<64x16xf32>
    %c0_169 = arith.constant 0 : index
    %c0_170 = arith.constant 0 : index
    %c0_171 = arith.constant 0 : index
    %404 = vector.load %arg1[%c0_169, %c0_170, %c0_171] : memref<2x32x64xf32, #tpu.memory_space<vmem>>, vector<1x32x64xf32>
    %405 = vector.shape_cast %404 : vector<1x32x64xf32> to vector<32x64xf32>
    %406 = tpu.transpose %405, [1, 0] : vector<32x64xf32> -> vector<64x32xf32>
    %c1_172 = arith.constant 1 : index
    %c0_173 = arith.constant 0 : index
    %c0_174 = arith.constant 0 : index
    %407 = vector.load %arg1[%c1_172, %c0_173, %c0_174] : memref<2x32x64xf32, #tpu.memory_space<vmem>>, vector<1x32x64xf32>
    %408 = vector.shape_cast %407 : vector<1x32x64xf32> to vector<32x64xf32>
    %409 = tpu.transpose %408, [1, 0] : vector<32x64xf32> -> vector<64x32xf32>
    %410 = tpu.concatenate %400, %403 in 0 : vector<64x16xf32>, vector<64x16xf32> -> vector<128x16xf32>
    %411 = tpu.concatenate %406, %409 in 0 : vector<64x32xf32>, vector<64x32xf32> -> vector<128x32xf32>
    %cst_175 = arith.constant dense<0.000000e+00> : vector<128xf32>
    %412 = vector.multi_reduction <add>, %410, %cst_175 [1] : vector<128x16xf32> to vector<128xf32>
    %413 = vector.shape_cast %412 : vector<128xf32> to vector<128x1xf32>
    %cst_176 = arith.constant 1.600000e+01 : f32
    %414 = vector.broadcast %cst_176 : f32 to vector<128x1xf32>
    %415 = arith.divf %413, %414 : vector<128x1xf32>
    %416 = vector.broadcast %415 : vector<128x1xf32> to vector<128x16xf32>
    %417 = arith.subf %410, %416 : vector<128x16xf32>
    %418 = arith.mulf %417, %417 : vector<128x16xf32>
    %cst_177 = arith.constant dense<0.000000e+00> : vector<128xf32>
    %419 = vector.multi_reduction <add>, %418, %cst_177 [1] : vector<128x16xf32> to vector<128xf32>
    %420 = vector.shape_cast %419 : vector<128xf32> to vector<128x1xf32>
    %cst_178 = arith.constant 1.600000e+01 : f32
    %421 = vector.broadcast %cst_178 : f32 to vector<128x1xf32>
    %422 = arith.divf %420, %421 : vector<128x1xf32>
    %423 = vector.broadcast %415 : vector<128x1xf32> to vector<128x16xf32>
    %424 = arith.subf %410, %423 : vector<128x16xf32>
    %cst_179 = arith.constant 9.99999974E-6 : f32
    %425 = vector.broadcast %cst_179 : f32 to vector<128x1xf32>
    %426 = arith.addf %422, %425 : vector<128x1xf32>
    %427 = math.rsqrt %426 : vector<128x1xf32>
    %428 = vector.broadcast %427 : vector<128x1xf32> to vector<128x16xf32>
    %429 = arith.mulf %424, %428 : vector<128x16xf32>
    %430 = vector.broadcast %382 : vector<1x16xf32> to vector<128x16xf32>
    %431 = arith.mulf %429, %430 : vector<128x16xf32>
    %432 = vector.broadcast %383 : vector<1x16xf32> to vector<128x16xf32>
    %433 = arith.addf %431, %432 : vector<128x16xf32>
    %434 = vector.extract_strided_slice %433 {offsets = [0, 0], sizes = [64, 16], strides = [1, 1]} : vector<128x16xf32> to vector<64x16xf32>
    %cst_180 = arith.constant dense<0.000000e+00> : vector<16xf32>
    %435 = vector.multi_reduction <add>, %434, %cst_180 [0] : vector<64x16xf32> to vector<16xf32>
    %436 = vector.shape_cast %435 : vector<16xf32> to vector<1x16xf32>
    %cst_181 = arith.constant 6.400000e+01 : f32
    %437 = vector.broadcast %cst_181 : f32 to vector<1x16xf32>
    %438 = arith.divf %436, %437 : vector<1x16xf32>
    %cst_182 = arith.constant dense<0.000000e+00> : vector<1x32xf32>
    %439 = tpu.matmul %438, %384, %cst_182 {dimension_numbers = #tpu.dot_dimension_numbers<[1], [0], [0], [1], [0, 0, 1, 1], [], []>} : vector<1x16xf32>, vector<16x32xf32>, vector<1x32xf32> -> vector<1x32xf32>
    %440 = arith.addf %439, %385 : vector<1x32xf32>
    %cst_183 = arith.constant dense<0.000000e+00> : vector<1xf32>
    %441 = vector.multi_reduction <add>, %440, %cst_183 [1] : vector<1x32xf32> to vector<1xf32>
    %442 = vector.shape_cast %441 : vector<1xf32> to vector<1x1xf32>
    %cst_184 = arith.constant 3.200000e+01 : f32
    %443 = vector.broadcast %cst_184 : f32 to vector<1x1xf32>
    %444 = arith.divf %442, %443 : vector<1x1xf32>
    %445 = vector.broadcast %444 : vector<1x1xf32> to vector<1x32xf32>
    %446 = arith.subf %440, %445 : vector<1x32xf32>
    %447 = arith.mulf %446, %446 : vector<1x32xf32>
    %cst_185 = arith.constant dense<0.000000e+00> : vector<1xf32>
    %448 = vector.multi_reduction <add>, %447, %cst_185 [1] : vector<1x32xf32> to vector<1xf32>
    %449 = vector.shape_cast %448 : vector<1xf32> to vector<1x1xf32>
    %cst_186 = arith.constant 3.200000e+01 : f32
    %450 = vector.broadcast %cst_186 : f32 to vector<1x1xf32>
    %451 = arith.divf %449, %450 : vector<1x1xf32>
    %452 = vector.broadcast %444 : vector<1x1xf32> to vector<1x32xf32>
    %453 = arith.subf %440, %452 : vector<1x32xf32>
    %cst_187 = arith.constant 9.99999974E-6 : f32
    %454 = vector.broadcast %cst_187 : f32 to vector<1x1xf32>
    %455 = arith.addf %451, %454 : vector<1x1xf32>
    %456 = math.rsqrt %455 : vector<1x1xf32>
    %457 = vector.broadcast %456 : vector<1x1xf32> to vector<1x32xf32>
    %458 = arith.mulf %453, %457 : vector<1x32xf32>
    %459 = arith.mulf %458, %386 : vector<1x32xf32>
    %460 = arith.addf %459, %387 : vector<1x32xf32>
    %cst_188 = arith.constant dense<0.000000e+00> : vector<1x192xf32>
    %461 = tpu.matmul %460, %388, %cst_188 {dimension_numbers = #tpu.dot_dimension_numbers<[1], [0], [0], [1], [0, 0, 1, 1], [], []>} : vector<1x32xf32>, vector<32x192xf32>, vector<1x192xf32> -> vector<1x192xf32>
    %462 = vector.extract_strided_slice %433 {offsets = [64, 0], sizes = [64, 16], strides = [1, 1]} : vector<128x16xf32> to vector<64x16xf32>
    %cst_189 = arith.constant dense<0.000000e+00> : vector<16xf32>
    %463 = vector.multi_reduction <add>, %462, %cst_189 [0] : vector<64x16xf32> to vector<16xf32>
    %464 = vector.shape_cast %463 : vector<16xf32> to vector<1x16xf32>
    %cst_190 = arith.constant 6.400000e+01 : f32
    %465 = vector.broadcast %cst_190 : f32 to vector<1x16xf32>
    %466 = arith.divf %464, %465 : vector<1x16xf32>
    %cst_191 = arith.constant dense<0.000000e+00> : vector<1x32xf32>
    %467 = tpu.matmul %466, %384, %cst_191 {dimension_numbers = #tpu.dot_dimension_numbers<[1], [0], [0], [1], [0, 0, 1, 1], [], []>} : vector<1x16xf32>, vector<16x32xf32>, vector<1x32xf32> -> vector<1x32xf32>
    %468 = arith.addf %467, %385 : vector<1x32xf32>
    %cst_192 = arith.constant dense<0.000000e+00> : vector<1xf32>
    %469 = vector.multi_reduction <add>, %468, %cst_192 [1] : vector<1x32xf32> to vector<1xf32>
    %470 = vector.shape_cast %469 : vector<1xf32> to vector<1x1xf32>
    %cst_193 = arith.constant 3.200000e+01 : f32
    %471 = vector.broadcast %cst_193 : f32 to vector<1x1xf32>
    %472 = arith.divf %470, %471 : vector<1x1xf32>
    %473 = vector.broadcast %472 : vector<1x1xf32> to vector<1x32xf32>
    %474 = arith.subf %468, %473 : vector<1x32xf32>
    %475 = arith.mulf %474, %474 : vector<1x32xf32>
    %cst_194 = arith.constant dense<0.000000e+00> : vector<1xf32>
    %476 = vector.multi_reduction <add>, %475, %cst_194 [1] : vector<1x32xf32> to vector<1xf32>
    %477 = vector.shape_cast %476 : vector<1xf32> to vector<1x1xf32>
    %cst_195 = arith.constant 3.200000e+01 : f32
    %478 = vector.broadcast %cst_195 : f32 to vector<1x1xf32>
    %479 = arith.divf %477, %478 : vector<1x1xf32>
    %480 = vector.broadcast %472 : vector<1x1xf32> to vector<1x32xf32>
    %481 = arith.subf %468, %480 : vector<1x32xf32>
    %cst_196 = arith.constant 9.99999974E-6 : f32
    %482 = vector.broadcast %cst_196 : f32 to vector<1x1xf32>
    %483 = arith.addf %479, %482 : vector<1x1xf32>
    %484 = math.rsqrt %483 : vector<1x1xf32>
    %485 = vector.broadcast %484 : vector<1x1xf32> to vector<1x32xf32>
    %486 = arith.mulf %481, %485 : vector<1x32xf32>
    %487 = arith.mulf %486, %386 : vector<1x32xf32>
    %488 = arith.addf %487, %387 : vector<1x32xf32>
    %cst_197 = arith.constant dense<0.000000e+00> : vector<1x192xf32>
    %489 = tpu.matmul %488, %388, %cst_197 {dimension_numbers = #tpu.dot_dimension_numbers<[1], [0], [0], [1], [0, 0, 1, 1], [], []>} : vector<1x32xf32>, vector<32x192xf32>, vector<1x192xf32> -> vector<1x192xf32>
    %cst_198 = arith.constant dense<0.000000e+00> : vector<128xf32>
    %490 = vector.multi_reduction <add>, %411, %cst_198 [1] : vector<128x32xf32> to vector<128xf32>
    %491 = vector.shape_cast %490 : vector<128xf32> to vector<128x1xf32>
    %cst_199 = arith.constant 3.200000e+01 : f32
    %492 = vector.broadcast %cst_199 : f32 to vector<128x1xf32>
    %493 = arith.divf %491, %492 : vector<128x1xf32>
    %494 = vector.broadcast %493 : vector<128x1xf32> to vector<128x32xf32>
    %495 = arith.subf %411, %494 : vector<128x32xf32>
    %496 = arith.mulf %495, %495 : vector<128x32xf32>
    %cst_200 = arith.constant dense<0.000000e+00> : vector<128xf32>
    %497 = vector.multi_reduction <add>, %496, %cst_200 [1] : vector<128x32xf32> to vector<128xf32>
    %498 = vector.shape_cast %497 : vector<128xf32> to vector<128x1xf32>
    %cst_201 = arith.constant 3.200000e+01 : f32
    %499 = vector.broadcast %cst_201 : f32 to vector<128x1xf32>
    %500 = arith.divf %498, %499 : vector<128x1xf32>
    %501 = vector.broadcast %493 : vector<128x1xf32> to vector<128x32xf32>
    %502 = arith.subf %411, %501 : vector<128x32xf32>
    %cst_202 = arith.constant 9.99999974E-6 : f32
    %503 = vector.broadcast %cst_202 : f32 to vector<128x1xf32>
    %504 = arith.addf %500, %503 : vector<128x1xf32>
    %505 = math.rsqrt %504 : vector<128x1xf32>
    %506 = vector.broadcast %505 : vector<128x1xf32> to vector<128x32xf32>
    %507 = arith.mulf %502, %506 : vector<128x32xf32>
    %508 = vector.broadcast %386 : vector<1x32xf32> to vector<128x32xf32>
    %509 = arith.mulf %507, %508 : vector<128x32xf32>
    %510 = vector.broadcast %387 : vector<1x32xf32> to vector<128x32xf32>
    %511 = arith.addf %509, %510 : vector<128x32xf32>
    %cst_203 = arith.constant dense<0.000000e+00> : vector<128x192xf32>
    %512 = tpu.matmul %511, %388, %cst_203 {dimension_numbers = #tpu.dot_dimension_numbers<[1], [0], [0], [1], [0, 0, 1, 1], [], []>} : vector<128x32xf32>, vector<32x192xf32>, vector<128x192xf32> -> vector<128x192xf32>
    %513 = vector.extract_strided_slice %512 {offsets = [0, 0], sizes = [64, 64], strides = [1, 1]} : vector<128x192xf32> to vector<64x64xf32>
    %cst_204 = arith.constant 1.250000e-01 : f32
    %514 = vector.broadcast %cst_204 : f32 to vector<64x64xf32>
    %515 = arith.mulf %513, %514 : vector<64x64xf32>
    %516 = vector.extract_strided_slice %512 {offsets = [0, 64], sizes = [64, 64], strides = [1, 1]} : vector<128x192xf32> to vector<64x64xf32>
    %517 = vector.extract_strided_slice %512 {offsets = [0, 128], sizes = [64, 64], strides = [1, 1]} : vector<128x192xf32> to vector<64x64xf32>
    %518 = vector.extract_strided_slice %461 {offsets = [0, 64], sizes = [1, 64], strides = [1, 1]} : vector<1x192xf32> to vector<1x64xf32>
    %519 = vector.extract_strided_slice %461 {offsets = [0, 128], sizes = [1, 64], strides = [1, 1]} : vector<1x192xf32> to vector<1x64xf32>
    %cst_205 = arith.constant dense<0.000000e+00> : vector<64x64xf32>
    %520 = tpu.matmul %515, %516, %cst_205 {dimension_numbers = #tpu.dot_dimension_numbers<[1], [1], [0], [0], [0, 0, 1, 0], [], []>} : vector<64x64xf32>, vector<64x64xf32>, vector<64x64xf32> -> vector<64x64xf32>
    %521 = vector.broadcast %518 : vector<1x64xf32> to vector<64x64xf32>
    %522 = arith.mulf %515, %521 : vector<64x64xf32>
    %cst_206 = arith.constant dense<0.000000e+00> : vector<64xf32>
    %523 = vector.multi_reduction <add>, %522, %cst_206 [1] : vector<64x64xf32> to vector<64xf32>
    %524 = vector.shape_cast %523 : vector<64xf32> to vector<64x1xf32>
    %cst_207 = arith.constant dense<0xFF800000> : vector<64xf32>
    %525 = vector.multi_reduction <maximumf>, %520, %cst_207 [1] : vector<64x64xf32> to vector<64xf32>
    %526 = vector.shape_cast %525 : vector<64xf32> to vector<64x1xf32>
    %527 = arith.maximumf %526, %524 : vector<64x1xf32>
    %528 = vector.broadcast %527 : vector<64x1xf32> to vector<64x64xf32>
    %529 = arith.subf %520, %528 : vector<64x64xf32>
    %530 = math.exp %529 : vector<64x64xf32>
    %531 = arith.subf %524, %527 : vector<64x1xf32>
    %532 = math.exp %531 : vector<64x1xf32>
    %cst_208 = arith.constant dense<0.000000e+00> : vector<64xf32>
    %533 = vector.multi_reduction <add>, %530, %cst_208 [1] : vector<64x64xf32> to vector<64xf32>
    %534 = vector.shape_cast %533 : vector<64xf32> to vector<64x1xf32>
    %535 = arith.addf %534, %532 : vector<64x1xf32>
    %536 = tpu.reciprocal %535 {approx = true} : vector<64x1xf32> -> vector<64x1xf32>
    %cst_209 = arith.constant dense<0.000000e+00> : vector<64x64xf32>
    %537 = tpu.matmul %530, %517, %cst_209 {dimension_numbers = #tpu.dot_dimension_numbers<[1], [0], [0], [1], [0, 0, 1, 1], [], []>} : vector<64x64xf32>, vector<64x64xf32>, vector<64x64xf32> -> vector<64x64xf32>
    %538 = vector.broadcast %532 : vector<64x1xf32> to vector<64x64xf32>
    %539 = vector.broadcast %519 : vector<1x64xf32> to vector<64x64xf32>
    %540 = arith.mulf %538, %539 : vector<64x64xf32>
    %541 = arith.addf %537, %540 : vector<64x64xf32>
    %542 = vector.broadcast %536 : vector<64x1xf32> to vector<64x64xf32>
    %543 = arith.mulf %541, %542 : vector<64x64xf32>
    %cst_210 = arith.constant dense<0.000000e+00> : vector<64x32xf32>
    %544 = tpu.matmul %543, %391, %cst_210 {dimension_numbers = #tpu.dot_dimension_numbers<[1], [0], [0], [1], [0, 0, 1, 1], [], []>} : vector<64x64xf32>, vector<64x32xf32>, vector<64x32xf32> -> vector<64x32xf32>
    %545 = vector.extract_strided_slice %512 {offsets = [64, 0], sizes = [64, 64], strides = [1, 1]} : vector<128x192xf32> to vector<64x64xf32>
    %cst_211 = arith.constant 1.250000e-01 : f32
    %546 = vector.broadcast %cst_211 : f32 to vector<64x64xf32>
    %547 = arith.mulf %545, %546 : vector<64x64xf32>
    %548 = vector.extract_strided_slice %512 {offsets = [64, 64], sizes = [64, 64], strides = [1, 1]} : vector<128x192xf32> to vector<64x64xf32>
    %549 = vector.extract_strided_slice %512 {offsets = [64, 128], sizes = [64, 64], strides = [1, 1]} : vector<128x192xf32> to vector<64x64xf32>
    %550 = vector.extract_strided_slice %489 {offsets = [0, 64], sizes = [1, 64], strides = [1, 1]} : vector<1x192xf32> to vector<1x64xf32>
    %551 = vector.extract_strided_slice %489 {offsets = [0, 128], sizes = [1, 64], strides = [1, 1]} : vector<1x192xf32> to vector<1x64xf32>
    %cst_212 = arith.constant dense<0.000000e+00> : vector<64x64xf32>
    %552 = tpu.matmul %547, %548, %cst_212 {dimension_numbers = #tpu.dot_dimension_numbers<[1], [1], [0], [0], [0, 0, 1, 0], [], []>} : vector<64x64xf32>, vector<64x64xf32>, vector<64x64xf32> -> vector<64x64xf32>
    %553 = vector.broadcast %550 : vector<1x64xf32> to vector<64x64xf32>
    %554 = arith.mulf %547, %553 : vector<64x64xf32>
    %cst_213 = arith.constant dense<0.000000e+00> : vector<64xf32>
    %555 = vector.multi_reduction <add>, %554, %cst_213 [1] : vector<64x64xf32> to vector<64xf32>
    %556 = vector.shape_cast %555 : vector<64xf32> to vector<64x1xf32>
    %cst_214 = arith.constant dense<0xFF800000> : vector<64xf32>
    %557 = vector.multi_reduction <maximumf>, %552, %cst_214 [1] : vector<64x64xf32> to vector<64xf32>
    %558 = vector.shape_cast %557 : vector<64xf32> to vector<64x1xf32>
    %559 = arith.maximumf %558, %556 : vector<64x1xf32>
    %560 = vector.broadcast %559 : vector<64x1xf32> to vector<64x64xf32>
    %561 = arith.subf %552, %560 : vector<64x64xf32>
    %562 = math.exp %561 : vector<64x64xf32>
    %563 = arith.subf %556, %559 : vector<64x1xf32>
    %564 = math.exp %563 : vector<64x1xf32>
    %cst_215 = arith.constant dense<0.000000e+00> : vector<64xf32>
    %565 = vector.multi_reduction <add>, %562, %cst_215 [1] : vector<64x64xf32> to vector<64xf32>
    %566 = vector.shape_cast %565 : vector<64xf32> to vector<64x1xf32>
    %567 = arith.addf %566, %564 : vector<64x1xf32>
    %568 = tpu.reciprocal %567 {approx = true} : vector<64x1xf32> -> vector<64x1xf32>
    %cst_216 = arith.constant dense<0.000000e+00> : vector<64x64xf32>
    %569 = tpu.matmul %562, %549, %cst_216 {dimension_numbers = #tpu.dot_dimension_numbers<[1], [0], [0], [1], [0, 0, 1, 1], [], []>} : vector<64x64xf32>, vector<64x64xf32>, vector<64x64xf32> -> vector<64x64xf32>
    %570 = vector.broadcast %564 : vector<64x1xf32> to vector<64x64xf32>
    %571 = vector.broadcast %551 : vector<1x64xf32> to vector<64x64xf32>
    %572 = arith.mulf %570, %571 : vector<64x64xf32>
    %573 = arith.addf %569, %572 : vector<64x64xf32>
    %574 = vector.broadcast %568 : vector<64x1xf32> to vector<64x64xf32>
    %575 = arith.mulf %573, %574 : vector<64x64xf32>
    %cst_217 = arith.constant dense<0.000000e+00> : vector<64x32xf32>
    %576 = tpu.matmul %575, %391, %cst_217 {dimension_numbers = #tpu.dot_dimension_numbers<[1], [0], [0], [1], [0, 0, 1, 1], [], []>} : vector<64x64xf32>, vector<64x32xf32>, vector<64x32xf32> -> vector<64x32xf32>
    %577 = tpu.concatenate %544, %576 in 0 : vector<64x32xf32>, vector<64x32xf32> -> vector<128x32xf32>
    %578 = vector.broadcast %389 : vector<1x32xf32> to vector<128x32xf32>
    %579 = arith.addf %577, %578 : vector<128x32xf32>
    %580 = arith.addf %411, %579 : vector<128x32xf32>
    %cst_218 = arith.constant dense<0.000000e+00> : vector<128xf32>
    %581 = vector.multi_reduction <add>, %580, %cst_218 [1] : vector<128x32xf32> to vector<128xf32>
    %582 = vector.shape_cast %581 : vector<128xf32> to vector<128x1xf32>
    %cst_219 = arith.constant 3.200000e+01 : f32
    %583 = vector.broadcast %cst_219 : f32 to vector<128x1xf32>
    %584 = arith.divf %582, %583 : vector<128x1xf32>
    %585 = vector.broadcast %584 : vector<128x1xf32> to vector<128x32xf32>
    %586 = arith.subf %580, %585 : vector<128x32xf32>
    %587 = arith.mulf %586, %586 : vector<128x32xf32>
    %cst_220 = arith.constant dense<0.000000e+00> : vector<128xf32>
    %588 = vector.multi_reduction <add>, %587, %cst_220 [1] : vector<128x32xf32> to vector<128xf32>
    %589 = vector.shape_cast %588 : vector<128xf32> to vector<128x1xf32>
    %cst_221 = arith.constant 3.200000e+01 : f32
    %590 = vector.broadcast %cst_221 : f32 to vector<128x1xf32>
    %591 = arith.divf %589, %590 : vector<128x1xf32>
    %592 = vector.broadcast %584 : vector<128x1xf32> to vector<128x32xf32>
    %593 = arith.subf %580, %592 : vector<128x32xf32>
    %cst_222 = arith.constant 9.99999974E-6 : f32
    %594 = vector.broadcast %cst_222 : f32 to vector<128x1xf32>
    %595 = arith.addf %591, %594 : vector<128x1xf32>
    %596 = math.rsqrt %595 : vector<128x1xf32>
    %597 = vector.broadcast %596 : vector<128x1xf32> to vector<128x32xf32>
    %598 = arith.mulf %593, %597 : vector<128x32xf32>
    %599 = vector.broadcast %392 : vector<1x32xf32> to vector<128x32xf32>
    %600 = arith.mulf %598, %599 : vector<128x32xf32>
    %601 = vector.broadcast %393 : vector<1x32xf32> to vector<128x32xf32>
    %602 = arith.addf %600, %601 : vector<128x32xf32>
    %cst_223 = arith.constant dense<0.000000e+00> : vector<128x256xf32>
    %603 = tpu.matmul %602, %394, %cst_223 {dimension_numbers = #tpu.dot_dimension_numbers<[1], [0], [0], [1], [0, 0, 1, 1], [], []>} : vector<128x32xf32>, vector<32x256xf32>, vector<128x256xf32> -> vector<128x256xf32>
    %604 = vector.broadcast %395 : vector<1x256xf32> to vector<128x256xf32>
    %605 = arith.addf %603, %604 : vector<128x256xf32>
    %cst_224 = arith.constant 5.000000e-01 : f32
    %606 = vector.broadcast %cst_224 : f32 to vector<128x256xf32>
    %607 = arith.mulf %606, %605 : vector<128x256xf32>
    %cst_225 = arith.constant 0.707106769 : f32
    %608 = vector.broadcast %cst_225 : f32 to vector<128x256xf32>
    %609 = arith.mulf %605, %608 : vector<128x256xf32>
    %610 = math.erf %609 : vector<128x256xf32>
    %cst_226 = arith.constant 1.000000e+00 : f32
    %611 = vector.broadcast %cst_226 : f32 to vector<128x256xf32>
    %612 = arith.addf %611, %610 : vector<128x256xf32>
    %613 = arith.mulf %607, %612 : vector<128x256xf32>
    %cst_227 = arith.constant dense<0.000000e+00> : vector<128x32xf32>
    %614 = tpu.matmul %613, %396, %cst_227 {dimension_numbers = #tpu.dot_dimension_numbers<[1], [0], [0], [1], [0, 0, 1, 1], [], []>} : vector<128x256xf32>, vector<256x32xf32>, vector<128x32xf32> -> vector<128x32xf32>
    %615 = arith.addf %580, %614 : vector<128x32xf32>
    %616 = vector.broadcast %397 : vector<1x32xf32> to vector<128x32xf32>
    %617 = arith.addf %615, %616 : vector<128x32xf32>
    %618 = vector.extract_strided_slice %617 {offsets = [0, 0], sizes = [64, 32], strides = [1, 1]} : vector<128x32xf32> to vector<64x32xf32>
    %619 = tpu.transpose %618, [1, 0] : vector<64x32xf32> -> vector<32x64xf32>
    %c0_228 = arith.constant 0 : index
    %c0_229 = arith.constant 0 : index
    %c0_230 = arith.constant 0 : index
    %620 = vector.load %arg34[%c0_228, %c0_229, %c0_230] : memref<2x32x64xf32, #tpu.memory_space<vmem>>, vector<1x32x64xf32>
    %621 = vector.shape_cast %620 : vector<1x32x64xf32> to vector<32x64xf32>
    %622 = vector.shape_cast %619 : vector<32x64xf32> to vector<1x32x64xf32>
    tpu.vector_store %arg34[%c0_228, %c0_229, %c0_230], %622 {strides = array<i32>} : memref<2x32x64xf32, #tpu.memory_space<vmem>>, vector<1x32x64xf32>,
    %623 = vector.extract_strided_slice %617 {offsets = [64, 0], sizes = [64, 32], strides = [1, 1]} : vector<128x32xf32> to vector<64x32xf32>
    %624 = tpu.transpose %623, [1, 0] : vector<64x32xf32> -> vector<32x64xf32>
    %c1_231 = arith.constant 1 : index
    %c0_232 = arith.constant 0 : index
    %c0_233 = arith.constant 0 : index
    %625 = vector.load %arg34[%c1_231, %c0_232, %c0_233] : memref<2x32x64xf32, #tpu.memory_space<vmem>>, vector<1x32x64xf32>
    %626 = vector.shape_cast %625 : vector<1x32x64xf32> to vector<32x64xf32>
    %627 = vector.shape_cast %624 : vector<32x64xf32> to vector<1x32x64xf32>
    tpu.vector_store %arg34[%c1_231, %c0_232, %c0_233], %627 {strides = array<i32>} : memref<2x32x64xf32, #tpu.memory_space<vmem>>, vector<1x32x64xf32>,
    return
  }
  func.func @transform_0(%arg0: i32) -> (i32, i32, i32) {
    %c0_i32 = arith.constant 0 : i32
    %c0_i32_0 = arith.constant 0 : i32
    %c0_i32_1 = arith.constant 0 : i32
    return %arg0, %c0_i32, %c0_i32_0 : i32, i32, i32
  }
  func.func @transform_1(%arg0: i32) -> (i32, i32, i32) {
    %c0_i32 = arith.constant 0 : i32
    %c0_i32_0 = arith.constant 0 : i32
    %c0_i32_1 = arith.constant 0 : i32
    return %arg0, %c0_i32, %c0_i32_0 : i32, i32, i32
  }
  func.func @transform_2(%arg0: i32) -> (i32, i32) {
    %c0_i32 = arith.constant 0 : i32
    %c0_i32_0 = arith.constant 0 : i32
    %c0_i32_1 = arith.constant 0 : i32
    return %c0_i32, %c0_i32_0 : i32, i32
  }
  func.func @transform_3(%arg0: i32) -> (i32, i32) {
    %c0_i32 = arith.constant 0 : i32
    %c0_i32_0 = arith.constant 0 : i32
    %c0_i32_1 = arith.constant 0 : i32
    return %c0_i32, %c0_i32_0 : i32, i32
  }
  func.func @transform_4(%arg0: i32) -> (i32, i32) {
    %c0_i32 = arith.constant 0 : i32
    %c0_i32_0 = arith.constant 0 : i32
    %c0_i32_1 = arith.constant 0 : i32
    return %c0_i32, %c0_i32_0 : i32, i32
  }
  func.func @transform_5(%arg0: i32) -> (i32, i32) {
    %c0_i32 = arith.constant 0 : i32
    %c0_i32_0 = arith.constant 0 : i32
    %c0_i32_1 = arith.constant 0 : i32
    return %c0_i32, %c0_i32_0 : i32, i32
  }
  func.func @transform_6(%arg0: i32) -> (i32, i32) {
    %c0_i32 = arith.constant 0 : i32
    %c0_i32_0 = arith.constant 0 : i32
    %c0_i32_1 = arith.constant 0 : i32
    return %c0_i32, %c0_i32_0 : i32, i32
  }
  func.func @transform_7(%arg0: i32) -> (i32, i32) {
    %c0_i32 = arith.constant 0 : i32
    %c0_i32_0 = arith.constant 0 : i32
    %c0_i32_1 = arith.constant 0 : i32
    return %c0_i32, %c0_i32_0 : i32, i32
  }
  func.func @transform_8(%arg0: i32) -> (i32, i32) {
    %c0_i32 = arith.constant 0 : i32
    %c0_i32_0 = arith.constant 0 : i32
    %c0_i32_1 = arith.constant 0 : i32
    return %c0_i32, %c0_i32_0 : i32, i32
  }
  func.func @transform_9(%arg0: i32) -> (i32, i32, i32) {
    %c0_i32 = arith.constant 0 : i32
    %c0_i32_0 = arith.constant 0 : i32
    %c0_i32_1 = arith.constant 0 : i32
    %c0_i32_2 = arith.constant 0 : i32
    return %c0_i32, %c0_i32_0, %c0_i32_1 : i32, i32, i32
  }
  func.func @transform_10(%arg0: i32) -> (i32, i32) {
    %c0_i32 = arith.constant 0 : i32
    %c0_i32_0 = arith.constant 0 : i32
    %c0_i32_1 = arith.constant 0 : i32
    return %c0_i32, %c0_i32_0 : i32, i32
  }
  func.func @transform_11(%arg0: i32) -> (i32, i32) {
    %c0_i32 = arith.constant 0 : i32
    %c0_i32_0 = arith.constant 0 : i32
    %c0_i32_1 = arith.constant 0 : i32
    return %c0_i32, %c0_i32_0 : i32, i32
  }
  func.func @transform_12(%arg0: i32) -> (i32, i32) {
    %c0_i32 = arith.constant 0 : i32
    %c0_i32_0 = arith.constant 0 : i32
    %c0_i32_1 = arith.constant 0 : i32
    return %c0_i32, %c0_i32_0 : i32, i32
  }
  func.func @transform_13(%arg0: i32) -> (i32, i32) {
    %c0_i32 = arith.constant 0 : i32
    %c0_i32_0 = arith.constant 0 : i32
    %c0_i32_1 = arith.constant 0 : i32
    return %c0_i32, %c0_i32_0 : i32, i32
  }
  func.func @transform_14(%arg0: i32) -> (i32, i32) {
    %c0_i32 = arith.constant 0 : i32
    %c0_i32_0 = arith.constant 0 : i32
    %c0_i32_1 = arith.constant 0 : i32
    return %c0_i32, %c0_i32_0 : i32, i32
  }
  func.func @transform_15(%arg0: i32) -> (i32, i32) {
    %c0_i32 = arith.constant 0 : i32
    %c0_i32_0 = arith.constant 0 : i32
    %c0_i32_1 = arith.constant 0 : i32
    return %c0_i32, %c0_i32_0 : i32, i32
  }
  func.func @transform_16(%arg0: i32) -> (i32, i32) {
    %c0_i32 = arith.constant 0 : i32
    %c0_i32_0 = arith.constant 0 : i32
    %c0_i32_1 = arith.constant 0 : i32
    return %c0_i32, %c0_i32_0 : i32, i32
  }
  func.func @transform_17(%arg0: i32) -> (i32, i32) {
    %c0_i32 = arith.constant 0 : i32
    %c0_i32_0 = arith.constant 0 : i32
    %c0_i32_1 = arith.constant 0 : i32
    return %c0_i32, %c0_i32_0 : i32, i32
  }
  func.func @transform_18(%arg0: i32) -> (i32, i32) {
    %c0_i32 = arith.constant 0 : i32
    %c0_i32_0 = arith.constant 0 : i32
    %c0_i32_1 = arith.constant 0 : i32
    return %c0_i32, %c0_i32_0 : i32, i32
  }
  func.func @transform_19(%arg0: i32) -> (i32, i32) {
    %c0_i32 = arith.constant 0 : i32
    %c0_i32_0 = arith.constant 0 : i32
    %c0_i32_1 = arith.constant 0 : i32
    return %c0_i32, %c0_i32_0 : i32, i32
  }
  func.func @transform_20(%arg0: i32) -> (i32, i32) {
    %c0_i32 = arith.constant 0 : i32
    %c0_i32_0 = arith.constant 0 : i32
    %c0_i32_1 = arith.constant 0 : i32
    return %c0_i32, %c0_i32_0 : i32, i32
  }
  func.func @transform_21(%arg0: i32) -> (i32, i32) {
    %c0_i32 = arith.constant 0 : i32
    %c0_i32_0 = arith.constant 0 : i32
    %c0_i32_1 = arith.constant 0 : i32
    return %c0_i32, %c0_i32_0 : i32, i32
  }
  func.func @transform_22(%arg0: i32) -> (i32, i32) {
    %c0_i32 = arith.constant 0 : i32
    %c0_i32_0 = arith.constant 0 : i32
    %c0_i32_1 = arith.constant 0 : i32
    return %c0_i32, %c0_i32_0 : i32, i32
  }
  func.func @transform_23(%arg0: i32) -> (i32, i32) {
    %c0_i32 = arith.constant 0 : i32
    %c0_i32_0 = arith.constant 0 : i32
    %c0_i32_1 = arith.constant 0 : i32
    return %c0_i32, %c0_i32_0 : i32, i32
  }
  func.func @transform_24(%arg0: i32) -> (i32, i32, i32) {
    %c0_i32 = arith.constant 0 : i32
    %c0_i32_0 = arith.constant 0 : i32
    %c0_i32_1 = arith.constant 0 : i32
    %c0_i32_2 = arith.constant 0 : i32
    return %c0_i32, %c0_i32_0, %c0_i32_1 : i32, i32, i32
  }
  func.func @transform_25(%arg0: i32) -> (i32, i32) {
    %c0_i32 = arith.constant 0 : i32
    %c0_i32_0 = arith.constant 0 : i32
    %c0_i32_1 = arith.constant 0 : i32
    return %c0_i32, %c0_i32_0 : i32, i32
  }
  func.func @transform_26(%arg0: i32) -> (i32, i32) {
    %c0_i32 = arith.constant 0 : i32
    %c0_i32_0 = arith.constant 0 : i32
    %c0_i32_1 = arith.constant 0 : i32
    return %c0_i32, %c0_i32_0 : i32, i32
  }
  func.func @transform_27(%arg0: i32) -> (i32, i32) {
    %c0_i32 = arith.constant 0 : i32
    %c0_i32_0 = arith.constant 0 : i32
    %c0_i32_1 = arith.constant 0 : i32
    return %c0_i32, %c0_i32_0 : i32, i32
  }
  func.func @transform_28(%arg0: i32) -> (i32, i32) {
    %c0_i32 = arith.constant 0 : i32
    %c0_i32_0 = arith.constant 0 : i32
    %c0_i32_1 = arith.constant 0 : i32
    return %c0_i32, %c0_i32_0 : i32, i32
  }
  func.func @transform_29(%arg0: i32) -> (i32, i32) {
    %c0_i32 = arith.constant 0 : i32
    %c0_i32_0 = arith.constant 0 : i32
    %c0_i32_1 = arith.constant 0 : i32
    return %c0_i32, %c0_i32_0 : i32, i32
  }
  func.func @transform_30(%arg0: i32) -> (i32, i32) {
    %c0_i32 = arith.constant 0 : i32
    %c0_i32_0 = arith.constant 0 : i32
    %c0_i32_1 = arith.constant 0 : i32
    return %c0_i32, %c0_i32_0 : i32, i32
  }
  func.func @transform_31(%arg0: i32) -> (i32, i32) {
    %c0_i32 = arith.constant 0 : i32
    %c0_i32_0 = arith.constant 0 : i32
    %c0_i32_1 = arith.constant 0 : i32
    return %c0_i32, %c0_i32_0 : i32, i32
  }
  func.func @transform_32(%arg0: i32) -> (i32, i32, i32) {
    %c0_i32 = arith.constant 0 : i32
    %c0_i32_0 = arith.constant 0 : i32
    %c0_i32_1 = arith.constant 0 : i32
    return %arg0, %c0_i32, %c0_i32_0 : i32, i32, i32
  }
  func.func @transform_33(%arg0: i32) -> (i32, i32, i32) {
    %c0_i32 = arith.constant 0 : i32
    %c0_i32_0 = arith.constant 0 : i32
    %c0_i32_1 = arith.constant 0 : i32
    return %arg0, %c0_i32, %c0_i32_0 : i32, i32, i32
  }
}

</mosaic_0001>

<bundles_post_ra>
// kernel: _lambda_.1
= control target key start
LH: loop header
LB: loop body
LE: loop exit
PB: predicated region body
PF: predicated region fallthrough
CT: control target
= control target key end

     0   :  { %s13433_s6 = smov 1   ;;  %s13434_s10 = smov 2   ;;  %s18481_s0 = inlined_call_operand.smem [shape: u32[34], index: -1, kind: input, shape index: {}] }
   0x1   :  { %s13493_s5 = sld [smem:[%s18481_s0]]   ;;  %s13435_s14 = smov 3  }
   0x2   :  { %s13498_s9 = sld [smem:[%s18481_s0 + %s13433_s6]]   ;;  %s13436_s18 = smov 4  }
   0x3   :  { %s13503_s13 = sld [smem:[%s18481_s0 + %s13434_s10]]   ;;  %s13437_s22 = smov 5  }
   0x4   :  { %s13508_s17 = sld [smem:[%s18481_s0 + %s13435_s14]]   ;;  %s13438_s26 = smov 6  }
   0x5   :  { %s13513_s21 = sld [smem:[%s18481_s0 + %s13436_s18]]   ;;  %s13439_s30 = smov 7  }
   0x6   :  { %s13518_s25 = sld [smem:[%s18481_s0 + %s13437_s22]]   ;;  %s13440_s4 = smov 8  }
   0x7   :  { %s13523_s29 = sld [smem:[%s18481_s0 + %s13438_s26]]   ;;  %s13441_s10 = smov 9  }
   0x8   :  { %s13528_s3 = sld [smem:[%s18481_s0 + %s13439_s30]]   ;;  %s13442_s15 = smov 10  }
   0x9   :  { %s13533_s8 = sld [smem:[%s18481_s0 + %s13440_s4]]   ;;  %s13443_s20 = smov 11  }
   0xa   :  { %s13538_s14 = sld [smem:[%s18481_s0 + %s13441_s10]]   ;;  %s13444_s26 = smov 12  }
   0xb   :  { %s13543_s19 = sld [smem:[%s18481_s0 + %s13442_s15]]   ;;  %s13445_s1 = smov 13  }
   0xc   :  { %s13548_s24 = sld [smem:[%s18481_s0 + %s13443_s20]]   ;;  %s13446_s7 = smov 14  }
   0xd   :  { %s13553_s30 = sld [smem:[%s18481_s0 + %s13444_s26]]   ;;  %s13447_s15 = smov 15  }
   0xe   :  { %18640 = sst [smem:[#allocation17_spill]] %s13528_s3  ;;  %s13448_s22 = smov 16  }
   0xf   :  { %s13558_s6 = sld [smem:[%s18481_s0 + %s13445_s1]]   ;;  %s13449_s28 = smov 17  }
  0x10   :  { %s13563_s12 = sld [smem:[%s18481_s0 + %s13446_s7]]   ;;  %s13450_s7 = smov 18  }
  0x11   :  { %18641 = sst [smem:[#allocation18_spill]] %s13543_s19 }
  0x12   :  { %18642 = sst [smem:[#allocation19_spill]] %s13548_s24 }
  0x13   :  { %18643 = sst [smem:[#allocation20_spill]] %s13553_s30 }
  0x14   :  { %s13568_s20 = sld [smem:[%s18481_s0 + %s13447_s15]]   ;;  %s13451_s15 = smov 19  }
  0x15   :  { %s13573_s27 = sld [smem:[%s18481_s0 + %s13448_s22]]   ;;  %s13452_s22 = smov 20  }
  0x16   :  { %18644 = sst [smem:[#allocation21_spill]] %s13563_s12 }
  0x17   :  { %s13578_s4 = sld [smem:[%s18481_s0 + %s13449_s28]]   ;;  %s13453_s28 = smov 21  }
  0x18   :  { %s13583_s12 = sld [smem:[%s18481_s0 + %s13450_s7]]   ;;  %s13454_s7 = smov 22  }
  0x19   :  { %s13598_s30 = sld [smem:[%s18481_s0 + %s13453_s28]]   ;;  %s13457_s28 = smov 25  }
  0x1a   :  { %18645 = sst [smem:[#allocation22_spill]] %s13568_s20 }
  0x1b   :  { %18646 = sst [smem:[#allocation23_spill]] %s13573_s27 }
  0x1c   :  { %s13588_s20 = sld [smem:[%s18481_s0 + %s13451_s15]]   ;;  %s13455_s15 = smov 23  }
  0x1d   :  { %18647 = sst [smem:[#allocation24_spill]] %s13578_s4 }
  0x1e   :  { %18648 = sst [smem:[#allocation25_spill]] %s13583_s12 }
  0x1f   :  { %s13593_s27 = sld [smem:[%s18481_s0 + %s13452_s22]]   ;;  %s13456_s22 = smov 24  }
  0x20   :  { %18650 = sst [smem:[#allocation27_spill]] %s13598_s30 }
  0x21   :  { %s13603_s24 = sld [smem:[%s18481_s0 + %s13454_s7]]   ;;  %s13458_s7 = smov 26  }
  0x22   :  { %s13608_s19 = sld [smem:[%s18481_s0 + %s13455_s15]]   ;;  %s13459_s15 = smov 27  }
  0x23   :  { %s13618_s30 = sld [smem:[%s18481_s0 + %s13457_s28]]   ;;  %s13461_s28 = smov 29  }
  0x24   :  { %s13628_s12 = sld [smem:[%s18481_s0 + %s13459_s15]]   ;;  %s13463_s15 = smov 31  }
  0x25   :  { %18649 = sst [smem:[#allocation26_spill]] %s13593_s27 }
  0x26   :  { %s13613_s27 = sld [smem:[%s18481_s0 + %s13456_s22]]   ;;  %s13460_s22 = smov 28  }
  0x27   :  { %18651 = sst [smem:[#allocation28_spill]] %s13603_s24 }
  0x28   :  { %s13623_s24 = sld [smem:[%s18481_s0 + %s13458_s7]]   ;;  %s13462_s7 = smov 30  }
  0x29   :  { %18652 = sst [smem:[#allocation29_spill]] %s13618_s30 }
  0x2a   :  { %18654 = sst [smem:[#allocation31_spill]] %s13628_s12 }
  0x2b   :  { %s13633_s4 = sld [smem:[%s18481_s0 + %s13460_s22]]   ;;  %s13464_s22 = smov 32  }
  0x2c   :  { %s13638_s30 = sld [smem:[%s18481_s0 + %s13461_s28]]   ;;  %s13465_s28 = smov 33  }
  0x2d   :  { %s13648_s12 = sld [smem:[%s18481_s0 + %s13463_s15]]  }
  0x2e   :  { %18653 = sst [smem:[#allocation30_spill]] %s13623_s24 }
  0x2f   :  { %s13643_s24 = sld [smem:[%s18481_s0 + %s13462_s7]]  }
  0x30   :  { %s13653_s3 = sld [smem:[%s18481_s0 + %s13464_s22]]  }
  0x32   :  { %18655 = sst [smem:[#allocation32_spill]] %s13638_s30 }
  0x33   :  { %s13658_s30 = sld [smem:[%s18481_s0 + %s13465_s28]]  }
  0x34   :  { %73 = vsyncpa [#allocation3], 0 }
  0x35   :  { %74 = vsyncpa [#allocation5], 0 }
  0x36   :  { %75 = vsyncpa [#allocation8], 0 }
  0x37   :  { %76 = vsyncpa [#allocation11], 0  ;;  %s13466_s7 = smov [#allocation4]   ;;  %s13271_s11 = scalar_lea.hbm %s13538_s14, 1536 }
  0x38   :  { %s110_s10 = sshll.u32 %s13466_s7, 4  ;;  %p13272_p0 = scmp.ne.s32.totalorder %s13538_s14, %s13271_s11  ;;  %s111_s10 = int_to_ptr.vmem [resolvable:$true] %s110_s10 }
  0x39   :  { %p13275_p1 = scmp.lt.u32.totalorder %s13271_s11, %s13538_s14 }
  0x3b   :  { %p13277_p2 = pnand %p13275_p1, %p13272_p0 }
  0x3d   :  { %13280 = shalt.err (!%p13277_p2)
}
  0x3e   :  { %s13281_s15 = scalar_lea.vmem %s111_s10, 1536  ;;  %p13286_p4 = scmp.lt.s32.totalorder %s111_s10, %s111_s10 }
  0x3f   :  { %p13282_p3 = scmp.ne.s32.totalorder %s111_s10, %s13281_s15  ;;  %p13287_p5 = scmp.lt.s32.totalorder %s13281_s15, %s13281_s15 }
  0x41   :  { %p13288_p6 = por %p13287_p5, %p13286_p4 }
  0x43   :  { %p13289_p7 = pnand %p13288_p6, %p13282_p3 }
  0x45   :  { %13292 = shalt.err (!%p13289_p7)
}
  0x46   :  { %s13467_s0 = smov 128   ;;  %s13468_s16 = smov 8  }
  0x47   :  { %116 = dma.hbm_to_vmem [thread:$0]  %s13538_s14, 1536, %s111_s10, [#allocation5], %s13467_s0, %s13467_s0, %s13468_s16  }
  0x48   :  { %s13469_s18 = smov [#allocation7]   ;;  %s13470_s23 = smov [#allocation10]  }
  0x49   :  { %s150_s22 = sshll.u32 %s13469_s18, 4  ;;  %s180_s26 = sshll.u32 %s13470_s23, 4  ;;  %s151_s22 = int_to_ptr.vmem [resolvable:$true] %s150_s22  ;;  %s181_s26 = int_to_ptr.vmem [resolvable:$true] %s180_s26 }
  0x4a   :  { %s13293_s28 = scalar_lea.hbm %s13588_s20, 256 }
  0x4b   :  { %p13294_p8 = scmp.ne.s32.totalorder %s13588_s20, %s13293_s28  ;;  %p13297_p9 = scmp.lt.u32.totalorder %s13293_s28, %s13588_s20 }
  0x4d   :  { %p13299_p10 = pnand %p13297_p9, %p13294_p8 }
  0x4f   :  { %13302 = shalt.err (!%p13299_p10)
}
  0x50   :  { %s13303_s1 = scalar_lea.vmem %s151_s22, 256  ;;  %p13308_p12 = scmp.lt.s32.totalorder %s151_s22, %s151_s22 }
  0x51   :  { %p13304_p11 = scmp.ne.s32.totalorder %s151_s22, %s13303_s1  ;;  %p13309_p13 = scmp.lt.s32.totalorder %s13303_s1, %s13303_s1 }
  0x53   :  { %p13310_p0 = por %p13309_p13, %p13308_p12 }
  0x55   :  { %p13311_p1 = pnand %p13310_p0, %p13304_p11 }
  0x57   :  { %13314 = shalt.err (!%p13311_p1)
}
  0x58   :  { %156 = dma.hbm_to_vmem [thread:$0]  %s13588_s20, 256, %s151_s22, [#allocation8], %s13467_s0, %s13467_s0, %s13468_s16  }
  0x59   :  { %s13315_s14 = scalar_lea.hbm %s13613_s27, 1024 }
  0x5a   :  { %p13316_p2 = scmp.ne.s32.totalorder %s13613_s27, %s13315_s14  ;;  %p13319_p3 = scmp.lt.u32.totalorder %s13315_s14, %s13613_s27 }
  0x5c   :  { %p13321_p4 = pnand %p13319_p3, %p13316_p2 }
  0x5e   :  { %13324 = shalt.err (!%p13321_p4)
}
  0x5f   :  { %s13325_s2 = scalar_lea.vmem %s181_s26, 1024  ;;  %p13330_p6 = scmp.lt.s32.totalorder %s181_s26, %s181_s26 }
  0x60   :  { %p13326_p5 = scmp.ne.s32.totalorder %s181_s26, %s13325_s2  ;;  %p13331_p7 = scmp.lt.s32.totalorder %s13325_s2, %s13325_s2 }
  0x62   :  { %p13332_p8 = por %p13331_p7, %p13330_p6 }
  0x64   :  { %p13333_p9 = pnand %p13332_p8, %p13326_p5 }
  0x66   :  { %13336 = shalt.err (!%p13333_p9)
}
  0x67   :  { %186 = dma.hbm_to_vmem [thread:$0]  %s13613_s27, 1024, %s181_s26, [#allocation11], %s13467_s0, %s13467_s0, %s13468_s16  }
  0x68   :  { %s13471_s20 = smov [#allocation2]   ;;  %s13337_s10 = scalar_lea.hbm %s13533_s8, 768 }
  0x69   :  { %s98_s7 = sshll.u32 %s13471_s20, 4  ;;  %p13338_p10 = scmp.ne.s32.totalorder %s13533_s8, %s13337_s10  ;;  %s99_s7 = int_to_ptr.vmem [resolvable:$true] %s98_s7 }
  0x6a   :  { %p13341_p11 = scmp.lt.u32.totalorder %s13337_s10, %s13533_s8 }
  0x6c   :  { %p13343_p12 = pnand %p13341_p11, %p13338_p10 }
  0x6e   :  { %13346 = shalt.err (!%p13343_p12)
}
  0x6f   :  { %s13347_s11 = scalar_lea.vmem %s99_s7, 768  ;;  %p13352_p0 = scmp.lt.s32.totalorder %s99_s7, %s99_s7 }
  0x70   :  { %p13348_p13 = scmp.ne.s32.totalorder %s99_s7, %s13347_s11  ;;  %p13353_p1 = scmp.lt.s32.totalorder %s13347_s11, %s13347_s11 }
  0x72   :  { %p13354_p2 = por %p13353_p1, %p13352_p0 }
  0x74   :  { %p13355_p3 = pnand %p13354_p2, %p13348_p13 }
  0x76   :  { %13358 = shalt.err (!%p13355_p3)
}
  0x77   :  { %s13472_s15 = smov 384   ;;  %s13473_s27 = smov 24  }
  0x78   :  { %104 = dma.hbm_to_vmem [thread:$0]  %s13533_s8, 768, %s99_s7, [#allocation3], %s13472_s15, %s13472_s15, %s13473_s27  }
  0x79   :  { %s13474_s18 = smov [#allocation6]   ;;  %s13475_s23 = smov [#allocation9]  }
  0x7a   :  { %s128_s22 = sshll.u32 %s13474_s18, 4  ;;  %s168_s26 = sshll.u32 %s13475_s23, 4  ;;  %s129_s22 = int_to_ptr.vmem [resolvable:$true] %s128_s22  ;;  %s13685_s26 = int_to_ptr.vmem [resolvable:$true] %s168_s26 }
  0x7b   :  { %s13359_s28 = scalar_lea.hbm %s13558_s6, 256 }
  0x7c   :  { %p13360_p4 = scmp.ne.s32.totalorder %s13558_s6, %s13359_s28  ;;  %p13363_p5 = scmp.lt.u32.totalorder %s13359_s28, %s13558_s6 }
  0x7e   :  { %p13365_p6 = pnand %p13363_p5, %p13360_p4 }
  0x80   :  { %13368 = shalt.err (!%p13365_p6)
}
  0x81   :  { %s13369_s1 = scalar_lea.vmem %s129_s22, 256  ;;  %p13374_p8 = scmp.lt.s32.totalorder %s129_s22, %s129_s22 }
  0x82   :  { %p13370_p7 = scmp.ne.s32.totalorder %s129_s22, %s13369_s1  ;;  %p13375_p9 = scmp.lt.s32.totalorder %s13369_s1, %s13369_s1 }
  0x84   :  { %p13376_p10 = por %p13375_p9, %p13374_p8 }
  0x86   :  { %p13377_p11 = pnand %p13376_p10, %p13370_p7 }
  0x88   :  { %13380 = shalt.err (!%p13377_p11)
}
  0x89   :  { %134 = dma.hbm_to_vmem [thread:$0]  %s13558_s6, 256, %s129_s22, [#allocation5], %s13467_s0, %s13467_s0, %s13468_s16  }
  0x8a   :  { %s13381_s8 = scalar_lea.hbm %s13608_s19, 1024 }
  0x8b   :  { %p13382_p12 = scmp.ne.s32.totalorder %s13608_s19, %s13381_s8  ;;  %p13385_p13 = scmp.lt.u32.totalorder %s13381_s8, %s13608_s19 }
  0x8d   :  { %p13387_p0 = pnand %p13385_p13, %p13382_p12 }
  0x8f   :  { %13390 = shalt.err (!%p13387_p0)
}
  0x90   :  { %s13391_s14 = scalar_lea.vmem %s13685_s26, 1024  ;;  %p13396_p2 = scmp.lt.s32.totalorder %s13685_s26, %s13685_s26 }
  0x91   :  { %p13392_p1 = scmp.ne.s32.totalorder %s13685_s26, %s13391_s14  ;;  %p13397_p3 = scmp.lt.s32.totalorder %s13391_s14, %s13391_s14 }
  0x93   :  { %p13398_p4 = por %p13397_p3, %p13396_p2 }
  0x95   :  { %p13399_p5 = pnand %p13398_p4, %p13392_p1 }
  0x97   :  { %13402 = shalt.err (!%p13399_p5)
}
  0x98   :  { %s13476_s2 = smov 256   ;;  %s13477_s6 = smov 16  }
  0x99   :  { %174 = dma.hbm_to_vmem [thread:$0]  %s13608_s19, 1024, %s13685_s26, [#allocation8], %s13476_s2, %s13476_s2, %s13477_s6  }
  0x9a   :  { %s13478_s0 = smov [#allocation12]   ;;  %s13403_s20 = scalar_lea.hbm %s13633_s4, 1024 }
  0x9b   :  { %s198_s16 = sshll.u32 %s13478_s0, 4  ;;  %p13404_p6 = scmp.ne.s32.totalorder %s13633_s4, %s13403_s20  ;;  %s199_s16 = int_to_ptr.vmem [resolvable:$true] %s198_s16 }
  0x9c   :  { %p13407_p7 = scmp.lt.u32.totalorder %s13403_s20, %s13633_s4 }
  0x9e   :  { %p13409_p8 = pnand %p13407_p7, %p13404_p6 }
  0xa0   :  { %13412 = shalt.err (!%p13409_p8)
}
  0xa1   :  { %s13413_s7 = scalar_lea.vmem %s199_s16, 1024  ;;  %p13418_p10 = scmp.lt.s32.totalorder %s199_s16, %s199_s16 }
  0xa2   :  { %p13414_p9 = scmp.ne.s32.totalorder %s199_s16, %s13413_s7  ;;  %p13419_p11 = scmp.lt.s32.totalorder %s13413_s7, %s13413_s7 }
  0xa4   :  { %p13420_p12 = por %p13419_p11, %p13418_p10 }
  0xa6   :  { %p13421_p13 = pnand %p13420_p12, %p13414_p9 }
  0xa8   :  { %13424 = shalt.err (!%p13421_p13)
}
  0xa9   :  { %204 = dma.hbm_to_vmem [thread:$0]  %s13633_s4, 1024, %s199_s16, [#allocation11], %s13476_s2, %s13476_s2, %s13477_s6  }
  0xaa   :  { %13425 = dma.done.wait [#allocation3], 768  }
  0xab   :  { %13426 = vsyncadd [#allocation3], 4294966528 }
  0xac   :  { %13427 = dma.done.wait [#allocation5], 1792  }
  0xad   :  { %13428 = vsyncadd [#allocation5], 4294965504 }
  0xae   :  { %13429 = dma.done.wait [#allocation8], 1280  }
  0xaf   :  { %13430 = vsyncadd [#allocation8], 4294966016 }
  0xb0   :  { %13431 = dma.done.wait [#allocation11], 2048  }
  0xb1   :  { %13432 = vsyncadd [#allocation11], 4294965248  ;;  %v284_v0 = vld [vmem:[%s13493_s5] sm:$0xff]  ;;  %v285_v1 = vld [vmem:[%s13493_s5 + $0x8] sm:$0xff]  ;;  %vm426_vm0 = vcmask 261120   ;;  %vm13480_vm1 = vmmov 0  }
  0xb2   :  { %288 = vxpose.xlu0.b32.start [1/4] (short) (narrow) %v284_v0, 64  ;;  %v286_v2 = vld [vmem:[%s13493_s5 + $0x10] sm:$0xff]  ;;  %v287_v3 = vld [vmem:[%s13493_s5 + $0x18] sm:$0xff]  ;;  %v10057_v20 = vld [vmem:[%s13493_s5 + $0x20] sm:$0xff]  ;;  %vm793_vm2 = vcmask 130048   ;;  %vm776_vm3 = vcmask 122880  }
  0xb3   :  { %v10058_v21 = vld [vmem:[%s13493_s5 + $0x28] sm:$0xff]  ;;  %v10059_v22 = vld [vmem:[%s13493_s5 + $0x30] sm:$0xff]  ;;  %v10060_v23 = vld [vmem:[%s13493_s5 + $0x38] sm:$0xff]  ;;  %vm2015_vm5 = vcmask 523264   ;;  %s18958_s19 = sld [smem:[#allocation26_spill]]  ;;  %vm7121_vm6 = vcmask 253952  }
  0xb4   :  { %vm14232_vm4 = vmpackc.low %vm426_vm0, %vm426_vm0  ;;  %s18959_s4 = sld [smem:[#allocation27_spill]]  ;;  %s18960_s10 = sld [smem:[#allocation28_spill]] }
  0xb5   :  { %s18961_s11 = sld [smem:[#allocation18_spill]]  ;;  %s19001_s15 = sld [smem:[#allocation20_spill]]  ;;  %vm17449_vm7 = vmpackc.low %vm2015_vm5, %vm2015_vm5 }
  0xb6   :  { %289 = vxpose.xlu0.b32.cont [2/4] (short) (narrow) %v285_v1, 64  ;;  %s19002_s27 = sld [smem:[#allocation22_spill]]  ;;  %s19011_s18 = sld [smem:[#allocation21_spill]] }
  0xb7   :  { %s19018_s22 = sld [smem:[#allocation23_spill]]  ;;  %s19029_s23 = sld [smem:[#allocation29_spill]] }
  0xb8   :  { %s19043_s26 = sld [smem:[#allocation30_spill]]  ;;  %s19044_s28 = sld [smem:[#allocation31_spill]] }
  0xba   :  { %290 = vxpose.xlu0.b32.cont [3/4] (short) (narrow) %v286_v2, 64 }
  0xbe   :  { %291 = vxpose.xlu0.b32.end [4/4] (short) (narrow) %v287_v3, 64 }
 0x132   :  { %v304_v4 = vpop.trf.xlu0 }
 0x133   :  { %v427_v5 = vsel %vm426_vm0, %v304_v4, 0.0 }
 0x134   :  { %428 = vadd.xlane.f32.xlu1 %v427_v5 }
 0x136   :  { %v305_v6 = vpop.trf.xlu0 }
 0x137   :  { %v430_v7 = vsel %vm426_vm0, %v305_v6, 0.0 }
 0x138   :  { %431 = vadd.xlane.f32.xlu1 %v430_v7 }
 0x13a   :  { %v13713_v8 = vpop.trf.xlu0 }
 0x13b   :  { %v433_v9 = vsel %vm426_vm0, %v13713_v8, 0.0 }
 0x13c   :  { %434 = vadd.xlane.f32.xlu1 %v433_v9 }
 0x13e   :  { %v13717_v10 = vpop.trf.xlu0 }
 0x13f   :  { %v436_v11 = vsel %vm426_vm0, %v13717_v10, 0.0 }
 0x140   :  { %437 = vadd.xlane.f32.xlu1 %v436_v11 }
 0x142   :  { %v13721_v12 = vpop.trf.xlu0 }
 0x143   :  { %v439_v13 = vsel %vm426_vm0, %v13721_v12, 0.0 }
 0x144   :  { %440 = vadd.xlane.f32.xlu0 %v439_v13 }
 0x146   :  { %v13725_v14 = vpop.trf.xlu0 }
 0x147   :  { %v442_v15 = vsel %vm426_vm0, %v13725_v14, 0.0 }
 0x148   :  { %443 = vadd.xlane.f32.xlu1 %v442_v15 }
 0x14a   :  { %v13729_v16 = vpop.trf.xlu0 }
 0x14b   :  { %v445_v17 = vsel %vm426_vm0, %v13729_v16, 0.0 }
 0x14c   :  { %446 = vadd.xlane.f32.xlu1 %v445_v17  ;;  %v235_v17 = vld [vmem:[%s13513_s21 + $0x8] sm:$0xff] }
 0x14e   :  { %v13733_v18 = vpop.trf.xlu0 }
 0x14f   :  { %v448_v19 = vsel %vm426_vm0, %v13733_v18, 0.0 }
 0x150   :  { %449 = vadd.xlane.f32.xlu1 %v448_v19  ;;  %v236_v19 = vld [vmem:[%s13513_s21 + $0x10] sm:$0xff] }
 0x183   :  { %325 = vxpose.xlu1.b32.start [1/4] (short) (narrow) %v10057_v20, 64 }
 0x187   :  { %326 = vxpose.xlu1.b32.cont [2/4] (short) (narrow) %v10058_v21, 64  ;;  %v237_v21 = vld [vmem:[%s13513_s21 + $0x18] sm:$0xff] }
 0x18b   :  { %327 = vxpose.xlu1.b32.cont [3/4] (short) (narrow) %v10059_v22, 64  ;;  %v18486_v22 = vmov 0.0  }
 0x18c   :  { %10972 = vmatprep.mubr.msk.f32.mxu0 %vm13480_vm1, %v18486_v22  ;;  %861 = vmatprep.mubr.f32.mxu1 %v18486_v22 }
 0x18f   :  { %328 = vxpose.xlu1.b32.end [4/4] (short) (narrow) %v10060_v23, 64  ;;  %v13830_v23 = vpack.c.bf16 %v237_v21, %v236_v19 }
 0x1c1   :  { %v429_v24 = vpop.xlane.xlu1 %428 }
 0x1c2   :  { %v476_v42 = vmul.f32 0.03125, %v429_v24 }
 0x1c4   :  { %v13767_v45 = vsub.f32 %v304_v4, %v476_v42 }
 0x1c5   :  { %v432_v25 = vpop.xlane.xlu1 %431 }
 0x1c6   :  { %v477_v46 = vmul.f32 0.03125, %v432_v25  ;;  %v508_v52 = vmul.f32 %v13767_v45, %v13767_v45 }
 0x1c8   :  { %v13773_v49 = vsub.f32 %v305_v6, %v477_v46  ;;  %v524_v55 = vsel %vm426_vm0, %v508_v52, 0.0 }
 0x1c9   :  { %v435_v26 = vpop.xlane.xlu1 %434 }
 0x1ca   :  { %v478_v50 = vmul.f32 0.03125, %v435_v26  ;;  %v509_v56 = vmul.f32 %v13773_v49, %v13773_v49 }
 0x1cc   :  { %v13780_v53 = vsub.f32 %v13713_v8, %v478_v50  ;;  %v527_v60 = vsel %vm426_vm0, %v509_v56, 0.0 }
 0x1cd   :  { %v438_v27 = vpop.xlane.xlu1 %437 }
 0x1ce   :  { %v479_v54 = vmul.f32 0.03125, %v438_v27  ;;  %v510_v61 = vmul.f32 %v13780_v53, %v13780_v53 }
 0x1d0   :  { %v13786_v58 = vsub.f32 %v13717_v10, %v479_v54  ;;  %v530_v0 = vsel %vm426_vm0, %v510_v61, 0.0 }
 0x1d1   :  { %v441_v57 = vpop.xlane.xlu0 %440 }
 0x1d2   :  { %v480_v59 = vmul.f32 0.03125, %v441_v57  ;;  %v511_v1 = vmul.f32 %v13786_v58, %v13786_v58 }
 0x1d4   :  { %v13792_v62 = vsub.f32 %v13721_v12, %v480_v59  ;;  %v533_v4 = vsel %vm426_vm0, %v511_v1, 0.0 }
 0x1d5   :  { %v444_v28 = vpop.xlane.xlu1 %443 }
 0x1d6   :  { %v481_v63 = vmul.f32 0.03125, %v444_v28  ;;  %v512_v5 = vmul.f32 %v13792_v62, %v13792_v62 }
 0x1d8   :  { %v13798_v2 = vsub.f32 %v13725_v14, %v481_v63  ;;  %v536_v8 = vsel %vm426_vm0, %v512_v5, 0.0 }
 0x1d9   :  { %v447_v29 = vpop.xlane.xlu1 %446 }
 0x1da   :  { %v482_v3 = vmul.f32 0.03125, %v447_v29  ;;  %v513_v9 = vmul.f32 %v13798_v2, %v13798_v2 }
 0x1dc   :  { %v13804_v6 = vsub.f32 %v13729_v16, %v482_v3  ;;  %v539_v11 = vsel %vm426_vm0, %v513_v9, 0.0  ;;  %v234_v16 = vld [vmem:[%s13513_s21] sm:$0xff]  ;;  %s13483_s21 = smov 96  }
 0x1dd   :  { %v450_v30 = vpop.xlane.xlu1 %449  ;;  %v13823_v20 = vpack.c.bf16 %v235_v17, %v234_v16 }
 0x1de   :  { %v483_v7 = vmul.f32 0.03125, %v450_v30  ;;  %v514_v12 = vmul.f32 %v13804_v6, %v13804_v6 }
 0x1e0   :  { %v13810_v10 = vsub.f32 %v13733_v18, %v483_v7  ;;  %v542_v13 = vsel %vm426_vm0, %v514_v12, 0.0  ;;  %v18484_v18 = vmov 0.0|0.0  }
 0x1e1   :  { %11750 = vmatprep.subr.bf16.mxu0 %v18484_v18 }
 0x1e2   :  { %v515_v14 = vmul.f32 %v13810_v10, %v13810_v10  ;;  %11752 = vmatpush3.bf16.msra.mxu0 %v13823_v20 }
 0x1e3   :  { %11753 = vmatprep.subr.bf16.mxu0 %v18484_v18 }
 0x1e4   :  { %v545_v15 = vsel %vm426_vm0, %v515_v14, 0.0 }
 0x1e6   :  { %11755 = vmatpush3.bf16.msra.mxu0 %v13830_v23 }
 0x1e7   :  { %11763 = vmatprep.subr.bf16.mxu0 %v18484_v18 }
 0x203   :  { %v13741_v31 = vpop.trf.xlu1 }
 0x204   :  { %v451_v32 = vsel %vm426_vm0, %v13741_v31, 0.0 }
 0x205   :  { %452 = vadd.xlane.f32.xlu0 %v451_v32 }
 0x207   :  { %v13745_v33 = vpop.trf.xlu1 }
 0x208   :  { %v454_v34 = vsel %vm426_vm0, %v13745_v33, 0.0 }
 0x209   :  { %455 = vadd.xlane.f32.xlu0 %v454_v34 }
 0x20b   :  { %v13749_v35 = vpop.trf.xlu1 }
 0x20c   :  { %v457_v36 = vsel %vm426_vm0, %v13749_v35, 0.0 }
 0x20d   :  { %458 = vadd.xlane.f32.xlu0 %v457_v36 }
 0x20f   :  { %v13753_v37 = vpop.trf.xlu1 }
 0x210   :  { %v460_v38 = vsel %vm426_vm0, %v13753_v37, 0.0 }
 0x211   :  { %461 = vadd.xlane.f32.xlu0 %v460_v38 }
 0x213   :  { %v13757_v39 = vpop.trf.xlu1 }
 0x214   :  { %v463_v40 = vsel %vm426_vm0, %v13757_v39, 0.0 }
 0x215   :  { %464 = vadd.xlane.f32.xlu1 %v463_v40 }
 0x217   :  { %v13761_v41 = vpop.trf.xlu1 }
 0x218   :  { %v466_v43 = vsel %vm426_vm0, %v13761_v41, 0.0 }
 0x219   :  { %467 = vadd.xlane.f32.xlu0 %v466_v43 }
 0x21b   :  { %v13765_v44 = vpop.trf.xlu1 }
 0x21c   :  { %v469_v47 = vsel %vm426_vm0, %v13765_v44, 0.0 }
 0x21d   :  { %470 = vadd.xlane.f32.xlu0 %v469_v47 }
 0x21f   :  { %v13771_v48 = vpop.trf.xlu1 }
 0x220   :  { %v472_v51 = vsel %vm426_vm0, %v13771_v48, 0.0 }
 0x221   :  { %473 = vadd.xlane.f32.xlu0 %v472_v51 }
 0x225   :  { %525 = vadd.xlane.f32.xlu0 %v524_v55 }
 0x229   :  { %528 = vadd.xlane.f32.xlu0 %v527_v60 }
 0x22d   :  { %531 = vadd.xlane.f32.xlu0 %v530_v0 }
 0x231   :  { %534 = vadd.xlane.f32.xlu0 %v533_v4 }
 0x235   :  { %537 = vadd.xlane.f32.xlu0 %v536_v8 }
 0x239   :  { %540 = vadd.xlane.f32.xlu0 %v539_v11 }
 0x23d   :  { %543 = vadd.xlane.f32.xlu0 %v542_v13 }
 0x241   :  { %546 = vadd.xlane.f32.xlu0 %v545_v15 }
 0x292   :  { %v453_v24 = vpop.xlane.xlu0 %452 }
 0x293   :  { %v484_v25 = vmul.f32 0.03125, %v453_v24 }
 0x295   :  { %v13836_v26 = vsub.f32 %v13741_v31, %v484_v25 }
 0x296   :  { %v456_v27 = vpop.xlane.xlu0 %455 }
 0x297   :  { %v485_v28 = vmul.f32 0.03125, %v456_v27  ;;  %v516_v29 = vmul.f32 %v13836_v26, %v13836_v26 }
 0x299   :  { %v13841_v30 = vsub.f32 %v13745_v33, %v485_v28  ;;  %v548_v32 = vsel %vm426_vm0, %v516_v29, 0.0 }
 0x29a   :  { %549 = vadd.xlane.f32.xlu0 %v548_v32  ;;  %v459_v34 = vpop.xlane.xlu0 %458 }
 0x29b   :  { %v486_v36 = vmul.f32 0.03125, %v459_v34  ;;  %v517_v38 = vmul.f32 %v13841_v30, %v13841_v30 }
 0x29d   :  { %v13847_v40 = vsub.f32 %v13749_v35, %v486_v36  ;;  %v551_v31 = vsel %vm426_vm0, %v517_v38, 0.0 }
 0x29e   :  { %552 = vadd.xlane.f32.xlu0 %v551_v31  ;;  %v462_v42 = vpop.xlane.xlu0 %461 }
 0x29f   :  { %v487_v43 = vmul.f32 0.03125, %v462_v42  ;;  %v518_v33 = vmul.f32 %v13847_v40, %v13847_v40 }
 0x2a1   :  { %v13853_v46 = vsub.f32 %v13753_v37, %v487_v43  ;;  %v554_v47 = vsel %vm426_vm0, %v518_v33, 0.0 }
 0x2a2   :  { %v465_v50 = vpop.xlane.xlu1 %464  ;;  %555 = vadd.xlane.f32.xlu0 %v554_v47 }
 0x2a3   :  { %v488_v51 = vmul.f32 0.03125, %v465_v50  ;;  %v519_v35 = vmul.f32 %v13853_v46, %v13853_v46 }
 0x2a5   :  { %v13859_v52 = vsub.f32 %v13757_v39, %v488_v51  ;;  %v557_v54 = vsel %vm426_vm0, %v519_v35, 0.0  ;;  %v13887_v51 = vld [vmem:[%s13503_s13] ss:$0 sm:$0xff]  ;;  %s18664_s13 = sld [smem:[#allocation17_spill]] }
 0x2a6   :  { %558 = vadd.xlane.f32.xlu1 %v557_v54  ;;  %v468_v55 = vpop.xlane.xlu0 %467 }
 0x2a7   :  { %v489_v56 = vmul.f32 0.03125, %v468_v55  ;;  %v520_v37 = vmul.f32 %v13859_v52, %v13859_v52 }
 0x2a9   :  { %v13865_v57 = vsub.f32 %v13761_v41, %v489_v56  ;;  %v560_v59 = vsel %vm426_vm0, %v520_v37, 0.0 }
 0x2aa   :  { %561 = vadd.xlane.f32.xlu0 %v560_v59  ;;  %v471_v60 = vpop.xlane.xlu0 %470 }
 0x2ab   :  { %v490_v61 = vmul.f32 0.03125, %v471_v60  ;;  %v521_v39 = vmul.f32 %v13865_v57, %v13865_v57 }
 0x2ad   :  { %v13871_v63 = vsub.f32 %v13765_v44, %v490_v61  ;;  %v563_v0 = vsel %vm426_vm0, %v521_v39, 0.0  ;;  %v13894_v61 = vld [vmem:[%s13508_s17] ss:$0 sm:$0xff]  ;;  %s13482_s17 = smov 32  }
 0x2ae   :  { %564 = vadd.xlane.f32.xlu1 %v563_v0  ;;  %v474_v1 = vpop.xlane.xlu0 %473 }
 0x2af   :  { %v491_v3 = vmul.f32 0.03125, %v474_v1  ;;  %v522_v41 = vmul.f32 %v13871_v63, %v13871_v63 }
 0x2b1   :  { %v13877_v4 = vsub.f32 %v13771_v48, %v491_v3  ;;  %v566_v5 = vsel %vm426_vm0, %v522_v41, 0.0 }
 0x2b2   :  { %567 = vadd.xlane.f32.xlu0 %v566_v5  ;;  %v526_v7 = vpop.xlane.xlu0 %525 }
 0x2b3   :  { %v523_v8 = vmul.f32 %v13877_v4, %v13877_v4  ;;  %v572_v9 = vmul.f32 0.03125, %v526_v7 }
 0x2b5   :  { %v569_v44 = vsel %vm426_vm0, %v523_v8, 0.0  ;;  %v588_v14 = vadd.f32 1e-05, %v572_v9 }
 0x2b6   :  { %570 = vadd.xlane.f32.xlu1 %v569_v44  ;;  %v529_v11 = vpop.xlane.xlu0 %528 }
 0x2b7   :  { %v573_v12 = vmul.f32 0.03125, %v529_v11 }
 0x2b9   :  { %v589_v13 = vadd.f32 1e-05, %v573_v12 }
 0x2ba   :  { %v532_v15 = vpop.xlane.xlu0 %531 }
 0x2bb   :  { %v574_v16 = vmul.f32 0.03125, %v532_v15  ;;  %12590 = vrsqrt.f32 %v589_v13 }
 0x2bc   :  { %12592 = vrsqrt.f32 %v588_v14 }
 0x2bd   :  { %v590_v48 = vadd.f32 1e-05, %v574_v16 }
 0x2be   :  { %v535_v17 = vpop.xlane.xlu0 %534 }
 0x2bf   :  { %12594 = vrsqrt.f32 %v590_v48  ;;  %v575_v19 = vmul.f32 0.03125, %v535_v17 }
 0x2c1   :  { %v591_v21 = vadd.f32 1e-05, %v575_v19  ;;  %v357_v19 = vld [vmem:[%s13498_s9] sm:$0xff] }
 0x2c2   :  { %v538_v24 = vpop.xlane.xlu0 %537 }
 0x2c3   :  { %12596 = vrsqrt.f32 %v591_v21  ;;  %v576_v25 = vmul.f32 0.03125, %v538_v24 }
 0x2c5   :  { %v592_v27 = vadd.f32 1e-05, %v576_v25  ;;  %v12591_v29 = vpop.eup %12590 }
 0x2c6   :  { %v541_v28 = vpop.xlane.xlu0 %540  ;;  %v12593_v34 = vpop.eup %12592  ;;  %v621_v31 = vmul.f32 %v12591_v29, %v13773_v49 }
 0x2c7   :  { %12598 = vrsqrt.f32 %v592_v27  ;;  %v577_v32 = vmul.f32 0.03125, %v541_v28  ;;  %v620_v33 = vmul.f32 %v12593_v34, %v13767_v45  ;;  %v358_v34 = vld [vmem:[%s13498_s9 + $0x8] sm:$0xff] }
 0x2c8   :  { %v643_v54 = vmul.f32 %v13887_v51, %v621_v31 }
 0x2c9   :  { %v12595_v36 = vpop.eup %12594  ;;  %v593_v38 = vadd.f32 1e-05, %v577_v32  ;;  %v642_v49 = vmul.f32 %v13887_v51, %v620_v33 }
 0x2ca   :  { %v544_v42 = vpop.xlane.xlu0 %543  ;;  %v622_v47 = vmul.f32 %v12595_v36, %v13780_v53  ;;  %v665_v53 = vadd.f32 %v13894_v61, %v643_v54 }
 0x2cb   :  { %12600 = vrsqrt.f32 %v593_v38  ;;  %v578_v43 = vmul.f32 0.03125, %v544_v42 }
 0x2cc   :  { %v644_v59 = vmul.f32 %v13887_v51, %v622_v47  ;;  %v681_v5 = vsel %vm426_vm0, %v665_v53, 0.0 }
 0x2cd   :  { %v12597_v50 = vpop.eup %12596  ;;  %v594_v35 = vadd.f32 1e-05, %v578_v43 }
 0x2ce   :  { %v623_v55 = vmul.f32 %v12597_v50, %v13786_v58  ;;  %v547_v56 = vpop.xlane.xlu0 %546  ;;  %v664_v58 = vadd.f32 %v13894_v61, %v642_v49  ;;  %v666_v1 = vadd.f32 %v13894_v61, %v644_v59 }
 0x2cf   :  { %12602 = vrsqrt.f32 %v594_v35  ;;  %v579_v37 = vmul.f32 0.03125, %v547_v56 }
 0x2d0   :  { %v645_v39 = vmul.f32 %v13887_v51, %v623_v55  ;;  %v680_v44 = vsel %vm426_vm0, %v664_v58, 0.0  ;;  %v683_v9 = vsel %vm426_vm0, %v666_v1, 0.0 }
 0x2d1   :  { %v12599_v60 = vpop.eup %12598  ;;  %v595_v45 = vadd.f32 1e-05, %v579_v37  ;;  %v682_v13 = vadd.f32 %v681_v5, %v680_v44 }
 0x2d2   :  { %v624_v0 = vmul.f32 %v12599_v60, %v13792_v62  ;;  %v667_v7 = vadd.f32 %v13894_v61, %v645_v39 }
 0x2d3   :  { %12604 = vrsqrt.f32 %v595_v45  ;;  %v684_v48 = vadd.f32 %v683_v9, %v682_v13 }
 0x2d4   :  { %v646_v3 = vmul.f32 %v13887_v51, %v624_v0  ;;  %v685_v14 = vsel %vm426_vm0, %v667_v7, 0.0 }
 0x2d5   :  { %v12601_v41 = vpop.eup %12600  ;;  %v686_v24 = vadd.f32 %v685_v14, %v684_v48 }
 0x2d6   :  { %v625_v8 = vmul.f32 %v12601_v41, %v13798_v2  ;;  %v668_v62 = vadd.f32 %v13894_v61, %v646_v3 }
 0x2d8   :  { %v647_v11 = vmul.f32 %v13887_v51, %v625_v8  ;;  %v687_v2 = vsel %vm426_vm0, %v668_v62, 0.0 }
 0x2d9   :  { %v12603_v12 = vpop.eup %12602  ;;  %v688_v29 = vadd.f32 %v687_v2, %v686_v24 }
 0x2da   :  { %v669_v15 = vadd.f32 %v13894_v61, %v647_v11  ;;  %v626_v16 = vmul.f32 %v12603_v12, %v13804_v6 }
 0x2dc   :  { %v648_v17 = vmul.f32 %v13887_v51, %v626_v16  ;;  %v689_v28 = vsel %vm426_vm0, %v669_v15, 0.0 }
 0x2dd   :  { %v12605_v21 = vpop.eup %12604  ;;  %v690_v36 = vadd.f32 %v689_v28, %v688_v29 }
 0x2de   :  { %v670_v25 = vadd.f32 %v13894_v61, %v648_v17  ;;  %v627_v27 = vmul.f32 %v12605_v21, %v13810_v10 }
 0x2df   :  { %359 = vxpose.xlu0.b32.start [1/2] (short) (narrow) %v357_v19, 64 }
 0x2e0   :  { %v649_v32 = vmul.f32 %v13887_v51, %v627_v27  ;;  %v691_v6 = vsel %vm426_vm0, %v670_v25, 0.0 }
 0x2e1   :  { %v692_v31 = vadd.f32 %v691_v6, %v690_v36 }
 0x2e2   :  { %v671_v38 = vadd.f32 %v13894_v61, %v649_v32 }
 0x2e3   :  { %360 = vxpose.xlu0.b32.end [2/2] (short) (narrow) %v358_v34, 64 }
 0x2e4   :  { %v693_v42 = vsel %vm426_vm0, %v671_v38, 0.0 }
 0x2e5   :  { %v694_v43 = vadd.f32 %v693_v42, %v692_v31 }
 0x2e7   :  { %v695_v33 = vrot.slane %v694_v43, 4 }
 0x2e9   :  { %v696_v47 = vadd.f32 %v695_v33, %v694_v43 }
 0x2eb   :  { %v697_v10 = vrot.slane %v696_v47, 2 }
 0x2ed   :  { %v698_v50 = vadd.f32 %v697_v10, %v696_v47 }
 0x2ef   :  { %v699_v35 = vrot.slane %v698_v50, 1 }
 0x2f1   :  { %v700_v54 = vadd.f32 %v699_v35, %v698_v50 }
 0x2f3   :  { %v702_v55 = vmul.f32 0.015625, %v700_v54 }
 0x2f5   :  { %10973 = vmatmul.mubr.msk.f32.vlgmr.msra.gmra.mrb[0].mxu0 %vm426_vm0, %v702_v55 }
 0x2f6   :  { %11765 = vmatpush3.bf16.msra.mxu0 %v13823_v20  ;;  %10990 = vmatprep.mubr.msk.f32.mxu0 %vm13480_vm1, %v18486_v22 }
 0x2f7   :  { %11766 = vmatprep.subr.bf16.mxu0 %v18484_v18 }
 0x2fa   :  { %11768 = vmatpush3.bf16.msra.mxu0 %v13830_v23 }
 0x327   :  { %v550_v56 = vpop.xlane.xlu0 %549 }
 0x328   :  { %v580_v37 = vmul.f32 0.03125, %v550_v56 }
 0x32a   :  { %v596_v45 = vadd.f32 1e-05, %v580_v37 }
 0x32b   :  { %v553_v49 = vpop.xlane.xlu0 %552 }
 0x32c   :  { %v581_v59 = vmul.f32 0.03125, %v553_v49 }
 0x32e   :  { %v597_v60 = vadd.f32 1e-05, %v581_v59 }
 0x32f   :  { %v556_v53 = vpop.xlane.xlu0 %555 }
 0x330   :  { %v582_v39 = vmul.f32 0.03125, %v556_v53  ;;  %12606 = vrsqrt.f32 %v597_v60 }
 0x331   :  { %12608 = vrsqrt.f32 %v596_v45 }
 0x332   :  { %v598_v0 = vadd.f32 1e-05, %v582_v39 }
 0x333   :  { %v559_v58 = vpop.xlane.xlu1 %558 }
 0x334   :  { %12610 = vrsqrt.f32 %v598_v0  ;;  %v583_v20 = vmul.f32 0.03125, %v559_v58 }
 0x336   :  { %v599_v1 = vadd.f32 1e-05, %v583_v20 }
 0x337   :  { %v562_v3 = vpop.xlane.xlu0 %561 }
 0x338   :  { %12612 = vrsqrt.f32 %v599_v1  ;;  %v584_v41 = vmul.f32 0.03125, %v562_v3 }
 0x33a   :  { %v600_v5 = vadd.f32 1e-05, %v584_v41  ;;  %v12607_v7 = vpop.eup %12606 }
 0x33b   :  { %v565_v23 = vpop.xlane.xlu1 %564  ;;  %v12609_v44 = vpop.eup %12608  ;;  %v629_v11 = vmul.f32 %v12607_v7, %v13841_v30 }
 0x33c   :  { %12614 = vrsqrt.f32 %v600_v5  ;;  %v585_v8 = vmul.f32 0.03125, %v565_v23  ;;  %v628_v14 = vmul.f32 %v12609_v44, %v13836_v26 }
 0x33d   :  { %v651_v2 = vmul.f32 %v13887_v51, %v629_v11 }
 0x33e   :  { %v12611_v9 = vpop.eup %12610  ;;  %v601_v62 = vadd.f32 1e-05, %v585_v8  ;;  %v650_v24 = vmul.f32 %v13887_v51, %v628_v14 }
 0x33f   :  { %v568_v12 = vpop.xlane.xlu0 %567  ;;  %v630_v15 = vmul.f32 %v12611_v9, %v13847_v40  ;;  %v673_v28 = vadd.f32 %v13894_v61, %v651_v2 }
 0x340   :  { %12616 = vrsqrt.f32 %v601_v62  ;;  %v586_v13 = vmul.f32 0.03125, %v568_v12  ;;  %v672_v29 = vadd.f32 %v13894_v61, %v650_v24 }
 0x341   :  { %v652_v30 = vmul.f32 %v13887_v51, %v630_v15  ;;  %v939_v6 = vsel %vm426_vm0, %v673_v28, 0.0 }
 0x342   :  { %v12613_v16 = vpop.eup %12612  ;;  %v602_v48 = vadd.f32 1e-05, %v586_v13  ;;  %v938_v31 = vsel %vm426_vm0, %v672_v29, 0.0 }
 0x343   :  { %v631_v17 = vmul.f32 %v12613_v16, %v13853_v46  ;;  %v571_v19 = vpop.xlane.xlu1 %570  ;;  %v674_v46 = vadd.f32 %v13894_v61, %v652_v30  ;;  %v940_v47 = vadd.f32 %v939_v6, %v938_v31 }
 0x344   :  { %12618 = vrsqrt.f32 %v602_v48  ;;  %v587_v21 = vmul.f32 0.03125, %v571_v19 }
 0x345   :  { %v653_v26 = vmul.f32 %v13887_v51, %v631_v17  ;;  %v941_v42 = vsel %vm426_vm0, %v674_v46, 0.0 }
 0x346   :  { %v12615_v25 = vpop.eup %12614  ;;  %v603_v27 = vadd.f32 1e-05, %v587_v21  ;;  %v942_v54 = vadd.f32 %v941_v42, %v940_v47 }
 0x347   :  { %v632_v40 = vmul.f32 %v12615_v25, %v13859_v52  ;;  %v675_v36 = vadd.f32 %v13894_v61, %v653_v26 }
 0x348   :  { %12620 = vrsqrt.f32 %v603_v27 }
 0x349   :  { %v654_v32 = vmul.f32 %v13887_v51, %v632_v40  ;;  %v943_v10 = vsel %vm426_vm0, %v675_v36, 0.0 }
 0x34a   :  { %v12617_v34 = vpop.eup %12616  ;;  %v944_v37 = vadd.f32 %v943_v10, %v942_v54 }
 0x34b   :  { %v633_v38 = vmul.f32 %v12617_v34, %v13865_v57  ;;  %v676_v52 = vadd.f32 %v13894_v61, %v654_v32 }
 0x34d   :  { %v655_v43 = vmul.f32 %v13887_v51, %v633_v38  ;;  %v945_v55 = vsel %vm426_vm0, %v676_v52, 0.0 }
 0x34e   :  { %v12619_v33 = vpop.eup %12618  ;;  %v946_v45 = vadd.f32 %v945_v55, %v944_v37 }
 0x34f   :  { %v677_v50 = vadd.f32 %v13894_v61, %v655_v43  ;;  %v634_v35 = vmul.f32 %v12619_v33, %v13871_v63 }
 0x351   :  { %v656_v57 = vmul.f32 %v13887_v51, %v634_v35  ;;  %v947_v49 = vsel %vm426_vm0, %v677_v50, 0.0 }
 0x352   :  { %v12621_v56 = vpop.eup %12620  ;;  %v948_v0 = vadd.f32 %v947_v49, %v946_v45 }
 0x353   :  { %v678_v59 = vadd.f32 %v13894_v61, %v656_v57  ;;  %v635_v60 = vmul.f32 %v12621_v56, %v13877_v4 }
 0x355   :  { %v949_v53 = vsel %vm426_vm0, %v678_v59, 0.0  ;;  %v657_v39 = vmul.f32 %v13887_v51, %v635_v60 }
 0x356   :  { %v950_v58 = vadd.f32 %v949_v53, %v948_v0 }
 0x357   :  { %v679_v63 = vadd.f32 %v13894_v61, %v657_v39 }
 0x359   :  { %v951_v20 = vsel %vm426_vm0, %v679_v63, 0.0 }
 0x35a   :  { %v952_v1 = vadd.f32 %v951_v20, %v950_v58 }
 0x35c   :  { %v953_v3 = vrot.slane %v952_v1, 4 }
 0x35e   :  { %v954_v41 = vadd.f32 %v953_v3, %v952_v1 }
 0x35f   :  { %v13961_v5 = vpop.trf.xlu0 }
 0x360   :  { %18656 = vst [vmem:[#allocation33_spill] sm:$0xff] %v13961_v5  ;;  %v1192_v4 = vsel %vm793_vm2, %v13961_v5, 0.0  ;;  %v955_v23 = vrot.slane %v954_v41, 2 }
 0x361   :  { %1193 = vadd.xlane.f32.xlu1 %v1192_v4 }
 0x362   :  { %v956_v7 = vadd.f32 %v955_v23, %v954_v41  ;;  %v238_v41 = vld [vmem:[%s13518_s25] sm:$0x1]  ;;  %s13484_s25 = smov 64  }
 0x363   :  { %v13965_v8 = vpop.trf.xlu0 }
 0x364   :  { %18657 = vst [vmem:[#allocation34_spill] sm:$0xff] %v13965_v8  ;;  %v1195_v51 = vsel %vm793_vm2, %v13965_v8, 0.0  ;;  %v957_v61 = vrot.slane %v956_v7, 1 }
 0x365   :  { %1196 = vadd.xlane.f32.xlu1 %v1195_v51  ;;  %v242_v51 = vld [vmem:[#allocation2 + $0x8] sm:$0xff] }
 0x366   :  { %v958_v44 = vadd.f32 %v957_v61, %v956_v7  ;;  %v245_v61 = vld [vmem:[#allocation2 + $0x20] sm:$0xff] }
 0x367   :  { %v13969_v9 = vpop.trf.xlu0 }
 0x368   :  { %18658 = vst [vmem:[#allocation35_spill] sm:$0xff] %v13969_v9  ;;  %v1198_v62 = vsel %vm793_vm2, %v13969_v9, 0.0  ;;  %v959_v11 = vmul.f32 0.015625, %v958_v44  ;;  %v14046_v44 = vpack.c.bf16 %v245_v61, %v242_v51 }
 0x369   :  { %1199 = vadd.xlane.f32.xlu1 %v1198_v62  ;;  %v241_v62 = vld [vmem:[#allocation2] sm:$0xff] }
 0x36a   :  { %10991 = vmatmul.mubr.msk.f32.vlgmr.msra.gmra.mrb[2].mxu0 %vm426_vm0, %v959_v11  ;;  %v244_v11 = vld [vmem:[#allocation2 + $0x18] sm:$0xff]  ;;  %11777 = vmatprep.subr.bf16.mxu0 %v14046_v44 }
 0x36b   :  { %v13974_v12 = vpop.trf.xlu0  ;;  %1556 = vmatprep.mubr.f32.mxu0 %v18486_v22  ;;  %11757 = vmatprep.subr.bf16.mxu1 %v14046_v44 }
 0x36c   :  { %18659 = vst [vmem:[#allocation36_spill] sm:$0xff] %v13974_v12  ;;  %v1201_v13 = vsel %vm793_vm2, %v13974_v12, 0.0 }
 0x36d   :  { %1202 = vadd.xlane.f32.xlu1 %v1201_v13  ;;  %v14048_v13 = vpack.c.bf16 %v244_v11, %v241_v62 }
 0x36f   :  { %v13979_v14 = vpop.trf.xlu0  ;;  %11779 = vmatpush1.bf16.msra.mxu0 %v14048_v13  ;;  %11759 = vmatpush1.bf16.msra.mxu1 %v14048_v13 }
 0x370   :  { %18660 = vst [vmem:[#allocation37_spill] sm:$0xff] %v13979_v14  ;;  %v1204_v15 = vsel %vm793_vm2, %v13979_v14, 0.0  ;;  %11760 = vmatprep.subr.bf16.mxu1 %v18484_v18 }
 0x371   :  { %1205 = vadd.xlane.f32.xlu1 %v1204_v15 }
 0x373   :  { %v13983_v16 = vpop.trf.xlu0 }
 0x374   :  { %18661 = vst [vmem:[#allocation38_spill] sm:$0xff] %v13983_v16  ;;  %v1207_v48 = vsel %vm793_vm2, %v13983_v16, 0.0 }
 0x375   :  { %1208 = vadd.xlane.f32.xlu1 %v1207_v48 }
 0x377   :  { %v13987_v2 = vpop.trf.xlu0 }
 0x378   :  { %18662 = vst [vmem:[#allocation39_spill] sm:$0xff] %v13987_v2  ;;  %v1210_v17 = vsel %vm793_vm2, %v13987_v2, 0.0 }
 0x379   :  { %1211 = vadd.xlane.f32.xlu1 %v1210_v17 }
 0x37b   :  { %v13991_v19 = vpop.trf.xlu0 }
 0x37c   :  { %18663 = vst [vmem:[#allocation40_spill] sm:$0xff] %v13991_v19  ;;  %v1213_v21 = vsel %vm793_vm2, %v13991_v19, 0.0 }
 0x37d   :  { %1214 = vadd.xlane.f32.xlu1 %v1213_v21 }
 0x3c8   :  { %v772_v24 = vpop.f32.mrb[0].mxu0 }
 0x3c9   :  { %v10974_v30 = vpop.f32.mrb[1].mxu0  ;;  %v14043_v23 = vadd.f32 %v772_v24, %v238_v41 }
 0x3ca   :  { %v10061_v30 = vld [vmem:[%s13498_s9 + $0x10] sm:$0xff] }
 0x3cb   :  { %v777_v15 = vsel %vm776_vm3, %v14043_v23, 0.0 }
 0x3ee   :  { %v1194_v25 = vpop.xlane.xlu1 %1193 }
 0x3ef   :  { %v1240_v27 = vmul.f32 0.0625, %v1194_v25  ;;  %v10062_v25 = vld [vmem:[%s13498_s9 + $0x18] sm:$0xff] }
 0x3f1   :  { %v13996_v28 = vsub.f32 %v13961_v5, %v1240_v27 }
 0x3f2   :  { %v1197_v26 = vpop.xlane.xlu1 %1196 }
 0x3f3   :  { %v1241_v40 = vmul.f32 0.0625, %v1197_v26  ;;  %v1272_v29 = vmul.f32 %v13996_v28, %v13996_v28 }
 0x3f5   :  { %v14001_v46 = vsub.f32 %v13965_v8, %v1241_v40  ;;  %v1288_v32 = vsel %vm793_vm2, %v1272_v29, 0.0  ;;  %v1401_v40 = vlaneseq }
 0x3f6   :  { %v1200_v34 = vpop.xlane.xlu1 %1199  ;;  %1289 = vadd.xlane.f32.xlu1 %v1288_v32 }
 0x3f7   :  { %v1242_v6 = vmul.f32 0.0625, %v1200_v34  ;;  %v1273_v36 = vmul.f32 %v14001_v46, %v14001_v46 }
 0x3f9   :  { %v14007_v38 = vsub.f32 %v13969_v9, %v1242_v6  ;;  %v1291_v31 = vsel %vm793_vm2, %v1273_v36, 0.0  ;;  %v14063_v6 = vshrl.u32 %v1401_v40, 7 }
 0x3fa   :  { %v1203_v42 = vpop.xlane.xlu1 %1202  ;;  %1292 = vadd.xlane.f32.xlu1 %v1291_v31 }
 0x3fb   :  { %v1243_v52 = vmul.f32 0.0625, %v1203_v42  ;;  %v1274_v43 = vmul.f32 %v14007_v38, %v14007_v38  ;;  %18665 = vst [vmem:[#allocation41_spill] sm:$0xff] %v14063_v6 }
 0x3fd   :  { %v14013_v33 = vsub.f32 %v13974_v12, %v1243_v52  ;;  %v1294_v47 = vsel %vm793_vm2, %v1274_v43, 0.0  ;;  %v14066_v52 = vsub.s32 0, %v14063_v6 }
 0x3fe   :  { %v1206_v10 = vpop.xlane.xlu1 %1205  ;;  %1295 = vadd.xlane.f32.xlu1 %v1294_v47  ;;  %v14069_v47 = vld [vmem:[%s13523_s29] sm:$0x1]  ;;  %s18950_s29 = sld [smem:[#allocation25_spill]] }
 0x3ff   :  { %v1244_v50 = vmul.f32 0.0625, %v1206_v10  ;;  %v1275_v35 = vmul.f32 %v14013_v33, %v14013_v33  ;;  %18666 = vst [vmem:[#allocation42_spill] sm:$0xff] %v14066_v52 }
 0x401   :  { %v14019_v54 = vsub.f32 %v13979_v14, %v1244_v50  ;;  %v1297_v55 = vsel %vm793_vm2, %v1275_v35, 0.0  ;;  %v14072_v35 = vld [vmem:[%s18664_s13] sm:$0x1] }
 0x402   :  { %v1209_v57 = vpop.xlane.xlu1 %1208  ;;  %1298 = vadd.xlane.f32.xlu1 %v1297_v55  ;;  %v14076_v55 = vrot.slane %v14069_v47, %v14066_v52 }
 0x403   :  { %v1245_v56 = vmul.f32 0.0625, %v1209_v57  ;;  %v1276_v37 = vmul.f32 %v14019_v54, %v14019_v54 }
 0x405   :  { %v14025_v49 = vsub.f32 %v13983_v16, %v1245_v56  ;;  %v1300_v59 = vsel %vm793_vm2, %v1276_v37, 0.0 }
 0x406   :  { %1301 = vadd.xlane.f32.xlu0 %v1300_v59  ;;  %v1212_v60 = vpop.xlane.xlu1 %1211 }
 0x407   :  { %v1246_v45 = vmul.f32 0.0625, %v1212_v60  ;;  %v1277_v53 = vmul.f32 %v14025_v49, %v14025_v49  ;;  %v14081_v60 = vrot.slane %v14072_v35, %v14066_v52 }
 0x409   :  { %v14031_v39 = vsub.f32 %v13987_v2, %v1246_v45  ;;  %v1303_v0 = vsel %vm793_vm2, %v1277_v53, 0.0 }
 0x40a   :  { %1304 = vadd.xlane.f32.xlu1 %v1303_v0  ;;  %v1215_v63 = vpop.xlane.xlu1 %1214 }
 0x40b   :  { %v1247_v58 = vmul.f32 0.0625, %v1215_v63  ;;  %v1278_v20 = vmul.f32 %v14031_v39, %v14031_v39 }
 0x40d   :  { %v14037_v1 = vsub.f32 %v13991_v19, %v1247_v58  ;;  %v1306_v3 = vsel %vm793_vm2, %v1278_v20, 0.0 }
 0x40e   :  { %1307 = vadd.xlane.f32.xlu1 %v1306_v3 }
 0x40f   :  { %v1279_v4 = vmul.f32 %v14037_v1, %v14037_v1 }
 0x411   :  { %v1309_v7 = vsel %vm793_vm2, %v1279_v4, 0.0 }
 0x412   :  { %1310 = vadd.xlane.f32.xlu1 %v1309_v7 }
 0x416   :  { %778 = vadd.xlane.f32.xlu1 %v777_v15 }
 0x43d   :  { %v1029_v48 = vpop.f32.mrb[2].mxu0 }
 0x43e   :  { %v14057_v17 = vadd.f32 %v1029_v48, %v238_v41  ;;  %v10992_v21 = vpop.f32.mrb[3].mxu0 }
 0x440   :  { %v1033_v24 = vsel %vm776_vm3, %v14057_v17, 0.0 }
 0x441   :  { %1034 = vadd.xlane.f32.xlu0 %v1033_v24 }
 0x449   :  { %394 = vxpose.xlu1.b32.start [1/2] (short) (narrow) %v10061_v30, 64 }
 0x44d   :  { %395 = vxpose.xlu1.b32.end [2/2] (short) (narrow) %v10062_v25, 64 }
 0x483   :  { %v1290_v27 = vpop.xlane.xlu1 %1289 }
 0x484   :  { %v1336_v26 = vmul.f32 0.0625, %v1290_v27 }
 0x486   :  { %v1352_v29 = vadd.f32 1e-05, %v1336_v26 }
 0x487   :  { %v1293_v32 = vpop.xlane.xlu1 %1292 }
 0x488   :  { %12622 = vrsqrt.f32 %v1352_v29  ;;  %v1337_v34 = vmul.f32 0.0625, %v1293_v32 }
 0x48a   :  { %v1353_v36 = vadd.f32 1e-05, %v1337_v34 }
 0x48b   :  { %v1296_v31 = vpop.xlane.xlu1 %1295 }
 0x48c   :  { %12624 = vrsqrt.f32 %v1353_v36  ;;  %v1338_v42 = vmul.f32 0.0625, %v1296_v31 }
 0x48e   :  { %v1354_v43 = vadd.f32 1e-05, %v1338_v42 }
 0x48f   :  { %v1299_v10 = vpop.xlane.xlu1 %1298 }
 0x490   :  { %12626 = vrsqrt.f32 %v1354_v43  ;;  %v1339_v50 = vmul.f32 0.0625, %v1299_v10 }
 0x492   :  { %v12623_v57 = vpop.eup %12622  ;;  %v1355_v56 = vadd.f32 1e-05, %v1339_v50 }
 0x493   :  { %v1384_v37 = vmul.f32 %v12623_v57, %v13996_v28  ;;  %v1302_v59 = vpop.xlane.xlu0 %1301 }
 0x494   :  { %12628 = vrsqrt.f32 %v1355_v56  ;;  %v1340_v45 = vmul.f32 0.0625, %v1302_v59 }
 0x495   :  { %v1406_v53 = vmul.f32 %v14076_v55, %v1384_v37 }
 0x496   :  { %v12625_v0 = vpop.eup %12624  ;;  %v1356_v63 = vadd.f32 1e-05, %v1340_v45 }
 0x497   :  { %v1305_v58 = vpop.xlane.xlu1 %1304  ;;  %v14085_v20 = vadd.f32 %v14081_v60, %v1406_v53  ;;  %v1385_v3 = vmul.f32 %v12625_v0, %v14001_v46 }
 0x498   :  { %12630 = vrsqrt.f32 %v1356_v63  ;;  %v1341_v41 = vmul.f32 0.0625, %v1305_v58 }
 0x499   :  { %10071 = vmatmul.mubr.msk.f32.vlgmr.msra.gmra.mrb[4].mxu0 %vm793_vm2, %v14085_v20  ;;  %v1407_v28 = vmul.f32 %v14076_v55, %v1385_v3 }
 0x49a   :  { %v12627_v4 = vpop.eup %12626  ;;  %v1357_v7 = vadd.f32 1e-05, %v1341_v41  ;;  %1562 = vmatprep.mubr.f32.mxu0 %v18486_v22 }
 0x49b   :  { %v1308_v51 = vpop.xlane.xlu1 %1307  ;;  %v14093_v61 = vadd.f32 %v14081_v60, %v1407_v28  ;;  %v1386_v62 = vmul.f32 %v12627_v4, %v14007_v38 }
 0x49c   :  { %12632 = vrsqrt.f32 %v1357_v7  ;;  %v1342_v11 = vmul.f32 0.0625, %v1308_v51 }
 0x49d   :  { %10072 = vmatmul.mubr.msk.f32.gmra.mrb[6].mxu0 %vm793_vm2, %v14093_v61  ;;  %v1408_v46 = vmul.f32 %v14076_v55, %v1386_v62 }
 0x49e   :  { %v12629_v15 = vpop.eup %12628  ;;  %v1358_v48 = vadd.f32 1e-05, %v1342_v11  ;;  %1568 = vmatprep.mubr.f32.mxu0 %v18486_v22 }
 0x49f   :  { %v1311_v21 = vpop.xlane.xlu1 %1310  ;;  %v14101_v24 = vadd.f32 %v14081_v60, %v1408_v46  ;;  %v1387_v30 = vmul.f32 %v12629_v15, %v14013_v33 }
 0x4a0   :  { %12634 = vrsqrt.f32 %v1358_v48  ;;  %v1343_v25 = vmul.f32 0.0625, %v1311_v21 }
 0x4a1   :  { %10073 = vmatmul.mubr.msk.f32.gmra.mrb[8].mxu0 %vm793_vm2, %v14101_v24  ;;  %v1409_v38 = vmul.f32 %v14076_v55, %v1387_v30 }
 0x4a2   :  { %v12631_v27 = vpop.eup %12630  ;;  %v1359_v26 = vadd.f32 1e-05, %v1343_v25  ;;  %1574 = vmatprep.mubr.f32.mxu0 %v18486_v22 }
 0x4a3   :  { %v779_v40 = vpop.xlane.xlu1 %778  ;;  %v14109_v29 = vadd.f32 %v14081_v60, %v1409_v38  ;;  %v1388_v32 = vmul.f32 %v12631_v27, %v14019_v54 }
 0x4a4   :  { %12636 = vrsqrt.f32 %v1359_v26  ;;  %v781_v34 = vmul.f32 0.0625, %v779_v40  ;;  %v243_v40 = vld [vmem:[#allocation2 + $0x10] sm:$0xff] }
 0x4a5   :  { %10074 = vmatmul.mubr.msk.f32.gmra.mrb[10].mxu0 %vm793_vm2, %v14109_v29  ;;  %v1410_v33 = vmul.f32 %v14076_v55, %v1388_v32  ;;  %v246_v32 = vld [vmem:[#allocation2 + $0x28] sm:$0xff] }
 0x4a6   :  { %v12633_v36 = vpop.eup %12632  ;;  %v782_v31 = vsub.f32 %v14043_v23, %v781_v34  ;;  %1580 = vmatprep.mubr.f32.mxu0 %v18486_v22 }
 0x4a7   :  { %v14118_v42 = vadd.f32 %v14081_v60, %v1410_v33  ;;  %v1389_v43 = vmul.f32 %v12633_v36, %v14025_v49  ;;  %v14181_v33 = vpack.c.bf16 %v246_v32, %v243_v40 }
 0x4a8   :  { %v783_v10 = vmul.f32 %v782_v31, %v782_v31 }
 0x4a9   :  { %10075 = vmatmul.mubr.msk.f32.gmra.mrb[12].mxu0 %vm793_vm2, %v14118_v42  ;;  %v1411_v54 = vmul.f32 %v14076_v55, %v1389_v43 }
 0x4aa   :  { %v12635_v50 = vpop.eup %12634  ;;  %v784_v57 = vsel %vm776_vm3, %v783_v10, 0.0  ;;  %1586 = vmatprep.mubr.f32.mxu0 %v18486_v22 }
 0x4ab   :  { %785 = vadd.xlane.f32.xlu1 %v784_v57  ;;  %v14127_v23 = vadd.f32 %v14081_v60, %v1411_v54  ;;  %v1390_v56 = vmul.f32 %v12635_v50, %v14031_v39 }
 0x4ad   :  { %10076 = vmatmul.mubr.msk.f32.gmra.mrb[14].mxu0 %vm793_vm2, %v14127_v23  ;;  %v1412_v49 = vmul.f32 %v14076_v55, %v1390_v56 }
 0x4ae   :  { %v12637_v37 = vpop.eup %12636  ;;  %1592 = vmatprep.mubr.f32.mxu0 %v18486_v22 }
 0x4af   :  { %v14135_v59 = vadd.f32 %v14081_v60, %v1412_v49  ;;  %v1391_v45 = vmul.f32 %v12637_v37, %v14037_v1 }
 0x4b1   :  { %10077 = vmatmul.mubr.msk.f32.gmra.mrb[16].mxu0 %vm793_vm2, %v14135_v59  ;;  %v1413_v53 = vmul.f32 %v14076_v55, %v1391_v45 }
 0x4b2   :  { %1598 = vmatprep.mubr.f32.mxu0 %v18486_v22 }
 0x4b3   :  { %v14143_v39 = vadd.f32 %v14081_v60, %v1413_v53 }
 0x4b5   :  { %10078 = vmatmul.mubr.msk.f32.gmra.mrb[18].mxu0 %vm793_vm2, %v14143_v39 }
 0x4b6   :  { %1604 = vmatprep.mubr.f32.mxu0 %v18486_v22 }
 0x4c9   :  { %v14148_v0 = vpop.trf.xlu1 }
 0x4ca   :  { %18667 = vst [vmem:[#allocation43_spill] sm:$0xff] %v14148_v0  ;;  %v1216_v1 = vsel %vm793_vm2, %v14148_v0, 0.0 }
 0x4cb   :  { %1217 = vadd.xlane.f32.xlu0 %v1216_v1 }
 0x4cd   :  { %v14152_v63 = vpop.trf.xlu1 }
 0x4ce   :  { %18668 = vst [vmem:[#allocation44_spill] sm:$0xff] %v14152_v63  ;;  %v1219_v58 = vsel %vm793_vm2, %v14152_v63, 0.0 }
 0x4cf   :  { %1220 = vadd.xlane.f32.xlu0 %v1219_v58 }
 0x4d1   :  { %v14156_v3 = vpop.trf.xlu1 }
 0x4d2   :  { %18669 = vst [vmem:[#allocation45_spill] sm:$0xff] %v14156_v3  ;;  %v1222_v41 = vsel %vm793_vm2, %v14156_v3, 0.0 }
 0x4d3   :  { %1223 = vadd.xlane.f32.xlu0 %v1222_v41 }
 0x4d5   :  { %v14160_v28 = vpop.trf.xlu1 }
 0x4d6   :  { %18670 = vst [vmem:[#allocation46_spill] sm:$0xff] %v14160_v28  ;;  %v1225_v4 = vsel %vm793_vm2, %v14160_v28, 0.0 }
 0x4d7   :  { %1226 = vadd.xlane.f32.xlu0 %v1225_v4 }
 0x4d9   :  { %v14164_v7 = vpop.trf.xlu1 }
 0x4da   :  { %18671 = vst [vmem:[#allocation47_spill] sm:$0xff] %v14164_v7  ;;  %v1228_v51 = vsel %vm793_vm2, %v14164_v7, 0.0 }
 0x4db   :  { %1229 = vadd.xlane.f32.xlu0 %v1228_v51 }
 0x4dd   :  { %v14168_v62 = vpop.trf.xlu1 }
 0x4de   :  { %18672 = vst [vmem:[#allocation48_spill] sm:$0xff] %v14168_v62  ;;  %v1231_v11 = vsel %vm793_vm2, %v14168_v62, 0.0 }
 0x4df   :  { %1232 = vadd.xlane.f32.xlu0 %v1231_v11 }
 0x4e1   :  { %v14172_v46 = vpop.trf.xlu1 }
 0x4e2   :  { %18673 = vst [vmem:[#allocation49_spill] sm:$0xff] %v14172_v46  ;;  %v1234_v15 = vsel %vm793_vm2, %v14172_v46, 0.0 }
 0x4e3   :  { %1235 = vadd.xlane.f32.xlu0 %v1234_v15 }
 0x4e5   :  { %v14176_v48 = vpop.trf.xlu1 }
 0x4e6   :  { %18674 = vst [vmem:[#allocation50_spill] sm:$0xff] %v14176_v48  ;;  %v1237_v21 = vsel %vm793_vm2, %v14176_v48, 0.0 }
 0x4e7   :  { %1238 = vadd.xlane.f32.xlu0 %v1237_v21 }
 0x538   :  { %v786_v30 = vpop.xlane.xlu1 %785 }
 0x539   :  { %v787_v25 = vmul.f32 0.0625, %v786_v30 }
 0x53b   :  { %v788_v38 = vadd.f32 1e-05, %v787_v25 }
 0x53d   :  { %12638 = vrsqrt.f32 %v788_v38 }
 0x547   :  { %v12639_v27 = vpop.eup %12638 }
 0x548   :  { %v790_v26 = vmul.f32 %v12639_v27, %v782_v31  ;;  %v14192_v31 = vpop.xlane.xlu0 %1034 }
 0x54a   :  { %v791_v34 = vmul.f32 %v790_v26, %v14069_v47 }
 0x54c   :  { %v792_v36 = vadd.f32 %v791_v34, %v14072_v35 }
 0x54e   :  { %10066 = vmatmul.mubr.msk.f32.vlgmr.msra.gmra.mrb[0].mxu1 %vm793_vm2, %v792_v36 }
 0x54f   :  { %11762 = vmatpush3.bf16.msra.mxu1 %v14181_v33  ;;  %10979 = vmatprep.mubr.msk.f32.mxu1 %vm13480_vm1, %v18486_v22 }
 0x550   :  { %11770 = vmatprep.subr.bf16.mxu1 %v14046_v44 }
 0x552   :  { %10980 = vmatmul.mubr.msk.f32.vlgmr.msra.gmra.mrb[2].mxu1 %vm793_vm2, %v792_v36 }
 0x553   :  { %11772 = vmatpush1.bf16.msra.mxu1 %v14048_v13  ;;  %1115 = vmatprep.mubr.f32.mxu1 %v18486_v22 }
 0x554   :  { %11773 = vmatprep.subr.bf16.mxu1 %v18484_v18 }
 0x558   :  { %v1218_v43 = vpop.xlane.xlu0 %1217 }
 0x559   :  { %v1248_v10 = vmul.f32 0.0625, %v1218_v43 }
 0x55b   :  { %v14196_v54 = vsub.f32 %v14148_v0, %v1248_v10 }
 0x55c   :  { %v1221_v50 = vpop.xlane.xlu0 %1220 }
 0x55d   :  { %v1249_v57 = vmul.f32 0.0625, %v1221_v50  ;;  %v1280_v44 = vmul.f32 %v14196_v54, %v14196_v54 }
 0x55f   :  { %v14201_v56 = vsub.f32 %v14152_v63, %v1249_v57  ;;  %v1312_v13 = vsel %vm793_vm2, %v1280_v44, 0.0 }
 0x560   :  { %1313 = vadd.xlane.f32.xlu0 %v1312_v13  ;;  %v1224_v49 = vpop.xlane.xlu0 %1223 }
 0x561   :  { %v1250_v37 = vmul.f32 0.0625, %v1224_v49  ;;  %v1281_v45 = vmul.f32 %v14201_v56, %v14201_v56 }
 0x563   :  { %v14207_v53 = vsub.f32 %v14156_v3, %v1250_v37  ;;  %v1315_v1 = vsel %vm793_vm2, %v1281_v45, 0.0  ;;  %v253_v37 = vld [vmem:[#allocation4 + $0x20] sm:$0xff] }
 0x564   :  { %1316 = vadd.xlane.f32.xlu0 %v1315_v1  ;;  %v1227_v58 = vpop.xlane.xlu0 %1226 }
 0x565   :  { %v1251_v41 = vmul.f32 0.0625, %v1227_v58  ;;  %v1282_v4 = vmul.f32 %v14207_v53, %v14207_v53 }
 0x567   :  { %v14213_v51 = vsub.f32 %v14160_v28, %v1251_v41  ;;  %v1318_v11 = vsel %vm793_vm2, %v1282_v4, 0.0 }
 0x568   :  { %1319 = vadd.xlane.f32.xlu0 %v1318_v11  ;;  %v1230_v15 = vpop.xlane.xlu0 %1229 }
 0x569   :  { %v1252_v21 = vmul.f32 0.0625, %v1230_v15  ;;  %v1283_v30 = vmul.f32 %v14213_v51, %v14213_v51 }
 0x56b   :  { %v14219_v25 = vsub.f32 %v14164_v7, %v1252_v21  ;;  %v1321_v38 = vsel %vm793_vm2, %v1283_v30, 0.0 }
 0x56c   :  { %1322 = vadd.xlane.f32.xlu0 %v1321_v38  ;;  %v1233_v27 = vpop.xlane.xlu0 %1232  ;;  %v1558_v26 = vpop.f32.mrb[4].mxu0 }
 0x56d   :  { %v1253_v40 = vmul.f32 0.0625, %v1233_v27  ;;  %v1560_v32 = vpop.f32.mrb[5].mxu0  ;;  %v1284_v34 = vmul.f32 %v14219_v25, %v14219_v25 }
 0x56f   :  { %v14225_v36 = vsub.f32 %v14168_v62, %v1253_v40  ;;  %v1324_v43 = vsel %vm793_vm2, %v1284_v34, 0.0 }
 0x570   :  { %1325 = vadd.xlane.f32.xlu0 %v1324_v43  ;;  %v1236_v10 = vpop.xlane.xlu0 %1235  ;;  %v1564_v50 = vpop.f32.mrb[6].mxu0 }
 0x571   :  { %v1254_v57 = vmul.f32 0.0625, %v1236_v10  ;;  %v12390_v44 = vpack.i.bf16 %v1564_v50, %v1558_v26  ;;  %v1566_v13 = vpop.f32.mrb[7].mxu0  ;;  %v1285_v49 = vmul.f32 %v14225_v36, %v14225_v36 }
 0x572   :  { %v14236_v45 = vpack.i.bf16 %v1566_v13, %v1560_v32  ;;  %v11824_v1 = vpack.c.bf16 %v1566_v13, %v1560_v32 }
 0x573   :  { %v14239_v58 = vsub.f32 %v14172_v46, %v1254_v57  ;;  %v1327_v41 = vsel %vm793_vm2, %v1285_v49, 0.0 }
 0x574   :  { %1328 = vadd.xlane.f32.xlu0 %v1327_v41  ;;  %v1239_v4 = vpop.xlane.xlu0 %1238  ;;  %v1570_v11 = vpop.f32.mrb[8].mxu0  ;;  %11826 = vmatprep.subr.msk.bf16.mxu0 %vm14232_vm4, %v11824_v1 }
 0x575   :  { %v1255_v15 = vmul.f32 0.0625, %v1239_v4  ;;  %v1572_v21 = vpop.f32.mrb[9].mxu0  ;;  %11829 = vmatpush3.bf16.xpose.msk.msra.mxu0 %vm14232_vm4, %v11824_v1  ;;  %v1286_v30 = vmul.f32 %v14239_v58, %v14239_v58 }
 0x577   :  { %v14249_v38 = vsub.f32 %v14176_v48, %v1255_v15  ;;  %v1330_v27 = vsel %vm793_vm2, %v1286_v30, 0.0 }
 0x578   :  { %1331 = vadd.xlane.f32.xlu0 %v1330_v27  ;;  %v1576_v40 = vpop.f32.mrb[10].mxu0 }
 0x579   :  { %v12395_v32 = vpack.i.bf16 %v1576_v40, %v1570_v11  ;;  %v1578_v34 = vpop.f32.mrb[11].mxu0  ;;  %v1287_v43 = vmul.f32 %v14249_v38, %v14249_v38 }
 0x57a   :  { %v12455_v10 = vpack.i.bf16 %v1578_v34, %v1572_v21  ;;  %v11830_v57 = vpack.c.bf16 %v1578_v34, %v1572_v21 }
 0x57b   :  { %v1333_v13 = vsel %vm793_vm2, %v1287_v43, 0.0 }
 0x57c   :  { %1334 = vadd.xlane.f32.xlu1 %v1333_v13  ;;  %v1582_v49 = vpop.f32.mrb[12].mxu0  ;;  %11832 = vmatprep.subr.msk.bf16.mxu0 %vm14232_vm4, %v11830_v57 }
 0x57d   :  { %v1584_v1 = vpop.f32.mrb[13].mxu0  ;;  %11835 = vmatpush3.bf16.xpose.msk.msra.mxu0 %vm14232_vm4, %v11830_v57  ;;  %v14271_v57 = vmul.f32 0.17677669, %v1558_v26  ;;  %v14287_v26 = vmul.f32 0.17677669, %v1582_v49 }
 0x580   :  { %v1588_v41 = vpop.f32.mrb[14].mxu0 }
 0x581   :  { %v12400_v4 = vpack.i.bf16 %v1588_v41, %v1582_v49  ;;  %v1590_v15 = vpop.f32.mrb[15].mxu0 }
 0x582   :  { %v12460_v30 = vpack.i.bf16 %v1590_v15, %v1584_v1  ;;  %v11836_v27 = vpack.c.bf16 %v1590_v15, %v1584_v1  ;;  %v14273_v1 = vmul.f32 0.17677669, %v1564_v50  ;;  %v14289_v50 = vmul.f32 0.17677669, %v1588_v41 }
 0x584   :  { %v1594_v18 = vpop.f32.mrb[16].mxu0  ;;  %11838 = vmatprep.subr.msk.bf16.mxu0 %vm14232_vm4, %v11836_v27 }
 0x585   :  { %v1596_v21 = vpop.f32.mrb[17].mxu0  ;;  %11841 = vmatpush3.bf16.xpose.msk.msra.mxu0 %vm14232_vm4, %v11836_v27 }
 0x588   :  { %v1600_v34 = vpop.f32.mrb[18].mxu0 }
 0x589   :  { %v12405_v43 = vpack.i.bf16 %v1600_v34, %v1594_v18  ;;  %v1602_v13 = vpop.f32.mrb[19].mxu0 }
 0x58a   :  { %v12465_v22 = vpack.i.bf16 %v1602_v13, %v1596_v21  ;;  %v11842_v6 = vpack.c.bf16 %v1602_v13, %v1596_v21 }
 0x58c   :  { %11844 = vmatprep.subr.msk.bf16.mxu0 %vm14232_vm4, %v11842_v6 }
 0x58d   :  { %12396 = vrot.lane.b32.xlu1 %v12395_v32, %s13482_s17  ;;  %11847 = vmatpush3.bf16.xpose.msk.msra.mxu0 %vm14232_vm4, %v11842_v6  ;;  %v14279_v32 = vmul.f32 0.17677669, %v1570_v11  ;;  %v14281_v6 = vmul.f32 0.17677669, %v1576_v40  ;;  %v14297_v11 = vmul.f32 0.17677669, %v1600_v34 }
 0x58e   :  { %12391 = vrot.lane.b32.xlu0 %v12390_v44, %s13482_s17  ;;  %v14295_v44 = vmul.f32 0.17677669, %v1594_v18  ;;  %v1036_v18 = vmul.f32 0.0625, %v14192_v31 }
 0x590   :  { %v14317_v40 = vsub.f32 %v14057_v17, %v1036_v18 }
 0x591   :  { %12401 = vrot.lane.b32.xlu1 %v12400_v4, %s13482_s17 }
 0x592   :  { %12406 = vrot.lane.b32.xlu0 %v12405_v43, %s13482_s17  ;;  %v1038_v49 = vmul.f32 %v14317_v40, %v14317_v40 }
 0x594   :  { %v1039_v41 = vsel %vm776_vm3, %v1038_v49, 0.0 }
 0x595   :  { %2349 = vrot.lane.b32.xlu1 %v14271_v57, %s13483_s21 }
 0x596   :  { %2351 = vrot.lane.b32.xlu0 %v14273_v1, %s13483_s21 }
 0x599   :  { %2353 = vrot.lane.b32.xlu1 %v14279_v32, %s13483_s21 }
 0x59a   :  { %2355 = vrot.lane.b32.xlu0 %v14281_v6, %s13483_s21 }
 0x59d   :  { %2357 = vrot.lane.b32.xlu1 %v14287_v26, %s13483_s21 }
 0x59e   :  { %2359 = vrot.lane.b32.xlu0 %v14289_v50, %s13483_s21 }
 0x5a1   :  { %2361 = vrot.lane.b32.xlu1 %v14295_v44, %s13483_s21 }
 0x5a2   :  { %2363 = vrot.lane.b32.xlu0 %v14297_v11, %s13483_s21 }
 0x5a5   :  { %12416 = vrot.lane.b32.xlu1 %v12455_v10, %s13484_s25 }
 0x5a6   :  { %12411 = vrot.lane.b32.xlu0 %v14236_v45, %s13484_s25 }
 0x5a9   :  { %12426 = vrot.lane.b32.xlu1 %v12465_v22, %s13484_s25 }
 0x5aa   :  { %12421 = vrot.lane.b32.xlu0 %v12460_v30, %s13484_s25 }
 0x5ad   :  { %12431 = vrot.lane.b32.xlu1 %v14236_v45, %s13482_s17 }
 0x5b1   :  { %12436 = vrot.lane.b32.xlu1 %v12455_v10, %s13482_s17 }
 0x5b5   :  { %12446 = vrot.lane.b32.xlu1 %v12465_v22, %s13482_s17 }
 0x5b9   :  { %12456 = vrot.lane.b32.xlu1 %v12455_v10, %s13483_s21 }
 0x5bd   :  { %3153 = vrot.lane.b32.xlu1 %v14279_v32, %s13484_s25 }
 0x5c1   :  { %3157 = vrot.lane.b32.xlu1 %v14287_v26, %s13484_s25 }
 0x5c5   :  { %3161 = vrot.lane.b32.xlu1 %v14295_v44, %s13484_s25 }
 0x5c9   :  { %1040 = vadd.xlane.f32.xlu0 %v1039_v41 }
 0x5df   :  { %12441 = vrot.lane.b32.xlu0 %v12460_v30, %s13482_s17 }
 0x5e3   :  { %12451 = vrot.lane.b32.xlu0 %v14236_v45, %s13483_s21 }
 0x5e7   :  { %12461 = vrot.lane.b32.xlu0 %v12460_v30, %s13483_s21 }
 0x5eb   :  { %12466 = vrot.lane.b32.xlu0 %v12465_v22, %s13483_s21 }
 0x5ed   :  { %v1314_v17 = vpop.xlane.xlu0 %1313 }
 0x5ee   :  { %v1344_v31 = vmul.f32 0.0625, %v1314_v17 }
 0x5ef   :  { %3149 = vrot.lane.b32.xlu0 %v14271_v57, %s13484_s25 }
 0x5f0   :  { %v1360_v10 = vadd.f32 1e-05, %v1344_v31 }
 0x5f1   :  { %v1317_v4 = vpop.xlane.xlu0 %1316 }
 0x5f2   :  { %12640 = vrsqrt.f32 %v1360_v10  ;;  %v1345_v15 = vmul.f32 0.0625, %v1317_v4 }
 0x5f3   :  { %3151 = vrot.lane.b32.xlu0 %v14273_v1, %s13484_s25 }
 0x5f4   :  { %v1361_v27 = vadd.f32 1e-05, %v1345_v15 }
 0x5f5   :  { %v1320_v21 = vpop.xlane.xlu0 %1319 }
 0x5f6   :  { %12642 = vrsqrt.f32 %v1361_v27  ;;  %v1346_v45 = vmul.f32 0.0625, %v1320_v21 }
 0x5f7   :  { %3155 = vrot.lane.b32.xlu0 %v14281_v6, %s13484_s25 }
 0x5f8   :  { %v1362_v22 = vadd.f32 1e-05, %v1346_v45 }
 0x5f9   :  { %v1323_v30 = vpop.xlane.xlu0 %1322 }
 0x5fa   :  { %12644 = vrsqrt.f32 %v1362_v22  ;;  %v1347_v34 = vmul.f32 0.0625, %v1323_v30  ;;  %v18677_v30 = vmov 0.0  }
 0x5fb   :  { %3159 = vrot.lane.b32.xlu0 %v14289_v50, %s13484_s25 }
 0x5fc   :  { %v12641_v43 = vpop.eup %12640  ;;  %v1363_v13 = vadd.f32 1e-05, %v1347_v34 }
 0x5fd   :  { %v1326_v18 = vpop.xlane.xlu0 %1325  ;;  %v1392_v49 = vmul.f32 %v12641_v43, %v14196_v54 }
 0x5fe   :  { %12646 = vrsqrt.f32 %v1363_v13  ;;  %v1348_v41 = vmul.f32 0.0625, %v1326_v18 }
 0x5ff   :  { %3163 = vrot.lane.b32.xlu0 %v14297_v11, %s13484_s25  ;;  %v1414_v17 = vmul.f32 %v14076_v55, %v1392_v49 }
 0x600   :  { %v12643_v31 = vpop.eup %12642  ;;  %v1364_v10 = vadd.f32 1e-05, %v1348_v41 }
 0x601   :  { %v1329_v4 = vpop.xlane.xlu0 %1328  ;;  %v14344_v15 = vadd.f32 %v14081_v60, %v1414_v17  ;;  %v1393_v27 = vmul.f32 %v12643_v31, %v14201_v56 }
 0x602   :  { %12648 = vrsqrt.f32 %v1364_v10  ;;  %v1349_v21 = vmul.f32 0.0625, %v1329_v4 }
 0x603   :  { %10079 = vmatmul.mubr.msk.f32.gmra.mrb[20].mxu0 %vm793_vm2, %v14344_v15  ;;  %v1415_v54 = vmul.f32 %v14076_v55, %v1393_v27 }
 0x604   :  { %v12645_v45 = vpop.eup %12644  ;;  %v1365_v22 = vadd.f32 1e-05, %v1349_v21  ;;  %1610 = vmatprep.mubr.f32.mxu0 %v18677_v30 }
 0x605   :  { %v1332_v34 = vpop.xlane.xlu0 %1331  ;;  %v14352_v43 = vadd.f32 %v14081_v60, %v1415_v54  ;;  %v1394_v13 = vmul.f32 %v12645_v45, %v14207_v53 }
 0x606   :  { %12650 = vrsqrt.f32 %v1365_v22  ;;  %v1350_v18 = vmul.f32 0.0625, %v1332_v34 }
 0x607   :  { %10080 = vmatmul.mubr.msk.f32.gmra.mrb[22].mxu0 %vm793_vm2, %v14352_v43  ;;  %v1416_v56 = vmul.f32 %v14076_v55, %v1394_v13 }
 0x608   :  { %v12647_v49 = vpop.eup %12646  ;;  %v1366_v41 = vadd.f32 1e-05, %v1350_v18  ;;  %1616 = vmatprep.mubr.f32.mxu0 %v18677_v30 }
 0x609   :  { %v1335_v17 = vpop.xlane.xlu1 %1334  ;;  %v14360_v31 = vadd.f32 %v14081_v60, %v1416_v56  ;;  %v1395_v10 = vmul.f32 %v12647_v49, %v14213_v51  ;;  %v12392_v13 = vpop.permute.xlu0 %12391 }
 0x60a   :  { %12652 = vrsqrt.f32 %v1366_v41  ;;  %v1351_v4 = vmul.f32 0.0625, %v1335_v17  ;;  %v12393_v28 = vunpack.i.l.bf16 %v12392_v13 }
 0x60b   :  { %10081 = vmatmul.mubr.msk.f32.gmra.mrb[24].mxu0 %vm793_vm2, %v14360_v31  ;;  %v1417_v53 = vmul.f32 %v14076_v55, %v1395_v10 }
 0x60c   :  { %v12649_v27 = vpop.eup %12648  ;;  %v1367_v21 = vadd.f32 1e-05, %v1351_v4  ;;  %1622 = vmatprep.mubr.f32.mxu0 %v18677_v30 }
 0x60d   :  { %v14367_v54 = vpop.permute.xlu1 %12396  ;;  %v14370_v45 = vadd.f32 %v14081_v60, %v1417_v53  ;;  %v1396_v22 = vmul.f32 %v12649_v27, %v14219_v25  ;;  %v14391_v4 = vpop.permute.xlu0 %12406 }
 0x60e   :  { %12654 = vrsqrt.f32 %v1367_v21 }
 0x60f   :  { %10082 = vmatmul.mubr.msk.f32.gmra.mrb[26].mxu0 %vm793_vm2, %v14370_v45  ;;  %v1418_v51 = vmul.f32 %v14076_v55, %v1396_v22 }
 0x610   :  { %v12651_v34 = vpop.eup %12650  ;;  %1628 = vmatprep.mubr.f32.mxu0 %v18677_v30 }
 0x611   :  { %v14378_v18 = vadd.f32 %v14081_v60, %v1418_v51  ;;  %v1397_v56 = vmul.f32 %v12651_v34, %v14225_v36  ;;  %v14381_v49 = vpop.permute.xlu1 %12401  ;;  %v2352_v51 = vpop.permute.xlu0 %2351 }
 0x613   :  { %10083 = vmatmul.mubr.msk.f32.gmra.mrb[28].mxu0 %vm793_vm2, %v14378_v18  ;;  %v1419_v25 = vmul.f32 %v14076_v55, %v1397_v56 }
 0x614   :  { %v12653_v41 = vpop.eup %12652  ;;  %1634 = vmatprep.mubr.f32.mxu0 %v18677_v30 }
 0x615   :  { %v14388_v17 = vadd.f32 %v14081_v60, %v1419_v25  ;;  %v1398_v10 = vmul.f32 %v12653_v41, %v14239_v58  ;;  %v2350_v27 = vpop.permute.xlu1 %2349 }
 0x617   :  { %10084 = vmatmul.mubr.msk.f32.gmra.mrb[30].mxu0 %vm793_vm2, %v14388_v17  ;;  %v1420_v36 = vmul.f32 %v14076_v55, %v1398_v10 }
 0x618   :  { %v12655_v53 = vpop.eup %12654  ;;  %1640 = vmatprep.mubr.f32.mxu0 %v18677_v30 }
 0x619   :  { %v14398_v21 = vadd.f32 %v14081_v60, %v1420_v36  ;;  %v1399_v22 = vmul.f32 %v12655_v53, %v14249_v38  ;;  %v2354_v56 = vpop.permute.xlu1 %2353  ;;  %v2356_v38 = vpop.permute.xlu0 %2355 }
 0x61b   :  { %10085 = vmatmul.mubr.msk.f32.gmra.mrb[32].mxu0 %vm793_vm2, %v14398_v21  ;;  %v1421_v58 = vmul.f32 %v14076_v55, %v1399_v22 }
 0x61c   :  { %1646 = vmatprep.mubr.f32.mxu0 %v18677_v30 }
 0x61d   :  { %v14406_v34 = vadd.f32 %v14081_v60, %v1421_v58  ;;  %v2358_v55 = vpop.permute.xlu1 %2357  ;;  %v2360_v36 = vpop.permute.xlu0 %2359 }
 0x61f   :  { %10086 = vmatmul.mubr.msk.f32.gmra.mrb[34].mxu0 %vm793_vm2, %v14406_v34 }
 0x620   :  { %11100 = vmatprep.mubr.msk.f32.mxu0 %vm426_vm0, %v2350_v27 }
 0x621   :  { %v14411_v25 = vpop.f32.mrb[0].mxu1  ;;  %v2362_v53 = vpop.permute.xlu1 %2361 }
 0x622   :  { %v14413_v41 = vpop.f32.mrb[1].mxu1  ;;  %v2364_v27 = vpop.permute.xlu0 %2363 }
 0x623   :  { %11101 = vmatmul.mubr.msk.f32.vlgmr.msra.gmra.mrb[36].mxu0 %vm426_vm0, %v2352_v51 }
 0x624   :  { %11103 = vmatprep.mubr.msk.f32.mxu0 %vm426_vm0, %v2354_v56 }
 0x625   :  { %v14417_v10 = vpop.f32.mrb[2].mxu1 }
 0x626   :  { %18678 = vst [vmem:[#allocation51_spill] sm:$0xff] %v14417_v10  ;;  %v10981_v60 = vpop.f32.mrb[3].mxu1  ;;  %v12412_v22 = vpop.permute.xlu0 %12411 }
 0x627   :  { %11104 = vmatmul.mubr.msk.f32.gmra.mrb[38].mxu0 %vm426_vm0, %v2356_v38 }
 0x628   :  { %11106 = vmatprep.mubr.msk.f32.mxu0 %vm426_vm0, %v2358_v55 }
 0x62a   :  { %v14424_v58 = vpop.permute.xlu0 %12421 }
 0x62b   :  { %11107 = vmatmul.mubr.msk.f32.gmra.mrb[40].mxu0 %vm426_vm0, %v2360_v36  ;;  %v12394_v36 = vunpack.i.h.bf16 %v12392_v13 }
 0x62c   :  { %11109 = vmatprep.mubr.msk.f32.mxu0 %vm426_vm0, %v2362_v53 }
 0x62d   :  { %v11784_v53 = vpack.c.bf16 %v12394_v36, %v12393_v28 }
 0x62f   :  { %11110 = vmatmul.mubr.msk.f32.gmra.mrb[42].mxu0 %vm426_vm0, %v2364_v27 }
 0x656   :  { %v1041_v51 = vpop.xlane.xlu0 %1040 }
 0x657   :  { %v1042_v56 = vmul.f32 0.0625, %v1041_v51 }
 0x659   :  { %v1043_v48 = vadd.f32 1e-05, %v1042_v56 }
 0x65b   :  { %12656 = vrsqrt.f32 %v1043_v48  ;;  %v12417_v48 = vpop.permute.xlu1 %12416 }
 0x665   :  { %v12657_v60 = vpop.eup %12656 }
 0x666   :  { %v1045_v38 = vmul.f32 %v12657_v60, %v14317_v40  ;;  %v12418_v40 = vunpack.i.l.bf16 %v12417_v48 }
 0x668   :  { %v1046_v55 = vmul.f32 %v1045_v38, %v14069_v47  ;;  %v12399_v47 = vunpack.i.h.bf16 %v14367_v54 }
 0x66a   :  { %v1047_v62 = vadd.f32 %v1046_v55, %v14072_v35  ;;  %v12398_v35 = vunpack.i.l.bf16 %v14367_v54 }
 0x66c   :  { %10069 = vmatmul.mubr.msk.f32.vlgmr.msra.gmra.mrb[4].mxu1 %vm793_vm2, %v1047_v62  ;;  %v11790_v28 = vpack.c.bf16 %v12399_v47, %v12398_v35 }
 0x66d   :  { %11775 = vmatpush3.bf16.msra.mxu1 %v14181_v33  ;;  %10997 = vmatprep.mubr.msk.f32.mxu1 %vm13480_vm1, %v18677_v30 }
 0x66e   :  { %11781 = vmatprep.subr.bf16.mxu1 %v14181_v33 }
 0x670   :  { %10998 = vmatmul.mubr.msk.f32.vlgmr.msra.gmra.mrb[6].mxu1 %vm793_vm2, %v1047_v62 }
 0x671   :  { %11783 = vmatpush3.bf16.msra.mxu1 %v14181_v33  ;;  %11004 = vmatprep.mubr.msk.f32.mxu1 %vm793_vm2, %v14085_v20  ;;  %v12404_v20 = vunpack.i.h.bf16 %v14381_v49  ;;  %v12419_v33 = vunpack.i.h.bf16 %v12417_v48 }
 0x672   :  { %11786 = vmatprep.subr.msk.bf16.mxu1 %vm14232_vm4, %v11784_v53 }
 0x673   :  { %v11812_v54 = vpack.c.bf16 %v12419_v33, %v12418_v40 }
 0x674   :  { %11005 = vmatmul.mubr.msk.f32.vlgmr.msra.gmra.mrb[8].mxu1 %vm793_vm2, %v14093_v61  ;;  %v12403_v61 = vunpack.i.l.bf16 %v14381_v49 }
 0x675   :  { %11007 = vmatprep.mubr.msk.f32.mxu1 %vm793_vm2, %v14101_v24 }
 0x676   :  { %v11796_v24 = vpack.c.bf16 %v12404_v20, %v12403_v61 }
 0x678   :  { %11008 = vmatmul.mubr.msk.f32.gmra.mrb[10].mxu1 %vm793_vm2, %v14109_v29  ;;  %v12409_v29 = vunpack.i.h.bf16 %v14391_v4 }
 0x679   :  { %11010 = vmatprep.mubr.msk.f32.mxu1 %vm793_vm2, %v14118_v42  ;;  %v12408_v42 = vunpack.i.l.bf16 %v14391_v4 }
 0x67a   :  { %11789 = vmatpush3.bf16.xpose.msk.msra.mxu1 %vm14232_vm4, %v11784_v53 }
 0x67b   :  { %11792 = vmatprep.subr.msk.bf16.mxu1 %vm14232_vm4, %v11790_v28 }
 0x67c   :  { %11011 = vmatmul.mubr.msk.f32.gmra.mrb[12].mxu1 %vm793_vm2, %v14127_v23  ;;  %v11802_v23 = vpack.c.bf16 %v12409_v29, %v12408_v42 }
 0x67d   :  { %11013 = vmatprep.mubr.msk.f32.mxu1 %vm793_vm2, %v14135_v59  ;;  %v12414_v59 = vunpack.i.h.bf16 %v12412_v22 }
 0x680   :  { %11014 = vmatmul.mubr.msk.f32.gmra.mrb[14].mxu1 %vm793_vm2, %v14143_v39  ;;  %v12413_v39 = vunpack.i.l.bf16 %v12412_v22 }
 0x681   :  { %11016 = vmatprep.mubr.msk.f32.mxu1 %vm793_vm2, %v14344_v15  ;;  %v12427_v15 = vpop.permute.xlu1 %12426 }
 0x682   :  { %11795 = vmatpush3.bf16.xpose.msk.msra.mxu1 %vm14232_vm4, %v11790_v28  ;;  %v11808_v62 = vpack.c.bf16 %v12414_v59, %v12413_v39  ;;  %v12428_v13 = vunpack.i.l.bf16 %v12427_v15 }
 0x683   :  { %11798 = vmatprep.subr.msk.bf16.mxu1 %vm14232_vm4, %v11796_v24 }
 0x684   :  { %11017 = vmatmul.mubr.msk.f32.gmra.mrb[16].mxu1 %vm793_vm2, %v14352_v43  ;;  %v12424_v43 = vunpack.i.h.bf16 %v14424_v58 }
 0x685   :  { %11019 = vmatprep.mubr.msk.f32.mxu1 %vm793_vm2, %v14360_v31  ;;  %v12423_v31 = vunpack.i.l.bf16 %v14424_v58  ;;  %v12432_v49 = vpop.permute.xlu1 %12431 }
 0x686   :  { %v12433_v4 = vunpack.i.l.bf16 %v12432_v49 }
 0x688   :  { %11020 = vmatmul.mubr.msk.f32.gmra.mrb[18].mxu1 %vm793_vm2, %v14370_v45  ;;  %v12429_v45 = vunpack.i.h.bf16 %v12427_v15 }
 0x689   :  { %11022 = vmatprep.mubr.msk.f32.mxu1 %vm793_vm2, %v14378_v18  ;;  %v11816_v18 = vpack.c.bf16 %v12424_v43, %v12423_v31  ;;  %v14639_v12 = vpop.permute.xlu1 %12436 }
 0x68a   :  { %11801 = vmatpush3.bf16.xpose.msk.msra.mxu1 %vm14232_vm4, %v11796_v24 }
 0x68b   :  { %11804 = vmatprep.subr.msk.bf16.mxu1 %vm14232_vm4, %v11802_v23 }
 0x68c   :  { %11023 = vmatmul.mubr.msk.f32.gmra.mrb[20].mxu1 %vm793_vm2, %v14388_v17  ;;  %v12434_v17 = vunpack.i.h.bf16 %v12432_v49 }
 0x68d   :  { %11025 = vmatprep.mubr.msk.f32.mxu1 %vm793_vm2, %v14398_v21  ;;  %v11820_v21 = vpack.c.bf16 %v12429_v45, %v12428_v13 }
 0x690   :  { %11026 = vmatmul.mubr.msk.f32.gmra.mrb[22].mxu1 %vm793_vm2, %v14406_v34  ;;  %v14508_v34 = vpack.c.bf16 %v12434_v17, %v12433_v4 }
 0x691   :  { %11044 = vmatprep.mubr.msk.f32.mxu1 %vm426_vm0, %v14271_v57 }
 0x692   :  { %11807 = vmatpush3.bf16.xpose.msk.msra.mxu1 %vm14232_vm4, %v11802_v23 }
 0x693   :  { %11809 = vmatprep.subr.bf16.mxu1 %v11808_v62 }
 0x699   :  { %11045 = vmatmul.mubr.msk.f32.vlgmr.msra.gmra.mrb[24].mxu1 %vm426_vm0, %v14273_v1 }
 0x69a   :  { %11047 = vmatprep.mubr.msk.f32.mxu1 %vm426_vm0, %v14279_v32  ;;  %11811 = vmatpush3.bf16.msra.mxu1 %v11808_v62 }
 0x69b   :  { %11813 = vmatprep.subr.bf16.mxu1 %v11812_v54 }
 0x69d   :  { %11048 = vmatmul.mubr.msk.f32.gmra.mrb[26].mxu1 %vm426_vm0, %v14281_v6 }
 0x69e   :  { %11050 = vmatprep.mubr.msk.f32.mxu1 %vm426_vm0, %v14287_v26  ;;  %11815 = vmatpush3.bf16.msra.mxu1 %v11812_v54 }
 0x69f   :  { %11817 = vmatprep.subr.bf16.mxu1 %v11816_v18 }
 0x6a1   :  { %11051 = vmatmul.mubr.msk.f32.gmra.mrb[28].mxu1 %vm426_vm0, %v14289_v50 }
 0x6a2   :  { %11053 = vmatprep.mubr.msk.f32.mxu1 %vm426_vm0, %v14295_v44  ;;  %11819 = vmatpush3.bf16.msra.mxu1 %v11816_v18 }
 0x6a3   :  { %11821 = vmatprep.subr.bf16.mxu1 %v11820_v21 }
 0x6a5   :  { %11054 = vmatmul.mubr.msk.f32.gmra.mrb[30].mxu1 %vm426_vm0, %v14297_v11 }
 0x6a6   :  { %11823 = vmatpush3.bf16.msra.mxu1 %v11820_v21 }
 0x6a7   :  { %11849 = vmatprep.subr.bf16.mxu1 %v14508_v34 }
 0x6d6   :  { %v1606_v27 = vpop.f32.mrb[20].mxu0 }
 0x6d7   :  { %v1608_v22 = vpop.f32.mrb[21].mxu0  ;;  %v14541_v18 = vmul.f32 0.17677669, %v1606_v27 }
 0x6d9   :  { %18688 = vst [vmem:[#allocation61_spill] sm:$0xff] %v14541_v18 }
 0x6da   :  { %v1612_v58 = vpop.f32.mrb[22].mxu0 }
 0x6db   :  { %v12470_v51 = vpack.i.bf16 %v1612_v58, %v1606_v27  ;;  %v1614_v56 = vpop.f32.mrb[23].mxu0  ;;  %v14526_v48 = vmul.f32 0.17677669, %v1612_v58 }
 0x6dc   :  { %v14511_v60 = vpack.i.bf16 %v1614_v56, %v1608_v22  ;;  %v14513_v38 = vpack.c.bf16 %v1614_v56, %v1608_v22 }
 0x6dd   :  { %12471 = vrot.lane.b32.xlu1 %v12470_v51, %s13482_s17  ;;  %18685 = vst [vmem:[#allocation58_spill] sm:$0xff] %v14526_v48 }
 0x6de   :  { %18679 = vst [vmem:[#allocation52_spill] sm:$0xff] %v14511_v60  ;;  %18680 = vst [vmem:[#allocation53_spill] sm:$0xff] %v14513_v38  ;;  %v1618_v55 = vpop.f32.mrb[24].mxu0 }
 0x6df   :  { %v1620_v36 = vpop.f32.mrb[25].mxu0  ;;  %v14530_v15 = vmul.f32 0.17677669, %v1618_v55 }
 0x6e2   :  { %v1624_v53 = vpop.f32.mrb[26].mxu0 }
 0x6e3   :  { %v12475_v47 = vpack.i.bf16 %v1624_v53, %v1618_v55  ;;  %v1626_v35 = vpop.f32.mrb[27].mxu0  ;;  %v14553_v21 = vmul.f32 0.17677669, %v1624_v53 }
 0x6e4   :  { %v14516_v28 = vpack.i.bf16 %v1626_v35, %v1620_v36  ;;  %v14518_v20 = vpack.c.bf16 %v1626_v35, %v1620_v36 }
 0x6e5   :  { %12476 = vrot.lane.b32.xlu0 %v12475_v47, %s13482_s17  ;;  %18690 = vst [vmem:[#allocation63_spill] sm:$0xff] %v14553_v21 }
 0x6e6   :  { %18681 = vst [vmem:[#allocation54_spill] sm:$0xff] %v14516_v28  ;;  %18682 = vst [vmem:[#allocation55_spill] sm:$0xff] %v14518_v20  ;;  %v1630_v61 = vpop.f32.mrb[28].mxu0 }
 0x6e7   :  { %v1632_v24 = vpop.f32.mrb[29].mxu0  ;;  %v14543_v49 = vmul.f32 0.17677669, %v1630_v61 }
 0x6e9   :  { %18689 = vst [vmem:[#allocation62_spill] sm:$0xff] %v14543_v49 }
 0x6ea   :  { %v1636_v29 = vpop.f32.mrb[30].mxu0 }
 0x6eb   :  { %v12480_v42 = vpack.i.bf16 %v1636_v29, %v1630_v61  ;;  %v1638_v23 = vpop.f32.mrb[31].mxu0  ;;  %v14555_v22 = vmul.f32 0.17677669, %v1636_v29 }
 0x6ec   :  { %v14521_v59 = vpack.i.bf16 %v1638_v23, %v1632_v24  ;;  %v14523_v39 = vpack.c.bf16 %v1638_v23, %v1632_v24 }
 0x6ed   :  { %12481 = vrot.lane.b32.xlu1 %v12480_v42, %s13482_s17 }
 0x6ee   :  { %18683 = vst [vmem:[#allocation56_spill] sm:$0xff] %v14521_v59  ;;  %18684 = vst [vmem:[#allocation57_spill] sm:$0xff] %v14523_v39  ;;  %v1642_v62 = vpop.f32.mrb[32].mxu0 }
 0x6ef   :  { %v1644_v33 = vpop.f32.mrb[33].mxu0  ;;  %v14565_v51 = vmul.f32 0.17677669, %v1642_v62 }
 0x6f1   :  { %4324 = vrot.lane.b32.xlu1 %v14526_v48, %s13483_s21 }
 0x6f2   :  { %v1648_v40 = vpop.f32.mrb[34].mxu0 }
 0x6f3   :  { %v12485_v43 = vpack.i.bf16 %v1648_v40, %v1642_v62  ;;  %v1650_v31 = vpop.f32.mrb[35].mxu0  ;;  %v14567_v56 = vmul.f32 0.17677669, %v1648_v40 }
 0x6f4   :  { %v14532_v54 = vpack.i.bf16 %v1650_v31, %v1644_v33  ;;  %v14534_v45 = vpack.c.bf16 %v1650_v31, %v1644_v33 }
 0x6f5   :  { %4326 = vrot.lane.b32.xlu1 %v14530_v15, %s13483_s21  ;;  %12486 = vrot.lane.b32.xlu0 %v12485_v43, %s13482_s17 }
 0x6f6   :  { %18686 = vst [vmem:[#allocation59_spill] sm:$0xff] %v14532_v54  ;;  %18687 = vst [vmem:[#allocation60_spill] sm:$0xff] %v14534_v45  ;;  %v14539_v13 = vpop.f32.mrb[36].mxu0 }
 0x6f7   :  { %v14545_v17 = vpop.f32.mrb[37].mxu0  ;;  %v2573_v61 = vsel %vm2015_vm5, %v14539_v13, -inf }
 0x6f8   :  { %v2570_v29 = vsel %vm2015_vm5, %v14545_v17, -inf }
 0x6f9   :  { %4330 = vrot.lane.b32.xlu1 %v14543_v49, %s13483_s21  ;;  %4322 = vrot.lane.b32.xlu0 %v14541_v18, %s13483_s21 }
 0x6fa   :  { %v14551_v4 = vpop.f32.mrb[38].mxu0 }
 0x6fb   :  { %v14557_v58 = vpop.f32.mrb[39].mxu0  ;;  %v2579_v23 = vsel %vm2015_vm5, %v14551_v4, -inf }
 0x6fc   :  { %v2576_v47 = vsel %vm2015_vm5, %v14557_v58, -inf }
 0x6fd   :  { %4332 = vrot.lane.b32.xlu1 %v14555_v22, %s13483_s21  ;;  %4328 = vrot.lane.b32.xlu0 %v14553_v21, %s13483_s21 }
 0x6fe   :  { %v14563_v27 = vpop.f32.mrb[40].mxu0 }
 0x6ff   :  { %v14569_v55 = vpop.f32.mrb[41].mxu0  ;;  %v2585_v62 = vsel %vm2015_vm5, %v14563_v27, -inf }
 0x700   :  { %v2582_v35 = vsel %vm2015_vm5, %v14569_v55, -inf }
 0x701   :  { %4334 = vrot.lane.b32.xlu0 %v14565_v51, %s13483_s21  ;;  %4336 = vrot.lane.b32.xlu1 %v14567_v56, %s13483_s21 }
 0x702   :  { %v14575_v36 = vpop.f32.mrb[42].mxu0 }
 0x703   :  { %18691 = vst [vmem:[#allocation64_spill] sm:$0xff] %v14575_v36  ;;  %v14577_v53 = vpop.f32.mrb[43].mxu0  ;;  %v2591_v24 = vsel %vm2015_vm5, %v14575_v36, -inf }
 0x704   :  { %v2588_v42 = vsel %vm2015_vm5, %v14577_v53, -inf }
 0x705   :  { %12496 = vrot.lane.b32.xlu0 %v14516_v28, %s13483_s21  ;;  %12491 = vrot.lane.b32.xlu1 %v14511_v60, %s13483_s21 }
 0x709   :  { %12501 = vrot.lane.b32.xlu1 %v14521_v59, %s13483_s21  ;;  %12506 = vrot.lane.b32.xlu0 %v14532_v54, %s13483_s21 }
 0x70d   :  { %5124 = vrot.lane.b32.xlu1 %v14526_v48, %s13484_s25  ;;  %5122 = vrot.lane.b32.xlu0 %v14541_v18, %s13484_s25 }
 0x72c   :  { %2577 = vmax.xlane.f32.xlu0 %v2576_v47 }
 0x730   :  { %2583 = vmax.xlane.f32.xlu0 %v2582_v35 }
 0x731   :  { %2574 = vmax.xlane.f32.xlu1 %v2573_v61 }
 0x734   :  { %2592 = vmax.xlane.f32.xlu0 %v2591_v24 }
 0x735   :  { %2571 = vmax.xlane.f32.xlu1 %v2570_v29  ;;  %v1978_v29 = vrot.slane %v14411_v25, %v14066_v52 }
 0x738   :  { %2589 = vmax.xlane.f32.xlu0 %v2588_v42  ;;  %v14615_v42 = vrot.slane %v14413_v41, %v14066_v52 }
 0x739   :  { %2580 = vmax.xlane.f32.xlu1 %v2579_v23 }
 0x73a   :  { %18694 = vst [vmem:[#allocation67_spill] sm:$0xff] %v14615_v42 }
 0x73d   :  { %2586 = vmax.xlane.f32.xlu1 %v2585_v62 }
 0x73f   :  { %v1117_v33 = vpop.f32.mrb[4].mxu1 }
 0x740   :  { %v1119_v40 = vpop.f32.mrb[5].mxu1 }
 0x743   :  { %v14607_v43 = vpop.f32.mrb[6].mxu1 }
 0x744   :  { %18692 = vst [vmem:[#allocation65_spill] sm:$0xff] %v14607_v43  ;;  %v10999_v31 = vpop.f32.mrb[7].mxu1 }
 0x745   :  { %v3952_v31 = vrot.slane %v1117_v33, %v14066_v52 }
 0x747   :  { %v11006_v47 = vpop.f32.mrb[8].mxu1 }
 0x748   :  { %v1719_v35 = vpop.f32.mrb[9].mxu1 }
 0x749   :  { %v14609_v61 = vpack.c.bf16 %v11006_v47, %v1719_v35  ;;  %v14624_v47 = vrot.slane %v1119_v40, %v14066_v52 }
 0x74b   :  { %18693 = vst [vmem:[#allocation66_spill] sm:$0xff] %v14609_v61  ;;  %v11009_v24 = vpop.f32.mrb[10].mxu1  ;;  %18696 = vst [vmem:[#allocation69_spill] sm:$0xff] %v14624_v47 }
 0x74c   :  { %v1729_v23 = vpop.f32.mrb[11].mxu1 }
 0x74d   :  { %v14617_v63 = vpack.c.bf16 %v11009_v24, %v1729_v23 }
 0x74e   :  { %2503 = vrot.lane.b32.xlu1 %v14615_v42, %s13482_s17  ;;  %1980 = vrot.lane.b32.xlu0 %v1978_v29, %s13482_s17 }
 0x74f   :  { %18695 = vst [vmem:[#allocation68_spill] sm:$0xff] %v14617_v63  ;;  %v11012_v62 = vpop.f32.mrb[12].mxu1 }
 0x750   :  { %v1739_v35 = vpop.f32.mrb[13].mxu1 }
 0x751   :  { %v14626_v25 = vpack.c.bf16 %v11012_v62, %v1739_v35 }
 0x752   :  { %4476 = vrot.lane.b32.xlu1 %v14624_v47, %s13482_s17  ;;  %3954 = vrot.lane.b32.xlu0 %v3952_v31, %s13482_s17 }
 0x753   :  { %18697 = vst [vmem:[#allocation70_spill] sm:$0xff] %v14626_v25  ;;  %v11015_v41 = vpop.f32.mrb[14].mxu1 }
 0x754   :  { %v1749_v24 = vpop.f32.mrb[15].mxu1 }
 0x755   :  { %v14631_v23 = vpack.c.bf16 %v11015_v41, %v1749_v24  ;;  %v14643_v41 = vpop.permute.xlu1 %12446 }
 0x757   :  { %18698 = vst [vmem:[#allocation71_spill] sm:$0xff] %v14631_v23  ;;  %v11018_v0 = vpop.f32.mrb[16].mxu1 }
 0x758   :  { %v1759_v29 = vpop.f32.mrb[17].mxu1 }
 0x759   :  { %v14633_v19 = vpack.c.bf16 %v11018_v0, %v1759_v29  ;;  %v14649_v29 = vpop.permute.xlu1 %12456 }
 0x75b   :  { %18699 = vst [vmem:[#allocation72_spill] sm:$0xff] %v14633_v19  ;;  %v11021_v33 = vpop.f32.mrb[18].mxu1 }
 0x75c   :  { %v1769_v2 = vpop.f32.mrb[19].mxu1 }
 0x75d   :  { %v14635_v40 = vpack.c.bf16 %v11021_v33, %v1769_v2  ;;  %v14663_v8 = vpop.permute.xlu1 %3153 }
 0x75e   :  { %18703 = vst [vmem:[#allocation76_spill] sm:$0xff] %v14663_v8 }
 0x75f   :  { %18700 = vst [vmem:[#allocation73_spill] sm:$0xff] %v14635_v40  ;;  %v11024_v16 = vpop.f32.mrb[20].mxu1 }
 0x760   :  { %v1779_v62 = vpop.f32.mrb[21].mxu1 }
 0x761   :  { %v14637_v35 = vpack.c.bf16 %v11024_v16, %v1779_v62  ;;  %v14671_v3 = vpop.permute.xlu1 %3157 }
 0x762   :  { %18704 = vst [vmem:[#allocation77_spill] sm:$0xff] %v14671_v3 }
 0x763   :  { %18701 = vst [vmem:[#allocation74_spill] sm:$0xff] %v14637_v35  ;;  %v11027_v14 = vpop.f32.mrb[22].mxu1 }
 0x764   :  { %v1789_v31 = vpop.f32.mrb[23].mxu1 }
 0x765   :  { %v14641_v9 = vpack.c.bf16 %v11027_v14, %v1789_v31 }
 0x767   :  { %18702 = vst [vmem:[#allocation75_spill] sm:$0xff] %v14641_v9 }
 0x76c   :  { %v14645_v24 = vpop.f32.mrb[24].mxu1 }
 0x76d   :  { %v14647_v0 = vpop.f32.mrb[25].mxu1  ;;  %v2019_v31 = vsel %vm2015_vm5, %v14645_v24, -inf }
 0x76e   :  { %v2016_v16 = vsel %vm2015_vm5, %v14647_v0, -inf }
 0x770   :  { %v14651_v2 = vpop.f32.mrb[26].mxu1 }
 0x771   :  { %v14655_v33 = vpop.f32.mrb[27].mxu1  ;;  %2017 = vmax.xlane.f32.xlu0 %v2016_v16  ;;  %v2025_v7 = vsel %vm2015_vm5, %v14651_v2, -inf  ;;  %v14673_v16 = vpop.permute.xlu0 %12441 }
 0x772   :  { %v2022_v30 = vsel %vm2015_vm5, %v14655_v33, -inf }
 0x774   :  { %v14657_v62 = vpop.f32.mrb[28].mxu1 }
 0x775   :  { %v14659_v14 = vpop.f32.mrb[29].mxu1  ;;  %v2031_v9 = vsel %vm2015_vm5, %v14657_v62, -inf  ;;  %v14681_v35 = vpop.permute.xlu0 %12451 }
 0x776   :  { %2020 = vmax.xlane.f32.xlu1 %v2019_v31  ;;  %v14679_v31 = vpop.permute.xlu1 %3161  ;;  %v2028_v40 = vsel %vm2015_vm5, %v14659_v14, -inf }
 0x777   :  { %18705 = vst [vmem:[#allocation78_spill] sm:$0xff] %v14679_v31 }
 0x778   :  { %v14665_v5 = vpop.f32.mrb[30].mxu1 }
 0x779   :  { %v14667_v46 = vpop.f32.mrb[31].mxu1  ;;  %v14687_v19 = vpop.permute.xlu0 %12461  ;;  %v2037_v43 = vsel %vm2015_vm5, %v14665_v5, -inf }
 0x77a   :  { %2026 = vmax.xlane.f32.xlu1 %v2025_v7  ;;  %v14685_v7 = vpop.permute.xlu1 %12471  ;;  %18707 = vst [vmem:[#allocation80_spill] sm:$0xff] %v14687_v19  ;;  %v2034_v47 = vsel %vm2015_vm5, %v14667_v46, -inf }
 0x77b   :  { %18706 = vst [vmem:[#allocation79_spill] sm:$0xff] %v14685_v7 }
 0x77d   :  { %v14695_v10 = vpop.permute.xlu0 %12466 }
 0x77e   :  { %2023 = vmax.xlane.f32.xlu1 %v2022_v30  ;;  %v14691_v30 = vpop.permute.xlu1 %12481  ;;  %18709 = vst [vmem:[#allocation82_spill] sm:$0xff] %v14695_v10 }
 0x77f   :  { %18708 = vst [vmem:[#allocation81_spill] sm:$0xff] %v14691_v30 }
 0x781   :  { %v14699_v52 = vpop.permute.xlu0 %3149 }
 0x782   :  { %2032 = vmax.xlane.f32.xlu1 %v2031_v9  ;;  %v14697_v9 = vpop.permute.xlu1 %4324  ;;  %18711 = vst [vmem:[#allocation84_spill] sm:$0xff] %v14699_v52 }
 0x783   :  { %18710 = vst [vmem:[#allocation83_spill] sm:$0xff] %v14697_v9 }
 0x786   :  { %2029 = vmax.xlane.f32.xlu1 %v2028_v40  ;;  %v14701_v54 = vpop.permute.xlu1 %4326  ;;  %v14703_v40 = vpop.permute.xlu0 %3151 }
 0x787   :  { %18712 = vst [vmem:[#allocation85_spill] sm:$0xff] %v14701_v54  ;;  %18713 = vst [vmem:[#allocation86_spill] sm:$0xff] %v14703_v40 }
 0x78a   :  { %2038 = vmax.xlane.f32.xlu1 %v2037_v43  ;;  %v14705_v59 = vpop.permute.xlu1 %4330  ;;  %v14707_v23 = vpop.permute.xlu0 %3155 }
 0x78b   :  { %18714 = vst [vmem:[#allocation87_spill] sm:$0xff] %v14705_v59  ;;  %18715 = vst [vmem:[#allocation88_spill] sm:$0xff] %v14707_v23 }
 0x78e   :  { %2035 = vmax.xlane.f32.xlu1 %v2034_v47  ;;  %v14709_v25 = vpop.permute.xlu1 %4332  ;;  %v14711_v43 = vpop.permute.xlu0 %3159 }
 0x78f   :  { %18716 = vst [vmem:[#allocation89_spill] sm:$0xff] %v14709_v25  ;;  %18717 = vst [vmem:[#allocation90_spill] sm:$0xff] %v14711_v43 }
 0x792   :  { %v14713_v28 = vpop.permute.xlu1 %4336  ;;  %v14715_v63 = vpop.permute.xlu0 %3163 }
 0x793   :  { %18718 = vst [vmem:[#allocation91_spill] sm:$0xff] %v14713_v28  ;;  %18719 = vst [vmem:[#allocation92_spill] sm:$0xff] %v14715_v63 }
 0x796   :  { %v14717_v47 = vpop.permute.xlu1 %12491  ;;  %v14719_v60 = vpop.permute.xlu0 %12476 }
 0x797   :  { %18720 = vst [vmem:[#allocation93_spill] sm:$0xff] %v14717_v47  ;;  %18721 = vst [vmem:[#allocation94_spill] sm:$0xff] %v14719_v60 }
 0x79a   :  { %v14721_v61 = vpop.permute.xlu0 %12486  ;;  %v14723_v54 = vpop.permute.xlu1 %12501 }
 0x79b   :  { %18722 = vst [vmem:[#allocation95_spill] sm:$0xff] %v14721_v61  ;;  %18723 = vst [vmem:[#allocation96_spill] sm:$0xff] %v14723_v54 }
 0x79e   :  { %v14725_v9 = vpop.permute.xlu0 %4322  ;;  %v14727_v59 = vpop.permute.xlu1 %5124 }
 0x79f   :  { %18724 = vst [vmem:[#allocation97_spill] sm:$0xff] %v14725_v9  ;;  %18725 = vst [vmem:[#allocation98_spill] sm:$0xff] %v14727_v59 }
 0x7a2   :  { %v14731_v25 = vpop.permute.xlu0 %4328 }
 0x7a3   :  { %18726 = vst [vmem:[#allocation99_spill] sm:$0xff] %v14731_v25 }
 0x7a6   :  { %v14735_v28 = vpop.permute.xlu0 %4334 }
 0x7a7   :  { %18727 = vst [vmem:[#allocation100_spill] sm:$0xff] %v14735_v28 }
 0x7aa   :  { %v14741_v38 = vpop.permute.xlu0 %12496 }
 0x7ab   :  { %18728 = vst [vmem:[#allocation101_spill] sm:$0xff] %v14741_v38 }
 0x7ae   :  { %v14747_v59 = vpop.permute.xlu0 %12506 }
 0x7af   :  { %18729 = vst [vmem:[#allocation102_spill] sm:$0xff] %v14747_v59 }
 0x7b2   :  { %v14755_v31 = vpop.permute.xlu0 %5122 }
 0x7b3   :  { %18730 = vst [vmem:[#allocation103_spill] sm:$0xff] %v14755_v31 }
 0x7b9   :  { %v14761_v3 = vpop.xlane.xlu0 %2577 }
 0x7bd   :  { %v14765_v23 = vpop.xlane.xlu0 %2583 }
 0x7be   :  { %v14729_v45 = vpop.xlane.xlu1 %2574 }
 0x7c1   :  { %v14767_v42 = vpop.xlane.xlu0 %2592 }
 0x7c2   :  { %v14733_v39 = vpop.xlane.xlu1 %2571 }
 0x7c5   :  { %v14769_v30 = vpop.xlane.xlu0 %2589 }
 0x7c6   :  { %v14737_v20 = vpop.xlane.xlu1 %2580 }
 0x7c9   :  { %v1981_v31 = vpop.permute.xlu0 %1980 }
 0x7ca   :  { %v14739_v47 = vpop.xlane.xlu1 %2586  ;;  %v1984_v8 = vmul.f32 %v1981_v31, %v14273_v1  ;;  %v1985_v60 = vmul.f32 %v1981_v31, %v14279_v32  ;;  %v1986_v52 = vmul.f32 %v1981_v31, %v14281_v6  ;;  %v1988_v19 = vmul.f32 %v1981_v31, %v14289_v50 }
 0x7cc   :  { %v1994_v40 = vsel %vm426_vm0, %v1984_v8, 0.0  ;;  %v1997_v7 = vsel %vm426_vm0, %v1985_v60, 0.0  ;;  %v2000_v36 = vsel %vm426_vm0, %v1986_v52, 0.0  ;;  %v2006_v8 = vsel %vm426_vm0, %v1988_v19, 0.0 }
 0x7ce   :  { %v2504_v63 = vpop.permute.xlu1 %2503 }
 0x7cf   :  { %v2506_v54 = vmul.f32 %v2504_v63, %v14271_v57  ;;  %v2507_v9 = vmul.f32 %v2504_v63, %v14273_v1  ;;  %v2508_v25 = vmul.f32 %v2504_v63, %v14279_v32  ;;  %v2509_v28 = vmul.f32 %v2504_v63, %v14281_v6 }
 0x7d0   :  { %v2510_v38 = vmul.f32 %v2504_v63, %v14287_v26  ;;  %v2511_v61 = vmul.f32 %v2504_v63, %v14289_v50  ;;  %v2512_v59 = vmul.f32 %v2504_v63, %v14295_v44  ;;  %v2513_v43 = vmul.f32 %v2504_v63, %v14297_v11 }
 0x7d1   :  { %2522 = vrot.lane.b32.xlu1 %v2506_v54, %s13483_s21  ;;  %2524 = vrot.lane.b32.xlu0 %v2507_v9, %s13483_s21  ;;  %v1983_v63 = vmul.f32 %v1981_v31, %v14271_v57  ;;  %v1987_v1 = vmul.f32 %v1981_v31, %v14287_v26  ;;  %v1989_v32 = vmul.f32 %v1981_v31, %v14295_v44 }
 0x7d2   :  { %v1990_v6 = vmul.f32 %v1981_v31, %v14297_v11  ;;  %v4477_v19 = vpop.permute.xlu1 %4476 }
 0x7d3   :  { %v1991_v10 = vsel %vm426_vm0, %v1983_v63, 0.0  ;;  %v2003_v57 = vsel %vm426_vm0, %v1987_v1, 0.0  ;;  %v2009_v60 = vsel %vm426_vm0, %v1989_v32, 0.0  ;;  %v14794_v52 = vmul.f32 %v4477_v19, %v14541_v18 }
 0x7d4   :  { %v2012_v50 = vsel %vm426_vm0, %v1990_v6, 0.0  ;;  %v14800_v44 = vmul.f32 %v4477_v19, %v14553_v21 }
 0x7d5   :  { %2526 = vrot.lane.b32.xlu1 %v2508_v25, %s13483_s21  ;;  %2528 = vrot.lane.b32.xlu0 %v2509_v28, %s13483_s21  ;;  %18731 = vst [vmem:[#allocation104_spill] sm:$0xff] %v14794_v52 }
 0x7d6   :  { %18732 = vst [vmem:[#allocation105_spill] sm:$0xff] %v14800_v44 }
 0x7d9   :  { %2530 = vrot.lane.b32.xlu1 %v2510_v38, %s13483_s21  ;;  %2532 = vrot.lane.b32.xlu0 %v2511_v61, %s13483_s21 }
 0x7dd   :  { %2534 = vrot.lane.b32.xlu1 %v2512_v59, %s13483_s21  ;;  %2536 = vrot.lane.b32.xlu0 %v2513_v43, %s13483_s21 }
 0x7fc   :  { %1995 = vadd.xlane.f32.xlu0 %v1994_v40 }
 0x800   :  { %1998 = vadd.xlane.f32.xlu0 %v1997_v7 }
 0x801   :  { %1992 = vadd.xlane.f32.xlu1 %v1991_v10  ;;  %v14806_v10 = vmul.f32 %v4477_v19, %v14526_v48 }
 0x803   :  { %v2021_v26 = vpop.xlane.xlu1 %2020  ;;  %18733 = vst [vmem:[#allocation106_spill] sm:$0xff] %v14806_v10 }
 0x804   :  { %2001 = vadd.xlane.f32.xlu0 %v2000_v36  ;;  %v14826_v36 = vmul.f32 %v4477_v19, %v14543_v49 }
 0x805   :  { %2007 = vadd.xlane.f32.xlu1 %v2006_v8 }
 0x806   :  { %18737 = vst [vmem:[#allocation110_spill] sm:$0xff] %v14826_v36 }
 0x807   :  { %v2027_v11 = vpop.xlane.xlu1 %2026 }
 0x808   :  { %2004 = vadd.xlane.f32.xlu0 %v2003_v57 }
 0x809   :  { %2010 = vadd.xlane.f32.xlu1 %v2009_v60 }
 0x80c   :  { %2013 = vadd.xlane.f32.xlu0 %v2012_v50 }
 0x81a   :  { %3318 = vrot.lane.b32.xlu1 %v2506_v54, %s13484_s25  ;;  %v2024_v54 = vpop.xlane.xlu1 %2023 }
 0x81e   :  { %3322 = vrot.lane.b32.xlu1 %v2508_v25, %s13484_s25  ;;  %v14831_v25 = vmul.f32 %v4477_v19, %v14567_v56 }
 0x820   :  { %18738 = vst [vmem:[#allocation111_spill] sm:$0xff] %v14831_v25 }
 0x822   :  { %3320 = vrot.lane.b32.xlu0 %v2507_v9, %s13484_s25  ;;  %3326 = vrot.lane.b32.xlu1 %v2510_v38, %s13484_s25  ;;  %v14809_v38 = vmul.f32 %v4477_v19, %v14555_v22  ;;  %v14837_v9 = vpop.permute.xlu0 %3954 }
 0x824   :  { %18734 = vst [vmem:[#allocation107_spill] sm:$0xff] %v14809_v38 }
 0x826   :  { %3324 = vrot.lane.b32.xlu0 %v2509_v28, %s13484_s25  ;;  %3330 = vrot.lane.b32.xlu1 %v2512_v59, %s13484_s25  ;;  %v14816_v28 = vmul.f32 %v4477_v19, %v14530_v15  ;;  %v14819_v59 = vmul.f32 %v4477_v19, %v14565_v51 }
 0x828   :  { %18735 = vst [vmem:[#allocation108_spill] sm:$0xff] %v14816_v28  ;;  %18736 = vst [vmem:[#allocation109_spill] sm:$0xff] %v14819_v59 }
 0x82a   :  { %3328 = vrot.lane.b32.xlu0 %v2511_v61, %s13484_s25  ;;  %4495 = vrot.lane.b32.xlu1 %v14794_v52, %s13483_s21  ;;  %v2033_v61 = vpop.xlane.xlu1 %2032 }
 0x82e   :  { %3332 = vrot.lane.b32.xlu0 %v2513_v43, %s13484_s25  ;;  %4501 = vrot.lane.b32.xlu1 %v14800_v44, %s13483_s21  ;;  %v2030_v31 = vpop.xlane.xlu1 %2029  ;;  %v2018_v43 = vpop.xlane.xlu0 %2017 }
 0x832   :  { %4497 = vrot.lane.b32.xlu0 %v14806_v10, %s13483_s21  ;;  %4505 = vrot.lane.b32.xlu1 %v14809_v38, %s13483_s21  ;;  %v14835_v7 = vpop.xlane.xlu1 %2038 }
 0x836   :  { %4499 = vrot.lane.b32.xlu0 %v14816_v28, %s13483_s21  ;;  %4507 = vrot.lane.b32.xlu1 %v14819_v59, %s13483_s21  ;;  %v2036_v40 = vpop.xlane.xlu1 %2035 }
 0x83a   :  { %4503 = vrot.lane.b32.xlu0 %v14826_v36, %s13483_s21 }
 0x83e   :  { %4509 = vrot.lane.b32.xlu0 %v14831_v25, %s13483_s21 }
 0x843   :  { %v2523_v63 = vpop.permute.xlu1 %2522  ;;  %v2525_v1 = vpop.permute.xlu0 %2524 }
 0x844   :  { %v2546_v32 = vsel %vm426_vm0, %v2523_v63, 0.0  ;;  %v2549_v6 = vsel %vm426_vm0, %v2525_v1, 0.0 }
 0x847   :  { %v2527_v8 = vpop.permute.xlu1 %2526  ;;  %v2529_v57 = vpop.permute.xlu0 %2528 }
 0x848   :  { %v2552_v50 = vsel %vm426_vm0, %v2527_v8, 0.0  ;;  %v2555_v25 = vsel %vm426_vm0, %v2529_v57, 0.0 }
 0x84b   :  { %v2531_v60 = vpop.permute.xlu1 %2530  ;;  %v2533_v59 = vpop.permute.xlu0 %2532 }
 0x84c   :  { %v2558_v19 = vsel %vm426_vm0, %v2531_v60, 0.0  ;;  %v2561_v36 = vsel %vm426_vm0, %v2533_v59, 0.0 }
 0x84f   :  { %v2535_v44 = vpop.permute.xlu1 %2534 }
 0x850   :  { %v2564_v63 = vsel %vm426_vm0, %v2535_v44, 0.0 }
 0x85a   :  { %2547 = vadd.xlane.f32.xlu1 %v2546_v32  ;;  %v2537_v32 = vpop.permute.xlu0 %2536 }
 0x85b   :  { %v2567_v1 = vsel %vm426_vm0, %v2537_v32, 0.0 }
 0x85d   :  { %2550 = vadd.xlane.f32.xlu0 %v2549_v6 }
 0x85e   :  { %2553 = vadd.xlane.f32.xlu1 %v2552_v50 }
 0x861   :  { %2559 = vadd.xlane.f32.xlu0 %v2558_v19 }
 0x862   :  { %2556 = vadd.xlane.f32.xlu1 %v2555_v25 }
 0x865   :  { %2562 = vadd.xlane.f32.xlu0 %v2561_v36 }
 0x869   :  { %2565 = vadd.xlane.f32.xlu0 %v2564_v63  ;;  %v3957_v63 = vmul.f32 %v14837_v9, %v14541_v18 }
 0x86b   :  { %v3965_v10 = vsel %vm426_vm0, %v3957_v63, 0.0 }
 0x86d   :  { %2568 = vadd.xlane.f32.xlu0 %v2567_v1 }
 0x873   :  { %5126 = vrot.lane.b32.xlu1 %v14530_v15, %s13484_s25 }
 0x883   :  { %5128 = vrot.lane.b32.xlu0 %v14553_v21, %s13484_s25 }
 0x889   :  { %v14851_v8 = vpop.xlane.xlu0 %1995 }
 0x88a   :  { %v14854_v25 = vmax.f32 %v2021_v26, %v14851_v8 }
 0x88c   :  { %v2049_v57 = vsub.f32 %v14645_v24, %v14854_v25 }
 0x88d   :  { %v14856_v59 = vpop.xlane.xlu0 %1998 }
 0x88e   :  { %v14859_v44 = vmax.f32 %v2024_v54, %v14856_v59  ;;  %v14861_v36 = vpop.xlane.xlu1 %1992  ;;  %v2058_v24 = vmul.f32 1.442695, %v2049_v57  ;;  %v3958_v57 = vmul.f32 %v14837_v9, %v14526_v48  ;;  %v3962_v48 = vmul.f32 %v14837_v9, %v14555_v22 }
 0x88f   :  { %v14866_v6 = vmax.f32 %v2018_v43, %v14861_v36 }
 0x890   :  { %v2050_v60 = vsub.f32 %v14655_v33, %v14859_v44 }
 0x891   :  { %v2048_v26 = vsub.f32 %v14647_v0, %v14866_v6  ;;  %v14872_v50 = vpop.xlane.xlu0 %2001 }
 0x892   :  { %v14875_v19 = vmax.f32 %v2027_v11, %v14872_v50  ;;  %v14877_v54 = vpop.xlane.xlu1 %2007  ;;  %v2060_v1 = vmul.f32 1.442695, %v2050_v60 }
 0x893   :  { %v2056_v32 = vmul.f32 1.442695, %v2048_v26  ;;  %v14882_v43 = vmax.f32 %v2033_v61, %v14877_v54 }
 0x894   :  { %v2051_v33 = vsub.f32 %v14651_v2, %v14875_v19 }
 0x895   :  { %v14886_v0 = vpop.xlane.xlu0 %2004  ;;  %12658 = vpow2.f32 %v2056_v32  ;;  %v2053_v60 = vsub.f32 %v14657_v62, %v14882_v43  ;;  %v3968_v62 = vsel %vm426_vm0, %v3958_v57, 0.0 }
 0x896   :  { %v14889_v11 = vmax.f32 %v2030_v31, %v14886_v0  ;;  %v14891_v28 = vpop.xlane.xlu1 %2010  ;;  %12660 = vpow2.f32 %v2058_v24  ;;  %v2062_v61 = vmul.f32 1.442695, %v2051_v33  ;;  %v12438_v33 = vunpack.i.l.bf16 %v14639_v12 }
 0x897   :  { %18739 = vst [vmem:[#allocation112_spill] sm:$0xff] %v14891_v28  ;;  %v14899_v2 = vmax.f32 %v2036_v40, %v14891_v28  ;;  %3966 = vadd.xlane.f32.xlu1 %v3965_v10  ;;  %12662 = vpow2.f32 %v2060_v1  ;;  %v2066_v40 = vmul.f32 1.442695, %v2053_v60  ;;  %v12439_v1 = vunpack.i.h.bf16 %v14639_v12 }
 0x898   :  { %v2052_v31 = vsub.f32 %v14659_v14, %v14889_v11  ;;  %12664 = vpow2.f32 %v2062_v61  ;;  %v12444_v60 = vunpack.i.h.bf16 %v14673_v16 }
 0x899   :  { %v2054_v26 = vsub.f32 %v14667_v46, %v14899_v2  ;;  %v14905_v63 = vpop.xlane.xlu0 %2013  ;;  %v3960_v46 = vmul.f32 %v14837_v9, %v14553_v21  ;;  %v11852_v12 = vpack.c.bf16 %v12439_v1, %v12438_v33  ;;  %v12453_v1 = vunpack.i.l.bf16 %v14681_v35 }
 0x89a   :  { %v2064_v32 = vmul.f32 1.442695, %v2052_v31  ;;  %v14909_v24 = vmax.f32 %v14835_v7, %v14905_v63 }
 0x89b   :  { %3969 = vadd.xlane.f32.xlu1 %v3968_v62  ;;  %v2068_v10 = vmul.f32 1.442695, %v2054_v26  ;;  %v3974_v61 = vsel %vm426_vm0, %v3960_v46, 0.0  ;;  %v12443_v26 = vunpack.i.l.bf16 %v14673_v16  ;;  %v12448_v16 = vunpack.i.l.bf16 %v14643_v41 }
 0x89c   :  { %12666 = vpow2.f32 %v2064_v32  ;;  %v2055_v14 = vsub.f32 %v14665_v5, %v14909_v24  ;;  %v12454_v46 = vunpack.i.h.bf16 %v14681_v35  ;;  %v3319_v35 = vpop.permute.xlu1 %3318 }
 0x89d   :  { %12668 = vpow2.f32 %v2066_v40  ;;  %v12449_v40 = vunpack.i.h.bf16 %v14643_v41 }
 0x89e   :  { %v2070_v7 = vmul.f32 1.442695, %v2055_v14  ;;  %12670 = vpow2.f32 %v2068_v10  ;;  %v11856_v10 = vpack.c.bf16 %v12444_v60, %v12443_v26 }
 0x89f   :  { %v14918_v31 = vpop.eup %12658  ;;  %v11860_v41 = vpack.c.bf16 %v12449_v40, %v12448_v16 }
 0x8a0   :  { %v14920_v57 = vpop.eup %12660  ;;  %11072 = vmatprep.mubr.msk.f32.mxu1 %vm2015_vm5, %v14918_v31  ;;  %12672 = vpow2.f32 %v2070_v7  ;;  %v14958_v7 = vpack.c.bf16 %v12454_v46, %v12453_v1  ;;  %v3323_v60 = vpop.permute.xlu1 %3322  ;;  %v3959_v46 = vmul.f32 %v14837_v9, %v14530_v15 }
 0x8a1   :  { %v14925_v5 = vpop.eup %12662  ;;  %11073 = vmatmul.mubr.msk.f32.vlgmr.msra.gmra.mrb[32].mxu1 %vm2015_vm5, %v14920_v57 }
 0x8a2   :  { %3975 = vadd.xlane.f32.xlu0 %v3974_v61  ;;  %11851 = vmatpush3.bf16.msra.mxu1 %v14508_v34  ;;  %v14934_v32 = vpop.eup %12664  ;;  %v3321_v61 = vpop.permute.xlu0 %3320  ;;  %v3971_v52 = vsel %vm426_vm0, %v3959_v46, 0.0 }
 0x8a3   :  { %11075 = vmatprep.mubr.msk.f32.mxu1 %vm2015_vm5, %v14925_v5  ;;  %11853 = vmatprep.subr.bf16.mxu1 %v11852_v12 }
 0x8a5   :  { %11076 = vmatmul.mubr.msk.f32.gmra.mrb[34].mxu1 %vm2015_vm5, %v14934_v32 }
 0x8a6   :  { %v14936_v62 = vpop.eup %12666  ;;  %11855 = vmatpush3.bf16.msra.mxu1 %v11852_v12  ;;  %v3325_v26 = vpop.permute.xlu0 %3324 }
 0x8a7   :  { %11078 = vmatprep.mubr.msk.f32.mxu1 %vm2015_vm5, %v14936_v62  ;;  %11857 = vmatprep.subr.bf16.mxu1 %v11856_v10  ;;  %v14944_v34 = vpop.eup %12668  ;;  %v14969_v12 = vpop.permute.xlu1 %3326 }
 0x8a8   :  { %v14946_v14 = vpop.eup %12670 }
 0x8a9   :  { %11079 = vmatmul.mubr.msk.f32.gmra.mrb[36].mxu1 %vm2015_vm5, %v14944_v34 }
 0x8aa   :  { %11859 = vmatpush3.bf16.msra.mxu1 %v11856_v10  ;;  %11081 = vmatprep.mubr.msk.f32.mxu1 %vm2015_vm5, %v14946_v14  ;;  %v14956_v33 = vpop.eup %12672  ;;  %v3329_v40 = vpop.permute.xlu0 %3328 }
 0x8ab   :  { %11861 = vmatprep.subr.bf16.mxu1 %v11860_v41  ;;  %v14971_v16 = vpop.permute.xlu1 %3330 }
 0x8ac   :  { %5130 = vrot.lane.b32.xlu1 %v14543_v49, %s13484_s25 }
 0x8ad   :  { %11082 = vmatmul.mubr.msk.f32.gmra.mrb[38].mxu1 %vm2015_vm5, %v14956_v33 }
 0x8ae   :  { %11863 = vmatpush3.bf16.msra.mxu1 %v11860_v41  ;;  %v14973_v10 = vpop.permute.xlu0 %3332  ;;  %v3961_v41 = vmul.f32 %v14837_v9, %v14543_v49  ;;  %v3963_v49 = vmul.f32 %v14837_v9, %v14565_v51 }
 0x8af   :  { %11882 = vmatprep.subr.msk.bf16.mxu1 %vm14232_vm4, %v14958_v7  ;;  %v14977_v1 = vpop.permute.xlu1 %4495 }
 0x8b0   :  { %5132 = vrot.lane.b32.xlu1 %v14555_v22, %s13484_s25  ;;  %18740 = vst [vmem:[#allocation113_spill] sm:$0xff] %v14977_v1  ;;  %v3977_v21 = vsel %vm426_vm0, %v3961_v41, 0.0  ;;  %v3980_v1 = vsel %vm426_vm0, %v3962_v48, 0.0  ;;  %v3964_v41 = vmul.f32 %v14837_v9, %v14567_v56 }
 0x8b2   :  { %v14982_v38 = vpop.permute.xlu0 %4497 }
 0x8b3   :  { %18741 = vst [vmem:[#allocation114_spill] sm:$0xff] %v14982_v38  ;;  %v14987_v18 = vpop.permute.xlu1 %4501 }
 0x8b4   :  { %18742 = vst [vmem:[#allocation115_spill] sm:$0xff] %v14987_v18 }
 0x8b6   :  { %v14989_v28 = vpop.permute.xlu0 %4499 }
 0x8b7   :  { %v14994_v46 = vpop.permute.xlu1 %4505 }
 0x8b8   :  { %5134 = vrot.lane.b32.xlu0 %v14565_v51, %s13484_s25  ;;  %18743 = vst [vmem:[#allocation116_spill] sm:$0xff] %v14994_v46 }
 0x8ba   :  { %v14999_v38 = vpop.permute.xlu0 %4503 }
 0x8bb   :  { %18744 = vst [vmem:[#allocation117_spill] sm:$0xff] %v14999_v38  ;;  %v15002_v18 = vpop.permute.xlu1 %4507 }
 0x8bc   :  { %18745 = vst [vmem:[#allocation118_spill] sm:$0xff] %v15002_v18 }
 0x8be   :  { %v15006_v48 = vpop.permute.xlu0 %4509 }
 0x8bf   :  { %18746 = vst [vmem:[#allocation119_spill] sm:$0xff] %v15006_v48 }
 0x8d4   :  { %3972 = vadd.xlane.f32.xlu1 %v3971_v52  ;;  %v3983_v52 = vsel %vm426_vm0, %v3963_v49, 0.0 }
 0x8d7   :  { %3978 = vadd.xlane.f32.xlu0 %v3977_v21  ;;  %v3986_v21 = vsel %vm426_vm0, %v3964_v41, 0.0  ;;  %v3345_v41 = vsel %vm426_vm0, %v3321_v61, 0.0 }
 0x8db   :  { %3981 = vadd.xlane.f32.xlu0 %v3980_v1  ;;  %v3342_v1 = vsel %vm426_vm0, %v3319_v35, 0.0 }
 0x8df   :  { %3984 = vadd.xlane.f32.xlu0 %v3983_v52 }
 0x8e3   :  { %3987 = vadd.xlane.f32.xlu0 %v3986_v21 }
 0x8e5   :  { %5136 = vrot.lane.b32.xlu1 %v14567_v56, %s13484_s25 }
 0x8e7   :  { %v15009_v46 = vpop.xlane.xlu1 %2547  ;;  %3343 = vadd.xlane.f32.xlu0 %v3342_v1 }
 0x8e8   :  { %v15013_v49 = vmax.f32 %v14733_v39, %v15009_v46 }
 0x8ea   :  { %v2602_v9 = vsub.f32 %v14545_v17, %v15013_v49  ;;  %v15017_v52 = vpop.xlane.xlu0 %2550 }
 0x8eb   :  { %v15022_v21 = vmax.f32 %v14729_v45, %v15017_v52  ;;  %v15024_v48 = vpop.xlane.xlu1 %2553  ;;  %3346 = vadd.xlane.f32.xlu0 %v3345_v41  ;;  %v3348_v45 = vsel %vm426_vm0, %v3323_v60, 0.0 }
 0x8ec   :  { %v2610_v35 = vmul.f32 1.442695, %v2602_v9  ;;  %v15028_v1 = vmax.f32 %v14761_v3, %v15024_v48 }
 0x8ed   :  { %v2603_v39 = vsub.f32 %v14539_v13, %v15022_v21 }
 0x8ee   :  { %12674 = vpow2.f32 %v2610_v35  ;;  %v2604_v17 = vsub.f32 %v14557_v58, %v15028_v1  ;;  %v15034_v61 = vpop.xlane.xlu0 %2559 }
 0x8ef   :  { %v2612_v18 = vmul.f32 1.442695, %v2603_v39  ;;  %v15039_v41 = vmax.f32 %v14765_v23, %v15034_v61  ;;  %v15041_v9 = vpop.xlane.xlu1 %2556  ;;  %3349 = vadd.xlane.f32.xlu0 %v3348_v45  ;;  %v3351_v23 = vsel %vm426_vm0, %v3325_v26, 0.0 }
 0x8f0   :  { %v2614_v3 = vmul.f32 1.442695, %v2604_v17  ;;  %v15045_v13 = vmax.f32 %v14737_v20, %v15041_v9 }
 0x8f1   :  { %12676 = vpow2.f32 %v2612_v18  ;;  %v2606_v58 = vsub.f32 %v14569_v55, %v15039_v41  ;;  %v3357_v55 = vsel %vm426_vm0, %v3329_v40, 0.0 }
 0x8f2   :  { %v2605_v60 = vsub.f32 %v14551_v4, %v15045_v13  ;;  %v15051_v35 = vpop.xlane.xlu0 %2562  ;;  %12678 = vpow2.f32 %v2614_v3 }
 0x8f3   :  { %v15056_v39 = vmax.f32 %v14739_v47, %v15051_v35  ;;  %3352 = vadd.xlane.f32.xlu0 %v3351_v23  ;;  %v2618_v17 = vmul.f32 1.442695, %v2606_v58  ;;  %v12459_v47 = vunpack.i.h.bf16 %v14649_v29  ;;  %v12458_v58 = vunpack.i.l.bf16 %v14649_v29 }
 0x8f4   :  { %v2616_v20 = vmul.f32 1.442695, %v2605_v60 }
 0x8f5   :  { %v2607_v18 = vsub.f32 %v14563_v27, %v15056_v39  ;;  %v11886_v29 = vpack.c.bf16 %v12459_v47, %v12458_v58 }
 0x8f6   :  { %v15060_v45 = vpop.xlane.xlu0 %2565  ;;  %12680 = vpow2.f32 %v2616_v20 }
 0x8f7   :  { %v2620_v4 = vmul.f32 1.442695, %v2607_v18  ;;  %v15065_v26 = vmax.f32 %v14769_v30, %v15060_v45  ;;  %3358 = vadd.xlane.f32.xlu0 %v3357_v55  ;;  %12682 = vpow2.f32 %v2618_v17  ;;  %v3363_v30 = vsel %vm426_vm0, %v14973_v10, 0.0  ;;  %v18747_v17 = vld [vmem:[#allocation64_spill] sm:$0xff] }
 0x8f8   :  { %v15067_v3 = vpop.eup %12674  ;;  %v18748_v55 = vld [vmem:[#allocation80_spill] sm:$0xff] }
 0x8f9   :  { %12684 = vpow2.f32 %v2620_v4  ;;  %v2608_v27 = vsub.f32 %v14577_v53, %v15065_v26  ;;  %11128 = vmatprep.mubr.msk.f32.mxu1 %vm2015_vm5, %v15067_v3  ;;  %v12464_v4 = vunpack.i.h.bf16 %v18748_v55  ;;  %v12463_v47 = vunpack.i.l.bf16 %v18748_v55 }
 0x8fa   :  { %v15075_v40 = vpop.xlane.xlu0 %2568 }
 0x8fb   :  { %v15079_v60 = vpop.eup %12676  ;;  %v2622_v23 = vmul.f32 1.442695, %v2608_v27  ;;  %v15083_v20 = vmax.f32 %v14767_v42, %v15075_v40  ;;  %3364 = vadd.xlane.f32.xlu0 %v3363_v30  ;;  %v2096_v42 = vsel %vm2015_vm5, %v14918_v31, 0.0  ;;  %v11892_v31 = vpack.c.bf16 %v12464_v4, %v12463_v47 }
 0x8fc   :  { %11129 = vmatmul.mubr.msk.f32.vlgmr.msra.gmra.mrb[40].mxu1 %vm2015_vm5, %v15079_v60  ;;  %v15087_v53 = vpop.eup %12678  ;;  %v3360_v47 = vsel %vm426_vm0, %v14971_v16, 0.0  ;;  %v2099_v16 = vsel %vm2015_vm5, %v14920_v57, 0.0  ;;  %v18752_v57 = vld [vmem:[#allocation94_spill] sm:$0xff] }
 0x8fd   :  { %12686 = vpow2.f32 %v2622_v23  ;;  %v2609_v18 = vsub.f32 %v18747_v17, %v15083_v20  ;;  %11885 = vmatpush3.bf16.xpose.msk.msra.mxu1 %vm14232_vm4, %v14958_v7  ;;  %11131 = vmatprep.mubr.msk.f32.mxu1 %vm2015_vm5, %v15087_v53  ;;  %v2105_v7 = vsel %vm2015_vm5, %v14934_v32, 0.0  ;;  %v2111_v23 = vsel %vm2015_vm5, %v14944_v34, 0.0  ;;  %v18749_v17 = vld [vmem:[#allocation82_spill] sm:$0xff] }
 0x8fe   :  { %11888 = vmatprep.subr.msk.bf16.mxu1 %vm14232_vm4, %v11886_v29  ;;  %v2114_v34 = vsel %vm2015_vm5, %v14946_v14, 0.0  ;;  %v18751_v14 = vld [vmem:[#allocation79_spill] sm:$0xff] }
 0x8ff   :  { %v2624_v10 = vmul.f32 1.442695, %v2609_v18  ;;  %2097 = vadd.xlane.f32.xlu0 %v2096_v42  ;;  %v12469_v18 = vunpack.i.h.bf16 %v18749_v17  ;;  %v12468_v42 = vunpack.i.l.bf16 %v18749_v17  ;;  %v2077_v17 = vsub.f32 %v14877_v54, %v14882_v43 }
 0x900   :  { %v15102_v58 = vpop.eup %12680  ;;  %v12478_v54 = vunpack.i.l.bf16 %v18752_v57  ;;  %v2073_v43 = vsub.f32 %v14851_v8, %v14854_v25  ;;  %v2117_v8 = vsel %vm2015_vm5, %v14956_v33, 0.0  ;;  %v18755_v25 = vld [vmem:[#allocation81_spill] sm:$0xff] }
 0x901   :  { %12688 = vpow2.f32 %v2624_v10  ;;  %v15104_v27 = vpop.eup %12682  ;;  %11132 = vmatmul.mubr.msk.f32.gmra.mrb[42].mxu1 %vm2015_vm5, %v15102_v58  ;;  %v2072_v10 = vsub.f32 %v14861_v36, %v14866_v6  ;;  %v11898_v4 = vpack.c.bf16 %v12469_v18, %v12468_v42  ;;  %v18750_v36 = vld [vmem:[#allocation84_spill] sm:$0xff]  ;;  %v2074_v6 = vsub.f32 %v14856_v59, %v14859_v44 }
 0x902   :  { %11134 = vmatprep.mubr.msk.f32.mxu1 %vm2015_vm5, %v15104_v27  ;;  %v2102_v42 = vsel %vm2015_vm5, %v14925_v5, 0.0  ;;  %v2090_v59 = vmul.f32 1.442695, %v2077_v17  ;;  %v2079_v44 = vsub.f32 %v14905_v63, %v14909_v24  ;;  %v2108_v5 = vsel %vm2015_vm5, %v14936_v62, 0.0  ;;  %v18753_v24 = vld [vmem:[#allocation86_spill] sm:$0xff]  ;;  %v18759_v17 = vld [vmem:[#allocation112_spill] sm:$0xff] }
 0x903   :  { %v15110_v30 = vpop.eup %12684  ;;  %2106 = vadd.xlane.f32.xlu0 %v2105_v7  ;;  %v12474_v7 = vunpack.i.h.bf16 %v18751_v14  ;;  %v2075_v63 = vsub.f32 %v14872_v50, %v14875_v19  ;;  %v12484_v62 = vunpack.i.h.bf16 %v18755_v25  ;;  %v12483_v50 = vunpack.i.l.bf16 %v18755_v25  ;;  %v18756_v19 = vld [vmem:[#allocation67_spill] sm:$0xff] }
 0x905   :  { %11891 = vmatpush3.bf16.xpose.msk.msra.mxu1 %vm14232_vm4, %v11886_v29  ;;  %v3354_v29 = vsel %vm426_vm0, %v14969_v12, 0.0  ;;  %v2080_v12 = vmul.f32 1.442695, %v2072_v10  ;;  %v2094_v10 = vmul.f32 1.442695, %v2079_v44 }
 0x906   :  { %11135 = vmatmul.mubr.msk.f32.gmra.mrb[44].mxu1 %vm2015_vm5, %v15110_v30  ;;  %11894 = vmatprep.subr.msk.bf16.mxu1 %vm14232_vm4, %v11892_v31 }
 0x907   :  { %v15122_v32 = vpop.eup %12686  ;;  %2112 = vadd.xlane.f32.xlu0 %v2111_v23  ;;  %v12473_v23 = vunpack.i.l.bf16 %v18751_v14  ;;  %12690 = vpow2.f32 %v2080_v12  ;;  %v18754_v12 = vld [vmem:[#allocation76_spill] sm:$0xff]  ;;  %v2076_v14 = vsub.f32 %v14886_v0, %v14889_v11 }
 0x908   :  { %11137 = vmatprep.mubr.msk.f32.mxu1 %vm2015_vm5, %v15122_v32 }
 0x909   :  { %3355 = vadd.xlane.f32.xlu1 %v3354_v29  ;;  %v11928_v18 = vpack.c.bf16 %v12474_v7, %v12473_v23  ;;  %v12479_v29 = vunpack.i.h.bf16 %v18752_v57  ;;  %v18757_v7 = vld [vmem:[#allocation88_spill] sm:$0xff]  ;;  %v18758_v23 = vld [vmem:[#allocation77_spill] sm:$0xff] }
 0x90b   :  { %v15134_v55 = vpop.eup %12688  ;;  %2115 = vadd.xlane.f32.xlu0 %v2114_v34 }
 0x90c   :  { %11138 = vmatmul.mubr.msk.f32.gmra.mrb[46].mxu1 %vm2015_vm5, %v15134_v55 }
 0x90d   :  { %11897 = vmatpush3.bf16.xpose.msk.msra.mxu1 %vm14232_vm4, %v11892_v31  ;;  %3361 = vadd.xlane.f32.xlu1 %v3360_v47  ;;  %v2084_v31 = vmul.f32 1.442695, %v2074_v6  ;;  %v2082_v47 = vmul.f32 1.442695, %v2073_v43  ;;  %v2086_v6 = vmul.f32 1.442695, %v2075_v63 }
 0x90e   :  { %11900 = vmatprep.subr.msk.bf16.mxu1 %vm14232_vm4, %v11898_v4  ;;  %11196 = vmatprep.mubr.msk.f32.mxu1 %vm426_vm0, %v18750_v36 }
 0x90f   :  { %12692 = vpow2.f32 %v2084_v31  ;;  %v2088_v31 = vmul.f32 1.442695, %v2076_v14  ;;  %v18766_v14 = vld [vmem:[#allocation58_spill] sm:$0xff] }
 0x910   :  { %12694 = vpow2.f32 %v2090_v59  ;;  %v18761_v59 = vld [vmem:[#allocation78_spill] sm:$0xff] }
 0x911   :  { %2100 = vadd.xlane.f32.xlu1 %v2099_v16  ;;  %v15168_v34 = vpop.eup %12690  ;;  %12696 = vpow2.f32 %v2094_v10  ;;  %v11940_v16 = vpack.c.bf16 %v12484_v62, %v12483_v50  ;;  %v18764_v10 = vld [vmem:[#allocation61_spill] sm:$0xff] }
 0x912   :  { %v2140_v36 = vmul.f32 %v15168_v34, %v18756_v19  ;;  %12698 = vpow2.f32 %v2082_v47 }
 0x913   :  { %12700 = vpow2.f32 %v2086_v6 }
 0x914   :  { %12702 = vpow2.f32 %v2088_v31  ;;  %v18771_v31 = vld [vmem:[#allocation97_spill] sm:$0xff] }
 0x915   :  { %11903 = vmatpush3.bf16.xpose.msk.msra.mxu1 %vm14232_vm4, %v11898_v4  ;;  %2103 = vadd.xlane.f32.xlu1 %v2102_v42  ;;  %v11934_v4 = vpack.c.bf16 %v12479_v29, %v12478_v54  ;;  %v18760_v42 = vld [vmem:[#allocation90_spill] sm:$0xff]  ;;  %v18763_v54 = vld [vmem:[#allocation92_spill] sm:$0xff] }
 0x916   :  { %11930 = vmatprep.subr.msk.bf16.mxu1 %vm14232_vm4, %v11928_v18 }
 0x919   :  { %2109 = vadd.xlane.f32.xlu1 %v2108_v5  ;;  %v15190_v33 = vpop.eup %12692 }
 0x91a   :  { %v2142_v0 = vmul.f32 %v15190_v33, %v18756_v19  ;;  %v15201_v11 = vpop.eup %12694 }
 0x91b   :  { %v2145_v43 = vmul.f32 %v15201_v11, %v18756_v19  ;;  %v15216_v5 = vpop.eup %12696 }
 0x91c   :  { %11197 = vmatmul.mubr.msk.f32.vlgmr.msra.gmra.mrb[48].mxu1 %vm426_vm0, %v18753_v24  ;;  %v2147_v63 = vmul.f32 %v15216_v5, %v18756_v19 }
 0x91d   :  { %11199 = vmatprep.mubr.msk.f32.mxu1 %vm426_vm0, %v18754_v12  ;;  %11933 = vmatpush3.bf16.xpose.msk.msra.mxu1 %vm14232_vm4, %v11928_v18  ;;  %v2078_v18 = vsub.f32 %v18759_v17, %v14899_v2  ;;  %v18762_v2 = vld [vmem:[#allocation95_spill] sm:$0xff]  ;;  %v18773_v17 = vld [vmem:[#allocation93_spill] sm:$0xff] }
 0x91e   :  { %2118 = vadd.xlane.f32.xlu1 %v2117_v8  ;;  %11936 = vmatprep.subr.msk.bf16.mxu1 %vm14232_vm4, %v11934_v4  ;;  %v12489_v44 = vunpack.i.h.bf16 %v18762_v2  ;;  %v12488_v57 = vunpack.i.l.bf16 %v18762_v2  ;;  %v18774_v2 = vld [vmem:[#allocation101_spill] sm:$0xff] }
 0x91f   :  { %v2092_v29 = vmul.f32 1.442695, %v2078_v18  ;;  %v12494_v18 = vunpack.i.h.bf16 %v18773_v17 }
 0x920   :  { %11200 = vmatmul.mubr.msk.f32.gmra.mrb[50].mxu1 %vm426_vm0, %v18757_v7  ;;  %v11946_v47 = vpack.c.bf16 %v12489_v44, %v12488_v57  ;;  %v18767_v7 = vld [vmem:[#allocation55_spill] sm:$0xff]  ;;  %v12499_v44 = vunpack.i.h.bf16 %v18774_v2 }
 0x921   :  { %11202 = vmatprep.mubr.msk.f32.mxu1 %vm426_vm0, %v18758_v23  ;;  %2188 = vrot.lane.b32.xlu0 %v2140_v36, %s13484_s25  ;;  %12704 = vpow2.f32 %v2092_v29  ;;  %v18765_v36 = vld [vmem:[#allocation53_spill] sm:$0xff]  ;;  %v18768_v23 = vld [vmem:[#allocation63_spill] sm:$0xff]  ;;  %v2628_v29 = vsub.f32 %v15024_v48, %v15028_v1  ;;  %v2650_v48 = vsel %vm2015_vm5, %v15067_v3, 0.0  ;;  %v18777_v1 = vld [vmem:[#allocation96_spill] sm:$0xff] }
 0x924   :  { %11203 = vmatmul.mubr.msk.f32.gmra.mrb[52].mxu1 %vm426_vm0, %v18760_v42  ;;  %v12493_v42 = vunpack.i.l.bf16 %v18773_v17  ;;  %v5129_v17 = vpop.permute.xlu0 %5128 }
 0x925   :  { %11205 = vmatprep.mubr.msk.f32.mxu1 %vm426_vm0, %v18761_v59  ;;  %11939 = vmatpush3.bf16.xpose.msk.msra.mxu1 %vm14232_vm4, %v11934_v4  ;;  %v15220_v4 = vpop.eup %12698  ;;  %v2665_v59 = vsel %vm2015_vm5, %v15110_v30, 0.0  ;;  %v2630_v30 = vsub.f32 %v15034_v61, %v15039_v41  ;;  %v12503_v61 = vunpack.i.l.bf16 %v18777_v1 }
 0x926   :  { %2192 = vrot.lane.b32.xlu0 %v2142_v0, %s13484_s25  ;;  %11942 = vmatprep.subr.msk.bf16.mxu1 %vm14232_vm4, %v11940_v16  ;;  %v2141_v24 = vmul.f32 %v15220_v4, %v18756_v19  ;;  %v15229_v12 = vpop.eup %12700  ;;  %v12024_v0 = vpack.c.bf16 %v12494_v18, %v12493_v42 }
 0x927   :  { %v2143_v8 = vmul.f32 %v15229_v12, %v18756_v19  ;;  %v15237_v25 = vpop.eup %12702  ;;  %v2642_v41 = vmul.f32 1.442695, %v2630_v30 }
 0x928   :  { %11206 = vmatmul.mubr.msk.f32.gmra.mrb[54].mxu1 %vm426_vm0, %v18763_v54  ;;  %v2144_v62 = vmul.f32 %v15237_v25, %v18756_v19  ;;  %v18775_v54 = vld [vmem:[#allocation83_spill] sm:$0xff] }
 0x929   :  { %11272 = vmatprep.mubr.msk.f32.mxu1 %vm426_vm0, %v18764_v10  ;;  %v12504_v10 = vunpack.i.h.bf16 %v18777_v1 }
 0x92a   :  { %2198 = vrot.lane.b32.xlu0 %v2145_v43, %s13484_s25  ;;  %v18776_v43 = vld [vmem:[#allocation85_spill] sm:$0xff] }
 0x92b   :  { %v15244_v50 = vpop.eup %12704  ;;  %v12036_v3 = vpack.c.bf16 %v12504_v10, %v12503_v61 }
 0x92c   :  { %v2146_v6 = vmul.f32 %v15244_v50, %v18756_v19 }
 0x92d   :  { %11945 = vmatpush3.bf16.xpose.msk.msra.mxu1 %vm14232_vm4, %v11940_v16  ;;  %v18769_v16 = vld [vmem:[#allocation62_spill] sm:$0xff] }
 0x92e   :  { %2202 = vrot.lane.b32.xlu0 %v2147_v63, %s13484_s25  ;;  %11948 = vmatprep.subr.msk.bf16.mxu1 %vm14232_vm4, %v11946_v47  ;;  %v18778_v63 = vld [vmem:[#allocation99_spill] sm:$0xff] }
 0x92f   :  { %2190 = vrot.lane.b32.xlu1 %v2141_v24, %s13484_s25  ;;  %v18779_v24 = vld [vmem:[#allocation87_spill] sm:$0xff] }
 0x933   :  { %2194 = vrot.lane.b32.xlu1 %v2143_v8, %s13484_s25  ;;  %v2659_v8 = vsel %vm2015_vm5, %v15102_v58, 0.0  ;;  %v5127_v58 = vpop.permute.xlu1 %5126 }
 0x935   :  { %11951 = vmatpush3.bf16.xpose.msk.msra.mxu1 %vm14232_vm4, %v11946_v47  ;;  %v2632_v47 = vsub.f32 %v15060_v45, %v15065_v26  ;;  %v2662_v26 = vsel %vm2015_vm5, %v15104_v27, 0.0 }
 0x936   :  { %11970 = vmatprep.subr.msk.bf16.mxu1 %vm14232_vm4, %v18765_v36 }
 0x937   :  { %2196 = vrot.lane.b32.xlu1 %v2144_v62, %s13484_s25  ;;  %v2646_v62 = vmul.f32 1.442695, %v2632_v47  ;;  %v15354_v18 = vpop.xlane.xlu1 %3966 }
 0x938   :  { %18785 = vst [vmem:[#allocation64_spill] sm:$0xff] %v15354_v18 }
 0x93b   :  { %2200 = vrot.lane.b32.xlu1 %v2146_v6, %s13484_s25  ;;  %v18781_v6 = vld [vmem:[#allocation100_spill] sm:$0xff] }
 0x93c   :  { %11273 = vmatmul.mubr.msk.f32.vlgmr.msra.gmra.mrb[56].mxu1 %vm426_vm0, %v18766_v14  ;;  %v18782_v14 = vld [vmem:[#allocation102_spill] sm:$0xff] }
 0x93d   :  { %11275 = vmatprep.mubr.msk.f32.mxu1 %vm426_vm0, %v14530_v15  ;;  %11973 = vmatpush3.bf16.xpose.msk.msra.mxu1 %vm14232_vm4, %v18765_v36  ;;  %v18770_v15 = vld [vmem:[#allocation57_spill] sm:$0xff] }
 0x93e   :  { %11976 = vmatprep.subr.msk.bf16.mxu1 %vm14232_vm4, %v18767_v7  ;;  %v18780_v36 = vld [vmem:[#allocation89_spill] sm:$0xff] }
 0x940   :  { %11276 = vmatmul.mubr.msk.f32.gmra.mrb[58].mxu1 %vm426_vm0, %v18768_v23  ;;  %v12508_v23 = vunpack.i.l.bf16 %v18782_v14 }
 0x941   :  { %11278 = vmatprep.mubr.msk.f32.mxu1 %vm426_vm0, %v18769_v16  ;;  %v18783_v16 = vld [vmem:[#allocation91_spill] sm:$0xff] }
 0x944   :  { %11279 = vmatmul.mubr.msk.f32.gmra.mrb[60].mxu1 %vm426_vm0, %v14555_v22  ;;  %v2653_v22 = vsel %vm2015_vm5, %v15079_v60, 0.0  ;;  %v2626_v60 = vsub.f32 %v15009_v46, %v15013_v49  ;;  %v2638_v49 = vmul.f32 1.442695, %v2628_v29 }
 0x945   :  { %11281 = vmatprep.mubr.msk.f32.mxu1 %vm426_vm0, %v14565_v51  ;;  %11979 = vmatpush3.bf16.xpose.msk.msra.mxu1 %vm14232_vm4, %v18767_v7  ;;  %v18772_v51 = vld [vmem:[#allocation60_spill] sm:$0xff]  ;;  %v12509_v7 = vunpack.i.h.bf16 %v18782_v14 }
 0x946   :  { %11982 = vmatprep.subr.msk.bf16.mxu1 %vm14232_vm4, %v18770_v15  ;;  %v2634_v57 = vmul.f32 1.442695, %v2626_v60  ;;  %v15369_v60 = vpop.xlane.xlu0 %3975 }
 0x947   :  { %v12042_v42 = vpack.c.bf16 %v12509_v7, %v12508_v23  ;;  %18786 = vst [vmem:[#allocation80_spill] sm:$0xff] %v15369_v60  ;;  %v248_v7 = vld [vmem:[#allocation4] sm:$0xff]  ;;  %v249_v23 = vld [vmem:[#allocation4 + $0x8] sm:$0xff] }
 0x948   :  { %11282 = vmatmul.mubr.msk.f32.gmra.mrb[62].mxu1 %vm426_vm0, %v14567_v56  ;;  %v2656_v56 = vsel %vm2015_vm5, %v15087_v53, 0.0  ;;  %v12498_v53 = vunpack.i.l.bf16 %v18774_v2  ;;  %12706 = vpow2.f32 %v2634_v57 }
 0x949   :  { %11328 = vmatprep.mubr.msk.f32.mxu1 %vm426_vm0, %v18771_v31  ;;  %12708 = vpow2.f32 %v2638_v49  ;;  %v18784_v31 = vld [vmem:[#allocation103_spill] sm:$0xff] }
 0x94a   :  { %v12030_v46 = vpack.c.bf16 %v12499_v44, %v12498_v53  ;;  %12710 = vpow2.f32 %v2642_v41  ;;  %v2633_v53 = vsub.f32 %v15075_v40, %v15083_v20  ;;  %v5135_v57 = vpop.permute.xlu0 %5134 }
 0x94b   :  { %12712 = vpow2.f32 %v2646_v62 }
 0x94c   :  { %v2648_v49 = vmul.f32 1.442695, %v2633_v53 }
 0x94d   :  { %2654 = vadd.xlane.f32.xlu0 %v2653_v22  ;;  %11985 = vmatpush3.bf16.xpose.msk.msra.mxu1 %vm14232_vm4, %v18770_v15  ;;  %v2627_v15 = vsub.f32 %v15017_v52, %v15022_v21  ;;  %v2629_v52 = vsub.f32 %v15041_v9, %v15045_v13  ;;  %v2631_v13 = vsub.f32 %v15051_v35, %v15056_v39 }
 0x94e   :  { %11988 = vmatprep.subr.msk.bf16.mxu1 %vm14232_vm4, %v18772_v51 }
 0x94f   :  { %v2640_v9 = vmul.f32 1.442695, %v2629_v52 }
 0x951   :  { %2657 = vadd.xlane.f32.xlu0 %v2656_v56  ;;  %v2636_v56 = vmul.f32 1.442695, %v2627_v15 }
 0x952   :  { %v15334_v45 = vpop.eup %12706 }
 0x953   :  { %v2690_v22 = vmul.f32 %v15334_v45, %v18756_v19  ;;  %v15350_v27 = vpop.eup %12708  ;;  %12714 = vpow2.f32 %v2636_v56 }
 0x954   :  { %v2692_v21 = vmul.f32 %v15350_v27, %v18756_v19  ;;  %12716 = vpow2.f32 %v2640_v9 }
 0x955   :  { %2666 = vadd.xlane.f32.xlu0 %v2665_v59  ;;  %11991 = vmatpush3.bf16.xpose.msk.msra.mxu1 %vm14232_vm4, %v18772_v51  ;;  %v2668_v51 = vsel %vm2015_vm5, %v15122_v32, 0.0  ;;  %v2671_v32 = vsel %vm2015_vm5, %v15134_v55, 0.0  ;;  %v15374_v59 = vpop.xlane.xlu1 %3969  ;;  %v2644_v55 = vmul.f32 1.442695, %v2631_v13 }
 0x956   :  { %12026 = vmatprep.subr.msk.bf16.mxu1 %vm14232_vm4, %v12024_v0  ;;  %18787 = vst [vmem:[#allocation82_spill] sm:$0xff] %v15374_v59 }
 0x957   :  { %12718 = vpow2.f32 %v2644_v55 }
 0x958   :  { %12720 = vpow2.f32 %v2648_v49 }
 0x95c   :  { %11329 = vmatmul.mubr.msk.f32.vlgmr.msra.gmra.mrb[64].mxu1 %vm426_vm0, %v18775_v54 }
 0x95d   :  { %11331 = vmatprep.mubr.msk.f32.mxu1 %vm426_vm0, %v18776_v43  ;;  %12029 = vmatpush3.bf16.xpose.msk.msra.mxu1 %vm14232_vm4, %v12024_v0  ;;  %v15363_v0 = vpop.eup %12710  ;;  %v254_v43 = vld [vmem:[#allocation4 + $0x28] sm:$0xff] }
 0x95e   :  { %12032 = vmatprep.subr.msk.bf16.mxu1 %vm14232_vm4, %v12030_v46  ;;  %v2694_v2 = vmul.f32 %v15363_v0, %v18756_v19  ;;  %v15378_v44 = vpop.eup %12712  ;;  %v15402_v1 = vpack.c.bf16 %v254_v43, %v253_v37 }
 0x95f   :  { %2651 = vadd.xlane.f32.xlu1 %v2650_v48  ;;  %v2696_v35 = vmul.f32 %v15378_v44, %v18756_v19  ;;  %v15398_v20 = vpop.eup %12714  ;;  %v18789_v48 = vld [vmem:[#allocation98_spill] sm:$0xff] }
 0x960   :  { %11332 = vmatmul.mubr.msk.f32.gmra.mrb[66].mxu1 %vm426_vm0, %v18778_v63  ;;  %18790 = vst [vmem:[#allocation79_spill] sm:$0xff] %v15402_v1  ;;  %v2691_v47 = vmul.f32 %v15398_v20, %v18756_v19  ;;  %11865 = vmatprep.subr.bf16.mxu0 %v15402_v1  ;;  %v15412_v63 = vpop.eup %12716 }
 0x961   :  { %11334 = vmatprep.mubr.msk.f32.mxu1 %vm426_vm0, %v18779_v24  ;;  %11867 = vmatpush3.bf16.msra.mxu0 %v15402_v1  ;;  %v15431_v14 = vpop.eup %12718 }
 0x963   :  { %2660 = vadd.xlane.f32.xlu1 %v2659_v8  ;;  %v255_v8 = vld [vmem:[#allocation4 + $0x30] sm:$0xff] }
 0x964   :  { %11335 = vmatmul.mubr.msk.f32.gmra.mrb[68].mxu1 %vm426_vm0, %v18780_v36  ;;  %v15392_v30 = vpop.xlane.xlu0 %3978 }
 0x965   :  { %11337 = vmatprep.mubr.msk.f32.mxu1 %vm426_vm0, %v18781_v6  ;;  %12035 = vmatpush3.bf16.xpose.msk.msra.mxu1 %vm14232_vm4, %v12030_v46  ;;  %v5131_v46 = vpop.permute.xlu1 %5130  ;;  %18788 = vst [vmem:[#allocation84_spill] sm:$0xff] %v15392_v30 }
 0x966   :  { %12038 = vmatprep.subr.msk.bf16.mxu1 %vm14232_vm4, %v12036_v3 }
 0x967   :  { %2663 = vadd.xlane.f32.xlu1 %v2662_v26 }
 0x968   :  { %11338 = vmatmul.mubr.msk.f32.gmra.mrb[70].mxu1 %vm426_vm0, %v18783_v16  ;;  %v15414_v24 = vpop.xlane.xlu0 %3981  ;;  %v15436_v16 = vpack.c.bf16 %v249_v23, %v248_v7 }
 0x969   :  { %11424 = vmatprep.mubr.msk.f32.mxu1 %vm426_vm0, %v18784_v31  ;;  %v5133_v10 = vpop.permute.xlu1 %5132  ;;  %18791 = vst [vmem:[#allocation94_spill] sm:$0xff] %v15414_v24  ;;  %v2695_v31 = vmul.f32 %v15431_v14, %v18756_v19 }
 0x96a   :  { %18794 = vst [vmem:[#allocation81_spill] sm:$0xff] %v15436_v16 }
 0x96b   :  { %2730 = vrot.lane.b32.xlu0 %v2690_v22, %s13482_s17  ;;  %2669 = vadd.xlane.f32.xlu1 %v2668_v51  ;;  %v15444_v22 = vpop.eup %12720 }
 0x96c   :  { %v15438_v15 = vpop.xlane.xlu0 %3984 }
 0x96d   :  { %12041 = vmatpush3.bf16.xpose.msk.msra.mxu1 %vm14232_vm4, %v12036_v3  ;;  %v256_v3 = vld [vmem:[#allocation4 + $0x38] sm:$0xff]  ;;  %v15421_v36 = vpop.xlane.xlu1 %3972  ;;  %18795 = vst [vmem:[#allocation67_spill] sm:$0xff] %v15438_v15 }
 0x96e   :  { %12044 = vmatprep.subr.msk.bf16.mxu1 %vm14232_vm4, %v12042_v42  ;;  %v15419_v62 = vpack.c.bf16 %v256_v3, %v255_v8  ;;  %18793 = vst [vmem:[#allocation76_spill] sm:$0xff] %v15421_v36 }
 0x96f   :  { %2734 = vrot.lane.b32.xlu0 %v2692_v21, %s13482_s17  ;;  %2672 = vadd.xlane.f32.xlu1 %v2671_v32 }
 0x970   :  { %18792 = vst [vmem:[#allocation86_spill] sm:$0xff] %v15419_v62  ;;  %11869 = vmatprep.subr.bf16.mxu0 %v15419_v62 }
 0x971   :  { %11871 = vmatpush3.bf16.msra.mxu0 %v15419_v62  ;;  %v5137_v51 = vpop.permute.xlu1 %5136 }
 0x972   :  { %11873 = vmatprep.subr.bf16.mxu0 %v15436_v16 }
 0x973   :  { %2738 = vrot.lane.b32.xlu0 %v2694_v2, %s13482_s17 }
 0x974   :  { %v15383_v29 = vpop.f32.mrb[32].mxu1 }
 0x975   :  { %12047 = vmatpush3.bf16.xpose.msk.msra.mxu1 %vm14232_vm4, %v12042_v42  ;;  %v15389_v39 = vpop.f32.mrb[33].mxu1  ;;  %v15450_v42 = vpop.xlane.xlu0 %3987 }
 0x976   :  { %18796 = vst [vmem:[#allocation88_spill] sm:$0xff] %v15450_v42 }
 0x977   :  { %2742 = vrot.lane.b32.xlu0 %v2696_v35, %s13482_s17 }
 0x978   :  { %v15394_v54 = vpop.f32.mrb[34].mxu1 }
 0x979   :  { %v15396_v40 = vpop.f32.mrb[35].mxu1  ;;  %v15453_v56 = vpop.xlane.xlu0 %3343 }
 0x97a   :  { %18797 = vst [vmem:[#allocation77_spill] sm:$0xff] %v15453_v56 }
 0x97c   :  { %11425 = vmatmul.mubr.msk.f32.vlgmr.msra.gmra.mrb[72].mxu1 %vm426_vm0, %v18789_v48  ;;  %v15404_v61 = vpop.f32.mrb[36].mxu1 }
 0x97d   :  { %11427 = vmatprep.mubr.msk.f32.mxu1 %vm426_vm0, %v5127_v58  ;;  %v15407_v41 = vpop.f32.mrb[37].mxu1  ;;  %v2693_v58 = vmul.f32 %v15412_v63, %v18756_v19  ;;  %v15455_v52 = vpop.xlane.xlu0 %3346 }
 0x97e   :  { %18798 = vst [vmem:[#allocation112_spill] sm:$0xff] %v15455_v52 }
 0x980   :  { %2732 = vrot.lane.b32.xlu1 %v2691_v47, %s13482_s17  ;;  %11428 = vmatmul.mubr.msk.f32.gmra.mrb[74].mxu1 %vm426_vm0, %v5129_v17  ;;  %v15423_v6 = vpop.f32.mrb[38].mxu1  ;;  %v2697_v17 = vmul.f32 %v15444_v22, %v18756_v19 }
 0x981   :  { %11430 = vmatprep.mubr.msk.f32.mxu1 %vm426_vm0, %v5131_v46  ;;  %v15426_v26 = vpop.f32.mrb[39].mxu1  ;;  %v15457_v21 = vpop.xlane.xlu0 %3349 }
 0x982   :  { %18799 = vst [vmem:[#allocation90_spill] sm:$0xff] %v15457_v21 }
 0x984   :  { %2736 = vrot.lane.b32.xlu1 %v2693_v58, %s13482_s17  ;;  %11431 = vmatmul.mubr.msk.f32.gmra.mrb[76].mxu1 %vm426_vm0, %v5133_v10 }
 0x985   :  { %11433 = vmatprep.mubr.msk.f32.mxu1 %vm426_vm0, %v5135_v57  ;;  %v15459_v32 = vpop.xlane.xlu0 %3352 }
 0x986   :  { %18800 = vst [vmem:[#allocation78_spill] sm:$0xff] %v15459_v32 }
 0x988   :  { %2740 = vrot.lane.b32.xlu1 %v2695_v31, %s13482_s17  ;;  %11434 = vmatmul.mubr.msk.f32.gmra.mrb[78].mxu1 %vm426_vm0, %v5137_v51 }
 0x989   :  { %v15461_v9 = vpop.xlane.xlu0 %3358 }
 0x98a   :  { %18801 = vst [vmem:[#allocation95_spill] sm:$0xff] %v15461_v9 }
 0x98c   :  { %2744 = vrot.lane.b32.xlu1 %v2697_v17, %s13482_s17 }
 0x98d   :  { %v15463_v13 = vpop.xlane.xlu0 %3364 }
 0x98e   :  { %18802 = vst [vmem:[#allocation92_spill] sm:$0xff] %v15463_v13 }
 0x991   :  { %v15467_v55 = vpop.xlane.xlu0 %2097 }
 0x995   :  { %v15471_v53 = vpop.xlane.xlu0 %2106 }
 0x996   :  { %v15465_v2 = vpop.xlane.xlu1 %3355 }
 0x997   :  { %18803 = vst [vmem:[#allocation61_spill] sm:$0xff] %v15465_v2 }
 0x999   :  { %v15475_v35 = vpop.xlane.xlu0 %2112 }
 0x99a   :  { %v15469_v19 = vpop.xlane.xlu1 %3361 }
 0x99b   :  { %18804 = vst [vmem:[#allocation53_spill] sm:$0xff] %v15469_v19 }
 0x99d   :  { %v15479_v49 = vpop.xlane.xlu0 %2115 }
 0x99e   :  { %v15473_v57 = vpop.xlane.xlu1 %2100 }
 0x9a1   :  { %v15483_v43 = vpop.permute.xlu0 %2188 }
 0x9a2   :  { %v15477_v46 = vpop.xlane.xlu1 %2103 }
 0x9a5   :  { %v15489_v8 = vpop.permute.xlu0 %2192 }
 0x9a6   :  { %v15481_v37 = vpop.xlane.xlu1 %2109 }
 0x9a9   :  { %v15497_v23 = vpop.permute.xlu0 %2198 }
 0x9ab   :  { %v15487_v10 = vpop.xlane.xlu1 %2118 }
 0x9ad   :  { %v15505_v62 = vpop.permute.xlu0 %2202 }
 0x9af   :  { %v15493_v58 = vpop.permute.xlu1 %2190 }
 0x9b3   :  { %v15503_v17 = vpop.permute.xlu1 %2194 }
 0x9b7   :  { %v15511_v36 = vpop.permute.xlu1 %2196 }
 0x9bb   :  { %v15513_v42 = vpop.permute.xlu1 %2200 }
 0x9cf   :  { %v15485_v48 = vpop.f32.mrb[40].mxu1 }
 0x9d0   :  { %v2844_v47 = vpop.f32.mrb[41].mxu1 }
 0x9d4   :  { %v15491_v3 = vpop.f32.mrb[42].mxu1 }
 0x9d5   :  { %v15495_v7 = vpop.f32.mrb[43].mxu1 }
 0x9d9   :  { %v15499_v31 = vpop.f32.mrb[44].mxu1 }
 0x9da   :  { %v15501_v51 = vpop.f32.mrb[45].mxu1  ;;  %v2655_v18 = vpop.xlane.xlu0 %2654 }
 0x9db   :  { %v2675_v32 = vadd.f32 %v15398_v20, %v2655_v18 }
 0x9de   :  { %v2658_v24 = vpop.xlane.xlu0 %2657 }
 0x9df   :  { %v15507_v1 = vpop.f32.mrb[46].mxu1 }
 0x9e0   :  { %v15509_v15 = vpop.f32.mrb[47].mxu1 }
 0x9e2   :  { %v2667_v59 = vpop.xlane.xlu0 %2666 }
 0x9e6   :  { %v2731_v38 = vpop.permute.xlu0 %2730 }
 0x9e7   :  { %v2845_v20 = vadd.f32 %v2844_v47, %v2731_v38 }
 0x9ec   :  { %v2652_v60 = vpop.xlane.xlu1 %2651 }
 0x9ed   :  { %v2674_v30 = vadd.f32 %v15334_v45, %v2652_v60  ;;  %v2676_v45 = vadd.f32 %v15350_v27, %v2658_v24 }
 0x9ef   :  { %12722 = vrcp.f32 %v2674_v30  ;;  %v15516_v19 = vpop.f32.mrb[48].mxu1 }
 0x9f0   :  { %v2661_v13 = vpop.xlane.xlu1 %2660  ;;  %v15518_v2 = vpop.f32.mrb[49].mxu1  ;;  %v3369_v9 = vsel %vm2015_vm5, %v15516_v19, -inf  ;;  %12724 = vrcp.f32 %v2675_v32 }
 0x9f1   :  { %18805 = vst [vmem:[#allocation58_spill] sm:$0xff] %v15518_v2  ;;  %3370 = vmax.xlane.f32.xlu0 %v3369_v9  ;;  %v3366_v21 = vsel %vm2015_vm5, %v15518_v2, -inf  ;;  %12726 = vrcp.f32 %v2676_v45  ;;  %v2677_v27 = vadd.f32 %v15412_v63, %v2661_v13  ;;  %v2679_v63 = vadd.f32 %v15431_v14, %v2667_v59  ;;  %v250_v59 = vld [vmem:[#allocation4 + $0x10] sm:$0xff]  ;;  %v251_v14 = vld [vmem:[#allocation4 + $0x18] sm:$0xff] }
 0x9f2   :  { %3367 = vmax.xlane.f32.xlu1 %v3366_v21 }
 0x9f3   :  { %v15525_v56 = vpop.f32.mrb[50].mxu1 }
 0x9f4   :  { %18806 = vst [vmem:[#allocation55_spill] sm:$0xff] %v15525_v56  ;;  %v2664_v60 = vpop.xlane.xlu1 %2663  ;;  %v15528_v30 = vpop.f32.mrb[51].mxu1  ;;  %v3375_v52 = vsel %vm2015_vm5, %v15525_v56, -inf }
 0x9f5   :  { %18807 = vst [vmem:[#allocation63_spill] sm:$0xff] %v15528_v30  ;;  %3376 = vmax.xlane.f32.xlu0 %v3375_v52  ;;  %v3372_v9 = vsel %vm2015_vm5, %v15528_v30, -inf  ;;  %v2678_v21 = vadd.f32 %v15363_v0, %v2664_v60  ;;  %v2735_v0 = vpop.permute.xlu0 %2734 }
 0x9f6   :  { %3373 = vmax.xlane.f32.xlu1 %v3372_v9 }
 0x9f7   :  { %v15535_v18 = vpop.f32.mrb[52].mxu1  ;;  %12728 = vrcp.f32 %v2678_v21  ;;  %v2120_v21 = vadd.f32 %v15168_v34, %v15467_v55 }
 0x9f8   :  { %v2670_v24 = vpop.xlane.xlu1 %2669  ;;  %v15538_v2 = vpop.f32.mrb[53].mxu1  ;;  %v3381_v56 = vsel %vm2015_vm5, %v15535_v18, -inf  ;;  %12730 = vrcp.f32 %v2677_v27 }
 0x9f9   :  { %v12723_v52 = vpop.eup %12722  ;;  %v3378_v30 = vsel %vm2015_vm5, %v15538_v2, -inf  ;;  %v2680_v45 = vadd.f32 %v15378_v44, %v2670_v24  ;;  %v2739_v27 = vpop.permute.xlu0 %2738 }
 0x9fa   :  { %3379 = vmax.xlane.f32.xlu0 %v3378_v30  ;;  %3382 = vmax.xlane.f32.xlu1 %v3381_v56  ;;  %v2883_v32 = vmul.f32 %v12723_v52, %v2845_v20  ;;  %v12725_v9 = vpop.eup %12724  ;;  %v2855_v20 = vadd.f32 %v15495_v7, %v2735_v0  ;;  %v18808_v52 = vld [vmem:[#allocation113_spill] sm:$0xff]  ;;  %v18810_v0 = vld [vmem:[#allocation114_spill] sm:$0xff] }
 0x9fb   :  { %v15545_v38 = vpop.f32.mrb[54].mxu1  ;;  %12732 = vrcp.f32 %v2680_v45 }
 0x9fc   :  { %v15548_v13 = vpop.f32.mrb[55].mxu1  ;;  %v2673_v47 = vpop.xlane.xlu1 %2672  ;;  %11148 = vmatprep.mubr.msk.f32.mxu0 %vm426_vm0, %v2883_v32  ;;  %v3387_v60 = vsel %vm2015_vm5, %v15545_v38, -inf  ;;  %12734 = vrcp.f32 %v2679_v63  ;;  %v4519_v32 = vsel %vm426_vm0, %v18808_v52, 0.0  ;;  %v15564_v63 = vpack.c.bf16 %v251_v14, %v250_v59 }
 0x9fd   :  { %v3384_v56 = vsel %vm2015_vm5, %v15548_v13, -inf  ;;  %v2681_v44 = vadd.f32 %v15444_v22, %v2673_v47  ;;  %v2122_v22 = vadd.f32 %v15190_v33, %v15477_v46  ;;  %v2121_v47 = vadd.f32 %v15220_v4, %v15473_v57  ;;  %v2743_v4 = vpop.permute.xlu0 %2742 }
 0x9fe   :  { %3385 = vmax.xlane.f32.xlu0 %v3384_v56  ;;  %3388 = vmax.xlane.f32.xlu1 %v3387_v60  ;;  %v12727_v60 = vpop.eup %12726  ;;  %18809 = vst [vmem:[#allocation62_spill] sm:$0xff] %v15564_v63  ;;  %v4522_v56 = vsel %vm426_vm0, %v18810_v0, 0.0  ;;  %v2865_v33 = vadd.f32 %v15501_v51, %v2739_v27  ;;  %v2123_v46 = vadd.f32 %v15229_v12, %v15471_v53  ;;  %v18811_v12 = vld [vmem:[#allocation66_spill] sm:$0xff] }
 0x9ff   :  { %12736 = vrcp.f32 %v2681_v44  ;;  %v2885_v7 = vmul.f32 %v12727_v60, %v2855_v20  ;;  %v2124_v51 = vadd.f32 %v15237_v25, %v15481_v37  ;;  %v2125_v53 = vadd.f32 %v15201_v11, %v15475_v35 }
 0xa00   :  { %v2733_v30 = vpop.permute.xlu1 %2732  ;;  %12738 = vrcp.f32 %v2120_v21  ;;  %v2875_v21 = vadd.f32 %v15509_v15, %v2743_v4  ;;  %v2303_v25 = vadd.f32 %v15389_v39, %v15483_v43  ;;  %v2126_v27 = vadd.f32 %v15244_v50, %v15479_v49 }
 0xa01   :  { %v2850_v24 = vadd.f32 %v15485_v48, %v2733_v30  ;;  %v12729_v55 = vpop.eup %12728  ;;  %12740 = vrcp.f32 %v2122_v22  ;;  %v2127_v52 = vadd.f32 %v15216_v5, %v15487_v10  ;;  %v2308_v39 = vadd.f32 %v15383_v29, %v15493_v58 }
 0xa02   :  { %4520 = vadd.xlane.f32.xlu1 %v4519_v32  ;;  %v12731_v30 = vpop.eup %12730  ;;  %12742 = vrcp.f32 %v2121_v47  ;;  %v2887_v44 = vmul.f32 %v12729_v55, %v2865_v33  ;;  %v2313_v5 = vadd.f32 %v15396_v40, %v15489_v8  ;;  %v2318_v29 = vadd.f32 %v15394_v54, %v15503_v17 }
 0xa03   :  { %v2884_v45 = vmul.f32 %v12725_v9, %v2850_v24  ;;  %12744 = vrcp.f32 %v2123_v46  ;;  %v2323_v60 = vadd.f32 %v15407_v41, %v15511_v36  ;;  %v2328_v54 = vadd.f32 %v15404_v61, %v15497_v23  ;;  %v18814_v36 = vld [vmem:[#allocation54_spill] sm:$0xff] }
 0xa04   :  { %v2737_v34 = vpop.permute.xlu1 %2736  ;;  %12746 = vrcp.f32 %v2124_v51  ;;  %v2338_v46 = vadd.f32 %v15423_v6, %v15505_v62  ;;  %v4525_v6 = vsel %vm426_vm0, %v14989_v28, 0.0 }
 0xa05   :  { %v2860_v48 = vadd.f32 %v15491_v3, %v2737_v34  ;;  %11149 = vmatmul.mubr.msk.f32.vlgmr.msra.gmra.mrb[44].mxu0 %vm426_vm0, %v2884_v45  ;;  %v12733_v59 = vpop.eup %12732  ;;  %12748 = vrcp.f32 %v2125_v53  ;;  %v18812_v45 = vld [vmem:[#allocation52_spill] sm:$0xff] }
 0xa06   :  { %11875 = vmatpush3.bf16.msra.mxu0 %v15436_v16  ;;  %4523 = vadd.xlane.f32.xlu1 %v4522_v56  ;;  %v12735_v9 = vpop.eup %12734  ;;  %12750 = vrcp.f32 %v2126_v27  ;;  %v18813_v34 = vld [vmem:[#allocation68_spill] sm:$0xff]  ;;  %v18815_v56 = vld [vmem:[#allocation70_spill] sm:$0xff] }
 0xa07   :  { %v2886_v57 = vmul.f32 %v12731_v30, %v2860_v48  ;;  %11151 = vmatprep.mubr.msk.f32.mxu0 %vm426_vm0, %v2885_v7  ;;  %11877 = vmatprep.subr.bf16.mxu0 %v15564_v63  ;;  %12752 = vrcp.f32 %v2127_v52  ;;  %v2333_v7 = vadd.f32 %v15426_v26, %v15513_v42  ;;  %v258_v26 = vld [vmem:[#allocation4 + $0x40] sm:$0xff]  ;;  %v259_v42 = vld [vmem:[#allocation4 + $0x48] sm:$0xff]  ;;  %v18824_v27 = vld [vmem:[#allocation116_spill] sm:$0xff] }
 0xa08   :  { %v2741_v3 = vpop.permute.xlu1 %2740 }
 0xa09   :  { %v2870_v14 = vadd.f32 %v15499_v31, %v2741_v3  ;;  %11152 = vmatmul.mubr.msk.f32.gmra.mrb[46].mxu0 %vm426_vm0, %v2886_v57  ;;  %v2889_v31 = vmul.f32 %v12733_v59, %v2875_v21  ;;  %v12737_v24 = vpop.eup %12736  ;;  %v18816_v3 = vld [vmem:[#allocation71_spill] sm:$0xff]  ;;  %v15645_v59 = vpack.c.bf16 %v259_v42, %v258_v26 }
 0xa0a   :  { %11879 = vmatpush3.bf16.msra.mxu0 %v15564_v63  ;;  %11154 = vmatprep.mubr.msk.f32.mxu0 %vm426_vm0, %v2887_v44  ;;  %v12739_v11 = vpop.eup %12738  ;;  %v18818_v21 = vld [vmem:[#allocation115_spill] sm:$0xff] }
 0xa0b   :  { %v2888_v20 = vmul.f32 %v12735_v9, %v2870_v14  ;;  %11905 = vmatprep.subr.bf16.mxu0 %v18811_v12  ;;  %v2341_v50 = vmul.f32 %v12739_v11, %v2303_v25  ;;  %18817 = vst [vmem:[#allocation57_spill] sm:$0xff] %v15645_v59  ;;  %v18821_v25 = vld [vmem:[#allocation117_spill] sm:$0xff]  ;;  %v18826_v11 = vld [vmem:[#allocation119_spill] sm:$0xff] }
 0xa0c   :  { %v2745_v37 = vpop.permute.xlu1 %2744 }
 0xa0d   :  { %v2880_v15 = vadd.f32 %v15507_v1, %v2745_v37  ;;  %11155 = vmatmul.mubr.msk.f32.gmra.mrb[48].mxu0 %vm426_vm0, %v2888_v20  ;;  %v12741_v1 = vpop.eup %12740  ;;  %v4528_v20 = vsel %vm426_vm0, %v18818_v21, 0.0  ;;  %v4531_v37 = vsel %vm426_vm0, %v18821_v25, 0.0 }
 0xa0e   :  { %11157 = vmatprep.mubr.msk.f32.mxu0 %vm426_vm0, %v2889_v31  ;;  %v12743_v32 = vpop.eup %12742  ;;  %v2343_v47 = vmul.f32 %v12741_v1, %v2313_v5 }
 0xa0f   :  { %v2890_v35 = vmul.f32 %v12737_v24, %v2880_v15  ;;  %v15599_v43 = vpop.f32.mrb[56].mxu1  ;;  %v2342_v10 = vmul.f32 %v12743_v32, %v2308_v39  ;;  %v12745_v40 = vpop.eup %12744  ;;  %v4534_v15 = vsel %vm426_vm0, %v18824_v27, 0.0  ;;  %v18825_v24 = vld [vmem:[#allocation118_spill] sm:$0xff]  ;;  %v4540_v39 = vsel %vm426_vm0, %v18826_v11, 0.0  ;;  %v18830_v32 = vld [vmem:[#allocation59_spill] sm:$0xff] }
 0xa10   :  { %v15601_v49 = vpop.f32.mrb[57].mxu1  ;;  %v12747_v8 = vpop.eup %12746  ;;  %v2344_v17 = vmul.f32 %v12745_v40, %v2318_v29  ;;  %v4537_v52 = vsel %vm426_vm0, %v18825_v24, 0.0 }
 0xa11   :  { %11158 = vmatmul.mubr.msk.f32.gmra.mrb[50].mxu0 %vm426_vm0, %v2890_v35  ;;  %v2345_v55 = vmul.f32 %v12747_v8, %v2323_v60  ;;  %v12749_v0 = vpop.eup %12748  ;;  %v18827_v35 = vld [vmem:[#allocation56_spill] sm:$0xff] }
 0xa12   :  { %11168 = vmatprep.mubr.msk.f32.mxu0 %vm426_vm0, %v2341_v50  ;;  %v12751_v61 = vpop.eup %12750  ;;  %v2346_v23 = vmul.f32 %v12749_v0, %v2328_v54  ;;  %v18838_v54 = vld [vmem:[#allocation104_spill] sm:$0xff] }
 0xa13   :  { %v15609_v58 = vpop.f32.mrb[58].mxu1  ;;  %v12753_v33 = vpop.eup %12752  ;;  %v2347_v4 = vmul.f32 %v12751_v61, %v2333_v7  ;;  %v18843_v61 = vld [vmem:[#allocation112_spill] sm:$0xff] }
 0xa14   :  { %v15613_v22 = vpop.f32.mrb[59].mxu1  ;;  %12511 = vrot.lane.b32.xlu0 %v18812_v45, %s13484_s25  ;;  %v2348_v44 = vmul.f32 %v12753_v33, %v2338_v46  ;;  %v3998_v7 = vsel %vm2015_vm5, %v15609_v58, -inf }
 0xa15   :  { %11169 = vmatmul.mubr.msk.f32.vlgmr.msra.gmra.mrb[44].mxu0 %vm426_vm0, %v2342_v10  ;;  %v3995_v33 = vsel %vm2015_vm5, %v15613_v22, -inf }
 0xa16   :  { %11907 = vmatpush3.bf16.msra.mxu0 %v18811_v12  ;;  %11171 = vmatprep.mubr.msk.f32.mxu0 %vm426_vm0, %v2343_v47  ;;  %v18835_v47 = vld [vmem:[#allocation107_spill] sm:$0xff] }
 0xa17   :  { %11909 = vmatprep.subr.bf16.mxu0 %v18813_v34  ;;  %v15623_v41 = vpop.f32.mrb[60].mxu1  ;;  %12516 = vrot.lane.b32.xlu1 %v18814_v36, %s13484_s25 }
 0xa18   :  { %v15629_v48 = vpop.f32.mrb[61].mxu1  ;;  %v4004_v24 = vsel %vm2015_vm5, %v15623_v41, -inf }
 0xa19   :  { %11172 = vmatmul.mubr.msk.f32.gmra.mrb[46].mxu0 %vm426_vm0, %v2344_v17  ;;  %v18840_v17 = vld [vmem:[#allocation108_spill] sm:$0xff] }
 0xa1a   :  { %11911 = vmatpush3.bf16.msra.mxu0 %v18813_v34  ;;  %11174 = vmatprep.mubr.msk.f32.mxu0 %vm426_vm0, %v2345_v55  ;;  %v18841_v34 = vld [vmem:[#allocation105_spill] sm:$0xff]  ;;  %v18842_v55 = vld [vmem:[#allocation110_spill] sm:$0xff] }
 0xa1b   :  { %11913 = vmatprep.subr.bf16.mxu0 %v18815_v56  ;;  %v15635_v30 = vpop.f32.mrb[62].mxu1 }
 0xa1c   :  { %v15637_v57 = vpop.f32.mrb[63].mxu1 }
 0xa1d   :  { %11175 = vmatmul.mubr.msk.f32.gmra.mrb[48].mxu0 %vm426_vm0, %v2346_v23 }
 0xa1e   :  { %11915 = vmatpush3.bf16.msra.mxu0 %v18815_v56  ;;  %11177 = vmatprep.mubr.msk.f32.mxu0 %vm426_vm0, %v2347_v4  ;;  %v18844_v4 = vld [vmem:[#allocation77_spill] sm:$0xff] }
 0xa1f   :  { %11917 = vmatprep.subr.bf16.mxu0 %v18816_v3 }
 0xa21   :  { %11178 = vmatmul.mubr.msk.f32.gmra.mrb[50].mxu0 %vm426_vm0, %v2348_v44 }
 0xa22   :  { %11919 = vmatpush3.bf16.msra.mxu0 %v18816_v3  ;;  %v18845_v3 = vld [vmem:[#allocation58_spill] sm:$0xff] }
 0xa23   :  { %11921 = vmatprep.subr.bf16.mxu0 %v15645_v59 }
 0xa2f   :  { %v15650_v51 = vpop.f32.mrb[64].mxu1 }
 0xa30   :  { %v15652_v62 = vpop.f32.mrb[65].mxu1 }
 0xa33   :  { %v15656_v14 = vpop.f32.mrb[66].mxu1  ;;  %4526 = vadd.xlane.f32.xlu0 %v4525_v6 }
 0xa34   :  { %v15658_v9 = vpop.f32.mrb[67].mxu1 }
 0xa37   :  { %v15662_v12 = vpop.f32.mrb[68].mxu1  ;;  %4529 = vadd.xlane.f32.xlu0 %v4528_v20 }
 0xa38   :  { %18819 = vst [vmem:[#allocation97_spill] sm:$0xff] %v15662_v12  ;;  %v15664_v53 = vpop.f32.mrb[69].mxu1 }
 0xa39   :  { %18820 = vst [vmem:[#allocation60_spill] sm:$0xff] %v15664_v53 }
 0xa3b   :  { %v15668_v31 = vpop.f32.mrb[70].mxu1  ;;  %4532 = vadd.xlane.f32.xlu1 %v4531_v37  ;;  %v18846_v37 = vld [vmem:[#allocation78_spill] sm:$0xff] }
 0xa3c   :  { %18822 = vst [vmem:[#allocation93_spill] sm:$0xff] %v15668_v31  ;;  %v15670_v28 = vpop.f32.mrb[71].mxu1 }
 0xa3d   :  { %18823 = vst [vmem:[#allocation101_spill] sm:$0xff] %v15670_v28 }
 0xa3f   :  { %4535 = vadd.xlane.f32.xlu1 %v4534_v15 }
 0xa43   :  { %4538 = vadd.xlane.f32.xlu1 %v4537_v52 }
 0xa47   :  { %4541 = vadd.xlane.f32.xlu1 %v4540_v39  ;;  %v18847_v39 = vld [vmem:[#allocation90_spill] sm:$0xff] }
 0xa4d   :  { %12521 = vrot.lane.b32.xlu0 %v18827_v35, %s13484_s25 }
 0xa4f   :  { %v15680_v50 = vpop.f32.mrb[72].mxu1 }
 0xa50   :  { %18828 = vst [vmem:[#allocation83_spill] sm:$0xff] %v15680_v50  ;;  %v15682_v1 = vpop.f32.mrb[73].mxu1 }
 0xa51   :  { %18829 = vst [vmem:[#allocation85_spill] sm:$0xff] %v15682_v1  ;;  %12526 = vrot.lane.b32.xlu0 %v18830_v32, %s13484_s25 }
 0xa53   :  { %v15686_v5 = vpop.f32.mrb[74].mxu1 }
 0xa54   :  { %18831 = vst [vmem:[#allocation96_spill] sm:$0xff] %v15686_v5  ;;  %v15688_v10 = vpop.f32.mrb[75].mxu1 }
 0xa55   :  { %18832 = vst [vmem:[#allocation99_spill] sm:$0xff] %v15688_v10  ;;  %12541 = vrot.lane.b32.xlu0 %v18827_v35, %s13482_s17 }
 0xa57   :  { %v15692_v29 = vpop.f32.mrb[76].mxu1 }
 0xa58   :  { %18833 = vst [vmem:[#allocation87_spill] sm:$0xff] %v15692_v29  ;;  %12531 = vrot.lane.b32.xlu1 %v18812_v45, %s13482_s17  ;;  %v15696_v60 = vpop.f32.mrb[77].mxu1  ;;  %v18839_v45 = vld [vmem:[#allocation106_spill] sm:$0xff] }
 0xa59   :  { %18834 = vst [vmem:[#allocation89_spill] sm:$0xff] %v15696_v60  ;;  %5301 = vrot.lane.b32.xlu0 %v18835_v47, %s13484_s25 }
 0xa5b   :  { %v15700_v40 = vpop.f32.mrb[78].mxu1 }
 0xa5c   :  { %18836 = vst [vmem:[#allocation100_spill] sm:$0xff] %v15700_v40  ;;  %12536 = vrot.lane.b32.xlu1 %v18814_v36, %s13482_s17  ;;  %v15704_v8 = vpop.f32.mrb[79].mxu1  ;;  %v3992_v36 = vsel %vm2015_vm5, %v15599_v43, -inf }
 0xa5d   :  { %18837 = vst [vmem:[#allocation102_spill] sm:$0xff] %v15704_v8 }
 0xa60   :  { %12546 = vrot.lane.b32.xlu1 %v18830_v32, %s13482_s17 }
 0xa64   :  { %5291 = vrot.lane.b32.xlu1 %v18838_v54, %s13484_s25  ;;  %v18849_v54 = vld [vmem:[#allocation63_spill] sm:$0xff] }
 0xa68   :  { %5293 = vrot.lane.b32.xlu1 %v18839_v45, %s13484_s25 }
 0xa6c   :  { %5295 = vrot.lane.b32.xlu1 %v18840_v17, %s13484_s25 }
 0xa70   :  { %5297 = vrot.lane.b32.xlu1 %v18841_v34, %s13484_s25 }
 0xa74   :  { %5299 = vrot.lane.b32.xlu1 %v18842_v55, %s13484_s25 }
 0xa78   :  { %3993 = vmax.xlane.f32.xlu0 %v3992_v36 }
 0xa7c   :  { %3999 = vmax.xlane.f32.xlu0 %v3998_v7 }
 0xa7e   :  { %v3371_v0 = vpop.xlane.xlu0 %3370 }
 0xa7f   :  { %v3391_v23 = vmax.f32 %v3371_v0, %v18843_v61  ;;  %v3368_v56 = vpop.xlane.xlu1 %3367  ;;  %v4007_v0 = vsel %vm2015_vm5, %v15637_v57, -inf }
 0xa80   :  { %v3390_v26 = vmax.f32 %v3368_v56, %v18844_v4  ;;  %3996 = vmax.xlane.f32.xlu0 %v3995_v33  ;;  %v18850_v56 = vld [vmem:[#allocation95_spill] sm:$0xff] }
 0xa81   :  { %v3399_v42 = vsub.f32 %v15516_v19, %v3391_v23  ;;  %v3423_v46 = vsub.f32 %v18843_v61, %v3391_v23  ;;  %v18848_v19 = vld [vmem:[#allocation55_spill] sm:$0xff] }
 0xa82   :  { %v3398_v44 = vsub.f32 %v18845_v3, %v3390_v26  ;;  %v3422_v6 = vsub.f32 %v18844_v4, %v3390_v26  ;;  %v3377_v21 = vpop.xlane.xlu0 %3376  ;;  %v18851_v4 = vld [vmem:[#allocation61_spill] sm:$0xff] }
 0xa83   :  { %v3408_v20 = vmul.f32 1.442695, %v3399_v42  ;;  %v3432_v25 = vmul.f32 1.442695, %v3423_v46  ;;  %v3393_v27 = vmax.f32 %v3377_v21, %v18846_v37  ;;  %v3374_v15 = vpop.xlane.xlu1 %3373 }
 0xa84   :  { %v3406_v52 = vmul.f32 1.442695, %v3398_v44  ;;  %v3430_v11 = vmul.f32 1.442695, %v3422_v6  ;;  %v3392_v35 = vmax.f32 %v3374_v15, %v18847_v39  ;;  %4005 = vmax.xlane.f32.xlu0 %v4004_v24 }
 0xa85   :  { %12754 = vpow2.f32 %v3408_v20  ;;  %v3401_v32 = vsub.f32 %v18848_v19, %v3393_v27  ;;  %v3425_v47 = vsub.f32 %v18846_v37, %v3393_v27  ;;  %v4552_v20 = vsel %vm2015_vm5, %v15656_v14, -inf  ;;  %v18852_v27 = vld [vmem:[#allocation92_spill] sm:$0xff] }
 0xa86   :  { %12756 = vpow2.f32 %v3432_v25  ;;  %v3400_v45 = vsub.f32 %v18849_v54, %v3392_v35  ;;  %v3424_v17 = vsub.f32 %v18847_v39, %v3392_v35  ;;  %v260_v35 = vld [vmem:[#allocation4 + $0x50] sm:$0xff]  ;;  %v261_v19 = vld [vmem:[#allocation4 + $0x58] sm:$0xff] }
 0xa87   :  { %12758 = vpow2.f32 %v3406_v52  ;;  %v3412_v34 = vmul.f32 1.442695, %v3401_v32  ;;  %v3436_v55 = vmul.f32 1.442695, %v3425_v47  ;;  %v3383_v36 = vpop.xlane.xlu1 %3382  ;;  %v3380_v7 = vpop.xlane.xlu0 %3379  ;;  %v18853_v52 = vld [vmem:[#allocation53_spill] sm:$0xff] }
 0xa88   :  { %12760 = vpow2.f32 %v3430_v11  ;;  %v3410_v61 = vmul.f32 1.442695, %v3400_v45  ;;  %v3434_v23 = vmul.f32 1.442695, %v3424_v17  ;;  %v3395_v33 = vmax.f32 %v3383_v36, %v18850_v56  ;;  %4008 = vmax.xlane.f32.xlu0 %v4007_v0  ;;  %v18855_v36 = vld [vmem:[#allocation51_spill] sm:$0xff] }
 0xa89   :  { %12762 = vpow2.f32 %v3412_v34  ;;  %v3394_v26 = vmax.f32 %v3380_v7, %v18851_v4  ;;  %v4561_v17 = vsel %vm2015_vm5, %v15670_v28, -inf }
 0xa8a   :  { %12764 = vpow2.f32 %v3436_v55  ;;  %v3403_v42 = vsub.f32 %v15535_v18, %v3395_v33  ;;  %v3427_v46 = vsub.f32 %v18850_v56, %v3395_v33  ;;  %v18854_v55 = vld [vmem:[#allocation42_spill] sm:$0xff]  ;;  %v15762_v56 = vpack.c.bf16 %v261_v19, %v260_v35 }
 0xa8b   :  { %12766 = vpow2.f32 %v3410_v61  ;;  %v3402_v3 = vsub.f32 %v15538_v2, %v3394_v26  ;;  %v3426_v44 = vsub.f32 %v18851_v4, %v3394_v26  ;;  %v3389_v6 = vpop.xlane.xlu1 %3388  ;;  %v3386_v21 = vpop.xlane.xlu0 %3385  ;;  %v3489_v7 = vrot.slane %v18855_v36, %v18854_v55 }
 0xa8c   :  { %12768 = vpow2.f32 %v3434_v23  ;;  %v3416_v25 = vmul.f32 1.442695, %v3403_v42  ;;  %v3440_v37 = vmul.f32 1.442695, %v3427_v46  ;;  %v3397_v15 = vmax.f32 %v3389_v6, %v18852_v27  ;;  %4553 = vmax.xlane.f32.xlu0 %v4552_v20  ;;  %18856 = vst [vmem:[#allocation91_spill] sm:$0xff] %v15762_v56 }
 0xa8d   :  { %v3414_v24 = vmul.f32 1.442695, %v3402_v3  ;;  %v3438_v18 = vmul.f32 1.442695, %v3426_v44  ;;  %v3396_v11 = vmax.f32 %v3386_v21, %v18853_v52  ;;  %v4001_v35 = vsel %vm2015_vm5, %v15629_v48, -inf }
 0xa8e   :  { %12770 = vpow2.f32 %v3416_v25  ;;  %v3405_v2 = vsub.f32 %v15545_v38, %v3397_v15  ;;  %v3429_v39 = vsub.f32 %v18852_v27, %v3397_v15  ;;  %v3989_v27 = vsel %vm2015_vm5, %v15601_v49, -inf }
 0xa8f   :  { %v12755_v32 = vpop.eup %12754  ;;  %12772 = vpow2.f32 %v3440_v37  ;;  %v3404_v47 = vsub.f32 %v15548_v13, %v3396_v11  ;;  %v3428_v54 = vsub.f32 %v18853_v52, %v3396_v11  ;;  %v12512_v45 = vpop.permute.xlu0 %12511 }
 0xa90   :  { %v15756_v34 = vpop.eup %12756  ;;  %12774 = vpow2.f32 %v3414_v24  ;;  %v3420_v38 = vmul.f32 1.442695, %v3405_v2  ;;  %v3444_v0 = vmul.f32 1.442695, %v3429_v39  ;;  %4562 = vmax.xlane.f32.xlu0 %v4561_v17  ;;  %v12514_v4 = vunpack.i.h.bf16 %v12512_v45 }
 0xa91   :  { %v15760_v61 = vpop.eup %12758  ;;  %12776 = vpow2.f32 %v3438_v18  ;;  %v3418_v23 = vmul.f32 1.442695, %v3404_v47  ;;  %v3442_v13 = vmul.f32 1.442695, %v3428_v54  ;;  %v15769_v26 = vmul.f32 %v15756_v34, %v3489_v7 }
 0xa92   :  { %v15764_v33 = vpop.eup %12760  ;;  %12778 = vpow2.f32 %v3420_v38  ;;  %11224 = vmatprep.mubr.msk.f32.mxu0 %vm2015_vm5, %v15760_v61  ;;  %v12513_v46 = vunpack.i.l.bf16 %v12512_v45  ;;  %v3449_v3 = vsel %vm2015_vm5, %v12755_v32, 0.0  ;;  %v4010_v38 = vsel %vm2015_vm5, %v15635_v30, -inf }
 0xa93   :  { %v15771_v42 = vpop.eup %12762  ;;  %12780 = vpow2.f32 %v3444_v0  ;;  %11225 = vmatmul.mubr.msk.f32.vlgmr.msra.gmra.mrb[52].mxu0 %vm2015_vm5, %v12755_v32  ;;  %v15776_v44 = vmul.f32 %v15764_v33, %v3489_v7 }
 0xa94   :  { %v15778_v6 = vpop.eup %12764  ;;  %12782 = vpow2.f32 %v3418_v23  ;;  %11923 = vmatpush3.bf16.msra.mxu0 %v15645_v59  ;;  %3450 = vadd.xlane.f32.xlu0 %v3449_v3  ;;  %v15790_v37 = vpack.c.bf16 %v12514_v4, %v12513_v46  ;;  %v4546_v23 = vsel %vm2015_vm5, %v15650_v51, -inf  ;;  %v4549_v4 = vsel %vm2015_vm5, %v15658_v9, -inf  ;;  %v18857_v3 = vld [vmem:[#allocation111_spill] sm:$0xff] }
 0xa95   :  { %v12767_v21 = vpop.eup %12766  ;;  %12784 = vpow2.f32 %v3442_v13  ;;  %11925 = vmatprep.subr.bf16.mxu0 %v15762_v56  ;;  %v15783_v20 = vmul.f32 %v15778_v6, %v3489_v7  ;;  %v4543_v13 = vsel %vm2015_vm5, %v15652_v62, -inf  ;;  %v4558_v46 = vsel %vm2015_vm5, %v15662_v12, -inf }
 0xa96   :  { %v15785_v25 = vpop.eup %12768  ;;  %11227 = vmatprep.mubr.msk.f32.mxu0 %vm2015_vm5, %v12767_v21  ;;  %v3452_v18 = vsel %vm2015_vm5, %v12767_v21, 0.0  ;;  %v4564_v21 = vsel %vm2015_vm5, %v15668_v31, -inf }
 0xa97   :  { %11228 = vmatmul.mubr.msk.f32.gmra.mrb[54].mxu0 %vm2015_vm5, %v15771_v42  ;;  %v15795_v15 = vmul.f32 %v15785_v25, %v3489_v7 }
 0xa98   :  { %v12771_v24 = vpop.eup %12770  ;;  %11927 = vmatpush3.bf16.msra.mxu0 %v15762_v56  ;;  %3990 = vmax.xlane.f32.xlu1 %v3989_v27  ;;  %v15843_v27 = vpop.xlane.xlu1 %4520 }
 0xa99   :  { %v15799_v52 = vpop.eup %12772  ;;  %11953 = vmatprep.subr.bf16.mxu0 %v15790_v37  ;;  %3453 = vadd.xlane.f32.xlu0 %v3452_v18  ;;  %v3461_v32 = vsel %vm2015_vm5, %v12771_v24, 0.0  ;;  %18858 = vst [vmem:[#allocation103_spill] sm:$0xff] %v15843_v27  ;;  %v3455_v18 = vsel %vm2015_vm5, %v15771_v42, 0.0  ;;  %v5339_v42 = vsel %vm2015_vm5, %v15682_v1, -inf }
 0xa9a   :  { %v12775_v11 = vpop.eup %12774  ;;  %v15803_v2 = vmul.f32 %v15799_v52, %v3489_v7 }
 0xa9b   :  { %v15805_v39 = vpop.eup %12776  ;;  %11230 = vmatprep.mubr.msk.f32.mxu0 %vm2015_vm5, %v12775_v11 }
 0xa9c   :  { %v12779_v19 = vpop.eup %12778  ;;  %11231 = vmatmul.mubr.msk.f32.gmra.mrb[56].mxu0 %vm2015_vm5, %v12771_v24  ;;  %4002 = vmax.xlane.f32.xlu1 %v4001_v35  ;;  %v15813_v47 = vmul.f32 %v15805_v39, %v3489_v7  ;;  %v3446_v24 = vsel %vm2015_vm5, %v15760_v61, 0.0  ;;  %v15849_v35 = vpop.xlane.xlu1 %4523 }
 0xa9d   :  { %v15815_v54 = vpop.eup %12780  ;;  %3462 = vadd.xlane.f32.xlu0 %v3461_v32  ;;  %v3458_v32 = vsel %vm2015_vm5, %v12775_v11, 0.0  ;;  %v5342_v11 = vsel %vm2015_vm5, %v15680_v50, -inf }
 0xa9e   :  { %v12783_v45 = vpop.eup %12782  ;;  %v15818_v17 = vmul.f32 %v15815_v54, %v3489_v7 }
 0xa9f   :  { %v15820_v36 = vpop.eup %12784  ;;  %11233 = vmatprep.mubr.msk.f32.mxu0 %vm2015_vm5, %v12783_v45 }
 0xaa0   :  { %11234 = vmatmul.mubr.msk.f32.gmra.mrb[58].mxu0 %vm2015_vm5, %v12779_v19  ;;  %4011 = vmax.xlane.f32.xlu1 %v4010_v38  ;;  %v15827_v0 = vmul.f32 %v15820_v36, %v3489_v7  ;;  %v4555_v7 = vsel %vm2015_vm5, %v15664_v53, -inf  ;;  %v15852_v38 = vpop.permute.xlu1 %12516 }
 0xaa4   :  { %4547 = vmax.xlane.f32.xlu1 %v4546_v23  ;;  %v3467_v23 = vsel %vm2015_vm5, %v12779_v19, 0.0  ;;  %v5345_v19 = vsel %vm2015_vm5, %v15688_v10, -inf }
 0xaa8   :  { %4544 = vmax.xlane.f32.xlu1 %v4543_v13 }
 0xaac   :  { %4550 = vmax.xlane.f32.xlu1 %v4549_v4  ;;  %v3464_v4 = vsel %vm2015_vm5, %v12783_v45, 0.0  ;;  %v5348_v45 = vsel %vm2015_vm5, %v15686_v5, -inf }
 0xab0   :  { %4559 = vmax.xlane.f32.xlu1 %v4558_v46 }
 0xab3   :  { %5305 = vrot.lane.b32.xlu0 %v18857_v3, %s13484_s25 }
 0xab4   :  { %4556 = vmax.xlane.f32.xlu1 %v4555_v7  ;;  %v18861_v7 = vld [vmem:[#allocation109_spill] sm:$0xff] }
 0xab8   :  { %4565 = vmax.xlane.f32.xlu1 %v4564_v21  ;;  %v5351_v21 = vsel %vm2015_vm5, %v15696_v60, -inf }
 0xabc   :  { %3447 = vadd.xlane.f32.xlu1 %v3446_v24 }
 0xac0   :  { %3456 = vadd.xlane.f32.xlu1 %v3455_v18  ;;  %v15876_v24 = vpop.xlane.xlu0 %4526 }
 0xac1   :  { %18862 = vst [vmem:[#allocation114_spill] sm:$0xff] %v15876_v24 }
 0xac4   :  { %3459 = vadd.xlane.f32.xlu1 %v3458_v32  ;;  %v5354_v32 = vsel %vm2015_vm5, %v15692_v29, -inf }
 0xac8   :  { %3468 = vadd.xlane.f32.xlu1 %v3467_v23  ;;  %v15855_v13 = vpop.xlane.xlu1 %4532  ;;  %v15882_v23 = vpop.xlane.xlu0 %4529 }
 0xacc   :  { %3465 = vadd.xlane.f32.xlu1 %v3464_v4  ;;  %v15858_v61 = vpop.xlane.xlu1 %4535 }
 0xacd   :  { %18859 = vst [vmem:[#allocation98_spill] sm:$0xff] %v15858_v61 }
 0xad0   :  { %v15864_v46 = vpop.xlane.xlu1 %4538 }
 0xad2   :  { %5340 = vmax.xlane.f32.xlu0 %v5339_v42  ;;  %v5357_v42 = vsel %vm2015_vm5, %v15704_v8, -inf }
 0xad4   :  { %v15868_v3 = vpop.xlane.xlu1 %4541 }
 0xad5   :  { %18860 = vst [vmem:[#allocation113_spill] sm:$0xff] %v15868_v3 }
 0xad6   :  { %5343 = vmax.xlane.f32.xlu0 %v5342_v11  ;;  %v15888_v11 = vpop.permute.xlu0 %12521 }
 0xad8   :  { %v15878_v18 = vpop.permute.xlu1 %12531 }
 0xada   :  { %5346 = vmax.xlane.f32.xlu0 %v5345_v19 }
 0xadc   :  { %v15884_v4 = vpop.permute.xlu1 %12536 }
 0xadd   :  { %5303 = vrot.lane.b32.xlu1 %v18861_v7, %s13484_s25 }
 0xade   :  { %5349 = vmax.xlane.f32.xlu0 %v5348_v45  ;;  %v15892_v45 = vpop.permute.xlu0 %12526 }
 0xae0   :  { %v15890_v19 = vpop.permute.xlu1 %12546 }
 0xae1   :  { %18863 = vst [vmem:[#allocation66_spill] sm:$0xff] %v15890_v19 }
 0xae2   :  { %5352 = vmax.xlane.f32.xlu0 %v5351_v21  ;;  %v15894_v21 = vpop.permute.xlu0 %12541 }
 0xae4   :  { %v5292_v7 = vpop.permute.xlu1 %5291 }
 0xae6   :  { %5355 = vmax.xlane.f32.xlu0 %v5354_v32  ;;  %v5315_v32 = vsel %vm426_vm0, %v5292_v7, 0.0  ;;  %v5302_v29 = vpop.permute.xlu0 %5301 }
 0xae8   :  { %v5294_v56 = vpop.permute.xlu1 %5293 }
 0xae9   :  { %v5318_v60 = vsel %vm426_vm0, %v5294_v56, 0.0 }
 0xaea   :  { %5358 = vmax.xlane.f32.xlu0 %v5357_v42  ;;  %v18864_v42 = vld [vmem:[#allocation82_spill] sm:$0xff] }
 0xaec   :  { %v5296_v59 = vpop.permute.xlu1 %5295 }
 0xaed   :  { %v5321_v1 = vsel %vm426_vm0, %v5296_v59, 0.0 }
 0xaf0   :  { %v5298_v10 = vpop.permute.xlu1 %5297 }
 0xaf1   :  { %v5324_v40 = vsel %vm426_vm0, %v5298_v10, 0.0 }
 0xaf4   :  { %v5300_v7 = vpop.permute.xlu1 %5299 }
 0xb01   :  { %5316 = vadd.xlane.f32.xlu1 %v5315_v32  ;;  %v5327_v32 = vsel %vm426_vm0, %v5300_v7, 0.0 }
 0xb05   :  { %5319 = vadd.xlane.f32.xlu1 %v5318_v60  ;;  %v3994_v8 = vpop.xlane.xlu0 %3993  ;;  %v5330_v60 = vsel %vm426_vm0, %v5302_v29, 0.0 }
 0xb06   :  { %v4014_v5 = vmax.f32 %v3994_v8, %v18864_v42 }
 0xb08   :  { %v4022_v50 = vsub.f32 %v15599_v43, %v4014_v5  ;;  %v4046_v8 = vsub.f32 %v18864_v42, %v4014_v5 }
 0xb09   :  { %5322 = vadd.xlane.f32.xlu1 %v5321_v1 }
 0xb0a   :  { %v4031_v63 = vmul.f32 1.442695, %v4022_v50  ;;  %v4055_v59 = vmul.f32 1.442695, %v4046_v8  ;;  %v4000_v50 = vpop.xlane.xlu0 %3999 }
 0xb0c   :  { %12786 = vpow2.f32 %v4031_v63 }
 0xb0d   :  { %5325 = vadd.xlane.f32.xlu1 %v5324_v40  ;;  %12788 = vpow2.f32 %v4055_v59  ;;  %v18866_v40 = vld [vmem:[#allocation84_spill] sm:$0xff] }
 0xb11   :  { %5328 = vadd.xlane.f32.xlu1 %v5327_v32  ;;  %v18867_v32 = vld [vmem:[#allocation69_spill] sm:$0xff] }
 0xb15   :  { %5331 = vadd.xlane.f32.xlu1 %v5330_v60  ;;  %v15918_v60 = vpop.xlane.xlu0 %3996 }
 0xb16   :  { %v15904_v56 = vpop.eup %12786 }
 0xb17   :  { %v4072_v43 = vsel %vm2015_vm5, %v15904_v56, 0.0  ;;  %v15909_v1 = vpop.eup %12788 }
 0xb18   :  { %4073 = vadd.xlane.f32.xlu0 %v4072_v43  ;;  %18865 = vst [vmem:[#allocation52_spill] sm:$0xff] %v15909_v1  ;;  %v4114_v5 = vmul.f32 %v15909_v1, %v18867_v32  ;;  %v18868_v43 = vld [vmem:[#allocation80_spill] sm:$0xff] }
 0xb19   :  { %v15922_v59 = vmax.f32 %v4000_v50, %v18868_v43  ;;  %v4006_v55 = vpop.xlane.xlu0 %4005 }
 0xb1b   :  { %18869 = vst [vmem:[#allocation68_spill] sm:$0xff] %v15922_v59  ;;  %v4024_v29 = vsub.f32 %v15609_v58, %v15922_v59 }
 0xb1d   :  { %v4035_v50 = vmul.f32 1.442695, %v4024_v29  ;;  %v15939_v3 = vpop.xlane.xlu0 %4008 }
 0xb1f   :  { %12790 = vpow2.f32 %v4035_v50 }
 0xb25   :  { %v3991_v63 = vpop.xlane.xlu1 %3990 }
 0xb29   :  { %v4003_v10 = vpop.xlane.xlu1 %4002 }
 0xb2a   :  { %v15912_v7 = vmax.f32 %v4003_v10, %v18866_v40  ;;  %v18870_v40 = vld [vmem:[#allocation94_spill] sm:$0xff] }
 0xb2b   :  { %v15930_v31 = vmax.f32 %v4006_v55, %v18870_v40  ;;  %v15954_v40 = vpop.xlane.xlu0 %4553 }
 0xb2d   :  { %v4012_v42 = vpop.xlane.xlu1 %4011  ;;  %18871 = vst [vmem:[#allocation54_spill] sm:$0xff] %v15930_v31  ;;  %v4026_v43 = vsub.f32 %v15623_v41, %v15930_v31 }
 0xb2e   :  { %4163 = vrot.lane.b32.xlu0 %v4114_v5, %s13484_s25 }
 0xb2f   :  { %v4039_v1 = vmul.f32 1.442695, %v4026_v43  ;;  %v15961_v50 = vpop.xlane.xlu0 %4562 }
 0xb31   :  { %v4548_v8 = vpop.xlane.xlu1 %4547  ;;  %12792 = vpow2.f32 %v4039_v1  ;;  %v18878_v1 = vld [vmem:[#allocation64_spill] sm:$0xff] }
 0xb32   :  { %v4568_v29 = vmax.f32 %v4548_v8, %v15849_v35 }
 0xb33   :  { %v3451_v31 = vpop.xlane.xlu0 %3450 }
 0xb35   :  { %v4545_v16 = vpop.xlane.xlu1 %4544 }
 0xb36   :  { %v15925_v10 = vmax.f32 %v4545_v16, %v15843_v27  ;;  %v18872_v16 = vld [vmem:[#allocation88_spill] sm:$0xff] }
 0xb37   :  { %v15942_v27 = vmax.f32 %v4012_v42, %v18872_v16  ;;  %v4576_v16 = vsub.f32 %v15650_v51, %v4568_v29 }
 0xb39   :  { %v4551_v28 = vpop.xlane.xlu1 %4550  ;;  %18873 = vst [vmem:[#allocation70_spill] sm:$0xff] %v15942_v27  ;;  %v4585_v43 = vmul.f32 1.442695, %v4576_v16 }
 0xb3a   :  { %v15935_v5 = vmax.f32 %v4551_v28, %v15876_v24  ;;  %v4028_v28 = vsub.f32 %v15635_v30, %v15942_v27  ;;  %v15963_v30 = vpop.eup %12790 }
 0xb3b   :  { %18876 = vst [vmem:[#allocation117_spill] sm:$0xff] %v15963_v30  ;;  %v4078_v41 = vsel %vm2015_vm5, %v15963_v30, 0.0  ;;  %v15967_v27 = vpop.eup %12792 }
 0xb3c   :  { %v4043_v58 = vmul.f32 1.442695, %v4028_v28  ;;  %18877 = vst [vmem:[#allocation116_spill] sm:$0xff] %v15967_v27  ;;  %v4013_v28 = vmax.f32 %v3991_v63, %v18878_v1  ;;  %v4084_v51 = vsel %vm2015_vm5, %v15967_v27, 0.0  ;;  %v4600_v63 = vsub.f32 %v15849_v35, %v4568_v29 }
 0xb3d   :  { %v4560_v55 = vpop.xlane.xlu1 %4559 }
 0xb3e   :  { %v15947_v59 = vmax.f32 %v4560_v55, %v15858_v61  ;;  %12794 = vpow2.f32 %v4043_v58  ;;  %v4021_v16 = vsub.f32 %v15601_v49, %v4013_v28  ;;  %v3471_v49 = vadd.f32 %v15756_v34, %v3451_v31 }
 0xb3f   :  { %12796 = vpow2.f32 %v4585_v43  ;;  %v3454_v43 = vpop.xlane.xlu0 %3453  ;;  %v4609_v53 = vmul.f32 1.442695, %v4600_v63 }
 0xb40   :  { %18874 = vst [vmem:[#allocation71_spill] sm:$0xff] %v15947_v59  ;;  %v3472_v35 = vadd.f32 %v15785_v25, %v3454_v43  ;;  %v12519_v25 = vunpack.i.h.bf16 %v15852_v38 }
 0xb41   :  { %v15956_v42 = vpop.xlane.xlu1 %4556 }
 0xb43   :  { %v3463_v27 = vpop.xlane.xlu0 %3462 }
 0xb45   :  { %v15959_v55 = vpop.xlane.xlu1 %4565 }
 0xb46   :  { %18875 = vst [vmem:[#allocation115_spill] sm:$0xff] %v15959_v55  ;;  %v4029_v55 = vmul.f32 1.442695, %v4021_v16 }
 0xb47   :  { %v5306_v29 = vpop.permute.xlu0 %5305 }
 0xb48   :  { %v15972_v24 = vpop.eup %12794  ;;  %12798 = vpow2.f32 %v4029_v55  ;;  %v4045_v55 = vsub.f32 %v18878_v1, %v4013_v28  ;;  %v5336_v31 = vsel %vm426_vm0, %v5306_v29, 0.0 }
 0xb49   :  { %v3448_v8 = vpop.xlane.xlu1 %3447  ;;  %18879 = vst [vmem:[#allocation118_spill] sm:$0xff] %v15972_v24  ;;  %v4090_v59 = vsel %vm2015_vm5, %v15972_v24, 0.0  ;;  %v15977_v12 = vpop.eup %12796  ;;  %12800 = vrcp.f32 %v3471_v49 }
 0xb4d   :  { %v3457_v61 = vpop.xlane.xlu1 %3456  ;;  %4079 = vadd.xlane.f32.xlu0 %v4078_v41  ;;  %v4626_v41 = vsel %vm2015_vm5, %v15977_v12, 0.0 }
 0xb4e   :  { %v3473_v16 = vadd.f32 %v15778_v6, %v3457_v61  ;;  %v4053_v61 = vmul.f32 1.442695, %v4045_v55 }
 0xb51   :  { %v3460_v58 = vpop.xlane.xlu1 %3459  ;;  %4085 = vadd.xlane.f32.xlu0 %v4084_v51  ;;  %v3470_v51 = vadd.f32 %v15764_v33, %v3448_v8  ;;  %v3475_v33 = vadd.f32 %v15799_v52, %v3463_v27  ;;  %v12518_v8 = vunpack.i.l.bf16 %v15852_v38  ;;  %v18880_v27 = vld [vmem:[#allocation76_spill] sm:$0xff] }
 0xb52   :  { %v15989_v34 = vpop.eup %12798  ;;  %v3474_v6 = vadd.f32 %v15805_v39, %v3460_v58  ;;  %v16001_v39 = vmax.f32 %v15918_v60, %v18880_v27 }
 0xb53   :  { %12802 = vrcp.f32 %v3470_v51  ;;  %v12801_v52 = vpop.eup %12800 }
 0xb54   :  { %12804 = vpow2.f32 %v4609_v53  ;;  %v4069_v53 = vsel %vm2015_vm5, %v15989_v34, 0.0  ;;  %v4023_v60 = vsub.f32 %v15613_v22, %v16001_v39 }
 0xb55   :  { %v3469_v30 = vpop.xlane.xlu1 %3468  ;;  %4091 = vadd.xlane.f32.xlu0 %v4090_v59  ;;  %12806 = vrcp.f32 %v3473_v16 }
 0xb56   :  { %12808 = vrcp.f32 %v3472_v35  ;;  %v3477_v1 = vadd.f32 %v15815_v54, %v3469_v30  ;;  %v12523_v35 = vunpack.i.l.bf16 %v15888_v11 }
 0xb57   :  { %12810 = vrcp.f32 %v3475_v33 }
 0xb58   :  { %12812 = vrcp.f32 %v3474_v6 }
 0xb59   :  { %v3466_v19 = vpop.xlane.xlu1 %3465  ;;  %4627 = vadd.xlane.f32.xlu0 %v4626_v41  ;;  %12814 = vpow2.f32 %v4053_v61 }
 0xb5a   :  { %v3476_v58 = vadd.f32 %v15820_v36, %v3466_v19  ;;  %12816 = vrcp.f32 %v3477_v1 }
 0xb5c   :  { %12818 = vrcp.f32 %v3476_v58 }
 0xb5d   :  { %v5304_v24 = vpop.permute.xlu1 %5303  ;;  %v12803_v41 = vpop.eup %12802 }
 0xb5e   :  { %v5333_v59 = vsel %vm426_vm0, %v5304_v24, 0.0  ;;  %v16005_v49 = vpop.eup %12804 }
 0xb5f   :  { %5334 = vadd.xlane.f32.xlu1 %v5333_v59  ;;  %v12807_v16 = vpop.eup %12806  ;;  %v12524_v59 = vunpack.i.h.bf16 %v15888_v11 }
 0xb60   :  { %v12809_v19 = vpop.eup %12808 }
 0xb61   :  { %v12811_v61 = vpop.eup %12810 }
 0xb63   :  { %5337 = vadd.xlane.f32.xlu1 %v5336_v31  ;;  %v18881_v31 = vld [vmem:[#allocation67_spill] sm:$0xff] }
 0xb64   :  { %v16021_v33 = vmax.f32 %v15939_v3, %v18881_v31 }
 0xb66   :  { %v11226_v24 = vpop.f32.mrb[52].mxu0 }
 0xb67   :  { %v3594_v28 = vadd.f32 %v11226_v24, %v15769_v26  ;;  %v3588_v43 = vpop.f32.mrb[53].mxu0  ;;  %4070 = vadd.xlane.f32.xlu1 %v4069_v53  ;;  %v12528_v24 = vunpack.i.l.bf16 %v15892_v45  ;;  %v11960_v53 = vpack.c.bf16 %v12524_v59, %v12523_v35  ;;  %v12543_v35 = vunpack.i.l.bf16 %v15894_v21 }
 0xb68   :  { %v3589_v63 = vadd.f32 %v3588_v43, %v15776_v44  ;;  %v11956_v44 = vpack.c.bf16 %v12519_v25, %v12518_v8  ;;  %v12529_v25 = vunpack.i.h.bf16 %v15892_v45  ;;  %v12813_v8 = vpop.eup %12812  ;;  %v4027_v45 = vsub.f32 %v15637_v57, %v16021_v33 }
 0xb69   :  { %v3628_v38 = vmul.f32 %v12801_v52, %v3594_v28  ;;  %v16029_v3 = vpop.eup %12814 }
 0xb6a   :  { %v3627_v54 = vmul.f32 %v12803_v41, %v3589_v63  ;;  %v11229_v30 = vpop.f32.mrb[54].mxu0  ;;  %v12817_v41 = vpop.eup %12816 }
 0xb6b   :  { %v3604_v26 = vadd.f32 %v11229_v30, %v15783_v20  ;;  %v3598_v51 = vpop.f32.mrb[55].mxu0  ;;  %v4664_v20 = vmul.f32 %v16005_v49, %v18867_v32  ;;  %v12534_v30 = vunpack.i.h.bf16 %v15878_v18 }
 0xb6c   :  { %v3599_v36 = vadd.f32 %v3598_v51, %v15795_v15  ;;  %11244 = vmatprep.mubr.msk.f32.mxu0 %vm426_vm0, %v3627_v54  ;;  %v4033_v15 = vmul.f32 1.442695, %v4023_v60  ;;  %v12819_v54 = vpop.eup %12818  ;;  %v12538_v60 = vunpack.i.l.bf16 %v15884_v4 }
 0xb6d   :  { %v3630_v29 = vmul.f32 %v12807_v16, %v3604_v26  ;;  %11245 = vmatmul.mubr.msk.f32.vlgmr.msra.gmra.mrb[44].mxu0 %vm426_vm0, %v3628_v38  ;;  %v12533_v26 = vunpack.i.l.bf16 %v15878_v18  ;;  %v12539_v18 = vunpack.i.h.bf16 %v15884_v4  ;;  %v12544_v4 = vunpack.i.h.bf16 %v15894_v21  ;;  %v18885_v21 = vld [vmem:[#allocation60_spill] sm:$0xff] }
 0xb6e   :  { %v3629_v55 = vmul.f32 %v12809_v19, %v3599_v36  ;;  %11955 = vmatpush3.bf16.msra.mxu0 %v15790_v37  ;;  %12820 = vpow2.f32 %v4033_v15  ;;  %v16062_v19 = vmax.f32 %v15956_v42, %v15855_v13  ;;  %v18884_v42 = vsub.f32 %v15658_v9, %v15935_v5  ;;  %v18890_v9 = vld [vmem:[#allocation101_spill] sm:$0xff] }
 0xb6f   :  { %v11232_v22 = vpop.f32.mrb[56].mxu0  ;;  %11957 = vmatprep.subr.bf16.mxu0 %v11956_v44  ;;  %4705 = vrot.lane.b32.xlu0 %v4664_v20, %s13482_s17  ;;  %v11992_v16 = vpack.c.bf16 %v12534_v30, %v12533_v26  ;;  %v18896_v30 = vld [vmem:[#allocation118_spill] sm:$0xff] }
 0xb70   :  { %v3614_v11 = vadd.f32 %v11232_v22, %v15803_v2  ;;  %v3608_v6 = vpop.f32.mrb[57].mxu0  ;;  %11247 = vmatprep.mubr.msk.f32.mxu0 %vm426_vm0, %v3629_v55  ;;  %v16033_v2 = vmax.f32 %v15954_v40, %v15882_v23  ;;  %v11964_v40 = vpack.c.bf16 %v12529_v25, %v12528_v24  ;;  %v4579_v20 = vsub.f32 %v18885_v21, %v16062_v19 }
 0xb71   :  { %v3609_v37 = vadd.f32 %v3608_v6, %v15813_v47  ;;  %11248 = vmatmul.mubr.msk.f32.gmra.mrb[46].mxu0 %vm426_vm0, %v3630_v29  ;;  %v18882_v47 = vsub.f32 %v15629_v48, %v15912_v7  ;;  %v4113_v48 = vmul.f32 %v16029_v3, %v18867_v32  ;;  %v11996_v29 = vpack.c.bf16 %v12539_v18, %v12538_v60  ;;  %v18888_v6 = vld [vmem:[#allocation113_spill] sm:$0xff]  ;;  %v18898_v18 = vld [vmem:[#allocation86_spill] sm:$0xff] }
 0xb72   :  { %v3632_v1 = vmul.f32 %v12811_v61, %v3614_v11  ;;  %11959 = vmatpush3.bf16.msra.mxu0 %v11956_v44  ;;  %v4578_v57 = vsub.f32 %v15656_v14, %v16033_v2  ;;  %v18883_v14 = vsub.f32 %v15652_v62, %v15925_v10  ;;  %v16074_v62 = vmax.f32 %v15961_v50, %v15864_v46  ;;  %v18887_v11 = vld [vmem:[#allocation117_spill] sm:$0xff]  ;;  %v18889_v61 = vld [vmem:[#allocation115_spill] sm:$0xff] }
 0xb73   :  { %v3631_v28 = vmul.f32 %v12813_v8, %v3609_v37  ;;  %v11235_v43 = vpop.f32.mrb[58].mxu0  ;;  %11961 = vmatprep.subr.bf16.mxu0 %v11960_v53  ;;  %v4037_v52 = vmul.f32 1.442695, %v18882_v47  ;;  %v12000_v50 = vpack.c.bf16 %v12544_v4, %v12543_v35  ;;  %v16089_v25 = vmax.f32 %v18889_v61, %v18888_v6 }
 0xb74   :  { %v3624_v58 = vadd.f32 %v11235_v43, %v15818_v17  ;;  %v3618_v63 = vpop.f32.mrb[59].mxu0  ;;  %v4589_v36 = vmul.f32 1.442695, %v4578_v57  ;;  %v4583_v44 = vmul.f32 1.442695, %v18883_v14  ;;  %v4581_v24 = vsub.f32 %v18890_v9, %v16074_v62  ;;  %v18892_v43 = vld [vmem:[#allocation97_spill] sm:$0xff] }
 0xb75   :  { %v3619_v38 = vadd.f32 %v3618_v63, %v15827_v0  ;;  %11250 = vmatprep.mubr.msk.f32.mxu0 %vm426_vm0, %v3631_v28  ;;  %v4041_v0 = vmul.f32 1.442695, %v4027_v45  ;;  %12822 = vpow2.f32 %v4037_v52  ;;  %v4591_v37 = vmul.f32 1.442695, %v4579_v20  ;;  %v18891_v28 = vld [vmem:[#allocation116_spill] sm:$0xff]  ;;  %v18893_v45 = vld [vmem:[#allocation71_spill] sm:$0xff] }
 0xb76   :  { %v3634_v51 = vmul.f32 %v12817_v41, %v3624_v58  ;;  %11251 = vmatmul.mubr.msk.f32.gmra.mrb[48].mxu0 %vm426_vm0, %v3632_v1  ;;  %v18894_v47 = vsub.f32 %v18892_v43, %v18893_v45  ;;  %v18895_v58 = vld [vmem:[#allocation93_spill] sm:$0xff]  ;;  %v4595_v41 = vmul.f32 1.442695, %v4581_v24  ;;  %v4602_v60 = vsub.f32 %v15882_v23, %v16033_v2 }
 0xb77   :  { %v3633_v17 = vmul.f32 %v12819_v54, %v3619_v38  ;;  %11963 = vmatpush3.bf16.msra.mxu0 %v11960_v53  ;;  %12824 = vpow2.f32 %v4041_v0  ;;  %v5341_v53 = vpop.xlane.xlu0 %5340  ;;  %v4582_v63 = vsub.f32 %v18895_v58, %v16089_v25  ;;  %v18901_v43 = vld [vmem:[#allocation65_spill] sm:$0xff] }
 0xb78   :  { %11965 = vmatprep.subr.bf16.mxu0 %v11964_v40  ;;  %4161 = vrot.lane.b32.xlu1 %v4113_v48, %s13484_s25  ;;  %v16064_v59 = vpop.eup %12820  ;;  %12826 = vpow2.f32 %v4589_v36  ;;  %v4593_v52 = vmul.f32 1.442695, %v18894_v47  ;;  %v4613_v2 = vmul.f32 1.442695, %v4602_v60 }
 0xb79   :  { %11253 = vmatprep.mubr.msk.f32.mxu0 %vm426_vm0, %v3633_v17  ;;  %12828 = vpow2.f32 %v4583_v44  ;;  %v4597_v26 = vmul.f32 1.442695, %v4582_v63  ;;  %v4075_v24 = vsel %vm2015_vm5, %v16064_v59, 0.0 }
 0xb7a   :  { %11254 = vmatmul.mubr.msk.f32.gmra.mrb[50].mxu0 %vm426_vm0, %v3634_v51  ;;  %v18897_v51 = vld [vmem:[#allocation79_spill] sm:$0xff] }
 0xb7b   :  { %11967 = vmatpush3.bf16.msra.mxu0 %v11964_v40  ;;  %11300 = vmatprep.mubr.msk.f32.mxu0 %vm2015_vm5, %v15989_v34  ;;  %v4587_v34 = vmul.f32 1.442695, %v18884_v42  ;;  %v5344_v54 = vpop.xlane.xlu0 %5343 }
 0xb7c   :  { %11993 = vmatprep.subr.bf16.mxu0 %v11992_v16 }
 0xb7d   :  { %12830 = vpow2.f32 %v4587_v34 }
 0xb7e   :  { %11301 = vmatmul.mubr.msk.f32.vlgmr.msra.gmra.mrb[60].mxu0 %vm2015_vm5, %v15904_v56  ;;  %v18886_v56 = vld [vmem:[#allocation66_spill] sm:$0xff]  ;;  %12832 = vpow2.f32 %v4591_v37 }
 0xb7f   :  { %11995 = vmatpush3.bf16.msra.mxu0 %v11992_v16  ;;  %11303 = vmatprep.mubr.msk.f32.mxu0 %vm2015_vm5, %v16064_v59  ;;  %v16081_v55 = vpop.eup %12822  ;;  %v12549_v22 = vunpack.i.h.bf16 %v18886_v56  ;;  %v12548_v15 = vunpack.i.l.bf16 %v18886_v56  ;;  %12834 = vpow2.f32 %v4593_v52  ;;  %v5347_v16 = vpop.xlane.xlu0 %5346  ;;  %v18903_v59 = vld [vmem:[#allocation103_spill] sm:$0xff] }
 0xb80   :  { %11997 = vmatprep.subr.bf16.mxu0 %v11996_v29  ;;  %12836 = vpow2.f32 %v4595_v41  ;;  %v4081_v63 = vsel %vm2015_vm5, %v16081_v55, 0.0 }
 0xb81   :  { %v16095_v8 = vpop.eup %12824  ;;  %v12004_v1 = vpack.c.bf16 %v12549_v22, %v12548_v15  ;;  %12838 = vpow2.f32 %v4597_v26 }
 0xb82   :  { %11304 = vmatmul.mubr.msk.f32.gmra.mrb[62].mxu0 %vm2015_vm5, %v18887_v11  ;;  %v12827_v38 = vpop.eup %12826 }
 0xb83   :  { %11999 = vmatpush3.bf16.msra.mxu0 %v11996_v29  ;;  %11306 = vmatprep.mubr.msk.f32.mxu0 %vm2015_vm5, %v16081_v55  ;;  %v16106_v40 = vpop.eup %12828  ;;  %v4632_v48 = vsel %vm2015_vm5, %v12827_v38, 0.0  ;;  %v18899_v29 = vld [vmem:[#allocation81_spill] sm:$0xff]  ;;  %v5350_v21 = vpop.xlane.xlu0 %5349  ;;  %v4087_v55 = vsel %vm2015_vm5, %v16095_v8, 0.0 }
 0xb84   :  { %12001 = vmatprep.subr.bf16.mxu0 %v12000_v50 }
 0xb86   :  { %11307 = vmatmul.mubr.msk.f32.gmra.mrb[64].mxu0 %vm2015_vm5, %v18891_v28  ;;  %v18900_v28 = vld [vmem:[#allocation42_spill] sm:$0xff] }
 0xb87   :  { %12003 = vmatpush3.bf16.msra.mxu0 %v12000_v50  ;;  %11309 = vmatprep.mubr.msk.f32.mxu0 %vm2015_vm5, %v16095_v8  ;;  %v12831_v57 = vpop.eup %12830  ;;  %v5353_v37 = vpop.xlane.xlu0 %5352  ;;  %v16157_v47 = vrot.slane %v18901_v43, %v18900_v28  ;;  %v4623_v8 = vsel %vm2015_vm5, %v16106_v40, 0.0 }
 0xb88   :  { %12005 = vmatprep.subr.bf16.mxu0 %v12004_v1  ;;  %v4629_v14 = vsel %vm2015_vm5, %v12831_v57, 0.0 }
 0xb8a   :  { %11310 = vmatmul.mubr.msk.f32.gmra.mrb[66].mxu0 %vm2015_vm5, %v18896_v30 }
 0xb8b   :  { %12007 = vmatpush3.bf16.msra.mxu0 %v12004_v1  ;;  %11356 = vmatprep.mubr.msk.f32.mxu0 %vm2015_vm5, %v16106_v40  ;;  %v5356_v26 = vpop.xlane.xlu0 %5355 }
 0xb8c   :  { %12009 = vmatprep.subr.bf16.mxu0 %v18897_v51 }
 0xb8e   :  { %11357 = vmatmul.mubr.msk.f32.vlgmr.msra.gmra.mrb[68].mxu0 %vm2015_vm5, %v15977_v12  ;;  %v5317_v17 = vpop.xlane.xlu1 %5316  ;;  %4633 = vadd.xlane.f32.xlu0 %v4632_v48  ;;  %v16125_v12 = vpop.eup %12832 }
 0xb8f   :  { %11359 = vmatprep.mubr.msk.f32.mxu0 %vm2015_vm5, %v12831_v57  ;;  %v16117_v0 = vmax.f32 %v5341_v53, %v5317_v17  ;;  %12011 = vmatpush3.bf16.msra.mxu0 %v18897_v51  ;;  %v16134_v23 = vpop.eup %12834 }
 0xb90   :  { %12013 = vmatprep.subr.bf16.mxu0 %v18898_v18  ;;  %v16137_v34 = vpop.eup %12836 }
 0xb91   :  { %v5395_v36 = vsub.f32 %v5317_v17, %v16117_v0  ;;  %v16145_v15 = vpop.eup %12838 }
 0xb92   :  { %11360 = vmatmul.mubr.msk.f32.gmra.mrb[70].mxu0 %vm2015_vm5, %v12827_v38  ;;  %v5320_v44 = vpop.xlane.xlu1 %5319  ;;  %4630 = vadd.xlane.f32.xlu0 %v4629_v14  ;;  %v4599_v38 = vsub.f32 %v18903_v59, %v15925_v10 }
 0xb93   :  { %v5403_v4 = vmul.f32 1.442695, %v5395_v36  ;;  %11362 = vmatprep.mubr.msk.f32.mxu0 %vm2015_vm5, %v16125_v12  ;;  %v16130_v35 = vmax.f32 %v5344_v54, %v5320_v44  ;;  %12015 = vmatpush3.bf16.msra.mxu0 %v18898_v18  ;;  %v18905_v36 = vld [vmem:[#allocation114_spill] sm:$0xff] }
 0xb94   :  { %12017 = vmatprep.subr.bf16.mxu0 %v18899_v29  ;;  %v4607_v10 = vmul.f32 1.442695, %v4599_v38  ;;  %v4601_v14 = vsub.f32 %v18905_v36, %v15935_v5  ;;  %v4603_v38 = vsub.f32 %v15855_v13, %v16062_v19 }
 0xb95   :  { %v5396_v42 = vsub.f32 %v5320_v44, %v16130_v35  ;;  %12840 = vpow2.f32 %v5403_v4 }
 0xb96   :  { %11363 = vmatmul.mubr.msk.f32.gmra.mrb[72].mxu0 %vm2015_vm5, %v16134_v23  ;;  %v5323_v20 = vpop.xlane.xlu1 %5322  ;;  %12842 = vpow2.f32 %v4613_v2 }
 0xb97   :  { %v5405_v56 = vmul.f32 1.442695, %v5396_v42  ;;  %11365 = vmatprep.mubr.msk.f32.mxu0 %vm2015_vm5, %v16137_v34  ;;  %v16143_v22 = vmax.f32 %v5347_v16, %v5323_v20 }
 0xb99   :  { %v5397_v11 = vsub.f32 %v5323_v20, %v16143_v22  ;;  %12844 = vpow2.f32 %v5405_v56 }
 0xb9a   :  { %11366 = vmatmul.mubr.msk.f32.gmra.mrb[74].mxu0 %vm2015_vm5, %v16145_v15  ;;  %v5326_v50 = vpop.xlane.xlu1 %5325 }
 0xb9b   :  { %v5407_v61 = vmul.f32 1.442695, %v5397_v11  ;;  %v16150_v9 = vmax.f32 %v5350_v21, %v5326_v50  ;;  %v4611_v21 = vmul.f32 1.442695, %v4601_v14 }
 0xb9c   :  { %4076 = vadd.xlane.f32.xlu1 %v4075_v24 }
 0xb9d   :  { %v5398_v53 = vsub.f32 %v5326_v50, %v16150_v9  ;;  %12846 = vpow2.f32 %v5407_v61 }
 0xb9e   :  { %v5329_v1 = vpop.xlane.xlu1 %5328 }
 0xb9f   :  { %v5409_v52 = vmul.f32 1.442695, %v5398_v53  ;;  %v16159_v58 = vmax.f32 %v5353_v37, %v5329_v1  ;;  %v16163_v41 = vpop.eup %12840 }
 0xba0   :  { %18902 = vst [vmem:[#allocation119_spill] sm:$0xff] %v16163_v41  ;;  %4082 = vadd.xlane.f32.xlu1 %v4081_v63  ;;  %v16170_v30 = vmul.f32 %v16163_v41, %v16157_v47  ;;  %v16172_v48 = vpop.eup %12842 }
 0xba1   :  { %v5399_v54 = vsub.f32 %v5329_v1, %v16159_v58  ;;  %12848 = vpow2.f32 %v5409_v52  ;;  %v4666_v44 = vmul.f32 %v16172_v48, %v18867_v32  ;;  %v18912_v1 = vld [vmem:[#allocation98_spill] sm:$0xff]  ;;  %v4638_v52 = vsel %vm2015_vm5, %v16134_v23, 0.0  ;;  %v5359_v23 = vpop.xlane.xlu0 %5358 }
 0xba2   :  { %v5332_v51 = vpop.xlane.xlu1 %5331  ;;  %v4604_v43 = vsub.f32 %v18912_v1, %v18893_v45  ;;  %v4635_v45 = vsel %vm2015_vm5, %v16125_v12, 0.0  ;;  %v4606_v12 = vsub.f32 %v18888_v6, %v16089_v25  ;;  %v4047_v25 = vsub.f32 %v18880_v27, %v16001_v39 }
 0xba3   :  { %v5411_v57 = vmul.f32 1.442695, %v5399_v54  ;;  %v16174_v17 = vmax.f32 %v5356_v26, %v5332_v51  ;;  %v16178_v16 = vpop.eup %12844  ;;  %v4615_v26 = vmul.f32 1.442695, %v4603_v38  ;;  %v4051_v38 = vsub.f32 %v18881_v31, %v16021_v33 }
 0xba4   :  { %18904 = vst [vmem:[#allocation56_spill] sm:$0xff] %v16178_v16  ;;  %4088 = vadd.xlane.f32.xlu1 %v4087_v55  ;;  %v16183_v60 = vmul.f32 %v16178_v16, %v16157_v47  ;;  %v4617_v63 = vmul.f32 1.442695, %v4604_v43  ;;  %v4621_v14 = vmul.f32 1.442695, %v4606_v12 }
 0xba5   :  { %v5400_v18 = vsub.f32 %v5332_v51, %v16174_v17  ;;  %12850 = vpow2.f32 %v5411_v57  ;;  %v4065_v39 = vmul.f32 1.442695, %v4051_v38 }
 0xba6   :  { %12852 = vpow2.f32 %v4607_v10 }
 0xba7   :  { %v5413_v4 = vmul.f32 1.442695, %v5400_v18  ;;  %v16191_v2 = vpop.eup %12846  ;;  %v4644_v18 = vsel %vm2015_vm5, %v16145_v15, 0.0 }
 0xba8   :  { %18906 = vst [vmem:[#allocation59_spill] sm:$0xff] %v16191_v2  ;;  %4709 = vrot.lane.b32.xlu0 %v4666_v44, %s13482_s17  ;;  %4624 = vadd.xlane.f32.xlu1 %v4623_v8  ;;  %v16196_v42 = vmul.f32 %v16191_v2, %v16157_v47  ;;  %v4605_v8 = vsub.f32 %v15864_v46, %v16074_v62  ;;  %v18915_v46 = vld [vmem:[#allocation54_spill] sm:$0xff] }
 0xba9   :  { %12854 = vpow2.f32 %v5413_v4  ;;  %v18916_v62 = vld [vmem:[#allocation94_spill] sm:$0xff] }
 0xbaa   :  { %12856 = vpow2.f32 %v4611_v21  ;;  %v4619_v15 = vmul.f32 1.442695, %v4605_v8  ;;  %v4641_v21 = vsel %vm2015_vm5, %v16137_v34, 0.0  ;;  %v4050_v43 = vsub.f32 %v18916_v62, %v18915_v46 }
 0xbab   :  { %v16198_v5 = vpop.eup %12848  ;;  %12858 = vpow2.f32 %v4617_v63 }
 0xbac   :  { %18907 = vst [vmem:[#allocation107_spill] sm:$0xff] %v16198_v5  ;;  %v16202_v20 = vmul.f32 %v16198_v5, %v16157_v47  ;;  %12860 = vpow2.f32 %v4615_v26  ;;  %v4063_v63 = vmul.f32 1.442695, %v4050_v43  ;;  %v6634_v5 = vld [vmem:[%s13498_s9] sm:$0xff] }
 0xbaf   :  { %v16204_v40 = vpop.eup %12850 }
 0xbb0   :  { %18908 = vst [vmem:[#allocation104_spill] sm:$0xff] %v16204_v40  ;;  %v16208_v56 = vmul.f32 %v16204_v40, %v16157_v47  ;;  %v16210_v11 = vpop.eup %12852 }
 0xbb1   :  { %v4663_v24 = vmul.f32 %v16210_v11, %v18867_v32 }
 0xbb2   :  { %18909 = vst [vmem:[#allocation106_spill] sm:$0xff] %v16208_v56 }
 0xbb3   :  { %v16212_v50 = vpop.eup %12854 }
 0xbb4   :  { %18910 = vst [vmem:[#allocation108_spill] sm:$0xff] %v16212_v50  ;;  %v16216_v61 = vmul.f32 %v16212_v50, %v16157_v47  ;;  %v16220_v37 = vpop.eup %12856 }
 0xbb5   :  { %v4665_v53 = vmul.f32 %v16220_v37, %v18867_v32  ;;  %v16230_v59 = vpop.eup %12858 }
 0xbb6   :  { %18911 = vst [vmem:[#allocation105_spill] sm:$0xff] %v16216_v61  ;;  %v4668_v54 = vmul.f32 %v16230_v59, %v18867_v32  ;;  %v16239_v57 = vpop.eup %12860 }
 0xbb7   :  { %v4667_v13 = vmul.f32 %v16239_v57, %v18867_v32 }
 0xbb9   :  { %4703 = vrot.lane.b32.xlu1 %v4663_v24, %s13482_s17  ;;  %v4057_v24 = vmul.f32 1.442695, %v4047_v25  ;;  %v18920_v25 = vld [vmem:[#allocation70_spill] sm:$0xff] }
 0xbbd   :  { %4707 = vrot.lane.b32.xlu1 %v4665_v53, %s13482_s17  ;;  %v18914_v53 = vld [vmem:[#allocation84_spill] sm:$0xff] }
 0xbbe   :  { %v4049_v1 = vsub.f32 %v18914_v53, %v15912_v7 }
 0xbc7   :  { %4639 = vadd.xlane.f32.xlu0 %v4638_v52  ;;  %v4061_v52 = vmul.f32 1.442695, %v4049_v1 }
 0xbdd   :  { %4713 = vrot.lane.b32.xlu0 %v4668_v54, %s13482_s17 }
 0xbe1   :  { %4636 = vadd.xlane.f32.xlu1 %v4635_v45  ;;  %v16285_v45 = vpop.xlane.xlu0 %4073 }
 0xbec   :  { %v5335_v51 = vpop.xlane.xlu1 %5334 }
 0xbed   :  { %v16241_v55 = vmax.f32 %v5359_v23, %v5335_v51  ;;  %v18917_v23 = vld [vmem:[#allocation68_spill] sm:$0xff] }
 0xbef   :  { %v5401_v10 = vsub.f32 %v5335_v51, %v16241_v55  ;;  %v18918_v51 = vld [vmem:[#allocation80_spill] sm:$0xff] }
 0xbf1   :  { %v5415_v19 = vmul.f32 1.442695, %v5401_v10  ;;  %v4048_v10 = vsub.f32 %v18918_v51, %v18917_v23 }
 0xbf2   :  { %4711 = vrot.lane.b32.xlu1 %v4667_v13, %s13482_s17  ;;  %v16295_v13 = vpop.permute.xlu0 %4163 }
 0xbf3   :  { %12862 = vpow2.f32 %v5415_v19  ;;  %v18919_v19 = vld [vmem:[#allocation100_spill] sm:$0xff] }
 0xbf4   :  { %12864 = vpow2.f32 %v4621_v14  ;;  %v5360_v12 = vsel %vm2015_vm5, %v18919_v19, -inf }
 0xbf5   :  { %12866 = vpow2.f32 %v4619_v15  ;;  %v18921_v15 = vld [vmem:[#allocation88_spill] sm:$0xff] }
 0xbf6   :  { %12868 = vpow2.f32 %v4057_v24  ;;  %v16308_v24 = vpop.xlane.xlu0 %4079 }
 0xbf7   :  { %12870 = vpow2.f32 %v4061_v52 }
 0xbf8   :  { %12872 = vpow2.f32 %v4063_v63 }
 0xbf9   :  { %12874 = vpow2.f32 %v4065_v39 }
 0xbfa   :  { %v16315_v62 = vpop.xlane.xlu0 %4085 }
 0xbfc   :  { %4645 = vadd.xlane.f32.xlu0 %v4644_v18  ;;  %v16299_v18 = vpop.xlane.xlu1 %5337 }
 0xbfd   :  { %v16251_v36 = vpop.eup %12862 }
 0xbfe   :  { %v16255_v44 = vmul.f32 %v16251_v36, %v16157_v47  ;;  %v16257_v4 = vpop.eup %12864  ;;  %v16319_v52 = vpop.xlane.xlu0 %4091 }
 0xbff   :  { %v4670_v6 = vmul.f32 %v16257_v4, %v18867_v32  ;;  %v16274_v27 = vpop.eup %12866 }
 0xc00   :  { %18913 = vst [vmem:[#allocation110_spill] sm:$0xff] %v16255_v44  ;;  %v4669_v34 = vmul.f32 %v16274_v27, %v18867_v32  ;;  %v16278_v54 = vpop.eup %12868  ;;  %v16312_v1 = vpop.xlane.xlu1 %4070 }
 0xc01   :  { %v4115_v7 = vmul.f32 %v16278_v54, %v18867_v32  ;;  %v16283_v26 = vpop.eup %12870 }
 0xc02   :  { %v4117_v31 = vmul.f32 %v16283_v26, %v18867_v32  ;;  %v16290_v33 = vpop.eup %12872 }
 0xc03   :  { %v4118_v14 = vmul.f32 %v16290_v33, %v18867_v32  ;;  %v16303_v8 = vpop.eup %12874 }
 0xc04   :  { %v4119_v53 = vmul.f32 %v16303_v8, %v18867_v32  ;;  %v16317_v43 = vpop.permute.xlu1 %4161 }
 0xc12   :  { %4717 = vrot.lane.b32.xlu0 %v4670_v6, %s13482_s17  ;;  %v4059_v6 = vmul.f32 1.442695, %v4048_v10  ;;  %v4628_v10 = vpop.xlane.xlu0 %4627 }
 0xc14   :  { %12876 = vpow2.f32 %v4059_v6 }
 0xc16   :  { %4642 = vadd.xlane.f32.xlu1 %v4641_v21  ;;  %v4052_v21 = vsub.f32 %v18921_v15, %v18920_v25  ;;  %v4706_v15 = vpop.permute.xlu0 %4705 }
 0xc18   :  { %v4067_v46 = vmul.f32 1.442695, %v4052_v21 }
 0xc1a   :  { %12878 = vpow2.f32 %v4067_v46 }
 0xc1b   :  { %v4634_v28 = vpop.xlane.xlu0 %4633 }
 0xc1c   :  { %v4650_v50 = vadd.f32 %v16172_v48, %v4634_v28 }
 0xc27   :  { %4715 = vrot.lane.b32.xlu1 %v4669_v34, %s13482_s17  ;;  %v16327_v34 = vpop.eup %12876 }
 0xc28   :  { %v4116_v23 = vmul.f32 %v16327_v34, %v18867_v32  ;;  %v16335_v51 = vpop.eup %12878 }
 0xc29   :  { %v16323_v38 = vpop.xlane.xlu1 %4076  ;;  %v4120_v6 = vmul.f32 %v16335_v51, %v18867_v32 }
 0xc2b   :  { %4165 = vrot.lane.b32.xlu1 %v4115_v7, %s13484_s25 }
 0xc2f   :  { %4169 = vrot.lane.b32.xlu1 %v4117_v31, %s13484_s25 }
 0xc31   :  { %5361 = vmax.xlane.f32.xlu0 %v5360_v12  ;;  %v16337_v12 = vpop.xlane.xlu1 %4082 }
 0xc33   :  { %4171 = vrot.lane.b32.xlu1 %v4118_v14, %s13484_s25 }
 0xc35   :  { %v16347_v21 = vpop.xlane.xlu1 %4088 }
 0xc37   :  { %4173 = vrot.lane.b32.xlu1 %v4119_v53, %s13484_s25 }
 0xc40   :  { %v16321_v63 = vpop.f32.mrb[44].mxu0 }
 0xc41   :  { %18922 = vst [vmem:[#allocation112_spill] sm:$0xff] %v16321_v63  ;;  %v16325_v39 = vpop.f32.mrb[45].mxu0  ;;  %v4631_v63 = vpop.xlane.xlu0 %4630 }
 0xc42   :  { %18923 = vst [vmem:[#allocation77_spill] sm:$0xff] %v16325_v39 }
 0xc44   :  { %v16329_v7 = vpop.f32.mrb[46].mxu0 }
 0xc45   :  { %18924 = vst [vmem:[#allocation58_spill] sm:$0xff] %v16329_v7  ;;  %v16331_v31 = vpop.f32.mrb[47].mxu0 }
 0xc46   :  { %18925 = vst [vmem:[#allocation78_spill] sm:$0xff] %v16331_v31 }
 0xc47   :  { %4167 = vrot.lane.b32.xlu0 %v4116_v23, %s13484_s25 }
 0xc49   :  { %v16340_v14 = vpop.f32.mrb[48].mxu0 }
 0xc4a   :  { %18926 = vst [vmem:[#allocation90_spill] sm:$0xff] %v16340_v14  ;;  %v16344_v25 = vpop.f32.mrb[49].mxu0  ;;  %v4625_v14 = vpop.xlane.xlu1 %4624 }
 0xc4b   :  { %18927 = vst [vmem:[#allocation55_spill] sm:$0xff] %v16344_v25  ;;  %4175 = vrot.lane.b32.xlu0 %v4120_v6, %s13484_s25  ;;  %v4647_v32 = vadd.f32 %v16210_v11, %v4625_v14  ;;  %v4648_v6 = vadd.f32 %v16005_v49, %v4628_v10  ;;  %v6635_v14 = vld [vmem:[%s13498_s9 + $0x8] sm:$0xff] }
 0xc4d   :  { %v16349_v53 = vpop.f32.mrb[50].mxu0  ;;  %12880 = vrcp.f32 %v4647_v32 }
 0xc4e   :  { %18928 = vst [vmem:[#allocation63_spill] sm:$0xff] %v16349_v53  ;;  %v16351_v46 = vpop.f32.mrb[51].mxu0  ;;  %12882 = vrcp.f32 %v4648_v6  ;;  %v4704_v49 = vpop.permute.xlu1 %4703 }
 0xc4f   :  { %18929 = vst [vmem:[#allocation95_spill] sm:$0xff] %v16351_v46  ;;  %v4649_v46 = vadd.f32 %v16220_v37, %v4631_v63  ;;  %v4710_v6 = vpop.permute.xlu0 %4709 }
 0xc51   :  { %v16353_v7 = vpop.f32.mrb[60].mxu0  ;;  %12884 = vrcp.f32 %v4649_v46 }
 0xc52   :  { %v16355_v23 = vpop.f32.mrb[61].mxu0  ;;  %12886 = vrcp.f32 %v4650_v50  ;;  %v4708_v48 = vpop.permute.xlu1 %4707 }
 0xc55   :  { %v16357_v31 = vpop.f32.mrb[62].mxu0 }
 0xc56   :  { %v16360_v25 = vpop.f32.mrb[63].mxu0 }
 0xc57   :  { %v12881_v63 = vpop.eup %12880 }
 0xc58   :  { %v12883_v32 = vpop.eup %12882 }
 0xc59   :  { %v16363_v53 = vpop.f32.mrb[64].mxu0 }
 0xc5a   :  { %v16366_v39 = vpop.f32.mrb[65].mxu0 }
 0xc5b   :  { %v12885_v50 = vpop.eup %12884 }
 0xc5d   :  { %v16369_v40 = vpop.f32.mrb[66].mxu0 }
 0xc5e   :  { %v16372_v11 = vpop.f32.mrb[67].mxu0 }
 0xc60   :  { %6636 = vxpose.xlu1.b32.start [1/2] (short) (narrow) %v6634_v5, 64  ;;  %v12887_v5 = vpop.eup %12886 }
 0xc61   :  { %v11358_v10 = vpop.f32.mrb[68].mxu0 }
 0xc62   :  { %v4823_v2 = vadd.f32 %v11358_v10, %v4706_v15  ;;  %v4817_v16 = vpop.f32.mrb[69].mxu0 }
 0xc63   :  { %v4818_v37 = vadd.f32 %v4817_v16, %v4704_v49 }
 0xc64   :  { %6637 = vxpose.xlu1.b32.end [2/2] (short) (narrow) %v6635_v14, 64  ;;  %v4857_v44 = vmul.f32 %v12883_v32, %v4823_v2  ;;  %v18930_v14 = vld [vmem:[#allocation62_spill] sm:$0xff] }
 0xc65   :  { %v4856_v41 = vmul.f32 %v12881_v63, %v4818_v37  ;;  %v11361_v28 = vpop.f32.mrb[70].mxu0  ;;  %v4640_v37 = vpop.xlane.xlu0 %4639 }
 0xc66   :  { %v4833_v56 = vadd.f32 %v11361_v28, %v4710_v6  ;;  %v4827_v46 = vpop.f32.mrb[71].mxu0  ;;  %v4652_v2 = vadd.f32 %v16230_v59, %v4640_v37  ;;  %v4095_v37 = vadd.f32 %v16278_v54, %v16323_v38 }
 0xc67   :  { %v4828_v61 = vadd.f32 %v4827_v46, %v4708_v48  ;;  %11376 = vmatprep.mubr.msk.f32.mxu0 %vm426_vm0, %v4856_v41 }
 0xc68   :  { %11377 = vmatmul.mubr.msk.f32.vlgmr.msra.gmra.mrb[76].mxu0 %vm426_vm0, %v4857_v44  ;;  %v4859_v49 = vmul.f32 %v12887_v5, %v4833_v56  ;;  %v18931_v44 = vld [vmem:[#allocation72_spill] sm:$0xff] }
 0xc69   :  { %v4858_v15 = vmul.f32 %v12885_v50, %v4828_v61  ;;  %12019 = vmatpush3.bf16.msra.mxu0 %v18899_v29  ;;  %v11364_v16 = vpop.f32.mrb[72].mxu0  ;;  %v4714_v32 = vpop.permute.xlu0 %4713 }
 0xc6a   :  { %v4837_v10 = vpop.f32.mrb[73].mxu0  ;;  %12021 = vmatprep.subr.bf16.mxu0 %v18930_v14  ;;  %v4843_v6 = vadd.f32 %v11364_v16, %v4714_v32  ;;  %v18932_v16 = vld [vmem:[#allocation52_spill] sm:$0xff] }
 0xc6b   :  { %11379 = vmatprep.mubr.msk.f32.mxu0 %vm426_vm0, %v4858_v15 }
 0xc6c   :  { %11380 = vmatmul.mubr.msk.f32.gmra.mrb[78].mxu0 %vm426_vm0, %v4859_v49 }
 0xc6d   :  { %12023 = vmatpush3.bf16.msra.mxu0 %v18930_v14  ;;  %v11367_v41 = vpop.f32.mrb[74].mxu0 }
 0xc6e   :  { %12049 = vmatprep.subr.bf16.mxu0 %v18931_v44  ;;  %v4847_v61 = vpop.f32.mrb[75].mxu0  ;;  %v4637_v63 = vpop.xlane.xlu1 %4636 }
 0xc6f   :  { %v4651_v29 = vadd.f32 %v16239_v57, %v4637_v63  ;;  %v4093_v57 = vadd.f32 %v16029_v3, %v16312_v1 }
 0xc71   :  { %12888 = vrcp.f32 %v4651_v29  ;;  %v4276_v29 = vadd.f32 %v16355_v23, %v16317_v43  ;;  %v4096_v23 = vadd.f32 %v16327_v34, %v16308_v24  ;;  %v4099_v24 = vadd.f32 %v16303_v8, %v16347_v21  ;;  %v18937_v8 = vld [vmem:[#allocation99_spill] sm:$0xff] }
 0xc72   :  { %12890 = vrcp.f32 %v4652_v2  ;;  %v4712_v56 = vpop.permute.xlu1 %4711  ;;  %v5373_v21 = vsub.f32 %v18937_v8, %v16143_v22  ;;  %v18939_v22 = vld [vmem:[#allocation96_spill] sm:$0xff] }
 0xc73   :  { %v4838_v28 = vadd.f32 %v4837_v10, %v4712_v56  ;;  %v4094_v10 = vadd.f32 %v18932_v16, %v16285_v45  ;;  %v4281_v45 = vadd.f32 %v16353_v7, %v16295_v13 }
 0xc7b   :  { %v12889_v48 = vpop.eup %12888 }
 0xc7c   :  { %v12891_v46 = vpop.eup %12890  ;;  %v4860_v50 = vmul.f32 %v12889_v48, %v4838_v28 }
 0xc7d   :  { %v4861_v5 = vmul.f32 %v12891_v46, %v4843_v6  ;;  %v18933_v46 = vld [vmem:[#allocation73_spill] sm:$0xff] }
 0xc7e   :  { %11382 = vmatprep.mubr.msk.f32.mxu0 %vm426_vm0, %v4860_v50  ;;  %v18935_v50 = vld [vmem:[#allocation74_spill] sm:$0xff] }
 0xc7f   :  { %11383 = vmatmul.mubr.msk.f32.gmra.mrb[80].mxu0 %vm426_vm0, %v4861_v5 }
 0xc89   :  { %v4646_v59 = vpop.xlane.xlu0 %4645 }
 0xc8a   :  { %v4654_v15 = vadd.f32 %v16257_v4, %v4646_v59 }
 0xc8c   :  { %12892 = vrcp.f32 %v4654_v15 }
 0xc8d   :  { %v4718_v63 = vpop.permute.xlu0 %4717 }
 0xc96   :  { %v12893_v4 = vpop.eup %12892 }
 0xca3   :  { %v4643_v49 = vpop.xlane.xlu1 %4642 }
 0xca4   :  { %v4653_v14 = vadd.f32 %v16274_v27, %v4643_v49  ;;  %v4853_v27 = vadd.f32 %v11367_v41, %v4718_v63 }
 0xca6   :  { %12894 = vrcp.f32 %v4653_v14  ;;  %v4863_v28 = vmul.f32 %v12893_v4, %v4853_v27  ;;  %v18941_v27 = vld [vmem:[#allocation57_spill] sm:$0xff] }
 0xca7   :  { %12896 = vrcp.f32 %v4093_v57  ;;  %v4716_v2 = vpop.permute.xlu1 %4715 }
 0xca8   :  { %12898 = vrcp.f32 %v4094_v10  ;;  %v4848_v3 = vadd.f32 %v4847_v61, %v4716_v2  ;;  %v4097_v61 = vadd.f32 %v16283_v26, %v16337_v12  ;;  %v18934_v26 = vld [vmem:[#allocation85_spill] sm:$0xff]  ;;  %v5374_v2 = vsub.f32 %v18939_v22, %v16150_v9 }
 0xca9   :  { %12900 = vrcp.f32 %v4095_v37  ;;  %v5371_v34 = vsub.f32 %v18934_v26, %v16117_v0  ;;  %v5383_v37 = vmul.f32 1.442695, %v5373_v21 }
 0xcaa   :  { %12902 = vrcp.f32 %v4096_v23 }
 0xcab   :  { %v4166_v56 = vpop.permute.xlu1 %4165  ;;  %12904 = vrcp.f32 %v4097_v61  ;;  %v5379_v0 = vmul.f32 1.442695, %v5371_v34 }
 0xcac   :  { %v4286_v54 = vadd.f32 %v16360_v25, %v4166_v56  ;;  %v4098_v25 = vadd.f32 %v16290_v33, %v16315_v62  ;;  %v18936_v33 = vld [vmem:[#allocation83_spill] sm:$0xff]  ;;  %v5385_v56 = vmul.f32 1.442695, %v5374_v2 }
 0xcad   :  { %v5372_v62 = vsub.f32 %v18936_v33, %v16130_v35 }
 0xcae   :  { %12906 = vrcp.f32 %v4098_v25  ;;  %v18944_v25 = vld [vmem:[#allocation91_spill] sm:$0xff] }
 0xcaf   :  { %v4170_v7 = vpop.permute.xlu1 %4169  ;;  %12908 = vrcp.f32 %v4099_v24  ;;  %v5381_v57 = vmul.f32 1.442695, %v5372_v62 }
 0xcb0   :  { %v12895_v1 = vpop.eup %12894 }
 0xcb1   :  { %v4862_v32 = vmul.f32 %v12895_v1, %v4848_v3  ;;  %v12897_v6 = vpop.eup %12896 }
 0xcb2   :  { %v4314_v48 = vmul.f32 %v12897_v6, %v4276_v29  ;;  %v12899_v38 = vpop.eup %12898 }
 0xcb3   :  { %11385 = vmatprep.mubr.msk.f32.mxu0 %vm426_vm0, %v4862_v32  ;;  %v12901_v43 = vpop.eup %12900  ;;  %v4315_v41 = vmul.f32 %v12899_v38, %v4281_v45  ;;  %v4172_v12 = vpop.permute.xlu1 %4171  ;;  %v18943_v45 = vld [vmem:[#allocation102_spill] sm:$0xff] }
 0xcb4   :  { %11386 = vmatmul.mubr.msk.f32.gmra.mrb[82].mxu0 %vm426_vm0, %v4863_v28  ;;  %v4316_v13 = vmul.f32 %v12901_v43, %v4286_v54  ;;  %v12903_v10 = vpop.eup %12902 }
 0xcb5   :  { %11396 = vmatprep.mubr.msk.f32.mxu0 %vm426_vm0, %v4314_v48  ;;  %v12905_v63 = vpop.eup %12904 }
 0xcb7   :  { %v4174_v14 = vpop.permute.xlu1 %4173 }
 0xcb8   :  { %11397 = vmatmul.mubr.msk.f32.vlgmr.msra.gmra.mrb[76].mxu0 %vm426_vm0, %v4315_v41  ;;  %v4306_v1 = vadd.f32 %v16372_v11, %v4174_v14  ;;  %v12907_v9 = vpop.eup %12906  ;;  %v5377_v11 = vsub.f32 %v18943_v45, %v16241_v55 }
 0xcb9   :  { %12051 = vmatpush3.bf16.msra.mxu0 %v18931_v44  ;;  %11399 = vmatprep.mubr.msk.f32.mxu0 %vm426_vm0, %v4316_v13  ;;  %v4100_v44 = vadd.f32 %v16335_v51, %v16319_v52  ;;  %v4296_v52 = vadd.f32 %v16366_v39, %v4170_v7  ;;  %v18938_v51 = vld [vmem:[#allocation75_spill] sm:$0xff]  ;;  %v4301_v39 = vadd.f32 %v16363_v53, %v4172_v12  ;;  %v12909_v53 = vpop.eup %12908 }
 0xcba   :  { %12053 = vmatprep.subr.bf16.mxu0 %v18933_v46  ;;  %v4320_v54 = vmul.f32 %v12909_v53, %v4306_v1 }
 0xcbb   :  { %12910 = vrcp.f32 %v4100_v44  ;;  %v4318_v3 = vmul.f32 %v12905_v63, %v4296_v52  ;;  %v4319_v28 = vmul.f32 %v12907_v9, %v4301_v39 }
 0xcbc   :  { %12912 = vpow2.f32 %v5379_v0 }
 0xcbd   :  { %12055 = vmatpush3.bf16.msra.mxu0 %v18933_v46 }
 0xcbe   :  { %12057 = vmatprep.subr.bf16.mxu0 %v18935_v50  ;;  %v5362_v5 = vpop.xlane.xlu0 %5361 }
 0xcbf   :  { %v5370_v59 = vmax.f32 %v5362_v5, %v16299_v18 }
 0xcc1   :  { %v5402_v15 = vsub.f32 %v16299_v18, %v5370_v59  ;;  %12059 = vmatpush3.bf16.msra.mxu0 %v18935_v50  ;;  %v18940_v18 = vld [vmem:[#allocation89_spill] sm:$0xff]  ;;  %v5378_v23 = vsub.f32 %v18919_v19, %v5370_v59 }
 0xcc2   :  { %12061 = vmatprep.subr.bf16.mxu0 %v18938_v51  ;;  %v4168_v49 = vpop.permute.xlu0 %4167  ;;  %v5375_v4 = vsub.f32 %v18940_v18, %v16159_v58  ;;  %v18942_v58 = vld [vmem:[#allocation87_spill] sm:$0xff] }
 0xcc3   :  { %v5417_v35 = vmul.f32 1.442695, %v5402_v15  ;;  %v4291_v16 = vadd.f32 %v16357_v31, %v4168_v49  ;;  %v5376_v32 = vsub.f32 %v18942_v58, %v16174_v17  ;;  %v5391_v17 = vmul.f32 1.442695, %v5377_v11 }
 0xcc4   :  { %v5387_v6 = vmul.f32 1.442695, %v5375_v4 }
 0xcc5   :  { %v4317_v29 = vmul.f32 %v12903_v10, %v4291_v16  ;;  %12063 = vmatpush3.bf16.msra.mxu0 %v18938_v51  ;;  %12914 = vpow2.f32 %v5417_v35  ;;  %v12911_v38 = vpop.eup %12910  ;;  %v5389_v43 = vmul.f32 1.442695, %v5376_v32  ;;  %v10318_v10 = vld [vmem:[%s13498_s9 + $0x10] sm:$0xff] }
 0xcc6   :  { %v4176_v31 = vpop.permute.xlu0 %4175  ;;  %12065 = vmatprep.subr.bf16.mxu0 %v18941_v27  ;;  %12916 = vpow2.f32 %v5381_v57  ;;  %v16449_v61 = vpop.eup %12912 }
 0xcc7   :  { %11400 = vmatmul.mubr.msk.f32.gmra.mrb[78].mxu0 %vm426_vm0, %v4317_v29  ;;  %12918 = vpow2.f32 %v5383_v37  ;;  %v4311_v48 = vadd.f32 %v16369_v40, %v4176_v31  ;;  %v5393_v40 = vmul.f32 1.442695, %v5378_v23  ;;  %v10319_v37 = vld [vmem:[%s13498_s9 + $0x18] sm:$0xff]  ;;  %s18949_s9 = sld [smem:[#allocation24_spill]] }
 0xcc8   :  { %11402 = vmatprep.mubr.msk.f32.mxu0 %vm426_vm0, %v4318_v3  ;;  %12920 = vpow2.f32 %v5385_v56 }
 0xcc9   :  { %12922 = vpow2.f32 %v5387_v6  ;;  %v4321_v41 = vmul.f32 %v12911_v38, %v4311_v48 }
 0xcca   :  { %12924 = vpow2.f32 %v5389_v43 }
 0xccb   :  { %11403 = vmatmul.mubr.msk.f32.gmra.mrb[80].mxu0 %vm426_vm0, %v4319_v28  ;;  %12926 = vpow2.f32 %v5391_v17 }
 0xccc   :  { %11405 = vmatprep.mubr.msk.f32.mxu0 %vm426_vm0, %v4320_v54  ;;  %12928 = vpow2.f32 %v5393_v40 }
 0xccf   :  { %11406 = vmatmul.mubr.msk.f32.gmra.mrb[82].mxu0 %vm426_vm0, %v4321_v41  ;;  %v16452_v55 = vpop.eup %12914 }
 0xcd0   :  { %11452 = vmatprep.mubr.msk.f32.mxu0 %vm2015_vm5, %v16449_v61  ;;  %v16456_v13 = vpop.eup %12916  ;;  %v16460_v19 = vmul.f32 %v16452_v55, %v16157_v47  ;;  %v18945_v47 = vmov 0.0|0.0  }
 0xcd1   :  { %v16462_v7 = vpop.eup %12918 }
 0xcd2   :  { %v16470_v46 = vpop.eup %12920 }
 0xcd3   :  { %11453 = vmatmul.mubr.msk.f32.vlgmr.msra.gmra.mrb[84].mxu0 %vm2015_vm5, %v16456_v13  ;;  %v16472_v24 = vpop.eup %12922 }
 0xcd4   :  { %11455 = vmatprep.mubr.msk.f32.mxu0 %vm2015_vm5, %v16462_v7  ;;  %12067 = vmatpush3.bf16.msra.mxu0 %v18941_v27  ;;  %v16480_v26 = vpop.eup %12924 }
 0xcd5   :  { %12069 = vmatprep.subr.bf16.mxu0 %v18944_v25  ;;  %v12927_v34 = vpop.eup %12926 }
 0xcd6   :  { %v16485_v12 = vpop.eup %12928  ;;  %v5437_v14 = vsel %vm2015_vm5, %v12927_v34, 0.0 }
 0xcd7   :  { %11456 = vmatmul.mubr.msk.f32.gmra.mrb[86].mxu0 %vm2015_vm5, %v16470_v46 }
 0xcd8   :  { %11458 = vmatprep.mubr.msk.f32.mxu0 %vm2015_vm5, %v16472_v24  ;;  %12071 = vmatpush3.bf16.msra.mxu0 %v18944_v25 }
 0xcd9   :  { %12108 = vmatprep.subr.bf16.mxu0 %v18945_v47 }
 0xcdb   :  { %11459 = vmatmul.mubr.msk.f32.gmra.mrb[88].mxu0 %vm2015_vm5, %v16480_v26 }
 0xcdc   :  { %11461 = vmatprep.mubr.msk.f32.mxu0 %vm2015_vm5, %v12927_v34 }
 0xcdf   :  { %11462 = vmatmul.mubr.msk.f32.gmra.mrb[90].mxu0 %vm2015_vm5, %v16485_v12 }
 0xce0   :  { %v6652_v44 = vpop.trf.xlu1 }
 0xce1   :  { %v6774_v50 = vsel %vm793_vm2, %v6652_v44, 0.0 }
 0xce2   :  { %6775 = vadd.xlane.f32.xlu0 %v6774_v50 }
 0xce4   :  { %v6653_v5 = vpop.trf.xlu1 }
 0xce5   :  { %v6777_v33 = vsel %vm793_vm2, %v6653_v5, 0.0 }
 0xce6   :  { %6778 = vadd.xlane.f32.xlu0 %v6777_v33 }
 0xce8   :  { %v6654_v62 = vpop.trf.xlu1 }
 0xce9   :  { %v6780_v59 = vsel %vm793_vm2, %v6654_v62, 0.0 }
 0xcea   :  { %6781 = vadd.xlane.f32.xlu0 %v6780_v59 }
 0xcec   :  { %v6655_v8 = vpop.trf.xlu1 }
 0xced   :  { %v6783_v21 = vsel %vm793_vm2, %v6655_v8, 0.0 }
 0xcee   :  { %6784 = vadd.xlane.f32.xlu0 %v6783_v21 }
 0xcf0   :  { %v6656_v0 = vpop.trf.xlu1 }
 0xcf1   :  { %v6786_v15 = vsel %vm793_vm2, %v6656_v0, 0.0 }
 0xcf2   :  { %6787 = vadd.xlane.f32.xlu0 %v6786_v15 }
 0xcf4   :  { %v6657_v52 = vpop.trf.xlu1 }
 0xcf5   :  { %v6789_v51 = vsel %vm793_vm2, %v6657_v52, 0.0 }
 0xcf6   :  { %6790 = vadd.xlane.f32.xlu1 %v6789_v51  ;;  %v5419_v51 = vsel %vm2015_vm5, %v16449_v61, 0.0 }
 0xcf8   :  { %v6658_v49 = vpop.trf.xlu1 }
 0xcf9   :  { %v6792_v57 = vsel %vm793_vm2, %v6658_v49, 0.0 }
 0xcfa   :  { %6793 = vadd.xlane.f32.xlu0 %v6792_v57  ;;  %5438 = vadd.xlane.f32.xlu1 %v5437_v14  ;;  %v5425_v57 = vsel %vm2015_vm5, %v16462_v7, 0.0  ;;  %v5428_v14 = vsel %vm2015_vm5, %v16470_v46, 0.0  ;;  %v5434_v7 = vsel %vm2015_vm5, %v16480_v26, 0.0 }
 0xcfc   :  { %v6659_v35 = vpop.trf.xlu1 }
 0xcfd   :  { %v6795_v16 = vsel %vm793_vm2, %v6659_v35, 0.0 }
 0xcfe   :  { %6796 = vadd.xlane.f32.xlu0 %v6795_v16  ;;  %v5431_v16 = vsel %vm2015_vm5, %v16472_v24, 0.0 }
 0xd2d   :  { %6670 = vxpose.xlu1.b32.start [1/2] (short) (narrow) %v10318_v10, 64 }
 0xd31   :  { %6671 = vxpose.xlu1.b32.end [2/2] (short) (narrow) %v10319_v37, 64 }
 0xd6f   :  { %v6776_v22 = vpop.xlane.xlu0 %6775 }
 0xd70   :  { %v6822_v2 = vmul.f32 0.0625, %v6776_v22 }
 0xd72   :  { %v16500_v63 = vsub.f32 %v6652_v44, %v6822_v2 }
 0xd73   :  { %v6779_v18 = vpop.xlane.xlu0 %6778 }
 0xd74   :  { %v6823_v4 = vmul.f32 0.0625, %v6779_v18  ;;  %v6854_v39 = vmul.f32 %v16500_v63, %v16500_v63  ;;  %v18946_v18 = vld [vmem:[#allocation105_spill] sm:$0xff] }
 0xd76   :  { %v16504_v29 = vsub.f32 %v6653_v5, %v6823_v4  ;;  %v6870_v3 = vsel %vm793_vm2, %v6854_v39, 0.0  ;;  %v18947_v39 = vld [vmem:[#allocation106_spill] sm:$0xff] }
 0xd77   :  { %6871 = vadd.xlane.f32.xlu0 %v6870_v3  ;;  %v6782_v1 = vpop.xlane.xlu0 %6781 }
 0xd78   :  { %v6824_v31 = vmul.f32 0.0625, %v6782_v1  ;;  %v6855_v27 = vmul.f32 %v16504_v29, %v16504_v29 }
 0xd7a   :  { %v16509_v9 = vsub.f32 %v6654_v62, %v6824_v31  ;;  %v6873_v56 = vsel %vm793_vm2, %v6855_v27, 0.0 }
 0xd7b   :  { %6874 = vadd.xlane.f32.xlu0 %v6873_v56  ;;  %v6785_v58 = vpop.xlane.xlu0 %6784 }
 0xd7c   :  { %v6825_v32 = vmul.f32 0.0625, %v6785_v58  ;;  %v6856_v53 = vmul.f32 %v16509_v9, %v16509_v9 }
 0xd7e   :  { %v16514_v6 = vsub.f32 %v6655_v8, %v6825_v32  ;;  %v6876_v45 = vsel %vm793_vm2, %v6856_v53, 0.0 }
 0xd7f   :  { %6877 = vadd.xlane.f32.xlu0 %v6876_v45  ;;  %v6788_v11 = vpop.xlane.xlu0 %6787 }
 0xd80   :  { %v6826_v28 = vmul.f32 0.0625, %v6788_v11  ;;  %v6857_v48 = vmul.f32 %v16514_v6, %v16514_v6 }
 0xd82   :  { %v16519_v54 = vsub.f32 %v6656_v0, %v6826_v28  ;;  %v6879_v38 = vsel %vm793_vm2, %v6857_v48, 0.0 }
 0xd83   :  { %v6791_v43 = vpop.xlane.xlu1 %6790  ;;  %6880 = vadd.xlane.f32.xlu0 %v6879_v38 }
 0xd84   :  { %v6827_v23 = vmul.f32 0.0625, %v6791_v43  ;;  %v6858_v17 = vmul.f32 %v16519_v54, %v16519_v54 }
 0xd86   :  { %v16524_v41 = vsub.f32 %v6657_v52, %v6827_v23  ;;  %v6882_v40 = vsel %vm793_vm2, %v6858_v17, 0.0 }
 0xd87   :  { %v5439_v25 = vpop.xlane.xlu1 %5438  ;;  %6883 = vadd.xlane.f32.xlu0 %v6882_v40  ;;  %v6794_v34 = vpop.xlane.xlu0 %6793 }
 0xd88   :  { %v5449_v44 = vadd.f32 %v16251_v36, %v5439_v25  ;;  %v6828_v50 = vmul.f32 0.0625, %v6794_v34  ;;  %v6859_v5 = vmul.f32 %v16524_v41, %v16524_v41 }
 0xd8a   :  { %v16530_v33 = vsub.f32 %v6658_v49, %v6828_v50  ;;  %v6885_v62 = vsel %vm793_vm2, %v6859_v5, 0.0  ;;  %v5422_v49 = vsel %vm2015_vm5, %v16456_v13, 0.0  ;;  %12930 = vrcp.f32 %v5449_v44 }
 0xd8b   :  { %6886 = vadd.xlane.f32.xlu0 %v6885_v62  ;;  %v6797_v59 = vpop.xlane.xlu0 %6796 }
 0xd8c   :  { %v6829_v8 = vmul.f32 0.0625, %v6797_v59  ;;  %v6860_v21 = vmul.f32 %v16530_v33, %v16530_v33 }
 0xd8e   :  { %v16535_v0 = vsub.f32 %v6659_v35, %v6829_v8  ;;  %v6888_v15 = vsel %vm793_vm2, %v6860_v21, 0.0 }
 0xd8f   :  { %6889 = vadd.xlane.f32.xlu0 %v6888_v15 }
 0xd90   :  { %v6861_v36 = vmul.f32 %v16535_v0, %v16535_v0 }
 0xd92   :  { %v6891_v52 = vsel %vm793_vm2, %v6861_v36, 0.0 }
 0xd93   :  { %6892 = vadd.xlane.f32.xlu0 %v6891_v52 }
 0xd94   :  { %v12931_v32 = vpop.eup %12930 }
 0xd97   :  { %5420 = vadd.xlane.f32.xlu0 %v5419_v51 }
 0xd9b   :  { %5423 = vadd.xlane.f32.xlu0 %v5422_v49 }
 0xd9f   :  { %5426 = vadd.xlane.f32.xlu0 %v5425_v57 }
 0xda3   :  { %5429 = vadd.xlane.f32.xlu0 %v5428_v14 }
 0xda6   :  { %v11454_v35 = vpop.f32.mrb[84].mxu0 }
 0xda7   :  { %v16552_v10 = vadd.f32 %v11454_v35, %v16183_v60  ;;  %5432 = vadd.xlane.f32.xlu0 %v5431_v16  ;;  %v5561_v61 = vpop.f32.mrb[85].mxu0 }
 0xda8   :  { %v16555_v13 = vadd.f32 %v5561_v61, %v16170_v30  ;;  %v5440_v30 = vsel %vm2015_vm5, %v16485_v12, 0.0  ;;  %v18948_v12 = vld [vmem:[#allocation110_spill] sm:$0xff] }
 0xdaa   :  { %v11457_v37 = vpop.f32.mrb[86].mxu0 }
 0xdab   :  { %v16560_v46 = vadd.f32 %v11457_v37, %v16202_v20  ;;  %5435 = vadd.xlane.f32.xlu0 %v5434_v7  ;;  %v5571_v22 = vpop.f32.mrb[87].mxu0 }
 0xdac   :  { %v16563_v24 = vadd.f32 %v5571_v22, %v16196_v42 }
 0xdad   :  { %v16565_v60 = vpop.trf.xlu1 }
 0xdae   :  { %v11460_v2 = vpop.f32.mrb[88].mxu0  ;;  %v6798_v20 = vsel %vm793_vm2, %v16565_v60, 0.0 }
 0xdaf   :  { %v16570_v4 = vadd.f32 %v11460_v2, %v18946_v18  ;;  %5441 = vadd.xlane.f32.xlu0 %v5440_v30  ;;  %v5581_v26 = vpop.f32.mrb[89].mxu0 }
 0xdb0   :  { %v16573_v3 = vadd.f32 %v5581_v26, %v18947_v39 }
 0xdb1   :  { %v16577_v1 = vpop.trf.xlu1 }
 0xdb2   :  { %v11463_v42 = vpop.f32.mrb[90].mxu0  ;;  %v6801_v58 = vsel %vm793_vm2, %v16577_v1, 0.0 }
 0xdb3   :  { %v16580_v31 = vadd.f32 %v11463_v42, %v16460_v19  ;;  %v5591_v27 = vpop.f32.mrb[91].mxu0  ;;  %6799 = vadd.xlane.f32.xlu0 %v6798_v20 }
 0xdb4   :  { %v5592_v56 = vadd.f32 %v5591_v27, %v18948_v12  ;;  %v16615_v27 = vld [vmem:[%s18949_s9] ss:$0 sm:$0xff] }
 0xdb5   :  { %v16585_v53 = vpop.trf.xlu1 }
 0xdb6   :  { %v16587_v45 = vmul.f32 %v12931_v32, %v5592_v56  ;;  %v6804_v11 = vsel %vm793_vm2, %v16585_v53, 0.0 }
 0xdb7   :  { %6802 = vadd.xlane.f32.xlu0 %v6801_v58 }
 0xdb9   :  { %v16591_v28 = vpop.trf.xlu1 }
 0xdba   :  { %v6807_v19 = vsel %vm793_vm2, %v16591_v28, 0.0 }
 0xdbb   :  { %6805 = vadd.xlane.f32.xlu0 %v6804_v11 }
 0xdbd   :  { %v16595_v48 = vpop.trf.xlu1 }
 0xdbe   :  { %v6810_v38 = vsel %vm793_vm2, %v16595_v48, 0.0 }
 0xdbf   :  { %6808 = vadd.xlane.f32.xlu0 %v6807_v19 }
 0xdc1   :  { %v16599_v43 = vpop.trf.xlu1 }
 0xdc2   :  { %v6813_v23 = vsel %vm793_vm2, %v16599_v43, 0.0 }
 0xdc3   :  { %6811 = vadd.xlane.f32.xlu0 %v6810_v38 }
 0xdc5   :  { %v16603_v17 = vpop.trf.xlu1 }
 0xdc6   :  { %v6816_v40 = vsel %vm793_vm2, %v16603_v17, 0.0 }
 0xdc7   :  { %6814 = vadd.xlane.f32.xlu0 %v6813_v23  ;;  %v16622_v23 = vld [vmem:[%s18950_s29] ss:$0 sm:$0xff] }
 0xdc9   :  { %v16607_v25 = vpop.trf.xlu1 }
 0xdca   :  { %v6819_v34 = vsel %vm793_vm2, %v16607_v25, 0.0 }
 0xdcb   :  { %6817 = vadd.xlane.f32.xlu0 %v6816_v40 }
 0xdcf   :  { %6820 = vadd.xlane.f32.xlu0 %v6819_v34 }
 0xe04   :  { %v6872_v44 = vpop.xlane.xlu0 %6871 }
 0xe05   :  { %v6918_v50 = vmul.f32 0.0625, %v6872_v44 }
 0xe07   :  { %v6934_v8 = vadd.f32 1e-05, %v6918_v50 }
 0xe08   :  { %v6875_v5 = vpop.xlane.xlu0 %6874 }
 0xe09   :  { %v6919_v62 = vmul.f32 0.0625, %v6875_v5 }
 0xe0b   :  { %v6935_v59 = vadd.f32 1e-05, %v6919_v62 }
 0xe0c   :  { %v6878_v21 = vpop.xlane.xlu0 %6877 }
 0xe0d   :  { %v6920_v15 = vmul.f32 0.0625, %v6878_v21  ;;  %12932 = vrsqrt.f32 %v6935_v59 }
 0xe0e   :  { %12934 = vrsqrt.f32 %v6934_v8 }
 0xe0f   :  { %v6936_v36 = vadd.f32 1e-05, %v6920_v15 }
 0xe10   :  { %v6881_v52 = vpop.xlane.xlu0 %6880 }
 0xe11   :  { %12936 = vrsqrt.f32 %v6936_v36  ;;  %v6921_v51 = vmul.f32 0.0625, %v6881_v52 }
 0xe13   :  { %v6937_v49 = vadd.f32 1e-05, %v6921_v51 }
 0xe14   :  { %v6884_v57 = vpop.xlane.xlu0 %6883 }
 0xe15   :  { %12938 = vrsqrt.f32 %v6937_v49  ;;  %v6922_v14 = vmul.f32 0.0625, %v6884_v57 }
 0xe17   :  { %v6938_v35 = vadd.f32 1e-05, %v6922_v14  ;;  %v12933_v61 = vpop.eup %12932 }
 0xe18   :  { %v6887_v16 = vpop.xlane.xlu0 %6886  ;;  %v12935_v7 = vpop.eup %12934  ;;  %v6967_v30 = vmul.f32 %v12933_v61, %v16504_v29 }
 0xe19   :  { %12940 = vrsqrt.f32 %v6938_v35  ;;  %v6923_v37 = vmul.f32 0.0625, %v6887_v16  ;;  %v6966_v39 = vmul.f32 %v12935_v7, %v16500_v63 }
 0xe1a   :  { %v6989_v56 = vmul.f32 %v16615_v27, %v6967_v30  ;;  %v18953_v30 = vld [vmem:[#allocation59_spill] sm:$0xff] }
 0xe1b   :  { %v12937_v22 = vpop.eup %12936  ;;  %v6939_v2 = vadd.f32 1e-05, %v6923_v37  ;;  %v6988_v29 = vmul.f32 %v16615_v27, %v6966_v39 }
 0xe1c   :  { %v6890_v18 = vpop.xlane.xlu0 %6889  ;;  %v6968_v20 = vmul.f32 %v12937_v22, %v16509_v9  ;;  %v7011_v9 = vadd.f32 %v16622_v23, %v6989_v56 }
 0xe1d   :  { %12942 = vrsqrt.f32 %v6939_v2  ;;  %v6924_v26 = vmul.f32 0.0625, %v6890_v18  ;;  %v7010_v5 = vadd.f32 %v16622_v23, %v6988_v29  ;;  %v18954_v29 = vld [vmem:[#allocation107_spill] sm:$0xff] }
 0xe1e   :  { %v6990_v19 = vmul.f32 %v16615_v27, %v6968_v20  ;;  %v7027_v21 = vsel %vm793_vm2, %v7011_v9, 0.0 }
 0xe1f   :  { %v12939_v42 = vpop.eup %12938  ;;  %v6940_v12 = vadd.f32 1e-05, %v6924_v26  ;;  %v7026_v49 = vsel %vm793_vm2, %v7010_v5, 0.0 }
 0xe20   :  { %v6969_v58 = vmul.f32 %v12939_v42, %v16514_v6  ;;  %v6893_v32 = vpop.xlane.xlu0 %6892  ;;  %v18951_v6 = vld [vmem:[#allocation119_spill] sm:$0xff]  ;;  %v7012_v62 = vadd.f32 %v16622_v23, %v6990_v19  ;;  %v7028_v61 = vadd.f32 %v7027_v21, %v7026_v49 }
 0xe21   :  { %12944 = vrsqrt.f32 %v6940_v12  ;;  %v6925_v11 = vmul.f32 0.0625, %v6893_v32 }
 0xe22   :  { %v6991_v40 = vmul.f32 %v16615_v27, %v6969_v58  ;;  %v7029_v57 = vsel %vm793_vm2, %v7012_v62, 0.0  ;;  %v18955_v62 = vld [vmem:[#allocation104_spill] sm:$0xff] }
 0xe23   :  { %v12941_v38 = vpop.eup %12940  ;;  %v6941_v63 = vadd.f32 1e-05, %v6925_v11  ;;  %v7030_v2 = vadd.f32 %v7029_v57, %v7028_v61 }
 0xe24   :  { %v6970_v34 = vmul.f32 %v12941_v38, %v16519_v54  ;;  %v5421_v44 = vpop.xlane.xlu0 %5420  ;;  %v7013_v15 = vadd.f32 %v16622_v23, %v6991_v40  ;;  %v18952_v54 = vld [vmem:[#allocation56_spill] sm:$0xff]  ;;  %v6568_v40 = vld [vmem:[#allocation7] sm:$0xff] }
 0xe25   :  { %12946 = vrsqrt.f32 %v6941_v63  ;;  %v5443_v50 = vadd.f32 %v18951_v6, %v5421_v44 }
 0xe26   :  { %v6992_v59 = vmul.f32 %v16615_v27, %v6970_v34  ;;  %v7031_v37 = vsel %vm793_vm2, %v7013_v15, 0.0  ;;  %v6569_v34 = vld [vmem:[#allocation7 + $0x8] sm:$0xff] }
 0xe27   :  { %v12943_v8 = vpop.eup %12942  ;;  %12948 = vrcp.f32 %v5443_v50  ;;  %v7032_v42 = vadd.f32 %v7031_v37, %v7030_v2 }
 0xe28   :  { %v6971_v36 = vmul.f32 %v12943_v8, %v16524_v41  ;;  %v5424_v52 = vpop.xlane.xlu0 %5423  ;;  %v7014_v14 = vadd.f32 %v16622_v23, %v6992_v59  ;;  %v16655_v8 = vpack.c.bf16 %v6569_v34, %v6568_v40  ;;  %v16702_v40 = vld [vmem:[%s18958_s19] sm:$0x1] }
 0xe29   :  { %v5444_v51 = vadd.f32 %v18952_v54, %v5424_v52 }
 0xe2a   :  { %v6993_v35 = vmul.f32 %v16615_v27, %v6971_v36  ;;  %v7033_v26 = vsel %vm793_vm2, %v7014_v14, 0.0 }
 0xe2b   :  { %v12945_v16 = vpop.eup %12944  ;;  %12950 = vrcp.f32 %v5444_v51  ;;  %v18956_v51 = vld [vmem:[#allocation108_spill] sm:$0xff] }
 0xe2c   :  { %v7015_v7 = vadd.f32 %v16622_v23, %v6993_v35  ;;  %v6972_v41 = vmul.f32 %v12945_v16, %v16530_v33  ;;  %v5427_v22 = vpop.xlane.xlu0 %5426  ;;  %v7034_v33 = vadd.f32 %v7033_v26, %v7032_v42  ;;  %v18957_v42 = vmov 0.0  }
 0xe2d   :  { %v5445_v18 = vadd.f32 %v18953_v30, %v5427_v22 }
 0xe2e   :  { %v6994_v39 = vmul.f32 %v16615_v27, %v6972_v41  ;;  %v7035_v12 = vsel %vm793_vm2, %v7015_v7, 0.0 }
 0xe2f   :  { %v12947_v20 = vpop.eup %12946  ;;  %12952 = vrcp.f32 %v5445_v18  ;;  %v7036_v44 = vadd.f32 %v7035_v12, %v7034_v33 }
 0xe30   :  { %v7016_v56 = vadd.f32 %v16622_v23, %v6994_v39  ;;  %v6973_v58 = vmul.f32 %v12947_v20, %v16535_v0  ;;  %v5430_v32 = vpop.xlane.xlu0 %5429 }
 0xe31   :  { %v12949_v11 = vpop.eup %12948  ;;  %v5446_v19 = vadd.f32 %v18954_v29, %v5430_v32 }
 0xe32   :  { %v7037_v38 = vsel %vm793_vm2, %v7016_v56, 0.0  ;;  %v6995_v63 = vmul.f32 %v16615_v27, %v6973_v58  ;;  %v5600_v9 = vmul.f32 %v12949_v11, %v16555_v13 }
 0xe33   :  { %12954 = vrcp.f32 %v5446_v19  ;;  %v7038_v5 = vadd.f32 %v7037_v38, %v7036_v44 }
 0xe34   :  { %v7017_v6 = vadd.f32 %v16622_v23, %v6995_v63  ;;  %v5433_v50 = vpop.xlane.xlu0 %5432  ;;  %11472 = vmatprep.mubr.msk.f32.mxu0 %vm426_vm0, %v5600_v9 }
 0xe35   :  { %v12951_v0 = vpop.eup %12950  ;;  %v5447_v59 = vadd.f32 %v18955_v62, %v5433_v50 }
 0xe36   :  { %v7039_v21 = vsel %vm793_vm2, %v7017_v6, 0.0  ;;  %v5601_v15 = vmul.f32 %v12951_v0, %v16552_v10 }
 0xe37   :  { %v7040_v13 = vadd.f32 %v7039_v21, %v7038_v5  ;;  %12956 = vrcp.f32 %v5447_v59 }
 0xe38   :  { %v5436_v36 = vpop.xlane.xlu0 %5435  ;;  %11473 = vmatmul.mubr.msk.f32.vlgmr.msra.gmra.mrb[76].mxu0 %vm426_vm0, %v5601_v15 }
 0xe39   :  { %v12953_v52 = vpop.eup %12952  ;;  %v7041_v54 = vrot.slane %v7040_v13, 4  ;;  %v5448_v49 = vadd.f32 %v18956_v51, %v5436_v36  ;;  %12110 = vmatpush3.bf16.msra.mxu0 %v16655_v8 }
 0xe3a   :  { %v5602_v57 = vmul.f32 %v12953_v52, %v16563_v24 }
 0xe3b   :  { %12958 = vrcp.f32 %v5448_v49  ;;  %v7042_v14 = vadd.f32 %v7041_v54, %v7040_v13 }
 0xe3c   :  { %v5442_v35 = vpop.xlane.xlu0 %5441  ;;  %11475 = vmatprep.mubr.msk.f32.mxu0 %vm426_vm0, %v5602_v57 }
 0xe3d   :  { %v12955_v16 = vpop.eup %12954  ;;  %v5450_v10 = vadd.f32 %v16452_v55, %v5442_v35  ;;  %v7043_v37 = vrot.slane %v7042_v14, 2 }
 0xe3e   :  { %v5603_v61 = vmul.f32 %v12955_v16, %v16560_v46 }
 0xe3f   :  { %12960 = vrcp.f32 %v5450_v10  ;;  %v7044_v2 = vadd.f32 %v7043_v37, %v7042_v14 }
 0xe40   :  { %11476 = vmatmul.mubr.msk.f32.gmra.mrb[78].mxu0 %vm426_vm0, %v5603_v61  ;;  %v6800_v7 = vpop.xlane.xlu0 %6799 }
 0xe41   :  { %v12957_v41 = vpop.eup %12956  ;;  %v7045_v26 = vrot.slane %v7044_v2, 1 }
 0xe42   :  { %v5604_v22 = vmul.f32 %v12957_v41, %v16573_v3 }
 0xe43   :  { %v7046_v20 = vadd.f32 %v7045_v26, %v7044_v2 }
 0xe44   :  { %11478 = vmatprep.mubr.msk.f32.mxu0 %vm426_vm0, %v5604_v22  ;;  %v6803_v24 = vpop.xlane.xlu0 %6802 }
 0xe45   :  { %v12959_v30 = vpop.eup %12958  ;;  %v7047_v12 = vmul.f32 0.015625, %v7046_v20  ;;  %v6831_v44 = vmul.f32 0.0625, %v6803_v24 }
 0xe46   :  { %v5605_v18 = vmul.f32 %v12959_v30, %v16570_v4 }
 0xe47   :  { %v16709_v5 = vsub.f32 %v16577_v1, %v6831_v44 }
 0xe48   :  { %11479 = vmatmul.mubr.msk.f32.gmra.mrb[80].mxu0 %vm426_vm0, %v5605_v18  ;;  %v6806_v55 = vpop.xlane.xlu0 %6805 }
 0xe49   :  { %v12961_v46 = vpop.eup %12960  ;;  %11481 = vmatprep.mubr.msk.f32.mxu0 %vm426_vm0, %v16587_v45  ;;  %v6832_v62 = vmul.f32 0.0625, %v6806_v55  ;;  %v6863_v52 = vmul.f32 %v16709_v5, %v16709_v5 }
 0xe4a   :  { %v5607_v39 = vmul.f32 %v12961_v46, %v16580_v31  ;;  %v6574_v46 = vld [vmem:[#allocation9 + $0x8] sm:$0xff] }
 0xe4b   :  { %v6897_v49 = vsel %vm793_vm2, %v6863_v52, 0.0 }
 0xe4c   :  { %11482 = vmatmul.mubr.msk.f32.gmra.mrb[82].mxu0 %vm426_vm0, %v5607_v39  ;;  %v6809_v3 = vpop.xlane.xlu0 %6808  ;;  %v6576_v39 = vld [vmem:[#allocation9 + $0x18] sm:$0xff] }
 0xe4d   :  { %11572 = vmatprep.mubr.msk.f32.mxu0 %vm13480_vm1, %v18957_v42  ;;  %v6833_v13 = vmul.f32 0.0625, %v6809_v3  ;;  %v16753_v20 = vpack.c.bf16 %v6576_v39, %v6574_v46  ;;  %v6573_v3 = vld [vmem:[#allocation9] sm:$0xff] }
 0xe4f   :  { %v16721_v54 = vsub.f32 %v16591_v28, %v6833_v13  ;;  %12112 = vmatprep.subr.bf16.mxu0 %v16753_v20 }
 0xe50   :  { %11573 = vmatmul.mubr.msk.f32.vlgmr.msra.gmra.mrb[92].mxu0 %vm793_vm2, %v7047_v12  ;;  %v6812_v4 = vpop.xlane.xlu0 %6811  ;;  %v6575_v12 = vld [vmem:[#allocation9 + $0x10] sm:$0xff] }
 0xe51   :  { %v6834_v56 = vmul.f32 0.0625, %v6812_v4  ;;  %7204 = vmatprep.mubr.f32.mxu0 %v18957_v42  ;;  %v6865_v16 = vmul.f32 %v16721_v54, %v16721_v54  ;;  %v6578_v4 = vld [vmem:[#allocation9 + $0x28] sm:$0xff] }
 0xe53   :  { %v16680_v58 = vsub.f32 %v16595_v48, %v6834_v56  ;;  %v6830_v48 = vmul.f32 0.0625, %v6800_v7  ;;  %v6903_v37 = vsel %vm793_vm2, %v6865_v16, 0.0  ;;  %v16755_v56 = vpack.c.bf16 %v6575_v12, %v6573_v3 }
 0xe54   :  { %v6815_v15 = vpop.xlane.xlu0 %6814 }
 0xe55   :  { %v6866_v31 = vmul.f32 %v16680_v58, %v16680_v58  ;;  %v16705_v34 = vsub.f32 %v16565_v60, %v6830_v48  ;;  %v16715_v60 = vsub.f32 %v16585_v53, %v6832_v62  ;;  %v6835_v51 = vmul.f32 0.0625, %v6815_v15  ;;  %v6579_v48 = vld [vmem:[#allocation9 + $0x30] sm:$0xff]  ;;  %12114 = vmatpush1.bf16.msra.mxu0 %v16755_v56  ;;  %v6704_v62 = vld [vmem:[%s13493_s5 + $0x10] sm:$0xff] }
 0xe57   :  { %v6906_v45 = vsel %vm793_vm2, %v6866_v31, 0.0  ;;  %v6862_v21 = vmul.f32 %v16705_v34, %v16705_v34  ;;  %v6864_v57 = vmul.f32 %v16715_v60, %v16715_v60  ;;  %v16727_v53 = vsub.f32 %v16599_v43, %v6835_v51  ;;  %v6580_v31 = vld [vmem:[#allocation9 + $0x38] sm:$0xff] }
 0xe58   :  { %6907 = vadd.xlane.f32.xlu1 %v6906_v45  ;;  %v6818_v1 = vpop.xlane.xlu0 %6817  ;;  %v6577_v45 = vld [vmem:[#allocation9 + $0x20] sm:$0xff]  ;;  %v16758_v44 = vpack.c.bf16 %v6580_v31, %v6578_v4 }
 0xe59   :  { %v6894_v36 = vsel %vm793_vm2, %v6862_v21, 0.0  ;;  %v6836_v14 = vmul.f32 0.0625, %v6818_v1  ;;  %v6900_v35 = vsel %vm793_vm2, %v6864_v57, 0.0  ;;  %v6867_v7 = vmul.f32 %v16727_v53, %v16727_v53 }
 0xe5a   :  { %12116 = vmatprep.subr.bf16.mxu0 %v16758_v44 }
 0xe5b   :  { %v16733_v28 = vsub.f32 %v16603_v17, %v6836_v14  ;;  %v6909_v41 = vsel %vm793_vm2, %v6867_v7, 0.0 }
 0xe5c   :  { %v6821_v10 = vpop.xlane.xlu0 %6820 }
 0xe5d   :  { %v6837_v61 = vmul.f32 0.0625, %v6821_v10  ;;  %v6868_v22 = vmul.f32 %v16733_v28, %v16733_v28 }
 0xe5f   :  { %v16739_v43 = vsub.f32 %v16607_v25, %v6837_v61  ;;  %v6912_v2 = vsel %vm793_vm2, %v6868_v22, 0.0 }
 0xe61   :  { %v6869_v17 = vmul.f32 %v16739_v43, %v16739_v43 }
 0xe63   :  { %v6915_v24 = vsel %vm793_vm2, %v6869_v17, 0.0 }
 0xee5   :  { %v6908_v16 = vpop.xlane.xlu1 %6907 }
 0xf0b   :  { %v16685_v32 = vpop.f32.mrb[76].mxu0 }
 0xf0c   :  { %v16687_v11 = vpop.f32.mrb[77].mxu0 }
 0xf13   :  { %v16689_v33 = vpop.f32.mrb[78].mxu0 }
 0xf14   :  { %v16691_v29 = vpop.f32.mrb[79].mxu0 }
 0xf1b   :  { %v16693_v19 = vpop.f32.mrb[80].mxu0 }
 0xf1c   :  { %v16695_v38 = vpop.f32.mrb[81].mxu0 }
 0xf1f   :  { %v16697_v63 = vpop.f32.mrb[82].mxu0 }
 0xf20   :  { %v16699_v9 = vpop.f32.mrb[83].mxu0 }
 0xf23   :  { %v7117_v6 = vpop.f32.mrb[92].mxu0 }
 0xf24   :  { %v7118_v50 = vadd.f32 %v7117_v6, %v16702_v40  ;;  %v11574_v0 = vpop.f32.mrb[93].mxu0  ;;  %v16761_v6 = vpack.c.bf16 %v6579_v48, %v6577_v45 }
 0xf25   :  { %v6703_v0 = vld [vmem:[%s13493_s5 + $0x8] sm:$0xff] }
 0xf26   :  { %v7122_v59 = vsel %vm7121_vm6, %v7118_v50, 0.0  ;;  %12118 = vmatpush1.bf16.msra.mxu0 %v16761_v6 }
 0xf27   :  { %7123 = vadd.xlane.f32.xlu0 %v7122_v59  ;;  %12119 = vmatprep.subr.bf16.mxu0 %v18945_v47  ;;  %v6705_v59 = vld [vmem:[%s13493_s5 + $0x18] sm:$0xff] }
 0xf2b   :  { %6895 = vadd.xlane.f32.xlu0 %v6894_v36 }
 0xf2f   :  { %6898 = vadd.xlane.f32.xlu0 %v6897_v49 }
 0xf33   :  { %6901 = vadd.xlane.f32.xlu0 %v6900_v35 }
 0xf37   :  { %6904 = vadd.xlane.f32.xlu0 %v6903_v37  ;;  %v6930_v37 = vmul.f32 0.0625, %v6908_v16 }
 0xf39   :  { %v6946_v22 = vadd.f32 1e-05, %v6930_v37 }
 0xf3b   :  { %6910 = vadd.xlane.f32.xlu0 %v6909_v41 }
 0xf3f   :  { %6913 = vadd.xlane.f32.xlu0 %v6912_v2 }
 0xf43   :  { %6916 = vadd.xlane.f32.xlu0 %v6915_v24 }
 0xfb4   :  { %v7124_v30 = vpop.xlane.xlu0 %7123 }
 0xfb5   :  { %v7125_v18 = vmul.f32 0.03125, %v7124_v30 }
 0xfb7   :  { %v16748_v26 = vsub.f32 %v7118_v50, %v7125_v18  ;;  %v6702_v50 = vld [vmem:[%s13493_s5] sm:$0xff] }
 0xfb8   :  { %v6896_v21 = vpop.xlane.xlu0 %6895 }
 0xfb9   :  { %v7127_v25 = vmul.f32 %v16748_v26, %v16748_v26  ;;  %v6926_v1 = vmul.f32 0.0625, %v6896_v21 }
 0xfbb   :  { %v7128_v55 = vsel %vm7121_vm6, %v7127_v25, 0.0  ;;  %v6942_v35 = vadd.f32 1e-05, %v6926_v1 }
 0xfbc   :  { %7129 = vadd.xlane.f32.xlu0 %v7128_v55  ;;  %v6899_v15 = vpop.xlane.xlu0 %6898 }
 0xfbd   :  { %v6927_v52 = vmul.f32 0.0625, %v6899_v15 }
 0xfbf   :  { %v6943_v57 = vadd.f32 1e-05, %v6927_v52 }
 0xfc0   :  { %v6902_v13 = vpop.xlane.xlu0 %6901 }
 0xfc1   :  { %v6928_v49 = vmul.f32 0.0625, %v6902_v13  ;;  %12962 = vrsqrt.f32 %v6943_v57 }
 0xfc2   :  { %12964 = vrsqrt.f32 %v6942_v35 }
 0xfc3   :  { %v6944_v47 = vadd.f32 1e-05, %v6928_v49 }
 0xfc4   :  { %v6905_v36 = vpop.xlane.xlu0 %6904 }
 0xfc5   :  { %v6929_v14 = vmul.f32 0.0625, %v6905_v36  ;;  %12966 = vrsqrt.f32 %v6944_v47 }
 0xfc7   :  { %v6945_v61 = vadd.f32 1e-05, %v6929_v14 }
 0xfc8   :  { %v6911_v51 = vpop.xlane.xlu0 %6910 }
 0xfc9   :  { %12968 = vrsqrt.f32 %v6945_v61  ;;  %v6931_v7 = vmul.f32 0.0625, %v6911_v51 }
 0xfca   :  { %12970 = vrsqrt.f32 %v6946_v22 }
 0xfcb   :  { %v6947_v17 = vadd.f32 1e-05, %v6931_v7  ;;  %v12963_v30 = vpop.eup %12962 }
 0xfcc   :  { %v6914_v10 = vpop.xlane.xlu0 %6913  ;;  %v12965_v25 = vpop.eup %12964  ;;  %v6975_v39 = vmul.f32 %v12963_v30, %v16709_v5 }
 0xfcd   :  { %v6932_v2 = vmul.f32 0.0625, %v6914_v10  ;;  %12972 = vrsqrt.f32 %v6947_v17  ;;  %v6974_v12 = vmul.f32 %v12965_v25, %v16705_v34 }
 0xfce   :  { %v6997_v31 = vmul.f32 %v16615_v27, %v6975_v39 }
 0xfcf   :  { %v6948_v18 = vadd.f32 1e-05, %v6932_v2  ;;  %v12967_v55 = vpop.eup %12966  ;;  %v6996_v48 = vmul.f32 %v16615_v27, %v6974_v12 }
 0xfd0   :  { %v6917_v41 = vpop.xlane.xlu0 %6916  ;;  %v6976_v4 = vmul.f32 %v12967_v55, %v16715_v60 }
 0xfd1   :  { %v6933_v24 = vmul.f32 0.0625, %v6917_v41  ;;  %12974 = vrsqrt.f32 %v6948_v18  ;;  %v7018_v34 = vadd.f32 %v16622_v23, %v6996_v48 }
 0xfd3   :  { %v6949_v46 = vadd.f32 1e-05, %v6933_v24  ;;  %v12969_v3 = vpop.eup %12968  ;;  %v7211_v51 = vsel %vm793_vm2, %v7018_v34, 0.0 }
 0xfd4   :  { %v6977_v45 = vmul.f32 %v12969_v3, %v16721_v54 }
 0xfd5   :  { %12976 = vrsqrt.f32 %v6949_v46 }
 0xfd6   :  { %v6999_v5 = vmul.f32 %v16615_v27, %v6977_v45  ;;  %v16803_v45 = vld [vmem:[%s18959_s4] sm:$0x1] }
 0xfd8   :  { %v7021_v54 = vadd.f32 %v16622_v23, %v6999_v5 }
 0xfda   :  { %v7216_v14 = vsel %vm793_vm2, %v7021_v54, 0.0 }
 0xfe9   :  { %6706 = vxpose.xlu0.b32.start [1/4] (short) (narrow) %v6702_v50, 64  ;;  %v6998_v50 = vmul.f32 %v16615_v27, %v6976_v4 }
 0xfeb   :  { %v7020_v60 = vadd.f32 %v16622_v23, %v6998_v50  ;;  %v16807_v50 = vld [vmem:[%s18960_s10] sm:$0x1] }
 0xfed   :  { %6707 = vxpose.xlu0.b32.cont [2/4] (short) (narrow) %v6703_v0, 64  ;;  %v12971_v0 = vpop.eup %12970  ;;  %v7214_v49 = vsel %vm793_vm2, %v7020_v60, 0.0 }
 0xfee   :  { %v6978_v21 = vmul.f32 %v12971_v0, %v16680_v58 }
 0xff0   :  { %v7000_v1 = vmul.f32 %v16615_v27, %v6978_v21 }
 0xff1   :  { %6708 = vxpose.xlu0.b32.cont [3/4] (short) (narrow) %v6704_v62, 64  ;;  %v7019_v62 = vadd.f32 %v16622_v23, %v6997_v31 }
 0xff2   :  { %v7022_v10 = vadd.f32 %v16622_v23, %v7000_v1 }
 0xff3   :  { %v7212_v13 = vsel %vm793_vm2, %v7019_v62, 0.0 }
 0xff4   :  { %v7213_v57 = vadd.f32 %v7212_v13, %v7211_v51  ;;  %v7218_v41 = vsel %vm793_vm2, %v7022_v10, 0.0  ;;  %v18967_v51 = vld [vmem:[#allocation49_spill] sm:$0xff] }
 0xff5   :  { %6709 = vxpose.xlu0.b32.end [4/4] (short) (narrow) %v6705_v59, 64  ;;  %v12973_v59 = vpop.eup %12972 }
 0xff6   :  { %v12975_v15 = vpop.eup %12974  ;;  %v6979_v36 = vmul.f32 %v12973_v59, %v16727_v53  ;;  %v7215_v16 = vadd.f32 %v7214_v49, %v7213_v57 }
 0xff7   :  { %v12977_v52 = vpop.eup %12976  ;;  %v6980_v58 = vmul.f32 %v12975_v15, %v16733_v28  ;;  %v18963_v15 = vld [vmem:[#allocation45_spill] sm:$0xff] }
 0xff8   :  { %v7001_v35 = vmul.f32 %v16615_v27, %v6979_v36  ;;  %v6981_v47 = vmul.f32 %v12977_v52, %v16739_v43  ;;  %v7217_v61 = vadd.f32 %v7216_v14, %v7215_v16 }
 0xff9   :  { %v7002_v53 = vmul.f32 %v16615_v27, %v6980_v58 }
 0xffa   :  { %v7023_v37 = vadd.f32 %v16622_v23, %v7001_v35  ;;  %v7003_v7 = vmul.f32 %v16615_v27, %v6981_v47  ;;  %v7219_v22 = vadd.f32 %v7218_v41, %v7217_v61 }
 0xffb   :  { %v7024_v28 = vadd.f32 %v16622_v23, %v7002_v53 }
 0xffc   :  { %v7220_v2 = vsel %vm793_vm2, %v7023_v37, 0.0  ;;  %v7025_v43 = vadd.f32 %v16622_v23, %v7003_v7 }
 0xffd   :  { %v7222_v17 = vsel %vm793_vm2, %v7024_v28, 0.0  ;;  %v7221_v24 = vadd.f32 %v7220_v2, %v7219_v22 }
 0xffe   :  { %v7224_v30 = vsel %vm793_vm2, %v7025_v43, 0.0  ;;  %v18972_v43 = vld [vmem:[#allocation77_spill] sm:$0xff] }
 0xfff   :  { %v7223_v18 = vadd.f32 %v7222_v17, %v7221_v24 }
0x1001   :  { %v7225_v25 = vadd.f32 %v7224_v30, %v7223_v18  ;;  %v18974_v18 = vld [vmem:[#allocation112_spill] sm:$0xff] }
0x1003   :  { %v7226_v27 = vrot.slane %v7225_v25, 4 }
0x1005   :  { %v7227_v3 = vadd.f32 %v7226_v27, %v7225_v25 }
0x1007   :  { %v7228_v12 = vrot.slane %v7227_v3, 2 }
0x1009   :  { %v7229_v4 = vadd.f32 %v7228_v12, %v7227_v3  ;;  %v18977_v3 = vld [vmem:[#allocation78_spill] sm:$0xff] }
0x100b   :  { %v7230_v48 = vrot.slane %v7229_v4, 1 }
0x100d   :  { %v7231_v5 = vadd.f32 %v7230_v48, %v7229_v4  ;;  %v18979_v48 = vld [vmem:[#allocation35_spill] sm:$0xff] }
0x100f   :  { %v7232_v59 = vmul.f32 0.015625, %v7231_v5  ;;  %v18980_v5 = vld [vmem:[#allocation36_spill] sm:$0xff] }
0x1049   :  { %v7130_v55 = vpop.xlane.xlu0 %7129 }
0x104a   :  { %v7131_v46 = vmul.f32 0.03125, %v7130_v55  ;;  %v18975_v55 = vld [vmem:[#allocation33_spill] sm:$0xff] }
0x104c   :  { %v7132_v39 = vadd.f32 1e-05, %v7131_v46  ;;  %v18976_v46 = vld [vmem:[#allocation34_spill] sm:$0xff] }
0x104e   :  { %12978 = vrsqrt.f32 %v7132_v39 }
0x1058   :  { %v12979_v31 = vpop.eup %12978 }
0x1059   :  { %v7134_v23 = vmul.f32 %v12979_v31, %v16748_v26  ;;  %v18978_v31 = vld [vmem:[#allocation58_spill] sm:$0xff] }
0x105b   :  { %v7135_v0 = vmul.f32 %v7134_v23, %v16803_v45 }
0x105d   :  { %v7136_v62 = vadd.f32 %v7135_v0, %v16807_v50 }
0x105f   :  { %10327 = vmatmul.mubr.msk.f32.vlgmr.msra.gmra.mrb[94].mxu0 %vm426_vm0, %v7136_v62 }
0x1060   :  { %12121 = vmatpush3.bf16.msra.mxu0 %v16655_v8  ;;  %11579 = vmatprep.mubr.msk.f32.mxu0 %vm13480_vm1, %v18957_v42  ;;  %v16825_v8 = vld [vmem:[%s18961_s11] ss:$0 sm:$0xff] }
0x1061   :  { %12123 = vmatprep.subr.bf16.mxu0 %v16753_v20  ;;  %v5761_v34 = vadd.f32 %v16825_v8, %v16691_v29  ;;  %v5763_v54 = vadd.f32 %v16825_v8, %v16695_v38  ;;  %v5765_v1 = vadd.f32 %v16825_v8, %v16699_v9  ;;  %v5751_v17 = vadd.f32 %v16825_v8, %v18972_v43 }
0x1062   :  { %v5752_v25 = vadd.f32 %v18974_v18, %v16825_v8  ;;  %v5753_v12 = vadd.f32 %v16825_v8, %v18977_v3  ;;  %v5754_v23 = vadd.f32 %v18978_v31, %v16825_v8  ;;  %v5760_v18 = vadd.f32 %v16685_v32, %v16825_v8  ;;  %v18991_v3 = vld [vmem:[#allocation44_spill] sm:$0xff]  ;;  %v18993_v31 = vld [vmem:[#allocation46_spill] sm:$0xff] }
0x1063   :  { %11580 = vmatmul.mubr.msk.f32.vlgmr.msra.gmra.mrb[96].mxu0 %vm793_vm2, %v7232_v59  ;;  %v16834_v13 = vadd.f32 %v5761_v34, %v18963_v15  ;;  %v16848_v49 = vadd.f32 %v5765_v1, %v18967_v51  ;;  %v16892_v27 = vadd.f32 %v5751_v17, %v18975_v55  ;;  %v18981_v34 = vld [vmem:[#allocation55_spill] sm:$0xff]  ;;  %v18983_v1 = vld [vmem:[#allocation37_spill] sm:$0xff]  ;;  %v5759_v17 = vadd.f32 %v16825_v8, %v16687_v11 }
0x1064   :  { %12125 = vmatpush1.bf16.msra.mxu0 %v16755_v56  ;;  %7388 = vmatprep.mubr.f32.mxu0 %v18957_v42  ;;  %v16895_v39 = vadd.f32 %v5752_v25, %v18976_v46  ;;  %v16904_v0 = vadd.f32 %v5753_v12, %v18979_v48  ;;  %v16909_v59 = vadd.f32 %v5754_v23, %v18980_v5  ;;  %v18989_v25 = vld [vmem:[#allocation43_spill] sm:$0xff] }
0x1065   :  { %12127 = vmatprep.subr.bf16.mxu0 %v16758_v44  ;;  %18964 = vst [vmem:[#allocation92_spill] sm:$0xff] %v16834_v13  ;;  %v5813_v29 = vsel %vm793_vm2, %v16834_v13, 0.0  ;;  %18968 = vst [vmem:[#allocation51_spill] sm:$0xff] %v16848_v49  ;;  %v5825_v58 = vsel %vm793_vm2, %v16848_v49, 0.0  ;;  %v5783_v4 = vsel %vm793_vm2, %v16892_v27, 0.0  ;;  %v5755_v15 = vadd.f32 %v16825_v8, %v18981_v34 }
0x1066   :  { %v5786_v62 = vsel %vm793_vm2, %v16895_v39, 0.0  ;;  %v5792_v51 = vsel %vm793_vm2, %v16909_v59, 0.0  ;;  %v16946_v55 = vadd.f32 %v5759_v17, %v18989_v25  ;;  %v16951_v12 = vadd.f32 %v5760_v18, %v18991_v3 }
0x1067   :  { %v5762_v11 = vadd.f32 %v16689_v33, %v16825_v8  ;;  %v5764_v32 = vadd.f32 %v16693_v19, %v16825_v8  ;;  %v5766_v33 = vadd.f32 %v16697_v63, %v16825_v8 }
0x1068   :  { %12129 = vmatpush1.bf16.msra.mxu0 %v16761_v6  ;;  %18990 = vst [vmem:[#allocation64_spill] sm:$0xff] %v16946_v55  ;;  %18992 = vst [vmem:[#allocation76_spill] sm:$0xff] %v16951_v12  ;;  %v5810_v48 = vsel %vm793_vm2, %v16951_v12, 0.0 }
0x1069   :  { %v16821_v26 = vpop.trf.xlu0  ;;  %12131 = vmatprep.subr.bf16.mxu0 %v16753_v20  ;;  %v18965_v20 = vld [vmem:[#allocation47_spill] sm:$0xff]  ;;  %v16958_v23 = vadd.f32 %v5762_v11, %v18993_v31 }
0x106a   :  { %v16841_v52 = vadd.f32 %v5763_v54, %v18965_v20  ;;  %v7395_v53 = vsel %vm426_vm0, %v16821_v26, 0.0  ;;  %v5789_v54 = vsel %vm793_vm2, %v16904_v0, 0.0 }
0x106b   :  { %18994 = vst [vmem:[#allocation67_spill] sm:$0xff] %v16958_v23  ;;  %v5816_v34 = vsel %vm793_vm2, %v16958_v23, 0.0 }
0x106c   :  { %18966 = vst [vmem:[#allocation53_spill] sm:$0xff] %v16841_v52  ;;  %v5819_v38 = vsel %vm793_vm2, %v16841_v52, 0.0 }
0x106d   :  { %v16827_v21 = vpop.trf.xlu0 }
0x106e   :  { %v7398_v37 = vsel %vm426_vm0, %v16827_v21, 0.0 }
0x1071   :  { %v16831_v60 = vpop.trf.xlu0 }
0x1072   :  { %18962 = vst [vmem:[#allocation61_spill] sm:$0xff] %v16831_v60  ;;  %v7401_v36 = vsel %vm426_vm0, %v16831_v60, 0.0 }
0x1073   :  { %7402 = vadd.xlane.f32.xlu0 %v7401_v36  ;;  %v18982_v36 = vld [vmem:[#allocation90_spill] sm:$0xff] }
0x1074   :  { %v5756_v20 = vadd.f32 %v18982_v36, %v16825_v8 }
0x1075   :  { %v16863_v10 = vpop.trf.xlu0 }
0x1077   :  { %5814 = vadd.xlane.f32.xlu0 %v5813_v29  ;;  %v16918_v29 = vadd.f32 %v5755_v15, %v18983_v1  ;;  %v18997_v15 = vld [vmem:[#allocation50_spill] sm:$0xff] }
0x1079   :  { %v16867_v61 = vpop.trf.xlu0 }
0x107a   :  { %18969 = vst [vmem:[#allocation111_spill] sm:$0xff] %v16867_v61  ;;  %v7407_v41 = vsel %vm426_vm0, %v16867_v61, 0.0 }
0x107b   :  { %5820 = vadd.xlane.f32.xlu0 %v5819_v38  ;;  %v18984_v38 = vld [vmem:[#allocation38_spill] sm:$0xff] }
0x107d   :  { %v16873_v7 = vpop.trf.xlu0 }
0x107e   :  { %18970 = vst [vmem:[#allocation109_spill] sm:$0xff] %v16873_v7  ;;  %v7410_v28 = vsel %vm426_vm0, %v16873_v7, 0.0 }
0x107f   :  { %5826 = vadd.xlane.f32.xlu0 %v5825_v58  ;;  %v16923_v58 = vadd.f32 %v5756_v20, %v18984_v38 }
0x1081   :  { %v16879_v22 = vpop.trf.xlu0 }
0x1082   :  { %18971 = vst [vmem:[#allocation82_spill] sm:$0xff] %v16879_v22  ;;  %v7413_v2 = vsel %vm426_vm0, %v16879_v22, 0.0 }
0x1085   :  { %v16885_v24 = vpop.trf.xlu0 }
0x1086   :  { %18973 = vst [vmem:[#allocation69_spill] sm:$0xff] %v16885_v24  ;;  %v7416_v30 = vsel %vm426_vm0, %v16885_v24, 0.0 }
0x1132   :  { %v16854_v57 = vpop.f32.mrb[94].mxu0 }
0x1133   :  { %v16856_v14 = vpop.f32.mrb[95].mxu0 }
0x1136   :  { %v7302_v9 = vpop.f32.mrb[96].mxu0 }
0x1137   :  { %v16859_v35 = vadd.f32 %v7302_v9, %v16702_v40  ;;  %v11581_v47 = vpop.f32.mrb[97].mxu0  ;;  %v7404_v40 = vsel %vm426_vm0, %v16863_v10, 0.0  ;;  %v18985_v9 = vld [vmem:[#allocation95_spill] sm:$0xff] }
0x1138   :  { %v5757_v47 = vadd.f32 %v16825_v8, %v18985_v9 }
0x1139   :  { %v7306_v16 = vsel %vm7121_vm6, %v16859_v35, 0.0 }
0x113a   :  { %7307 = vadd.xlane.f32.xlu1 %v7306_v16  ;;  %v5795_v16 = vsel %vm793_vm2, %v16918_v29, 0.0 }
0x113e   :  { %7396 = vadd.xlane.f32.xlu1 %v7395_v53  ;;  %v18986_v53 = vld [vmem:[#allocation63_spill] sm:$0xff] }
0x1142   :  { %7399 = vadd.xlane.f32.xlu1 %v7398_v37  ;;  %v5758_v37 = vadd.f32 %v18986_v53, %v16825_v8 }
0x1146   :  { %7405 = vadd.xlane.f32.xlu1 %v7404_v40  ;;  %v18987_v40 = vld [vmem:[#allocation39_spill] sm:$0xff] }
0x114a   :  { %7408 = vadd.xlane.f32.xlu1 %v7407_v41  ;;  %v16932_v41 = vadd.f32 %v5757_v47, %v18987_v40 }
0x114e   :  { %7411 = vadd.xlane.f32.xlu1 %v7410_v28  ;;  %v5798_v28 = vsel %vm793_vm2, %v16923_v58, 0.0 }
0x1152   :  { %7414 = vadd.xlane.f32.xlu1 %v7413_v2  ;;  %v18988_v2 = vld [vmem:[#allocation40_spill] sm:$0xff] }
0x1153   :  { %v16937_v43 = vadd.f32 %v5758_v37, %v18988_v2 }
0x1155   :  { %v5804_v46 = vsel %vm793_vm2, %v16937_v43, 0.0 }
0x1156   :  { %7417 = vadd.xlane.f32.xlu1 %v7416_v30  ;;  %v5801_v30 = vsel %vm793_vm2, %v16932_v41, 0.0 }
0x115a   :  { %5784 = vadd.xlane.f32.xlu1 %v5783_v4  ;;  %v5807_v4 = vsel %vm793_vm2, %v16946_v55, 0.0 }
0x115e   :  { %5787 = vadd.xlane.f32.xlu1 %v5786_v62  ;;  %v18995_v62 = vld [vmem:[#allocation48_spill] sm:$0xff] }
0x115f   :  { %v16965_v5 = vadd.f32 %v5764_v32, %v18995_v62 }
0x1161   :  { %18996 = vst [vmem:[#allocation60_spill] sm:$0xff] %v16965_v5  ;;  %v5822_v19 = vsel %vm793_vm2, %v16965_v5, 0.0 }
0x1162   :  { %5790 = vadd.xlane.f32.xlu1 %v5789_v54  ;;  %v16972_v54 = vadd.f32 %v5766_v33, %v18997_v15 }
0x1164   :  { %18998 = vst [vmem:[#allocation66_spill] sm:$0xff] %v16972_v54  ;;  %v5828_v36 = vsel %vm793_vm2, %v16972_v54, 0.0 }
0x1166   :  { %5793 = vadd.xlane.f32.xlu1 %v5792_v51  ;;  %v7403_v51 = vpop.xlane.xlu0 %7402 }
0x1167   :  { %v7445_v38 = vmul.f32 0.03125, %v7403_v51 }
0x116a   :  { %5796 = vadd.xlane.f32.xlu1 %v5795_v16  ;;  %v16984_v16 = vsub.f32 %v16831_v60, %v7445_v38 }
0x116e   :  { %5799 = vadd.xlane.f32.xlu1 %v5798_v28 }
0x1172   :  { %5802 = vadd.xlane.f32.xlu1 %v5801_v30  ;;  %v7477_v30 = vmul.f32 %v16984_v16, %v16984_v16 }
0x1174   :  { %v7497_v11 = vsel %vm426_vm0, %v7477_v30, 0.0 }
0x1176   :  { %5805 = vadd.xlane.f32.xlu1 %v5804_v46 }
0x117a   :  { %5808 = vadd.xlane.f32.xlu1 %v5807_v4 }
0x117e   :  { %5811 = vadd.xlane.f32.xlu1 %v5810_v48 }
0x1182   :  { %5817 = vadd.xlane.f32.xlu1 %v5816_v34 }
0x1186   :  { %5823 = vadd.xlane.f32.xlu1 %v5822_v19 }
0x118a   :  { %5829 = vadd.xlane.f32.xlu1 %v5828_v36 }
0x11c7   :  { %v7308_v20 = vpop.xlane.xlu1 %7307 }
0x11c8   :  { %v7309_v1 = vmul.f32 0.03125, %v7308_v20 }
0x11ca   :  { %v16979_v63 = vsub.f32 %v16859_v35, %v7309_v1 }
0x11cb   :  { %v7397_v8 = vpop.xlane.xlu1 %7396 }
0x11cc   :  { %v7443_v9 = vmul.f32 0.03125, %v7397_v8  ;;  %v7311_v47 = vmul.f32 %v16979_v63, %v16979_v63 }
0x11ce   :  { %v16987_v53 = vsub.f32 %v16821_v26, %v7443_v9  ;;  %v7312_v37 = vsel %vm7121_vm6, %v7311_v47, 0.0 }
0x11cf   :  { %v7400_v40 = vpop.xlane.xlu1 %7399  ;;  %7313 = vadd.xlane.f32.xlu0 %v7312_v37 }
0x11d0   :  { %v7444_v28 = vmul.f32 0.03125, %v7400_v40  ;;  %v7475_v35 = vmul.f32 %v16987_v53, %v16987_v53 }
0x11d2   :  { %v16993_v2 = vsub.f32 %v16827_v21, %v7444_v28  ;;  %v7491_v17 = vsel %vm426_vm0, %v7475_v35, 0.0 }
0x11d3   :  { %7492 = vadd.xlane.f32.xlu1 %v7491_v17  ;;  %v7406_v18 = vpop.xlane.xlu1 %7405 }
0x11d4   :  { %v7446_v25 = vmul.f32 0.03125, %v7406_v18  ;;  %v7476_v46 = vmul.f32 %v16993_v2, %v16993_v2 }
0x11d6   :  { %v17001_v3 = vsub.f32 %v16863_v10, %v7446_v25  ;;  %v7494_v4 = vsel %vm426_vm0, %v7476_v46, 0.0 }
0x11d7   :  { %7498 = vadd.xlane.f32.xlu1 %v7497_v11  ;;  %v7409_v31 = vpop.xlane.xlu1 %7408  ;;  %7495 = vadd.xlane.f32.xlu0 %v7494_v4 }
0x11d8   :  { %v7447_v32 = vmul.f32 0.03125, %v7409_v31  ;;  %v7478_v48 = vmul.f32 %v17001_v3, %v17001_v3 }
0x11da   :  { %v17008_v62 = vsub.f32 %v16867_v61, %v7447_v32  ;;  %v7500_v33 = vsel %vm426_vm0, %v7478_v48, 0.0 }
0x11db   :  { %v7412_v34 = vpop.xlane.xlu1 %7411  ;;  %7501 = vadd.xlane.f32.xlu0 %v7500_v33 }
0x11dc   :  { %v7448_v15 = vmul.f32 0.03125, %v7412_v34  ;;  %v7479_v19 = vmul.f32 %v17008_v62, %v17008_v62 }
0x11de   :  { %v17014_v36 = vsub.f32 %v16873_v7, %v7448_v15  ;;  %v7503_v20 = vsel %vm426_vm0, %v7479_v19, 0.0 }
0x11df   :  { %7504 = vadd.xlane.f32.xlu1 %v7503_v20  ;;  %v7415_v1 = vpop.xlane.xlu1 %7414 }
0x11e0   :  { %v7449_v51 = vmul.f32 0.03125, %v7415_v1  ;;  %v7480_v38 = vmul.f32 %v17014_v36, %v17014_v36 }
0x11e2   :  { %v17020_v8 = vsub.f32 %v16879_v22, %v7449_v51  ;;  %v7506_v9 = vsel %vm426_vm0, %v7480_v38, 0.0 }
0x11e3   :  { %v7418_v47 = vpop.xlane.xlu1 %7417  ;;  %7507 = vadd.xlane.f32.xlu0 %v7506_v9 }
0x11e4   :  { %v7450_v37 = vmul.f32 0.03125, %v7418_v47  ;;  %v7481_v40 = vmul.f32 %v17020_v8, %v17020_v8 }
0x11e6   :  { %v17026_v28 = vsub.f32 %v16885_v24, %v7450_v37  ;;  %v7509_v35 = vsel %vm426_vm0, %v7481_v40, 0.0 }
0x11e7   :  { %7510 = vadd.xlane.f32.xlu1 %v7509_v35  ;;  %v5785_v17 = vpop.xlane.xlu1 %5784 }
0x11e8   :  { %v5831_v30 = vmul.f32 0.0625, %v5785_v17  ;;  %v7482_v18 = vmul.f32 %v17026_v28, %v17026_v28 }
0x11ea   :  { %v17032_v25 = vsub.f32 %v16892_v27, %v5831_v30  ;;  %v7512_v46 = vsel %vm426_vm0, %v7482_v18, 0.0 }
0x11eb   :  { %v5788_v11 = vpop.xlane.xlu1 %5787  ;;  %7513 = vadd.xlane.f32.xlu0 %v7512_v46 }
0x11ec   :  { %v5832_v4 = vmul.f32 0.0625, %v5788_v11  ;;  %v5863_v31 = vmul.f32 %v17032_v25, %v17032_v25 }
0x11ee   :  { %v17038_v32 = vsub.f32 %v16895_v39, %v5832_v4  ;;  %v5879_v48 = vsel %vm793_vm2, %v5863_v31, 0.0 }
0x11ef   :  { %5880 = vadd.xlane.f32.xlu1 %v5879_v48  ;;  %v5791_v33 = vpop.xlane.xlu1 %5790  ;;  %v5815_v48 = vpop.xlane.xlu0 %5814 }
0x11f0   :  { %v5833_v34 = vmul.f32 0.0625, %v5791_v33  ;;  %v5864_v15 = vmul.f32 %v17038_v32, %v17038_v32 }
0x11f2   :  { %v17044_v19 = vsub.f32 %v16904_v0, %v5833_v34  ;;  %v5882_v20 = vsel %vm793_vm2, %v5864_v15, 0.0 }
0x11f3   :  { %v5794_v1 = vpop.xlane.xlu1 %5793  ;;  %5883 = vadd.xlane.f32.xlu0 %v5882_v20 }
0x11f4   :  { %v5834_v51 = vmul.f32 0.0625, %v5794_v1  ;;  %v5865_v38 = vmul.f32 %v17044_v19, %v17044_v19 }
0x11f6   :  { %v17050_v9 = vsub.f32 %v16909_v59, %v5834_v51  ;;  %v5885_v47 = vsel %vm793_vm2, %v5865_v38, 0.0 }
0x11f7   :  { %5886 = vadd.xlane.f32.xlu1 %v5885_v47  ;;  %v5797_v37 = vpop.xlane.xlu1 %5796 }
0x11f8   :  { %v5835_v40 = vmul.f32 0.0625, %v5797_v37  ;;  %v5866_v35 = vmul.f32 %v17050_v9, %v17050_v9  ;;  %v5841_v37 = vmul.f32 0.0625, %v5815_v48 }
0x11fa   :  { %v17056_v17 = vsub.f32 %v16918_v29, %v5835_v40  ;;  %v5888_v30 = vsel %vm793_vm2, %v5866_v35, 0.0  ;;  %v5821_v40 = vpop.xlane.xlu0 %5820 }
0x11fb   :  { %v5800_v18 = vpop.xlane.xlu1 %5799  ;;  %5889 = vadd.xlane.f32.xlu0 %v5888_v30 }
0x11fc   :  { %v5836_v46 = vmul.f32 0.0625, %v5800_v18  ;;  %v5867_v11 = vmul.f32 %v17056_v17, %v17056_v17 }
0x11fe   :  { %v17062_v4 = vsub.f32 %v16923_v58, %v5836_v46  ;;  %v5891_v31 = vsel %vm793_vm2, %v5867_v11, 0.0 }
0x11ff   :  { %5892 = vadd.xlane.f32.xlu1 %v5891_v31  ;;  %v5803_v33 = vpop.xlane.xlu1 %5802  ;;  %v17080_v31 = vsub.f32 %v16834_v13, %v5841_v37 }
0x1200   :  { %v5837_v34 = vmul.f32 0.0625, %v5803_v33  ;;  %v5868_v15 = vmul.f32 %v17062_v4, %v17062_v4  ;;  %v5843_v33 = vmul.f32 0.0625, %v5821_v40 }
0x1202   :  { %v17068_v20 = vsub.f32 %v16932_v41, %v5837_v34  ;;  %v5894_v1 = vsel %vm793_vm2, %v5868_v15, 0.0  ;;  %v5827_v15 = vpop.xlane.xlu0 %5826 }
0x1203   :  { %v5806_v51 = vpop.xlane.xlu1 %5805  ;;  %5895 = vadd.xlane.f32.xlu0 %v5894_v1  ;;  %v5845_v37 = vmul.f32 0.0625, %v5827_v15 }
0x1204   :  { %v5838_v38 = vmul.f32 0.0625, %v5806_v51  ;;  %v5869_v47 = vmul.f32 %v17068_v20, %v17068_v20 }
0x1205   :  { %v17101_v13 = vsub.f32 %v16848_v49, %v5845_v37 }
0x1206   :  { %v17074_v35 = vsub.f32 %v16937_v43, %v5838_v38  ;;  %v5897_v30 = vsel %vm793_vm2, %v5869_v47, 0.0  ;;  %v5873_v47 = vmul.f32 %v17080_v31, %v17080_v31 }
0x1207   :  { %5898 = vadd.xlane.f32.xlu1 %v5897_v30  ;;  %v5809_v18 = vpop.xlane.xlu1 %5808  ;;  %v17091_v30 = vsub.f32 %v16841_v52, %v5843_v33  ;;  %v5877_v49 = vmul.f32 %v17101_v13, %v17101_v13 }
0x1208   :  { %v5839_v46 = vmul.f32 0.0625, %v5809_v18  ;;  %v5870_v11 = vmul.f32 %v17074_v35, %v17074_v35 }
0x120a   :  { %v17083_v34 = vsub.f32 %v16946_v55, %v5839_v46  ;;  %v5900_v48 = vsel %vm793_vm2, %v5870_v11, 0.0 }
0x120b   :  { %v5812_v1 = vpop.xlane.xlu1 %5811  ;;  %5901 = vadd.xlane.f32.xlu0 %v5900_v48 }
0x120c   :  { %v5840_v51 = vmul.f32 0.0625, %v5812_v1  ;;  %v5871_v38 = vmul.f32 %v17083_v34, %v17083_v34  ;;  %v5909_v1 = vsel %vm793_vm2, %v5873_v47, 0.0 }
0x120e   :  { %v17094_v40 = vsub.f32 %v16951_v12, %v5840_v51  ;;  %v5903_v18 = vsel %vm793_vm2, %v5871_v38, 0.0  ;;  %v5875_v51 = vmul.f32 %v17091_v30, %v17091_v30 }
0x120f   :  { %5904 = vadd.xlane.f32.xlu1 %v5903_v18  ;;  %v5818_v46 = vpop.xlane.xlu1 %5817  ;;  %v264_v18 = vld [vmem:[#allocation6] sm:$0xff] }
0x1210   :  { %v5842_v11 = vmul.f32 0.0625, %v5818_v46  ;;  %v5872_v48 = vmul.f32 %v17094_v40, %v17094_v40  ;;  %v265_v46 = vld [vmem:[#allocation6 + $0x8] sm:$0xff] }
0x1211   :  { %v12072_v12 = vpack.c.bf16 %v265_v46, %v264_v18  ;;  %v5921_v18 = vsel %vm793_vm2, %v5877_v49, 0.0 }
0x1212   :  { %v17104_v33 = vsub.f32 %v16958_v23, %v5842_v11  ;;  %v5906_v15 = vsel %vm793_vm2, %v5872_v48, 0.0  ;;  %v5915_v11 = vsel %vm793_vm2, %v5875_v51, 0.0 }
0x1213   :  { %5910 = vadd.xlane.f32.xlu1 %v5909_v1  ;;  %v5824_v38 = vpop.xlane.xlu1 %5823  ;;  %5907 = vadd.xlane.f32.xlu0 %v5906_v15 }
0x1214   :  { %v5844_v52 = vmul.f32 0.0625, %v5824_v38  ;;  %v5874_v47 = vmul.f32 %v17104_v33, %v17104_v33  ;;  %12073 = vmatprep.subr.bf16.mxu1 %v12072_v12 }
0x1215   :  { %12075 = vmatpush3.bf16.msra.mxu1 %v12072_v12  ;;  %v10322_v12 = vld [vmem:[%s13493_s5 + $0x30] sm:$0xff] }
0x1216   :  { %v17112_v37 = vsub.f32 %v16965_v5, %v5844_v52  ;;  %v5912_v48 = vsel %vm793_vm2, %v5874_v47, 0.0 }
0x1217   :  { %5916 = vadd.xlane.f32.xlu1 %v5915_v11  ;;  %v5830_v1 = vpop.xlane.xlu1 %5829  ;;  %5913 = vadd.xlane.f32.xlu0 %v5912_v48  ;;  %v10320_v11 = vld [vmem:[%s13493_s5 + $0x20] sm:$0xff]  ;;  %v10321_v48 = vld [vmem:[%s13493_s5 + $0x28] sm:$0xff] }
0x1218   :  { %v5846_v15 = vmul.f32 0.0625, %v5830_v1  ;;  %v5876_v38 = vmul.f32 %v17112_v37, %v17112_v37  ;;  %v10323_v1 = vld [vmem:[%s13493_s5 + $0x38] sm:$0xff]  ;;  %s19000_s5 = sld [smem:[#allocation19_spill]] }
0x121a   :  { %v17121_v52 = vsub.f32 %v16972_v54, %v5846_v15  ;;  %v5918_v51 = vsel %vm793_vm2, %v5876_v38, 0.0 }
0x121b   :  { %5919 = vadd.xlane.f32.xlu0 %v5918_v51  ;;  %5922 = vadd.xlane.f32.xlu1 %v5921_v18 }
0x121c   :  { %v5878_v46 = vmul.f32 %v17121_v52, %v17121_v52 }
0x121e   :  { %v5924_v47 = vsel %vm793_vm2, %v5878_v46, 0.0 }
0x121f   :  { %5925 = vadd.xlane.f32.xlu0 %v5924_v47 }
0x124e   :  { %6742 = vxpose.xlu1.b32.start [1/4] (short) (narrow) %v10320_v11, 64 }
0x1252   :  { %6743 = vxpose.xlu1.b32.cont [2/4] (short) (narrow) %v10321_v48, 64 }
0x1256   :  { %6744 = vxpose.xlu1.b32.cont [3/4] (short) (narrow) %v10322_v12, 64 }
0x125a   :  { %6745 = vxpose.xlu1.b32.end [4/4] (short) (narrow) %v10323_v1, 64 }
0x125c   :  { %v7314_v15 = vpop.xlane.xlu0 %7313 }
0x125d   :  { %v7315_v38 = vmul.f32 0.03125, %v7314_v15 }
0x125f   :  { %v7316_v54 = vadd.f32 1e-05, %v7315_v38 }
0x1260   :  { %v7493_v49 = vpop.xlane.xlu1 %7492 }
0x1261   :  { %12980 = vrsqrt.f32 %v7316_v54  ;;  %v7539_v51 = vmul.f32 0.03125, %v7493_v49 }
0x1263   :  { %v7555_v18 = vadd.f32 1e-05, %v7539_v51 }
0x1264   :  { %v7499_v5 = vpop.xlane.xlu1 %7498  ;;  %v7496_v23 = vpop.xlane.xlu0 %7495 }
0x1265   :  { %12982 = vrsqrt.f32 %v7555_v18  ;;  %v7541_v46 = vmul.f32 0.03125, %v7499_v5  ;;  %v7540_v47 = vmul.f32 0.03125, %v7496_v23  ;;  %v18999_v18 = vld [vmem:[#allocation42_spill] sm:$0xff] }
0x1266   :  { %v17136_v23 = vrot.slane %v16803_v45, %v18999_v18 }
0x1267   :  { %v7557_v55 = vadd.f32 1e-05, %v7541_v46  ;;  %v7556_v11 = vadd.f32 1e-05, %v7540_v47 }
0x1268   :  { %v7502_v22 = vpop.xlane.xlu0 %7501 }
0x1269   :  { %v7542_v48 = vmul.f32 0.03125, %v7502_v22  ;;  %12984 = vrsqrt.f32 %v7556_v11 }
0x126a   :  { %12986 = vrsqrt.f32 %v7557_v55 }
0x126b   :  { %v12981_v12 = vpop.eup %12980  ;;  %v7558_v1 = vadd.f32 1e-05, %v7542_v48 }
0x126c   :  { %v7318_v15 = vmul.f32 %v12981_v12, %v16979_v63  ;;  %v7505_v38 = vpop.xlane.xlu1 %7504 }
0x126d   :  { %v7543_v24 = vmul.f32 0.03125, %v7505_v38  ;;  %12988 = vrsqrt.f32 %v7558_v1 }
0x126e   :  { %v7319_v54 = vmul.f32 %v7318_v15, %v16803_v45 }
0x126f   :  { %v12983_v49 = vpop.eup %12982  ;;  %v7559_v51 = vadd.f32 1e-05, %v7543_v24  ;;  %v17145_v24 = vrot.slane %v16807_v50, %v18999_v18 }
0x1270   :  { %v7587_v5 = vmul.f32 %v12983_v49, %v16987_v53  ;;  %v7508_v22 = vpop.xlane.xlu0 %7507  ;;  %v7320_v46 = vadd.f32 %v7319_v54, %v16807_v50 }
0x1271   :  { %v7544_v55 = vmul.f32 0.03125, %v7508_v22  ;;  %12990 = vrsqrt.f32 %v7559_v51 }
0x1272   :  { %10329 = vmatmul.mubr.msk.f32.vlgmr.msra.gmra.mrb[98].mxu0 %vm426_vm0, %v7320_v46  ;;  %v7609_v53 = vmul.f32 %v17136_v23, %v7587_v5 }
0x1273   :  { %v7560_v63 = vadd.f32 1e-05, %v7544_v55  ;;  %12133 = vmatpush1.bf16.msra.mxu0 %v16755_v56  ;;  %7759 = vmatprep.mubr.f32.mxu0 %v18957_v42  ;;  %v12985_v47 = vpop.eup %12984 }
0x1274   :  { %v7511_v45 = vpop.xlane.xlu1 %7510  ;;  %12135 = vmatprep.subr.bf16.mxu0 %v16758_v44  ;;  %v12987_v11 = vpop.eup %12986  ;;  %v7588_v12 = vmul.f32 %v12985_v47, %v16993_v2  ;;  %v7631_v15 = vadd.f32 %v17145_v24, %v7609_v53 }
0x1275   :  { %v7545_v48 = vmul.f32 0.03125, %v7511_v45  ;;  %12992 = vrsqrt.f32 %v7560_v63  ;;  %v7589_v50 = vmul.f32 %v12987_v11, %v16984_v16 }
0x1276   :  { %v7610_v38 = vmul.f32 %v17136_v23, %v7588_v12 }
0x1277   :  { %v7561_v1 = vadd.f32 1e-05, %v7545_v48  ;;  %12137 = vmatpush1.bf16.msra.mxu0 %v16761_v6  ;;  %v12989_v54 = vpop.eup %12988  ;;  %v7611_v6 = vmul.f32 %v17136_v23, %v7589_v50 }
0x1278   :  { %v7514_v56 = vpop.xlane.xlu0 %7513  ;;  %v7632_v51 = vadd.f32 %v17145_v24, %v7610_v38  ;;  %v7590_v5 = vmul.f32 %v12989_v54, %v17001_v3 }
0x1279   :  { %v7546_v49 = vmul.f32 0.03125, %v7514_v56  ;;  %12994 = vrsqrt.f32 %v7561_v1  ;;  %v7633_v63 = vadd.f32 %v17145_v24, %v7611_v6  ;;  %v17176_v6 = vld [vmem:[%s19000_s5] ss:$0 sm:$0xff] }
0x127a   :  { %10330 = vmatmul.mubr.msk.f32.vlgmr.msra.gmra.mrb[100].mxu0 %vm426_vm0, %v7631_v15  ;;  %v7612_v47 = vmul.f32 %v17136_v23, %v7590_v5 }
0x127b   :  { %v7562_v44 = vadd.f32 1e-05, %v7546_v49  ;;  %7765 = vmatprep.mubr.f32.mxu0 %v18957_v42  ;;  %v12991_v22 = vpop.eup %12990 }
0x127c   :  { %v5881_v2 = vpop.xlane.xlu1 %5880  ;;  %v7591_v45 = vmul.f32 %v12991_v22, %v17008_v62  ;;  %v7634_v12 = vadd.f32 %v17145_v24, %v7612_v47  ;;  %v17184_v47 = vld [vmem:[%s19001_s15] ss:$0 sm:$0xff] }
0x127d   :  { %v5927_v46 = vmul.f32 0.0625, %v5881_v2  ;;  %12996 = vrsqrt.f32 %v7562_v44 }
0x127e   :  { %10331 = vmatmul.mubr.msk.f32.gmra.mrb[102].mxu0 %vm426_vm0, %v7632_v51  ;;  %v7613_v1 = vmul.f32 %v17136_v23, %v7591_v45 }
0x127f   :  { %v5943_v16 = vadd.f32 1e-05, %v5927_v46  ;;  %7771 = vmatprep.mubr.f32.mxu0 %v18957_v42  ;;  %v12993_v53 = vpop.eup %12992 }
0x1280   :  { %v5884_v55 = vpop.xlane.xlu0 %5883  ;;  %v7592_v56 = vmul.f32 %v12993_v53, %v17014_v36  ;;  %v7635_v54 = vadd.f32 %v17145_v24, %v7613_v1 }
0x1281   :  { %12998 = vrsqrt.f32 %v5943_v16  ;;  %v5928_v11 = vmul.f32 0.0625, %v5884_v55 }
0x1282   :  { %10332 = vmatmul.mubr.msk.f32.gmra.mrb[104].mxu0 %vm426_vm0, %v7633_v63  ;;  %v7614_v49 = vmul.f32 %v17136_v23, %v7592_v56 }
0x1283   :  { %v5944_v3 = vadd.f32 1e-05, %v5928_v11  ;;  %7777 = vmatprep.mubr.f32.mxu0 %v18957_v42  ;;  %v12995_v15 = vpop.eup %12994 }
0x1284   :  { %v5887_v48 = vpop.xlane.xlu1 %5886  ;;  %v7593_v44 = vmul.f32 %v12995_v15, %v17020_v8  ;;  %v7636_v46 = vadd.f32 %v17145_v24, %v7614_v49 }
0x1285   :  { %13000 = vrsqrt.f32 %v5944_v3  ;;  %v5929_v38 = vmul.f32 0.0625, %v5887_v48 }
0x1286   :  { %10333 = vmatmul.mubr.msk.f32.gmra.mrb[106].mxu0 %vm426_vm0, %v7634_v12  ;;  %v7615_v16 = vmul.f32 %v17136_v23, %v7593_v44 }
0x1287   :  { %v5945_v62 = vadd.f32 1e-05, %v5929_v38  ;;  %7783 = vmatprep.mubr.f32.mxu0 %v18957_v42  ;;  %v12997_v2 = vpop.eup %12996 }
0x1288   :  { %v5890_v50 = vpop.xlane.xlu0 %5889  ;;  %v7594_v8 = vmul.f32 %v12997_v2, %v17026_v28  ;;  %v7637_v12 = vadd.f32 %v17145_v24, %v7615_v16 }
0x1289   :  { %13002 = vrsqrt.f32 %v5945_v62  ;;  %v5930_v36 = vmul.f32 0.0625, %v5890_v50 }
0x128a   :  { %10334 = vmatmul.mubr.msk.f32.gmra.mrb[108].mxu0 %vm426_vm0, %v7635_v54  ;;  %v7616_v28 = vmul.f32 %v17136_v23, %v7594_v8 }
0x128b   :  { %v12999_v51 = vpop.eup %12998  ;;  %v5946_v5 = vadd.f32 1e-05, %v5930_v36  ;;  %7789 = vmatprep.mubr.f32.mxu0 %v18957_v42 }
0x128c   :  { %v5893_v22 = vpop.xlane.xlu1 %5892  ;;  %v5975_v55 = vmul.f32 %v12999_v51, %v17032_v25  ;;  %v7638_v62 = vadd.f32 %v17145_v24, %v7616_v28 }
0x128d   :  { %13004 = vrsqrt.f32 %v5946_v5  ;;  %v5931_v63 = vmul.f32 0.0625, %v5893_v22 }
0x128e   :  { %10335 = vmatmul.mubr.msk.f32.gmra.mrb[110].mxu0 %vm426_vm0, %v7636_v46  ;;  %v5997_v45 = vmul.f32 %v17176_v6, %v5975_v55 }
0x128f   :  { %v13001_v53 = vpop.eup %13000  ;;  %v5947_v11 = vadd.f32 1e-05, %v5931_v63  ;;  %7795 = vmatprep.mubr.f32.mxu0 %v18957_v42 }
0x1290   :  { %v5976_v3 = vmul.f32 %v13001_v53, %v17038_v32  ;;  %v5896_v48 = vpop.xlane.xlu0 %5895  ;;  %v6019_v25 = vadd.f32 %v17184_v47, %v5997_v45 }
0x1291   :  { %13006 = vrsqrt.f32 %v5947_v11  ;;  %v5932_v1 = vmul.f32 0.0625, %v5896_v48 }
0x1292   :  { %v5998_v56 = vmul.f32 %v17176_v6, %v5976_v3  ;;  %10336 = vmatmul.mubr.msk.f32.gmra.mrb[112].mxu0 %vm426_vm0, %v7637_v12  ;;  %11488 = vmatprep.mubr.msk.f32.mxu1 %vm793_vm2, %v6019_v25 }
0x1293   :  { %v13003_v15 = vpop.eup %13002  ;;  %v5948_v38 = vadd.f32 1e-05, %v5932_v1  ;;  %7801 = vmatprep.mubr.f32.mxu0 %v18957_v42 }
0x1294   :  { %v5899_v32 = vpop.xlane.xlu1 %5898  ;;  %v6020_v50 = vadd.f32 %v17184_v47, %v5998_v56  ;;  %v5977_v54 = vmul.f32 %v13003_v15, %v17044_v19 }
0x1295   :  { %13008 = vrsqrt.f32 %v5948_v38  ;;  %v5933_v49 = vmul.f32 0.0625, %v5899_v32 }
0x1296   :  { %10337 = vmatmul.mubr.msk.f32.gmra.mrb[114].mxu0 %vm426_vm0, %v7638_v62  ;;  %11489 = vmatmul.mubr.msk.f32.vlgmr.msra.gmra.mrb[80].mxu1 %vm793_vm2, %v6020_v50  ;;  %v5999_v44 = vmul.f32 %v17176_v6, %v5977_v54 }
0x1297   :  { %v13005_v2 = vpop.eup %13004  ;;  %v5949_v36 = vadd.f32 1e-05, %v5933_v49  ;;  %7807 = vmatprep.mubr.f32.mxu0 %v18957_v42 }
0x1298   :  { %v5902_v51 = vpop.xlane.xlu0 %5901  ;;  %v6021_v5 = vadd.f32 %v17184_v47, %v5999_v44  ;;  %v5978_v22 = vmul.f32 %v13005_v2, %v17050_v9 }
0x1299   :  { %13010 = vrsqrt.f32 %v5949_v36  ;;  %v5934_v46 = vmul.f32 0.0625, %v5902_v51 }
0x129a   :  { %11491 = vmatprep.mubr.msk.f32.mxu1 %vm793_vm2, %v6021_v5  ;;  %v6000_v19 = vmul.f32 %v17176_v6, %v5978_v22 }
0x129b   :  { %v13007_v16 = vpop.eup %13006  ;;  %v5950_v55 = vadd.f32 1e-05, %v5934_v46 }
0x129c   :  { %v5905_v8 = vpop.xlane.xlu1 %5904  ;;  %v6022_v63 = vadd.f32 %v17184_v47, %v6000_v19  ;;  %v5979_v45 = vmul.f32 %v13007_v16, %v17056_v17 }
0x129d   :  { %13012 = vrsqrt.f32 %v5950_v55  ;;  %v5935_v53 = vmul.f32 0.0625, %v5905_v8 }
0x129e   :  { %11492 = vmatmul.mubr.msk.f32.gmra.mrb[82].mxu1 %vm793_vm2, %v6022_v63  ;;  %v6001_v11 = vmul.f32 %v17176_v6, %v5979_v45 }
0x129f   :  { %v13009_v9 = vpop.eup %13008  ;;  %v5951_v3 = vadd.f32 1e-05, %v5935_v53 }
0x12a0   :  { %v5911_v48 = vpop.xlane.xlu1 %5910  ;;  %v5908_v12 = vpop.xlane.xlu0 %5907  ;;  %v6023_v25 = vadd.f32 %v17184_v47, %v6001_v11  ;;  %v5980_v28 = vmul.f32 %v13009_v9, %v17062_v4 }
0x12a1   :  { %13014 = vrsqrt.f32 %v5951_v3  ;;  %v5937_v1 = vmul.f32 0.0625, %v5911_v48  ;;  %v5936_v56 = vmul.f32 0.0625, %v5908_v12 }
0x12a2   :  { %11494 = vmatprep.mubr.msk.f32.mxu1 %vm793_vm2, %v6023_v25  ;;  %v6002_v17 = vmul.f32 %v17176_v6, %v5980_v28 }
0x12a3   :  { %v13011_v15 = vpop.eup %13010  ;;  %v5953_v38 = vadd.f32 1e-05, %v5937_v1  ;;  %v5952_v32 = vadd.f32 1e-05, %v5936_v56 }
0x12a4   :  { %v5917_v62 = vpop.xlane.xlu1 %5916  ;;  %v5914_v50 = vpop.xlane.xlu0 %5913  ;;  %v6024_v54 = vadd.f32 %v17184_v47, %v6002_v17  ;;  %v5981_v49 = vmul.f32 %v13011_v15, %v17068_v20 }
0x12a5   :  { %13016 = vrsqrt.f32 %v5953_v38  ;;  %v5939_v44 = vmul.f32 0.0625, %v5917_v62  ;;  %v5938_v2 = vmul.f32 0.0625, %v5914_v50 }
0x12a6   :  { %13018 = vrsqrt.f32 %v5952_v32  ;;  %11495 = vmatmul.mubr.msk.f32.gmra.mrb[84].mxu1 %vm793_vm2, %v6024_v54  ;;  %v6003_v4 = vmul.f32 %v17176_v6, %v5981_v49 }
0x12a7   :  { %v13013_v36 = vpop.eup %13012  ;;  %v5955_v51 = vadd.f32 1e-05, %v5939_v44  ;;  %v5954_v5 = vadd.f32 1e-05, %v5938_v2 }
0x12a8   :  { %v5923_v22 = vpop.xlane.xlu1 %5922  ;;  %v5920_v46 = vpop.xlane.xlu0 %5919  ;;  %v6025_v19 = vadd.f32 %v17184_v47, %v6003_v4  ;;  %v5982_v16 = vmul.f32 %v13013_v36, %v17074_v35 }
0x12a9   :  { %13020 = vrsqrt.f32 %v5955_v51  ;;  %v5941_v55 = vmul.f32 0.0625, %v5923_v22  ;;  %v5940_v20 = vmul.f32 0.0625, %v5920_v46 }
0x12aa   :  { %13022 = vrsqrt.f32 %v5954_v5  ;;  %11497 = vmatprep.mubr.msk.f32.mxu1 %vm793_vm2, %v6025_v19  ;;  %v6004_v8 = vmul.f32 %v17176_v6, %v5982_v16 }
0x12ab   :  { %v13015_v63 = vpop.eup %13014  ;;  %v5957_v45 = vadd.f32 1e-05, %v5941_v55  ;;  %v5956_v53 = vadd.f32 1e-05, %v5940_v20 }
0x12ac   :  { %v5926_v11 = vpop.xlane.xlu0 %5925  ;;  %v6026_v9 = vadd.f32 %v17184_v47, %v6004_v8  ;;  %v5983_v3 = vmul.f32 %v13015_v63, %v17083_v34 }
0x12ad   :  { %13024 = vrsqrt.f32 %v5957_v45  ;;  %v5942_v48 = vmul.f32 0.0625, %v5926_v11 }
0x12ae   :  { %13026 = vrsqrt.f32 %v5956_v53  ;;  %11498 = vmatmul.mubr.msk.f32.gmra.mrb[86].mxu1 %vm793_vm2, %v6026_v9  ;;  %v6005_v35 = vmul.f32 %v17176_v6, %v5983_v3  ;;  %v267_v9 = vld [vmem:[%s19002_s27] sm:$0xff]  ;;  %v268_v3 = vld [vmem:[%s19002_s27 + $0x8] sm:$0xff] }
0x12af   :  { %v13017_v12 = vpop.eup %13016  ;;  %v5958_v25 = vadd.f32 1e-05, %v5942_v48  ;;  %v12076_v48 = vpack.c.bf16 %v268_v3, %v267_v9 }
0x12b0   :  { %v13019_v28 = vpop.eup %13018  ;;  %v6027_v1 = vadd.f32 %v17184_v47, %v6005_v35  ;;  %v5985_v56 = vmul.f32 %v13017_v12, %v17080_v31 }
0x12b1   :  { %13028 = vrsqrt.f32 %v5958_v25  ;;  %v5984_v17 = vmul.f32 %v13019_v28, %v17094_v40  ;;  %12077 = vmatprep.subr.bf16.mxu1 %v12076_v48  ;;  %v269_v25 = vld [vmem:[%s19002_s27 + $0x10] sm:$0xff]  ;;  %v270_v28 = vld [vmem:[%s19002_s27 + $0x18] sm:$0xff] }
0x12b2   :  { %11500 = vmatprep.mubr.msk.f32.mxu1 %vm793_vm2, %v6027_v1  ;;  %v6007_v34 = vmul.f32 %v17176_v6, %v5985_v56  ;;  %12079 = vmatpush3.bf16.msra.mxu1 %v12076_v48  ;;  %v12080_v1 = vpack.c.bf16 %v270_v28, %v269_v25 }
0x12b3   :  { %v13021_v15 = vpop.eup %13020  ;;  %v6006_v38 = vmul.f32 %v17176_v6, %v5984_v17 }
0x12b4   :  { %v13023_v32 = vpop.eup %13022  ;;  %v6029_v62 = vadd.f32 %v17184_v47, %v6007_v34  ;;  %v5987_v50 = vmul.f32 %v13021_v15, %v17091_v30  ;;  %12081 = vmatprep.subr.bf16.mxu1 %v12080_v1  ;;  %v271_v34 = vld [vmem:[%s19002_s27 + $0x20] sm:$0xff]  ;;  %v272_v15 = vld [vmem:[%s19002_s27 + $0x28] sm:$0xff] }
0x12b5   :  { %v6028_v54 = vadd.f32 %v17184_v47, %v6006_v38  ;;  %v5986_v49 = vmul.f32 %v13023_v32, %v17104_v33  ;;  %v12084_v38 = vpack.c.bf16 %v272_v15, %v271_v34 }
0x12b6   :  { %v6009_v31 = vmul.f32 %v17176_v6, %v5987_v50  ;;  %12083 = vmatpush3.bf16.msra.mxu1 %v12080_v1  ;;  %v273_v50 = vld [vmem:[%s19002_s27 + $0x30] sm:$0xff] }
0x12b7   :  { %v13025_v44 = vpop.eup %13024  ;;  %11501 = vmatmul.mubr.msk.f32.gmra.mrb[88].mxu1 %vm793_vm2, %v6028_v54  ;;  %v6008_v40 = vmul.f32 %v17176_v6, %v5986_v49  ;;  %12085 = vmatprep.subr.bf16.mxu1 %v12084_v38  ;;  %v274_v54 = vld [vmem:[%s19002_s27 + $0x38] sm:$0xff] }
0x12b8   :  { %v13027_v2 = vpop.eup %13026  ;;  %11503 = vmatprep.mubr.msk.f32.mxu1 %vm793_vm2, %v6029_v62  ;;  %v6031_v4 = vadd.f32 %v17184_v47, %v6009_v31  ;;  %v5989_v36 = vmul.f32 %v13025_v44, %v17101_v13  ;;  %v12088_v49 = vpack.c.bf16 %v274_v54, %v273_v50  ;;  %v275_v31 = vld [vmem:[%s19002_s27 + $0x40] sm:$0xff]  ;;  %v276_v44 = vld [vmem:[%s19002_s27 + $0x48] sm:$0xff] }
0x12b9   :  { %v6030_v30 = vadd.f32 %v17184_v47, %v6008_v40  ;;  %v5988_v51 = vmul.f32 %v13027_v2, %v17112_v37  ;;  %v12092_v40 = vpack.c.bf16 %v276_v44, %v275_v31  ;;  %v277_v2 = vld [vmem:[%s19002_s27 + $0x50] sm:$0xff] }
0x12ba   :  { %v6011_v33 = vmul.f32 %v17176_v6, %v5989_v36  ;;  %12087 = vmatpush3.bf16.msra.mxu1 %v12084_v38 }
0x12bb   :  { %v13029_v5 = vpop.eup %13028  ;;  %11504 = vmatmul.mubr.msk.f32.gmra.mrb[90].mxu1 %vm793_vm2, %v6030_v30  ;;  %v6010_v22 = vmul.f32 %v17176_v6, %v5988_v51  ;;  %12089 = vmatprep.subr.bf16.mxu1 %v12088_v49  ;;  %v279_v30 = vld [vmem:[%s19002_s27 + $0x60] sm:$0xff]  ;;  %v280_v51 = vld [vmem:[%s19002_s27 + $0x68] sm:$0xff] }
0x12bc   :  { %11506 = vmatprep.mubr.msk.f32.mxu1 %vm793_vm2, %v6031_v4  ;;  %v6033_v46 = vadd.f32 %v17184_v47, %v6011_v33  ;;  %v5990_v19 = vmul.f32 %v13029_v5, %v17121_v52  ;;  %v278_v4 = vld [vmem:[%s19002_s27 + $0x58] sm:$0xff]  ;;  %v12100_v33 = vpack.c.bf16 %v280_v51, %v279_v30  ;;  %v281_v5 = vld [vmem:[%s19002_s27 + $0x70] sm:$0xff] }
0x12bd   :  { %v6032_v16 = vadd.f32 %v17184_v47, %v6010_v22  ;;  %v12096_v36 = vpack.c.bf16 %v278_v4, %v277_v2  ;;  %v282_v22 = vld [vmem:[%s19002_s27 + $0x78] sm:$0xff] }
0x12be   :  { %v6012_v13 = vmul.f32 %v17176_v6, %v5990_v19  ;;  %12091 = vmatpush3.bf16.msra.mxu1 %v12088_v49 }
0x12bf   :  { %11507 = vmatmul.mubr.msk.f32.gmra.mrb[92].mxu1 %vm793_vm2, %v6032_v16  ;;  %12093 = vmatprep.subr.bf16.mxu1 %v12092_v40 }
0x12c0   :  { %11509 = vmatprep.mubr.msk.f32.mxu1 %vm793_vm2, %v6033_v46  ;;  %v6034_v37 = vadd.f32 %v17184_v47, %v6012_v13  ;;  %v12104_v46 = vpack.c.bf16 %v282_v22, %v281_v5  ;;  %v17348_v5 = vld [vmem:[%s19011_s18] ss:$0 sm:$0xff] }
0x12c2   :  { %12095 = vmatpush3.bf16.msra.mxu1 %v12092_v40 }
0x12c3   :  { %11510 = vmatmul.mubr.msk.f32.gmra.mrb[94].mxu1 %vm793_vm2, %v6034_v37  ;;  %12097 = vmatprep.subr.bf16.mxu1 %v12096_v36 }
0x12c6   :  { %12099 = vmatpush3.bf16.msra.mxu1 %v12096_v36 }
0x12c7   :  { %12101 = vmatprep.subr.bf16.mxu1 %v12100_v33 }
0x12ca   :  { %12103 = vmatpush3.bf16.msra.mxu1 %v12100_v33 }
0x12cb   :  { %12105 = vmatprep.subr.bf16.mxu1 %v12104_v46 }
0x12ce   :  { %v17258_v55 = vpop.trf.xlu1  ;;  %12107 = vmatpush3.bf16.msra.mxu1 %v12104_v46 }
0x12cf   :  { %19003 = vst [vmem:[#allocation117_spill] sm:$0xff] %v17258_v55  ;;  %v7419_v20 = vsel %vm426_vm0, %v17258_v55, 0.0 }
0x12d0   :  { %7420 = vadd.xlane.f32.xlu0 %v7419_v20 }
0x12d2   :  { %v17262_v52 = vpop.trf.xlu1 }
0x12d3   :  { %19004 = vst [vmem:[#allocation113_spill] sm:$0xff] %v17262_v52  ;;  %v7422_v6 = vsel %vm426_vm0, %v17262_v52, 0.0 }
0x12d4   :  { %7423 = vadd.xlane.f32.xlu0 %v7422_v6 }
0x12d6   :  { %v17266_v8 = vpop.trf.xlu1 }
0x12d7   :  { %19005 = vst [vmem:[#allocation115_spill] sm:$0xff] %v17266_v8  ;;  %v7425_v47 = vsel %vm426_vm0, %v17266_v8, 0.0 }
0x12d8   :  { %7426 = vadd.xlane.f32.xlu0 %v7425_v47 }
0x12da   :  { %v17270_v63 = vpop.trf.xlu1 }
0x12db   :  { %19006 = vst [vmem:[#allocation101_spill] sm:$0xff] %v17270_v63  ;;  %v7428_v45 = vsel %vm426_vm0, %v17270_v63, 0.0 }
0x12dc   :  { %7429 = vadd.xlane.f32.xlu0 %v7428_v45 }
0x12de   :  { %v17274_v53 = vpop.trf.xlu1 }
0x12df   :  { %19007 = vst [vmem:[#allocation116_spill] sm:$0xff] %v17274_v53  ;;  %v7431_v11 = vsel %vm426_vm0, %v17274_v53, 0.0 }
0x12e0   :  { %7432 = vadd.xlane.f32.xlu0 %v7431_v11 }
0x12e2   :  { %v17280_v35 = vpop.trf.xlu1 }
0x12e3   :  { %19008 = vst [vmem:[#allocation97_spill] sm:$0xff] %v17280_v35  ;;  %v7434_v12 = vsel %vm426_vm0, %v17280_v35, 0.0 }
0x12e4   :  { %7435 = vadd.xlane.f32.xlu0 %v7434_v12 }
0x12e6   :  { %v17286_v56 = vpop.trf.xlu1 }
0x12e7   :  { %19009 = vst [vmem:[#allocation71_spill] sm:$0xff] %v17286_v56  ;;  %v7437_v17 = vsel %vm426_vm0, %v17286_v56, 0.0 }
0x12e8   :  { %7438 = vadd.xlane.f32.xlu0 %v7437_v17 }
0x12ea   :  { %v17292_v32 = vpop.trf.xlu1 }
0x12eb   :  { %19010 = vst [vmem:[#allocation93_spill] sm:$0xff] %v17292_v32  ;;  %v7440_v62 = vsel %vm426_vm0, %v17292_v32, 0.0 }
0x12ec   :  { %7441 = vadd.xlane.f32.xlu0 %v7440_v62 }
0x1345   :  { %v17306_v19 = vpop.f32.mrb[98].mxu0 }
0x1346   :  { %v17308_v16 = vpop.f32.mrb[99].mxu0 }
0x134d   :  { %v17310_v13 = vpop.f32.mrb[100].mxu0 }
0x134e   :  { %v7763_v37 = vpop.f32.mrb[101].mxu0 }
0x1351   :  { %v17312_v20 = vpop.f32.mrb[102].mxu0 }
0x1352   :  { %v7769_v47 = vpop.f32.mrb[103].mxu0 }
0x1353   :  { %v17316_v45 = vpack.c.bf16 %v7769_v47, %v7763_v37 }
0x1355   :  { %v17318_v11 = vpop.f32.mrb[104].mxu0 }
0x1356   :  { %v7775_v9 = vpop.f32.mrb[105].mxu0 }
0x1359   :  { %v17320_v3 = vpop.f32.mrb[106].mxu0 }
0x135a   :  { %v7781_v12 = vpop.f32.mrb[107].mxu0 }
0x135b   :  { %v17324_v25 = vpack.c.bf16 %v7781_v12, %v7775_v9 }
0x135d   :  { %v17326_v28 = vpop.f32.mrb[108].mxu0  ;;  %v7421_v1 = vpop.xlane.xlu0 %7420 }
0x135e   :  { %v7787_v17 = vpop.f32.mrb[109].mxu0  ;;  %v7451_v34 = vmul.f32 0.03125, %v7421_v1 }
0x1360   :  { %v17329_v15 = vsub.f32 %v17258_v55, %v7451_v34 }
0x1361   :  { %v17331_v38 = vpop.f32.mrb[110].mxu0  ;;  %v7424_v62 = vpop.xlane.xlu0 %7423 }
0x1362   :  { %v7793_v54 = vpop.f32.mrb[111].mxu0  ;;  %v7452_v49 = vmul.f32 0.03125, %v7424_v62  ;;  %v7483_v31 = vmul.f32 %v17329_v15, %v17329_v15 }
0x1363   :  { %v17337_v44 = vpack.c.bf16 %v7793_v54, %v7787_v17 }
0x1364   :  { %v17340_v40 = vsub.f32 %v17262_v52, %v7452_v49  ;;  %v7515_v2 = vsel %vm426_vm0, %v7483_v31, 0.0 }
0x1365   :  { %v17343_v4 = vpop.f32.mrb[112].mxu0  ;;  %7516 = vadd.xlane.f32.xlu0 %v7515_v2  ;;  %v7427_v36 = vpop.xlane.xlu0 %7426 }
0x1366   :  { %v7799_v30 = vpop.f32.mrb[113].mxu0  ;;  %v7453_v51 = vmul.f32 0.03125, %v7427_v36  ;;  %v7484_v33 = vmul.f32 %v17340_v40, %v17340_v40 }
0x1368   :  { %v17351_v22 = vsub.f32 %v17266_v8, %v7453_v51  ;;  %v7518_v46 = vsel %vm426_vm0, %v7484_v33, 0.0 }
0x1369   :  { %v17354_v37 = vpop.f32.mrb[114].mxu0  ;;  %v11490_v47 = vpop.f32.mrb[80].mxu1  ;;  %7519 = vadd.xlane.f32.xlu0 %v7518_v46 }
0x136a   :  { %v6161_v12 = vadd.f32 %v11490_v47, %v17348_v5  ;;  %v7805_v1 = vpop.f32.mrb[115].mxu0  ;;  %v7430_v17 = vpop.xlane.xlu0 %7429  ;;  %v7485_v34 = vmul.f32 %v17351_v22, %v17351_v22 }
0x136b   :  { %v17361_v62 = vpack.c.bf16 %v7805_v1, %v7799_v30  ;;  %v7454_v54 = vmul.f32 0.03125, %v7430_v17  ;;  %v6155_v49 = vpop.f32.mrb[81].mxu1 }
0x136c   :  { %v6251_v31 = vmul.f32 0.70710677, %v6161_v12  ;;  %v6156_v2 = vadd.f32 %v17348_v5, %v6155_v49  ;;  %v7521_v36 = vsel %vm426_vm0, %v7485_v34, 0.0  ;;  %v6235_v55 = vmul.f32 0.5, %v6161_v12 }
0x136d   :  { %v17366_v51 = vsub.f32 %v17270_v63, %v7454_v54  ;;  %7522 = vadd.xlane.f32.xlu0 %v7521_v36 }
0x136e   :  { %13030 = verf.f32 %v6251_v31  ;;  %v6250_v33 = vmul.f32 0.70710677, %v6156_v2  ;;  %v7433_v46 = vpop.xlane.xlu0 %7432 }
0x136f   :  { %v7455_v47 = vmul.f32 0.03125, %v7433_v46  ;;  %v7486_v9 = vmul.f32 %v17366_v51, %v17366_v51 }
0x1370   :  { %13032 = verf.f32 %v6250_v33 }
0x1371   :  { %v17371_v30 = vsub.f32 %v17274_v53, %v7455_v47  ;;  %v11493_v1 = vpop.f32.mrb[82].mxu1  ;;  %v7524_v17 = vsel %vm426_vm0, %v7486_v9, 0.0 }
0x1372   :  { %v6171_v34 = vadd.f32 %v11493_v1, %v17348_v5  ;;  %7525 = vadd.xlane.f32.xlu0 %v7524_v17  ;;  %v7436_v54 = vpop.xlane.xlu0 %7435  ;;  %v6165_v49 = vpop.f32.mrb[83].mxu1 }
0x1373   :  { %v7456_v36 = vmul.f32 0.03125, %v7436_v54  ;;  %v6166_v31 = vadd.f32 %v17348_v5, %v6165_v49  ;;  %v7487_v46 = vmul.f32 %v17371_v30, %v17371_v30 }
0x1374   :  { %v6253_v50 = vmul.f32 0.70710677, %v6171_v34 }
0x1375   :  { %v17379_v33 = vsub.f32 %v17280_v35, %v7456_v36  ;;  %v6252_v47 = vmul.f32 0.70710677, %v6166_v31  ;;  %v7527_v48 = vsel %vm426_vm0, %v7487_v46, 0.0  ;;  %v6234_v46 = vmul.f32 0.5, %v6156_v2 }
0x1376   :  { %13034 = verf.f32 %v6253_v50  ;;  %7528 = vadd.xlane.f32.xlu0 %v7527_v48  ;;  %v7439_v9 = vpop.xlane.xlu0 %7438 }
0x1377   :  { %13036 = verf.f32 %v6252_v47  ;;  %v7457_v1 = vmul.f32 0.03125, %v7439_v9  ;;  %v7488_v17 = vmul.f32 %v17379_v33, %v17379_v33 }
0x1378   :  { %v13031_v54 = vpop.eup %13030 }
0x1379   :  { %v17385_v49 = vsub.f32 %v17286_v56, %v7457_v1  ;;  %v11496_v6 = vpop.f32.mrb[84].mxu1  ;;  %v7530_v53 = vsel %vm426_vm0, %v7488_v17, 0.0  ;;  %v6283_v35 = vadd.f32 1.0, %v13031_v54 }
0x137a   :  { %v13033_v36 = vpop.eup %13032  ;;  %v6181_v8 = vadd.f32 %v11496_v6, %v17348_v5  ;;  %7531 = vadd.xlane.f32.xlu0 %v7530_v53  ;;  %v7442_v50 = vpop.xlane.xlu0 %7441 }
0x137b   :  { %v6175_v48 = vpop.f32.mrb[85].mxu1  ;;  %v6282_v47 = vadd.f32 1.0, %v13033_v36  ;;  %v7458_v9 = vmul.f32 0.03125, %v7442_v50  ;;  %v7489_v1 = vmul.f32 %v17385_v49, %v17385_v49  ;;  %v6299_v61 = vmul.f32 %v6283_v35, %v6235_v55 }
0x137c   :  { %v6176_v63 = vadd.f32 %v17348_v5, %v6175_v48  ;;  %v6255_v52 = vmul.f32 0.70710677, %v6181_v8  ;;  %v6237_v35 = vmul.f32 0.5, %v6171_v34 }
0x137d   :  { %v17393_v56 = vsub.f32 %v17292_v32, %v7458_v9  ;;  %v6298_v54 = vmul.f32 %v6282_v47, %v6234_v46  ;;  %v7533_v53 = vsel %vm426_vm0, %v7489_v1, 0.0  ;;  %v6236_v9 = vmul.f32 0.5, %v6166_v31 }
0x137e   :  { %v6254_v17 = vmul.f32 0.70710677, %v6176_v63  ;;  %13038 = verf.f32 %v6255_v52  ;;  %7534 = vadd.xlane.f32.xlu0 %v7533_v53  ;;  %v6238_v31 = vmul.f32 0.5, %v6176_v63 }
0x137f   :  { %11544 = vmatprep.mubr.f32.mxu1 %v6298_v54  ;;  %v7490_v6 = vmul.f32 %v17393_v56, %v17393_v56 }
0x1380   :  { %13040 = verf.f32 %v6254_v17  ;;  %v13035_v12 = vpop.eup %13034  ;;  %11545 = vmatmul.mubr.f32.vlgmr.msra.gmra.mrb[96].mxu1 %v6299_v61 }
0x1381   :  { %v13037_v2 = vpop.eup %13036  ;;  %v6285_v36 = vadd.f32 1.0, %v13035_v12  ;;  %v11499_v50 = vpop.f32.mrb[86].mxu1  ;;  %v7536_v48 = vsel %vm426_vm0, %v7490_v6, 0.0 }
0x1382   :  { %v6284_v32 = vadd.f32 1.0, %v13037_v2  ;;  %v6191_v55 = vadd.f32 %v11499_v50, %v17348_v5  ;;  %7537 = vadd.xlane.f32.xlu1 %v7536_v48  ;;  %v6185_v52 = vpop.f32.mrb[87].mxu1  ;;  %v6239_v50 = vmul.f32 0.5, %v6181_v8 }
0x1383   :  { %v6186_v46 = vadd.f32 %v17348_v5, %v6185_v52  ;;  %v6301_v54 = vmul.f32 %v6285_v36, %v6237_v35 }
0x1384   :  { %v6257_v47 = vmul.f32 0.70710677, %v6191_v55  ;;  %v6300_v1 = vmul.f32 %v6284_v32, %v6236_v9 }
0x1385   :  { %v6256_v17 = vmul.f32 0.70710677, %v6186_v46 }
0x1386   :  { %13042 = verf.f32 %v6257_v47  ;;  %11547 = vmatprep.mubr.f32.mxu1 %v6300_v1 }
0x1387   :  { %13044 = verf.f32 %v6256_v17  ;;  %11548 = vmatmul.mubr.f32.gmra.mrb[98].mxu1 %v6301_v54 }
0x1388   :  { %v13039_v61 = vpop.eup %13038 }
0x1389   :  { %v6287_v6 = vadd.f32 1.0, %v13039_v61 }
0x138a   :  { %v13041_v53 = vpop.eup %13040  ;;  %v11502_v2 = vpop.f32.mrb[88].mxu1 }
0x138b   :  { %v6286_v12 = vadd.f32 1.0, %v13041_v53  ;;  %v6201_v48 = vadd.f32 %v11502_v2, %v17348_v5  ;;  %v6195_v34 = vpop.f32.mrb[89].mxu1  ;;  %v6303_v9 = vmul.f32 %v6287_v6, %v6239_v50  ;;  %v6240_v53 = vmul.f32 0.5, %v6186_v46 }
0x138c   :  { %v6196_v52 = vadd.f32 %v17348_v5, %v6195_v34  ;;  %v6241_v6 = vmul.f32 0.5, %v6191_v55 }
0x138d   :  { %v6302_v7 = vmul.f32 %v6286_v12, %v6238_v31  ;;  %v6259_v32 = vmul.f32 0.70710677, %v6201_v48 }
0x138e   :  { %v6258_v36 = vmul.f32 0.70710677, %v6196_v52  ;;  %v11505_v35 = vpop.f32.mrb[90].mxu1 }
0x138f   :  { %11550 = vmatprep.mubr.f32.mxu1 %v6302_v7  ;;  %13046 = verf.f32 %v6259_v32  ;;  %v6211_v47 = vadd.f32 %v11505_v35, %v17348_v5  ;;  %v6205_v1 = vpop.f32.mrb[91].mxu1 }
0x1390   :  { %11551 = vmatmul.mubr.f32.gmra.mrb[100].mxu1 %v6303_v9  ;;  %v13043_v63 = vpop.eup %13042  ;;  %13048 = verf.f32 %v6258_v36  ;;  %v6206_v8 = vadd.f32 %v17348_v5, %v6205_v1  ;;  %v19012_v36 = vpack.i.bf16 %v17312_v20, %v17310_v13 }
0x1391   :  { %v13045_v17 = vpop.eup %13044  ;;  %v6289_v54 = vadd.f32 1.0, %v13043_v63  ;;  %v6261_v61 = vmul.f32 0.70710677, %v6211_v47 }
0x1392   :  { %v6288_v2 = vadd.f32 1.0, %v13045_v17  ;;  %v6260_v31 = vmul.f32 0.70710677, %v6206_v8  ;;  %v11508_v12 = vpop.f32.mrb[92].mxu1 }
0x1393   :  { %13050 = verf.f32 %v6261_v61  ;;  %v6221_v7 = vadd.f32 %v11508_v12, %v17348_v5  ;;  %v6215_v50 = vpop.f32.mrb[93].mxu1  ;;  %v6305_v35 = vmul.f32 %v6289_v54, %v6241_v6  ;;  %v6242_v6 = vmul.f32 0.5, %v6196_v52 }
0x1394   :  { %13052 = verf.f32 %v6260_v31  ;;  %v6216_v34 = vadd.f32 %v17348_v5, %v6215_v50  ;;  %v6304_v32 = vmul.f32 %v6288_v2, %v6240_v53  ;;  %12551 = vrot.lane.b32.xlu0 %v19012_v36, %s13484_s25  ;;  %v19013_v2 = vpack.i.bf16 %v17320_v3, %v17318_v11 }
0x1395   :  { %v6263_v9 = vmul.f32 0.70710677, %v6221_v7 }
0x1396   :  { %v6262_v46 = vmul.f32 0.70710677, %v6216_v34  ;;  %v11511_v1 = vpop.f32.mrb[94].mxu1  ;;  %11553 = vmatprep.mubr.f32.mxu1 %v6304_v32  ;;  %v6243_v32 = vmul.f32 0.5, %v6201_v48  ;;  %v19015_v48 = vpack.i.bf16 %v17354_v37, %v17343_v4 }
0x1397   :  { %13054 = verf.f32 %v6263_v9  ;;  %v6231_v55 = vadd.f32 %v11511_v1, %v17348_v5  ;;  %v6225_v63 = vpop.f32.mrb[95].mxu1  ;;  %11554 = vmatmul.mubr.f32.gmra.mrb[102].mxu1 %v6305_v35 }
0x1398   :  { %13056 = verf.f32 %v6262_v46  ;;  %v6226_v17 = vadd.f32 %v17348_v5, %v6225_v63  ;;  %12556 = vrot.lane.b32.xlu0 %v19013_v2, %s13484_s25  ;;  %v19014_v5 = vpack.i.bf16 %v17331_v38, %v17326_v28  ;;  %v6244_v63 = vmul.f32 0.5, %v6206_v8 }
0x1399   :  { %v13047_v61 = vpop.eup %13046  ;;  %v6265_v53 = vmul.f32 0.70710677, %v6231_v55 }
0x139a   :  { %v13049_v31 = vpop.eup %13048  ;;  %v6291_v54 = vadd.f32 1.0, %v13047_v61  ;;  %v6264_v12 = vmul.f32 0.70710677, %v6226_v17  ;;  %v6245_v61 = vmul.f32 0.5, %v6211_v47 }
0x139b   :  { %v6290_v50 = vadd.f32 1.0, %v13049_v31  ;;  %13058 = verf.f32 %v6265_v53 }
0x139c   :  { %13060 = verf.f32 %v6264_v12  ;;  %12561 = vrot.lane.b32.xlu0 %v19014_v5, %s13484_s25  ;;  %v6307_v1 = vmul.f32 %v6291_v54, %v6243_v32  ;;  %v6246_v5 = vmul.f32 0.5, %v6216_v34 }
0x139d   :  { %v13051_v9 = vpop.eup %13050  ;;  %v6306_v36 = vmul.f32 %v6290_v50, %v6242_v6  ;;  %v6247_v50 = vmul.f32 0.5, %v6221_v7 }
0x139e   :  { %v13053_v35 = vpop.eup %13052  ;;  %v6293_v46 = vadd.f32 1.0, %v13051_v9 }
0x139f   :  { %v6292_v2 = vadd.f32 1.0, %v13053_v35  ;;  %11556 = vmatprep.mubr.f32.mxu1 %v6306_v36  ;;  %v6248_v36 = vmul.f32 0.5, %v6226_v17 }
0x13a0   :  { %11557 = vmatmul.mubr.f32.gmra.mrb[104].mxu1 %v6307_v1  ;;  %12566 = vrot.lane.b32.xlu0 %v19015_v48, %s13484_s25  ;;  %v6309_v60 = vmul.f32 %v6293_v46, %v6245_v61  ;;  %v6249_v1 = vmul.f32 0.5, %v6231_v55 }
0x13a1   :  { %v13055_v52 = vpop.eup %13054  ;;  %v6308_v53 = vmul.f32 %v6292_v2, %v6244_v63  ;;  %v17426_v2 = vmul.f32 0.125, %v17310_v13 }
0x13a2   :  { %v13057_v31 = vpop.eup %13056  ;;  %v6295_v12 = vadd.f32 1.0, %v13055_v52 }
0x13a3   :  { %v6294_v6 = vadd.f32 1.0, %v13057_v31  ;;  %11559 = vmatprep.mubr.f32.mxu1 %v6308_v53 }
0x13a4   :  { %11560 = vmatmul.mubr.f32.gmra.mrb[106].mxu1 %v6309_v60  ;;  %v6311_v9 = vmul.f32 %v6295_v12, %v6247_v50 }
0x13a5   :  { %v13059_v8 = vpop.eup %13058  ;;  %v6310_v54 = vmul.f32 %v6294_v6, %v6246_v5 }
0x13a6   :  { %v13061_v32 = vpop.eup %13060  ;;  %v6297_v47 = vadd.f32 1.0, %v13059_v8 }
0x13a7   :  { %v6296_v35 = vadd.f32 1.0, %v13061_v32  ;;  %11562 = vmatprep.mubr.f32.mxu1 %v6310_v54 }
0x13a8   :  { %11563 = vmatmul.mubr.f32.gmra.mrb[108].mxu1 %v6311_v9  ;;  %v6313_v63 = vmul.f32 %v6297_v47, %v6249_v1 }
0x13a9   :  { %v6312_v48 = vmul.f32 %v6296_v35, %v6248_v36 }
0x13ab   :  { %11565 = vmatprep.mubr.f32.mxu1 %v6312_v48 }
0x13ac   :  { %11566 = vmatmul.mubr.f32.gmra.mrb[110].mxu1 %v6313_v63 }
0x13ad   :  { %11598 = vmatprep.mubr.msk.f32.mxu1 %vm2015_vm5, %v17426_v2 }
0x13f2   :  { %v7517_v60 = vpop.xlane.xlu0 %7516 }
0x13f3   :  { %v7547_v7 = vmul.f32 0.03125, %v7517_v60 }
0x13f5   :  { %v7563_v34 = vadd.f32 1e-05, %v7547_v7 }
0x13f6   :  { %v7520_v46 = vpop.xlane.xlu0 %7519 }
0x13f7   :  { %13062 = vrsqrt.f32 %v7563_v34  ;;  %v7548_v17 = vmul.f32 0.03125, %v7520_v46 }
0x13f9   :  { %v7564_v61 = vadd.f32 1e-05, %v7548_v17 }
0x13fa   :  { %v7523_v52 = vpop.xlane.xlu0 %7522 }
0x13fb   :  { %13064 = vrsqrt.f32 %v7564_v61  ;;  %v7549_v55 = vmul.f32 0.03125, %v7523_v52 }
0x13fd   :  { %v7565_v53 = vadd.f32 1e-05, %v7549_v55 }
0x13ff   :  { %13066 = vrsqrt.f32 %v7565_v53  ;;  %v7526_v31 = vpop.xlane.xlu0 %7525 }
0x1400   :  { %v7550_v13 = vmul.f32 0.03125, %v7526_v31 }
0x1401   :  { %v13063_v12 = vpop.eup %13062 }
0x1402   :  { %v7566_v5 = vadd.f32 1e-05, %v7550_v13  ;;  %v7595_v6 = vmul.f32 %v13063_v12, %v17329_v15 }
0x1403   :  { %v7529_v50 = vpop.xlane.xlu0 %7528 }
0x1404   :  { %13068 = vrsqrt.f32 %v7566_v5  ;;  %v7551_v8 = vmul.f32 0.03125, %v7529_v50  ;;  %v7617_v54 = vmul.f32 %v17136_v23, %v7595_v6 }
0x1405   :  { %v13065_v32 = vpop.eup %13064 }
0x1406   :  { %v7567_v47 = vadd.f32 1e-05, %v7551_v8  ;;  %v7639_v9 = vadd.f32 %v17145_v24, %v7617_v54  ;;  %v7596_v36 = vmul.f32 %v13065_v32, %v17340_v40 }
0x1407   :  { %v7532_v35 = vpop.xlane.xlu0 %7531 }
0x1408   :  { %13070 = vrsqrt.f32 %v7567_v47  ;;  %v7552_v1 = vmul.f32 0.03125, %v7532_v35  ;;  %10338 = vmatmul.mubr.msk.f32.gmra.mrb[116].mxu0 %vm426_vm0, %v7639_v9  ;;  %v7618_v48 = vmul.f32 %v17136_v23, %v7596_v36 }
0x1409   :  { %v13067_v63 = vpop.eup %13066  ;;  %7813 = vmatprep.mubr.f32.mxu0 %v18957_v42 }
0x140a   :  { %v7568_v15 = vadd.f32 1e-05, %v7552_v1  ;;  %v7640_v60 = vadd.f32 %v17145_v24, %v7618_v48  ;;  %v7597_v7 = vmul.f32 %v13067_v63, %v17351_v22 }
0x140b   :  { %v7535_v34 = vpop.xlane.xlu0 %7534 }
0x140c   :  { %13072 = vrsqrt.f32 %v7568_v15  ;;  %10339 = vmatmul.mubr.msk.f32.gmra.mrb[118].mxu0 %vm426_vm0, %v7640_v60  ;;  %v7619_v40 = vmul.f32 %v17136_v23, %v7597_v7  ;;  %v7553_v46 = vmul.f32 0.03125, %v7535_v34 }
0x140d   :  { %7819 = vmatprep.mubr.f32.mxu0 %v18957_v42 }
0x140e   :  { %v13069_v17 = vpop.eup %13068  ;;  %v7641_v61 = vadd.f32 %v17145_v24, %v7619_v40  ;;  %v7569_v52 = vadd.f32 1e-05, %v7553_v46 }
0x140f   :  { %v7538_v55 = vpop.xlane.xlu1 %7537  ;;  %v7598_v53 = vmul.f32 %v13069_v17, %v17366_v51  ;;  %v12552_v13 = vpop.permute.xlu0 %12551 }
0x1410   :  { %v7554_v31 = vmul.f32 0.03125, %v7538_v55  ;;  %10340 = vmatmul.mubr.msk.f32.gmra.mrb[120].mxu0 %vm426_vm0, %v7641_v61  ;;  %13074 = vrsqrt.f32 %v7569_v52  ;;  %v12554_v22 = vunpack.i.h.bf16 %v12552_v13  ;;  %v12553_v12 = vunpack.i.l.bf16 %v12552_v13 }
0x1411   :  { %7825 = vmatprep.mubr.f32.mxu0 %v18957_v42  ;;  %v7620_v5 = vmul.f32 %v17136_v23, %v7598_v53 }
0x1412   :  { %v13071_v6 = vpop.eup %13070  ;;  %v7570_v50 = vadd.f32 1e-05, %v7554_v31  ;;  %v12138_v51 = vpack.c.bf16 %v12554_v22, %v12553_v12 }
0x1413   :  { %v7642_v54 = vadd.f32 %v17145_v24, %v7620_v5  ;;  %v7599_v32 = vmul.f32 %v13071_v6, %v17371_v30  ;;  %v12557_v47 = vpop.permute.xlu0 %12556 }
0x1414   :  { %13076 = vrsqrt.f32 %v7570_v50  ;;  %v12559_v9 = vunpack.i.h.bf16 %v12557_v47  ;;  %v12558_v36 = vunpack.i.l.bf16 %v12557_v47  ;;  %12140 = vmatprep.subr.msk.bf16.mxu1 %vm17449_vm7, %v12138_v51 }
0x1415   :  { %10341 = vmatmul.mubr.msk.f32.gmra.mrb[122].mxu0 %vm426_vm0, %v7642_v54  ;;  %v7621_v35 = vmul.f32 %v17136_v23, %v7599_v32  ;;  %12143 = vmatpush3.bf16.xpose.msk.msra.mxu1 %vm17449_vm7, %v12138_v51 }
0x1416   :  { %v13073_v1 = vpop.eup %13072  ;;  %7831 = vmatprep.mubr.f32.mxu0 %v18957_v42  ;;  %v12144_v48 = vpack.c.bf16 %v12559_v9, %v12558_v36 }
0x1417   :  { %v7643_v30 = vadd.f32 %v17145_v24, %v7621_v35  ;;  %v7600_v63 = vmul.f32 %v13073_v1, %v17379_v33  ;;  %v12562_v15 = vpop.permute.xlu0 %12561 }
0x1418   :  { %v12564_v60 = vunpack.i.h.bf16 %v12562_v15  ;;  %v12563_v7 = vunpack.i.l.bf16 %v12562_v15  ;;  %12146 = vmatprep.subr.msk.bf16.mxu1 %vm17449_vm7, %v12144_v48 }
0x1419   :  { %10342 = vmatmul.mubr.msk.f32.gmra.mrb[124].mxu0 %vm426_vm0, %v7643_v30  ;;  %v7622_v34 = vmul.f32 %v17136_v23, %v7600_v63 }
0x141a   :  { %7837 = vmatprep.mubr.f32.mxu0 %v18957_v42  ;;  %v13075_v40 = vpop.eup %13074  ;;  %v12150_v61 = vpack.c.bf16 %v12564_v60, %v12563_v7 }
0x141b   :  { %v7644_v46 = vadd.f32 %v17145_v24, %v7622_v34  ;;  %v7601_v17 = vmul.f32 %v13075_v40, %v17385_v49  ;;  %v12567_v52 = vpop.permute.xlu0 %12566 }
0x141c   :  { %v12569_v49 = vunpack.i.h.bf16 %v12567_v52  ;;  %v12568_v13 = vunpack.i.l.bf16 %v12567_v52 }
0x141d   :  { %10343 = vmatmul.mubr.msk.f32.gmra.mrb[126].mxu0 %vm426_vm0, %v7644_v46  ;;  %12149 = vmatpush3.bf16.xpose.msk.msra.mxu1 %vm17449_vm7, %v12144_v48  ;;  %v7623_v55 = vmul.f32 %v17136_v23, %v7601_v17 }
0x141e   :  { %v13077_v33 = vpop.eup %13076  ;;  %7843 = vmatprep.mubr.f32.mxu0 %v18957_v42  ;;  %12152 = vmatprep.subr.msk.bf16.mxu1 %vm17449_vm7, %v12150_v61  ;;  %v12156_v5 = vpack.c.bf16 %v12569_v49, %v12568_v13 }
0x141f   :  { %v7602_v53 = vmul.f32 %v13077_v33, %v17393_v56  ;;  %v7645_v31 = vadd.f32 %v17145_v24, %v7623_v55  ;;  %v17496_v56 = vmul.f32 0.125, %v17318_v11  ;;  %v17516_v11 = vmul.f32 0.125, %v17331_v38 }
0x1421   :  { %v7624_v22 = vmul.f32 %v17136_v23, %v7602_v53  ;;  %10344 = vmatmul.mubr.msk.f32.gmra.mrb[128].mxu0 %vm426_vm0, %v7645_v31  ;;  %v17493_v23 = vmul.f32 0.125, %v17312_v20  ;;  %v17508_v20 = vmul.f32 0.125, %v17326_v28 }
0x1422   :  { %7849 = vmatprep.mubr.f32.mxu0 %v18957_v42 }
0x1423   :  { %v7646_v12 = vadd.f32 %v17145_v24, %v7624_v22  ;;  %v17504_v24 = vmul.f32 0.125, %v17320_v3  ;;  %v17528_v3 = vmul.f32 0.125, %v17354_v37 }
0x1425   :  { %10345 = vmatmul.mubr.msk.f32.gmra.mrb[130].mxu0 %vm426_vm0, %v7646_v12  ;;  %12155 = vmatpush3.bf16.xpose.msk.msra.mxu1 %vm17449_vm7, %v12150_v61 }
0x1426   :  { %12158 = vmatprep.subr.msk.bf16.mxu1 %vm17449_vm7, %v12156_v5 }
0x142d   :  { %12161 = vmatpush3.bf16.xpose.msk.msra.mxu1 %vm17449_vm7, %v12156_v5 }
0x142e   :  { %12163 = vmatprep.subr.bf16.mxu1 %v17316_v45 }
0x1434   :  { %11599 = vmatmul.mubr.msk.f32.vlgmr.msra.gmra.mrb[112].mxu1 %vm2015_vm5, %v17493_v23 }
0x1435   :  { %11601 = vmatprep.mubr.msk.f32.mxu1 %vm2015_vm5, %v17496_v56  ;;  %12165 = vmatpush3.bf16.msra.mxu1 %v17316_v45  ;;  %v17520_v45 = vmul.f32 0.125, %v17343_v4 }
0x1436   :  { %12167 = vmatprep.subr.bf16.mxu1 %v17324_v25 }
0x1438   :  { %11602 = vmatmul.mubr.msk.f32.gmra.mrb[114].mxu1 %vm2015_vm5, %v17504_v24 }
0x1439   :  { %11604 = vmatprep.mubr.msk.f32.mxu1 %vm2015_vm5, %v17508_v20  ;;  %12169 = vmatpush3.bf16.msra.mxu1 %v17324_v25  ;;  %v10315_v25 = vld [vmem:[%s19018_s22] ss:$0 sm:$0xff] }
0x143a   :  { %12171 = vmatprep.subr.bf16.mxu1 %v17337_v44 }
0x143c   :  { %11605 = vmatmul.mubr.msk.f32.gmra.mrb[116].mxu1 %vm2015_vm5, %v17516_v11 }
0x143d   :  { %11607 = vmatprep.mubr.msk.f32.mxu1 %vm2015_vm5, %v17520_v45  ;;  %12173 = vmatpush3.bf16.msra.mxu1 %v17337_v44 }
0x143e   :  { %12175 = vmatprep.subr.bf16.mxu1 %v17361_v62 }
0x1440   :  { %11608 = vmatmul.mubr.msk.f32.gmra.mrb[118].mxu1 %vm2015_vm5, %v17528_v3 }
0x1441   :  { %12177 = vmatpush3.bf16.msra.mxu1 %v17361_v62 }
0x1453   :  { %v11546_v28 = vpop.f32.mrb[96].mxu1 }
0x1454   :  { %v6460_v38 = vadd.f32 %v11546_v28, %v16895_v39  ;;  %v6380_v4 = vpop.f32.mrb[97].mxu1  ;;  %v8036_v28 = vrot.slane %v16854_v57, %v18999_v18 }
0x1455   :  { %v6459_v6 = vadd.f32 %v6380_v4, %v16892_v27 }
0x1456   :  { %v17537_v50 = vadd.f32 %v10315_v25, %v6460_v38 }
0x1457   :  { %v17539_v44 = vadd.f32 %v10315_v25, %v6459_v6 }
0x1458   :  { %19019 = vst [vmem:[#allocation118_spill] sm:$0xff] %v17537_v50 }
0x1459   :  { %19020 = vst [vmem:[#allocation79_spill] sm:$0xff] %v17539_v44 }
0x145a   :  { %v11549_v37 = vpop.f32.mrb[98].mxu1 }
0x145b   :  { %v6462_v51 = vadd.f32 %v11549_v37, %v16909_v59  ;;  %v6390_v54 = vpop.f32.mrb[99].mxu1 }
0x145c   :  { %v6461_v32 = vadd.f32 %v6390_v54, %v16904_v0 }
0x145d   :  { %v17543_v47 = vadd.f32 %v10315_v25, %v6462_v51 }
0x145e   :  { %v17545_v62 = vadd.f32 %v10315_v25, %v6461_v32 }
0x145f   :  { %19021 = vst [vmem:[#allocation86_spill] sm:$0xff] %v17543_v47 }
0x1460   :  { %19022 = vst [vmem:[#allocation81_spill] sm:$0xff] %v17545_v62 }
0x1463   :  { %v11552_v9 = vpop.f32.mrb[100].mxu1 }
0x1464   :  { %v6464_v39 = vadd.f32 %v11552_v9, %v16923_v58  ;;  %v6400_v36 = vpop.f32.mrb[101].mxu1 }
0x1465   :  { %v6463_v27 = vadd.f32 %v6400_v36, %v16918_v29 }
0x1466   :  { %v17549_v35 = vadd.f32 %v10315_v25, %v6464_v39 }
0x1467   :  { %v17551_v1 = vadd.f32 %v10315_v25, %v6463_v27 }
0x1468   :  { %19023 = vst [vmem:[#allocation65_spill] sm:$0xff] %v17549_v35 }
0x1469   :  { %19024 = vst [vmem:[#allocation103_spill] sm:$0xff] %v17551_v1 }
0x146a   :  { %v11555_v48 = vpop.f32.mrb[102].mxu1 }
0x146b   :  { %v6466_v59 = vadd.f32 %v11555_v48, %v16937_v43  ;;  %v6410_v30 = vpop.f32.mrb[103].mxu1 }
0x146c   :  { %v6465_v0 = vadd.f32 %v6410_v30, %v16932_v41 }
0x146d   :  { %v17555_v63 = vadd.f32 %v10315_v25, %v6466_v59 }
0x146e   :  { %v17557_v15 = vadd.f32 %v10315_v25, %v6465_v0 }
0x146f   :  { %19025 = vst [vmem:[#allocation114_spill] sm:$0xff] %v17555_v63 }
0x1470   :  { %19026 = vst [vmem:[#allocation98_spill] sm:$0xff] %v17557_v15 }
0x1473   :  { %v17559_v60 = vpop.f32.mrb[104].mxu1 }
0x1474   :  { %v17561_v58 = vpop.f32.mrb[105].mxu1 }
0x1477   :  { %v17563_v7 = vpop.f32.mrb[106].mxu1 }
0x1478   :  { %v17565_v29 = vpop.f32.mrb[107].mxu1 }
0x147b   :  { %v17567_v34 = vpop.f32.mrb[108].mxu1 }
0x147c   :  { %v17569_v40 = vpop.f32.mrb[109].mxu1 }
0x147f   :  { %v17571_v43 = vpop.f32.mrb[110].mxu1 }
0x1480   :  { %19027 = vst [vmem:[#allocation84_spill] sm:$0xff] %v17571_v43  ;;  %v17573_v46 = vpop.f32.mrb[111].mxu1 }
0x1481   :  { %19028 = vst [vmem:[#allocation54_spill] sm:$0xff] %v17573_v46 }
0x14db   :  { %v7809_v41 = vpop.f32.mrb[116].mxu0 }
0x14dc   :  { %v17575_v17 = vmul.f32 0.125, %v7809_v41  ;;  %v7811_v61 = vpop.f32.mrb[117].mxu0 }
0x14de   :  { %11682 = vmatprep.mubr.msk.f32.mxu0 %vm2015_vm5, %v17575_v17 }
0x14df   :  { %v17579_v33 = vpop.f32.mrb[118].mxu0 }
0x14e0   :  { %v12570_v52 = vpack.i.bf16 %v17579_v33, %v7809_v41  ;;  %v7817_v55 = vpop.f32.mrb[119].mxu0 }
0x14e1   :  { %v17582_v53 = vpack.c.bf16 %v7817_v55, %v7811_v61 }
0x14e2   :  { %12571 = vrot.lane.b32.xlu0 %v12570_v52, %s13484_s25 }
0x14e3   :  { %v17585_v31 = vpop.f32.mrb[120].mxu0 }
0x14e4   :  { %v7823_v49 = vpop.f32.mrb[121].mxu0 }
0x14e8   :  { %v17587_v13 = vpop.f32.mrb[122].mxu0 }
0x14e9   :  { %v12575_v22 = vpack.i.bf16 %v17587_v13, %v17585_v31  ;;  %v7829_v12 = vpop.f32.mrb[123].mxu0 }
0x14ea   :  { %v17591_v5 = vpack.c.bf16 %v7829_v12, %v7823_v49 }
0x14eb   :  { %12576 = vrot.lane.b32.xlu0 %v12575_v22, %s13484_s25 }
0x14ec   :  { %v17594_v25 = vpop.f32.mrb[124].mxu0 }
0x14ed   :  { %v7835_v38 = vpop.f32.mrb[125].mxu0 }
0x14ef   :  { %8038 = vrot.lane.b32.xlu0 %v8036_v28, %s13484_s25 }
0x14f0   :  { %v17599_v4 = vpop.f32.mrb[126].mxu0 }
0x14f1   :  { %v12580_v6 = vpack.i.bf16 %v17599_v4, %v17594_v25  ;;  %v7841_v37 = vpop.f32.mrb[127].mxu0 }
0x14f2   :  { %v17603_v51 = vpack.c.bf16 %v7841_v37, %v7835_v38 }
0x14f3   :  { %12581 = vrot.lane.b32.xlu0 %v12580_v6, %s13484_s25 }
0x14f4   :  { %v17606_v54 = vpop.f32.mrb[128].mxu0 }
0x14f5   :  { %v7847_v32 = vpop.f32.mrb[129].mxu0 }
0x14f8   :  { %v17608_v9 = vpop.f32.mrb[130].mxu0 }
0x14f9   :  { %v12585_v57 = vpack.i.bf16 %v17608_v9, %v17606_v54  ;;  %v7853_v39 = vpop.f32.mrb[131].mxu0 }
0x14fa   :  { %v17612_v36 = vpack.c.bf16 %v7853_v39, %v7847_v32 }
0x14fb   :  { %12586 = vrot.lane.b32.xlu0 %v12585_v57, %s13484_s25 }
0x1507   :  { %v17615_v27 = vpop.f32.mrb[112].mxu1 }
0x1508   :  { %v17617_v48 = vpop.f32.mrb[113].mxu1 }
0x150b   :  { %v17619_v59 = vpop.f32.mrb[114].mxu1 }
0x150c   :  { %v17621_v30 = vpop.f32.mrb[115].mxu1  ;;  %v8082_v8 = vsel %vm2015_vm5, %v17619_v59, -inf }
0x150f   :  { %v17623_v0 = vpop.f32.mrb[116].mxu1 }
0x1510   :  { %v17625_v41 = vpop.f32.mrb[117].mxu1 }
0x1513   :  { %v17627_v61 = vpop.f32.mrb[118].mxu1 }
0x1514   :  { %v17629_v52 = vpop.f32.mrb[119].mxu1 }
0x1554   :  { %v12572_v55 = vpop.permute.xlu0 %12571 }
0x1555   :  { %v12574_v49 = vunpack.i.h.bf16 %v12572_v55  ;;  %v12573_v22 = vunpack.i.l.bf16 %v12572_v55 }
0x1557   :  { %v12194_v12 = vpack.c.bf16 %v12574_v49, %v12573_v22 }
0x1559   :  { %12196 = vmatprep.subr.msk.bf16.mxu0 %vm17449_vm7, %v12194_v12 }
0x155a   :  { %12199 = vmatpush3.bf16.xpose.msk.msra.mxu0 %vm17449_vm7, %v12194_v12 }
0x155d   :  { %v12577_v28 = vpop.permute.xlu0 %12576 }
0x155e   :  { %v12579_v38 = vunpack.i.h.bf16 %v12577_v28  ;;  %v12578_v6 = vunpack.i.l.bf16 %v12577_v28 }
0x1560   :  { %v12200_v37 = vpack.c.bf16 %v12579_v38, %v12578_v6 }
0x1561   :  { %v17635_v32 = vpop.permute.xlu0 %8038 }
0x1562   :  { %12202 = vmatprep.subr.msk.bf16.mxu0 %vm17449_vm7, %v12200_v37  ;;  %v8042_v57 = vmul.f32 %v17635_v32, %v17493_v23  ;;  %v8041_v39 = vmul.f32 %v17635_v32, %v17426_v2  ;;  %v8043_v22 = vmul.f32 %v17635_v32, %v17496_v56  ;;  %v8088_v2 = vsel %vm2015_vm5, %v17623_v0, -inf }
0x1563   :  { %12205 = vmatpush3.bf16.xpose.msk.msra.mxu0 %vm17449_vm7, %v12200_v37  ;;  %v8044_v37 = vmul.f32 %v17635_v32, %v17504_v24 }
0x1564   :  { %v8052_v55 = vsel %vm2015_vm5, %v8042_v57, 0.0  ;;  %v8049_v49 = vsel %vm2015_vm5, %v8041_v39, 0.0  ;;  %v8055_v23 = vsel %vm2015_vm5, %v8043_v22, 0.0  ;;  %v8085_v57 = vsel %vm2015_vm5, %v17625_v41, -inf }
0x1565   :  { %8053 = vadd.xlane.f32.xlu1 %v8052_v55  ;;  %8050 = vadd.xlane.f32.xlu0 %v8049_v49  ;;  %v12582_v12 = vpop.permute.xlu0 %12581  ;;  %v8058_v56 = vsel %vm2015_vm5, %v8044_v37, 0.0  ;;  %v8045_v39 = vmul.f32 %v17635_v32, %v17508_v20  ;;  %v8076_v20 = vsel %vm2015_vm5, %v17615_v27, -inf  ;;  %v17689_v37 = vmul.f32 0.125, %v17587_v13 }
0x1566   :  { %v12584_v28 = vunpack.i.h.bf16 %v12582_v12  ;;  %v12583_v38 = vunpack.i.l.bf16 %v12582_v12  ;;  %v8091_v12 = vsel %vm2015_vm5, %v17629_v52, -inf  ;;  %v17706_v13 = vmul.f32 0.125, %v17606_v54 }
0x1567   :  { %v8061_v22 = vsel %vm2015_vm5, %v8045_v39, 0.0  ;;  %v8047_v39 = vmul.f32 %v17635_v32, %v17520_v45  ;;  %v8048_v54 = vmul.f32 %v17635_v32, %v17528_v3  ;;  %v6583_v45 = vld [vmem:[#allocation10 + $0x8] sm:$0xff] }
0x1568   :  { %v12206_v6 = vpack.c.bf16 %v12584_v28, %v12583_v38  ;;  %v8094_v38 = vsel %vm2015_vm5, %v17627_v61, -inf }
0x1569   :  { %8056 = vadd.xlane.f32.xlu1 %v8055_v23  ;;  %8089 = vmax.xlane.f32.xlu0 %v8088_v2  ;;  %v17677_v23 = vmul.f32 0.125, %v17579_v33  ;;  %v17680_v2 = vmul.f32 0.125, %v17585_v31  ;;  %v17692_v33 = vmul.f32 0.125, %v17594_v25  ;;  %v8079_v31 = vsel %vm2015_vm5, %v17621_v30, -inf }
0x156a   :  { %12208 = vmatprep.subr.msk.bf16.mxu0 %vm17449_vm7, %v12206_v6 }
0x156b   :  { %12211 = vmatpush3.bf16.xpose.msk.msra.mxu0 %vm17449_vm7, %v12206_v6  ;;  %v8073_v6 = vsel %vm2015_vm5, %v17617_v48, -inf }
0x156d   :  { %8059 = vadd.xlane.f32.xlu1 %v8058_v56  ;;  %8086 = vmax.xlane.f32.xlu0 %v8085_v57  ;;  %v12587_v55 = vpop.permute.xlu0 %12586  ;;  %v8046_v56 = vmul.f32 %v17635_v32, %v17516_v11  ;;  %v17703_v57 = vmul.f32 0.125, %v17599_v4  ;;  %v17716_v11 = vmul.f32 0.125, %v17608_v9  ;;  %v8067_v4 = vsel %vm2015_vm5, %v8047_v39, 0.0 }
0x156e   :  { %v12589_v24 = vunpack.i.h.bf16 %v12587_v55  ;;  %v12588_v49 = vunpack.i.l.bf16 %v12587_v55  ;;  %v8070_v55 = vsel %vm2015_vm5, %v8048_v54, 0.0  ;;  %v8651_v9 = vrot.slane %v17306_v19, %v18999_v18 }
0x156f   :  { %v8064_v25 = vsel %vm2015_vm5, %v8046_v56, 0.0 }
0x1570   :  { %v12212_v28 = vpack.c.bf16 %v12589_v24, %v12588_v49  ;;  %v6582_v24 = vld [vmem:[#allocation10] sm:$0xff] }
0x1571   :  { %8062 = vadd.xlane.f32.xlu1 %v8061_v22  ;;  %8092 = vmax.xlane.f32.xlu0 %v8091_v12  ;;  %v17725_v49 = vpack.c.bf16 %v6583_v45, %v6582_v24 }
0x1572   :  { %12214 = vmatprep.subr.msk.bf16.mxu0 %vm17449_vm7, %v12212_v28 }
0x1573   :  { %12217 = vmatpush3.bf16.xpose.msk.msra.mxu0 %vm17449_vm7, %v12212_v28  ;;  %12179 = vmatprep.subr.bf16.mxu1 %v17725_v49 }
0x1575   :  { %8077 = vmax.xlane.f32.xlu1 %v8076_v20  ;;  %8095 = vmax.xlane.f32.xlu0 %v8094_v38 }
0x1579   :  { %8074 = vmax.xlane.f32.xlu1 %v8073_v6 }
0x157a   :  { %11683 = vmatmul.mubr.msk.f32.vlgmr.msra.gmra.mrb[132].mxu0 %vm2015_vm5, %v17677_v23 }
0x157b   :  { %11685 = vmatprep.mubr.msk.f32.mxu0 %vm2015_vm5, %v17680_v2 }
0x157d   :  { %8083 = vmax.xlane.f32.xlu1 %v8082_v8 }
0x157e   :  { %11686 = vmatmul.mubr.msk.f32.gmra.mrb[134].mxu0 %vm2015_vm5, %v17689_v37 }
0x157f   :  { %11688 = vmatprep.mubr.msk.f32.mxu0 %vm2015_vm5, %v17692_v33 }
0x1581   :  { %8080 = vmax.xlane.f32.xlu1 %v8079_v31 }
0x1582   :  { %11689 = vmatmul.mubr.msk.f32.gmra.mrb[136].mxu0 %vm2015_vm5, %v17703_v57 }
0x1583   :  { %11691 = vmatprep.mubr.msk.f32.mxu0 %vm2015_vm5, %v17706_v13 }
0x1585   :  { %8065 = vadd.xlane.f32.xlu1 %v8064_v25 }
0x1586   :  { %11692 = vmatmul.mubr.msk.f32.gmra.mrb[138].mxu0 %vm2015_vm5, %v17716_v11 }
0x1587   :  { %9499 = vmatprep.mubr.f32.mxu0 %v18957_v42 }
0x1589   :  { %8068 = vadd.xlane.f32.xlu1 %v8067_v4 }
0x158d   :  { %8071 = vadd.xlane.f32.xlu1 %v8070_v55 }
0x159e   :  { %8653 = vrot.lane.b32.xlu1 %v8651_v9, %s13484_s25 }
0x15f2   :  { %v8054_v22 = vpop.xlane.xlu1 %8053  ;;  %v8051_v12 = vpop.xlane.xlu0 %8050 }
0x15f6   :  { %v8057_v3 = vpop.xlane.xlu1 %8056  ;;  %v8090_v32 = vpop.xlane.xlu0 %8089 }
0x15fa   :  { %v8060_v28 = vpop.xlane.xlu1 %8059  ;;  %v8087_v20 = vpop.xlane.xlu0 %8086 }
0x15fe   :  { %v8063_v38 = vpop.xlane.xlu1 %8062 }
0x15ff   :  { %v8101_v6 = vmax.f32 %v8087_v20, %v8063_v38 }
0x1601   :  { %v8109_v8 = vsub.f32 %v17625_v41, %v8101_v6  ;;  %v8133_v31 = vsub.f32 %v8063_v38, %v8101_v6 }
0x1602   :  { %v8078_v56 = vpop.xlane.xlu1 %8077 }
0x1603   :  { %v8121_v25 = vmul.f32 1.442695, %v8109_v8  ;;  %v8145_v39 = vmul.f32 1.442695, %v8133_v31  ;;  %v8098_v4 = vmax.f32 %v8078_v56, %v8054_v22 }
0x1605   :  { %13078 = vpow2.f32 %v8121_v25  ;;  %v8106_v19 = vsub.f32 %v17615_v27, %v8098_v4  ;;  %v8130_v54 = vsub.f32 %v8054_v22, %v8098_v4  ;;  %v17739_v25 = vrot.slane %v16856_v14, %v18999_v18 }
0x1606   :  { %13080 = vpow2.f32 %v8145_v39  ;;  %v8075_v55 = vpop.xlane.xlu1 %8074 }
0x1607   :  { %v8115_v24 = vmul.f32 1.442695, %v8106_v19  ;;  %v8139_v45 = vmul.f32 1.442695, %v8130_v54  ;;  %v8097_v9 = vmax.f32 %v8075_v55, %v8051_v12 }
0x1609   :  { %13082 = vpow2.f32 %v8115_v24  ;;  %v8105_v63 = vsub.f32 %v17617_v48, %v8097_v9  ;;  %v8129_v20 = vsub.f32 %v8051_v12, %v8097_v9 }
0x160a   :  { %13084 = vpow2.f32 %v8139_v45  ;;  %v8084_v41 = vpop.xlane.xlu1 %8083 }
0x160b   :  { %v8113_v38 = vmul.f32 1.442695, %v8105_v63  ;;  %v8137_v6 = vmul.f32 1.442695, %v8129_v20  ;;  %v8100_v8 = vmax.f32 %v8084_v41, %v8060_v28  ;;  %v8093_v20 = vpop.xlane.xlu0 %8092 }
0x160d   :  { %13086 = vpow2.f32 %v8113_v38  ;;  %v8108_v31 = vsub.f32 %v17619_v59, %v8100_v8  ;;  %v8132_v56 = vsub.f32 %v8060_v28, %v8100_v8  ;;  %v6584_v38 = vld [vmem:[#allocation10 + $0x10] sm:$0xff] }
0x160e   :  { %13088 = vpow2.f32 %v8137_v6  ;;  %v8081_v27 = vpop.xlane.xlu1 %8080  ;;  %v6585_v6 = vld [vmem:[#allocation10 + $0x18] sm:$0xff] }
0x160f   :  { %v17735_v22 = vpop.eup %13078  ;;  %v8119_v39 = vmul.f32 1.442695, %v8108_v31  ;;  %v8143_v48 = vmul.f32 1.442695, %v8132_v56  ;;  %v8099_v12 = vmax.f32 %v8081_v27, %v8057_v3 }
0x1610   :  { %v17741_v4 = vpop.eup %13080  ;;  %v8165_v63 = vsel %vm2015_vm5, %v17735_v22, 0.0 }
0x1611   :  { %13090 = vpow2.f32 %v8119_v39  ;;  %v8107_v59 = vsub.f32 %v17621_v30, %v8099_v12  ;;  %v8131_v28 = vsub.f32 %v8057_v3, %v8099_v12  ;;  %8166 = vadd.xlane.f32.xlu1 %v8165_v63  ;;  %v17748_v19 = vmul.f32 %v17741_v4, %v17739_v25  ;;  %v6586_v63 = vld [vmem:[#allocation10 + $0x20] sm:$0xff] }
0x1612   :  { %13092 = vpow2.f32 %v8143_v48  ;;  %v8066_v14 = vpop.xlane.xlu1 %8065  ;;  %v17758_v48 = vpack.c.bf16 %v6585_v6, %v6584_v38 }
0x1613   :  { %v13083_v54 = vpop.eup %13082  ;;  %v8117_v55 = vmul.f32 1.442695, %v8107_v59  ;;  %v8141_v24 = vmul.f32 1.442695, %v8131_v28  ;;  %v8102_v45 = vmax.f32 %v8090_v32, %v8066_v14  ;;  %v6587_v59 = vld [vmem:[#allocation10 + $0x28] sm:$0xff] }
0x1614   :  { %v17750_v9 = vpop.eup %13084  ;;  %v8156_v41 = vsel %vm2015_vm5, %v13083_v54, 0.0 }
0x1615   :  { %13094 = vpow2.f32 %v8117_v55  ;;  %v8110_v30 = vsub.f32 %v17623_v0, %v8102_v45  ;;  %v8134_v3 = vsub.f32 %v8066_v14, %v8102_v45  ;;  %8157 = vadd.xlane.f32.xlu0 %v8156_v41  ;;  %v17756_v8 = vmul.f32 %v17750_v9, %v17739_v25 }
0x1616   :  { %13096 = vpow2.f32 %v8141_v24  ;;  %v8069_v31 = vpop.xlane.xlu1 %8068  ;;  %v8096_v24 = vpop.xlane.xlu0 %8095 }
0x1617   :  { %v13087_v56 = vpop.eup %13086  ;;  %v8123_v32 = vmul.f32 1.442695, %v8110_v30  ;;  %v8147_v27 = vmul.f32 1.442695, %v8134_v3  ;;  %v8103_v39 = vmax.f32 %v8093_v20, %v8069_v31  ;;  %v6588_v3 = vld [vmem:[#allocation10 + $0x30] sm:$0xff] }
0x1618   :  { %v17760_v12 = vpop.eup %13088  ;;  %11626 = vmatprep.mubr.msk.f32.mxu1 %vm2015_vm5, %v13087_v56  ;;  %v8153_v0 = vsel %vm2015_vm5, %v13087_v56, 0.0 }
0x1619   :  { %13098 = vpow2.f32 %v8123_v32  ;;  %v8111_v28 = vsub.f32 %v17629_v52, %v8103_v39  ;;  %v8135_v14 = vsub.f32 %v8069_v31, %v8103_v39  ;;  %11627 = vmatmul.mubr.msk.f32.vlgmr.msra.gmra.mrb[120].mxu1 %vm2015_vm5, %v13083_v54  ;;  %8154 = vadd.xlane.f32.xlu0 %v8153_v0  ;;  %v17768_v55 = vmul.f32 %v17760_v12, %v17739_v25  ;;  %v6589_v31 = vld [vmem:[#allocation10 + $0x38] sm:$0xff] }
0x161a   :  { %13100 = vpow2.f32 %v8147_v27  ;;  %12181 = vmatpush3.bf16.msra.mxu1 %v17725_v49  ;;  %v8072_v45 = vpop.xlane.xlu1 %8071  ;;  %v17772_v52 = vpack.c.bf16 %v6587_v59, %v6586_v63 }
0x161b   :  { %v13091_v20 = vpop.eup %13090  ;;  %v8125_v41 = vmul.f32 1.442695, %v8111_v28  ;;  %v8149_v38 = vmul.f32 1.442695, %v8135_v14  ;;  %v8104_v6 = vmax.f32 %v8096_v24, %v8072_v45  ;;  %12183 = vmatprep.subr.bf16.mxu1 %v17758_v48 }
0x161c   :  { %v17774_v30 = vpop.eup %13092  ;;  %v8162_v54 = vsel %vm2015_vm5, %v13091_v20, 0.0 }
0x161d   :  { %13102 = vpow2.f32 %v8125_v41  ;;  %v8112_v56 = vsub.f32 %v17627_v61, %v8104_v6  ;;  %v8136_v32 = vsub.f32 %v8072_v45, %v8104_v6  ;;  %8163 = vadd.xlane.f32.xlu0 %v8162_v54  ;;  %v17780_v27 = vmul.f32 %v17774_v30, %v17739_v25 }
0x161e   :  { %13104 = vpow2.f32 %v8149_v38  ;;  %12185 = vmatpush3.bf16.msra.mxu1 %v17758_v48  ;;  %v17783_v39 = vpop.permute.xlu1 %8653  ;;  %v17788_v61 = vpack.c.bf16 %v6589_v31, %v6588_v3 }
0x161f   :  { %v13095_v0 = vpop.eup %13094  ;;  %v8127_v63 = vmul.f32 1.442695, %v8112_v56  ;;  %v8151_v59 = vmul.f32 1.442695, %v8136_v32  ;;  %12187 = vmatprep.subr.bf16.mxu1 %v17772_v52  ;;  %v8659_v28 = vmul.f32 %v17783_v39, %v17689_v37  ;;  %v8660_v37 = vmul.f32 %v17783_v39, %v17692_v33 }
0x1620   :  { %v17790_v14 = vpop.eup %13096  ;;  %11629 = vmatprep.mubr.msk.f32.mxu1 %vm2015_vm5, %v13095_v0  ;;  %v8159_v24 = vsel %vm2015_vm5, %v13095_v0, 0.0  ;;  %v8656_v54 = vmul.f32 %v17783_v39, %v17575_v17  ;;  %v8661_v3 = vmul.f32 %v17783_v39, %v17703_v57  ;;  %v8662_v57 = vmul.f32 %v17783_v39, %v17706_v13 }
0x1621   :  { %13106 = vpow2.f32 %v8127_v63  ;;  %11630 = vmatmul.mubr.msk.f32.gmra.mrb[122].mxu1 %vm2015_vm5, %v13091_v20  ;;  %8160 = vadd.xlane.f32.xlu0 %v8159_v24  ;;  %v8673_v45 = vsel %vm2015_vm5, %v8659_v28, 0.0  ;;  %v17804_v38 = vmul.f32 %v17790_v14, %v17739_v25 }
0x1622   :  { %13108 = vpow2.f32 %v8151_v59  ;;  %12189 = vmatpush3.bf16.msra.mxu1 %v17772_v52  ;;  %11632 = vmatprep.mubr.msk.f32.mxu1 %vm2015_vm5, %v17735_v22  ;;  %v8676_v22 = vsel %vm2015_vm5, %v8660_v37, 0.0  ;;  %v8664_v17 = vsel %vm2015_vm5, %v8656_v54, 0.0  ;;  %v8679_v0 = vsel %vm2015_vm5, %v8661_v3, 0.0 }
0x1623   :  { %v13099_v41 = vpop.eup %13098  ;;  %8674 = vadd.xlane.f32.xlu1 %v8673_v45  ;;  %12191 = vmatprep.subr.bf16.mxu1 %v17788_v61  ;;  %v8682_v24 = vsel %vm2015_vm5, %v8662_v57, 0.0  ;;  %v8663_v45 = vmul.f32 %v17783_v39, %v17716_v11  ;;  %v8657_v54 = vmul.f32 %v17783_v39, %v17677_v23 }
0x1624   :  { %v17806_v20 = vpop.eup %13100  ;;  %v8168_v6 = vsel %vm2015_vm5, %v13099_v41, 0.0 }
0x1625   :  { %11633 = vmatmul.mubr.msk.f32.gmra.mrb[124].mxu1 %vm2015_vm5, %v13099_v41  ;;  %8169 = vadd.xlane.f32.xlu0 %v8168_v6  ;;  %v17814_v33 = vmul.f32 %v17806_v20, %v17739_v25  ;;  %v8685_v37 = vsel %vm2015_vm5, %v8663_v45, 0.0  ;;  %v8667_v3 = vsel %vm2015_vm5, %v8657_v54, 0.0 }
0x1626   :  { %12193 = vmatpush3.bf16.msra.mxu1 %v17788_v61 }
0x1627   :  { %v13103_v31 = vpop.eup %13102  ;;  %12219 = vmatprep.subr.bf16.mxu1 %v17582_v53  ;;  %8677 = vadd.xlane.f32.xlu1 %v8676_v22 }
0x1628   :  { %v17821_v56 = vpop.eup %13104  ;;  %11635 = vmatprep.mubr.msk.f32.mxu1 %vm2015_vm5, %v13103_v31  ;;  %v8171_v45 = vsel %vm2015_vm5, %v13103_v31, 0.0 }
0x1629   :  { %8665 = vadd.xlane.f32.xlu0 %v8664_v17  ;;  %v17827_v32 = vmul.f32 %v17821_v56, %v17739_v25 }
0x162b   :  { %v13107_v63 = vpop.eup %13106  ;;  %8680 = vadd.xlane.f32.xlu1 %v8679_v0 }
0x162c   :  { %v17832_v59 = vpop.eup %13108  ;;  %11636 = vmatmul.mubr.msk.f32.gmra.mrb[126].mxu1 %vm2015_vm5, %v13107_v63  ;;  %v8174_v23 = vsel %vm2015_vm5, %v13107_v63, 0.0 }
0x162d   :  { %v17837_v28 = vmul.f32 %v17832_v59, %v17739_v25 }
0x162f   :  { %8683 = vadd.xlane.f32.xlu1 %v8682_v24 }
0x1633   :  { %8686 = vadd.xlane.f32.xlu1 %v8685_v37  ;;  %v8658_v37 = vmul.f32 %v17783_v39, %v17680_v2 }
0x164d   :  { %v11684_v13 = vpop.f32.mrb[132].mxu0 }
0x164e   :  { %v8609_v41 = vpop.f32.mrb[133].mxu0  ;;  %v8691_v0 = vsel %vm2015_vm5, %v11684_v13, -inf }
0x164f   :  { %v8688_v6 = vsel %vm2015_vm5, %v8609_v41, -inf }
0x1650   :  { %8689 = vmax.xlane.f32.xlu0 %v8688_v6  ;;  %v8670_v6 = vsel %vm2015_vm5, %v8658_v37, 0.0 }
0x1651   :  { %v17846_v22 = vpop.f32.mrb[134].mxu0 }
0x1652   :  { %v17848_v25 = vpop.f32.mrb[135].mxu0 }
0x1653   :  { %v8694_v54 = vsel %vm2015_vm5, %v17848_v25, -inf }
0x1654   :  { %8668 = vadd.xlane.f32.xlu0 %v8667_v3  ;;  %v8697_v3 = vsel %vm2015_vm5, %v17846_v22, -inf }
0x1655   :  { %v17851_v11 = vpop.f32.mrb[136].mxu0 }
0x1656   :  { %v17853_v17 = vpop.f32.mrb[137].mxu0  ;;  %v8703_v31 = vsel %vm2015_vm5, %v17851_v11, -inf }
0x1657   :  { %v8700_v63 = vsel %vm2015_vm5, %v17853_v17, -inf }
0x1658   :  { %8692 = vmax.xlane.f32.xlu0 %v8691_v0 }
0x1659   :  { %v17856_v57 = vpop.f32.mrb[138].mxu0 }
0x165a   :  { %v17858_v24 = vpop.f32.mrb[139].mxu0  ;;  %v8709_v39 = vsel %vm2015_vm5, %v17856_v57, -inf }
0x165b   :  { %v8706_v2 = vsel %vm2015_vm5, %v17858_v24, -inf }
0x165c   :  { %8175 = vadd.xlane.f32.xlu0 %v8174_v23 }
0x1660   :  { %8172 = vadd.xlane.f32.xlu0 %v8171_v45 }
0x1664   :  { %8671 = vadd.xlane.f32.xlu0 %v8670_v6 }
0x1668   :  { %8695 = vmax.xlane.f32.xlu0 %v8694_v54 }
0x166c   :  { %8698 = vmax.xlane.f32.xlu0 %v8697_v3 }
0x1670   :  { %8701 = vmax.xlane.f32.xlu0 %v8700_v63 }
0x1674   :  { %8704 = vmax.xlane.f32.xlu0 %v8703_v31 }
0x1678   :  { %8707 = vmax.xlane.f32.xlu0 %v8706_v2 }
0x167c   :  { %8710 = vmax.xlane.f32.xlu0 %v8709_v39 }
0x16a2   :  { %v8158_v0 = vpop.xlane.xlu0 %8157 }
0x16a3   :  { %v8178_v63 = vadd.f32 %v17750_v9, %v8158_v0  ;;  %v8167_v0 = vpop.xlane.xlu1 %8166 }
0x16a5   :  { %13110 = vrcp.f32 %v8178_v63 }
0x16a6   :  { %v8155_v23 = vpop.xlane.xlu0 %8154 }
0x16a7   :  { %v8177_v31 = vadd.f32 %v17760_v12, %v8155_v23 }
0x16a9   :  { %13112 = vrcp.f32 %v8177_v31 }
0x16aa   :  { %v8164_v45 = vpop.xlane.xlu0 %8163 }
0x16ab   :  { %v8180_v50 = vadd.f32 %v17774_v30, %v8164_v45 }
0x16ae   :  { %v8161_v37 = vpop.xlane.xlu0 %8160 }
0x16af   :  { %v8179_v43 = vadd.f32 %v17790_v14, %v8161_v37 }
0x16b2   :  { %v8170_v6 = vpop.xlane.xlu0 %8169 }
0x16b6   :  { %v8666_v54 = vpop.xlane.xlu0 %8665 }
0x16dd   :  { %v8690_v3 = vpop.xlane.xlu0 %8689 }
0x16de   :  { %v8712_v15 = vmax.f32 %v8690_v3, %v8666_v54 }
0x16e0   :  { %v8720_v35 = vsub.f32 %v8609_v41, %v8712_v15  ;;  %v8744_v1 = vsub.f32 %v8666_v54, %v8712_v15  ;;  %v13111_v41 = vpop.eup %13110 }
0x16e1   :  { %v8669_v47 = vpop.xlane.xlu0 %8668  ;;  %v13113_v45 = vpop.eup %13112 }
0x16e2   :  { %v8728_v2 = vmul.f32 1.442695, %v8720_v35  ;;  %v8752_v62 = vmul.f32 1.442695, %v8744_v1  ;;  %v8182_v35 = vadd.f32 %v17806_v20, %v8170_v6  ;;  %v8675_v20 = vpop.xlane.xlu1 %8674 }
0x16e4   :  { %13114 = vpow2.f32 %v8728_v2 }
0x16e5   :  { %13116 = vpow2.f32 %v8752_v62  ;;  %v8693_v39 = vpop.xlane.xlu0 %8692  ;;  %v8181_v62 = vadd.f32 %v17741_v4, %v8167_v0 }
0x16e6   :  { %v8713_v44 = vmax.f32 %v8693_v39, %v8669_v47  ;;  %13118 = vrcp.f32 %v8180_v50  ;;  %v17889_v50 = vrot.slane %v17308_v16, %v18999_v18 }
0x16e7   :  { %13120 = vrcp.f32 %v8179_v43 }
0x16e8   :  { %v8721_v46 = vsub.f32 %v11684_v13, %v8713_v44  ;;  %v8745_v9 = vsub.f32 %v8669_v47, %v8713_v44 }
0x16e9   :  { %v8176_v3 = vpop.xlane.xlu0 %8175 }
0x16ea   :  { %v8730_v12 = vmul.f32 1.442695, %v8721_v46  ;;  %v8754_v15 = vmul.f32 1.442695, %v8745_v9  ;;  %v8184_v16 = vadd.f32 %v17832_v59, %v8176_v3 }
0x16ec   :  { %v11628_v1 = vpop.f32.mrb[120].mxu1  ;;  %13122 = vpow2.f32 %v8730_v12 }
0x16ed   :  { %v8301_v30 = vadd.f32 %v11628_v1, %v17756_v8  ;;  %v8295_v23 = vpop.f32.mrb[121].mxu1  ;;  %13124 = vpow2.f32 %v8754_v15  ;;  %v8173_v47 = vpop.xlane.xlu0 %8172 }
0x16ee   :  { %v8296_v44 = vadd.f32 %v8295_v23, %v17768_v55  ;;  %v17885_v14 = vpop.eup %13114  ;;  %13126 = vrcp.f32 %v8182_v35  ;;  %v8183_v37 = vadd.f32 %v17821_v56, %v8173_v47  ;;  %v8678_v56 = vpop.xlane.xlu1 %8677 }
0x16ef   :  { %v8335_v43 = vmul.f32 %v13111_v41, %v8301_v30  ;;  %v17891_v46 = vpop.eup %13116  ;;  %v8768_v8 = vsel %vm2015_vm5, %v17885_v14, 0.0  ;;  %13128 = vrcp.f32 %v8181_v62 }
0x16f0   :  { %v8334_v4 = vmul.f32 %v13113_v45, %v8296_v44  ;;  %8769 = vadd.xlane.f32.xlu1 %v8768_v8  ;;  %v17897_v55 = vmul.f32 %v17891_v46, %v17889_v50  ;;  %v13119_v54 = vpop.eup %13118  ;;  %13130 = vrcp.f32 %v8184_v16 }
0x16f1   :  { %v8672_v13 = vpop.xlane.xlu0 %8671  ;;  %v13121_v2 = vpop.eup %13120  ;;  %13132 = vrcp.f32 %v8183_v37 }
0x16f2   :  { %11654 = vmatprep.mubr.msk.f32.mxu1 %vm2015_vm5, %v8334_v4  ;;  %v8681_v8 = vpop.xlane.xlu1 %8680 }
0x16f3   :  { %11655 = vmatmul.mubr.msk.f32.vlgmr.msra.gmra.mrb[128].mxu1 %vm2015_vm5, %v8335_v43 }
0x16f4   :  { %12221 = vmatpush3.bf16.msra.mxu1 %v17582_v53  ;;  %v11631_v6 = vpop.f32.mrb[122].mxu1 }
0x16f5   :  { %v8311_v63 = vadd.f32 %v11631_v6, %v17780_v27  ;;  %12223 = vmatprep.subr.bf16.mxu1 %v17591_v5  ;;  %v8305_v31 = vpop.f32.mrb[123].mxu1  ;;  %v8696_v9 = vpop.xlane.xlu0 %8695 }
0x16f6   :  { %v8306_v39 = vadd.f32 %v8305_v31, %v17804_v38  ;;  %v17907_v0 = vpop.eup %13122  ;;  %v8714_v3 = vmax.f32 %v8696_v9, %v8672_v13 }
0x16f7   :  { %v8337_v59 = vmul.f32 %v13119_v54, %v8311_v63  ;;  %v17909_v12 = vpop.eup %13124  ;;  %v8771_v15 = vsel %vm2015_vm5, %v17907_v0, 0.0 }
0x16f8   :  { %v8336_v53 = vmul.f32 %v13121_v2, %v8306_v39  ;;  %12225 = vmatpush3.bf16.msra.mxu1 %v17591_v5  ;;  %v11634_v27 = vpop.f32.mrb[124].mxu1  ;;  %v8722_v35 = vsub.f32 %v17848_v25, %v8714_v3  ;;  %v8746_v38 = vsub.f32 %v8672_v13, %v8714_v3  ;;  %8772 = vadd.xlane.f32.xlu0 %v8771_v15  ;;  %v13127_v62 = vpop.eup %13126 }
0x16f9   :  { %v8321_v1 = vadd.f32 %v11634_v27, %v17814_v33  ;;  %12227 = vmatprep.subr.bf16.mxu1 %v17603_v51  ;;  %v8315_v41 = vpop.f32.mrb[125].mxu1  ;;  %v8699_v23 = vpop.xlane.xlu0 %8698  ;;  %v17921_v5 = vmul.f32 %v17909_v12, %v17889_v50 }
0x16fa   :  { %v8316_v30 = vadd.f32 %v8315_v41, %v17748_v19  ;;  %11657 = vmatprep.mubr.msk.f32.mxu1 %vm2015_vm5, %v8336_v53  ;;  %v13129_v45 = vpop.eup %13128  ;;  %v8732_v44 = vmul.f32 1.442695, %v8722_v35  ;;  %v8756_v25 = vmul.f32 1.442695, %v8746_v38  ;;  %v8715_v43 = vmax.f32 %v8699_v23, %v8675_v20  ;;  %v8684_v15 = vpop.xlane.xlu1 %8683 }
0x16fb   :  { %v8339_v47 = vmul.f32 %v13127_v62, %v8321_v1  ;;  %11658 = vmatmul.mubr.msk.f32.gmra.mrb[130].mxu1 %vm2015_vm5, %v8337_v59 }
0x16fc   :  { %v8338_v33 = vmul.f32 %v13129_v45, %v8316_v30  ;;  %12229 = vmatpush3.bf16.msra.mxu1 %v17603_v51  ;;  %13134 = vpow2.f32 %v8732_v44  ;;  %v8723_v19 = vsub.f32 %v17846_v22, %v8715_v43  ;;  %v8747_v4 = vsub.f32 %v8675_v20, %v8715_v43  ;;  %v13131_v22 = vpop.eup %13130 }
0x16fd   :  { %12231 = vmatprep.subr.bf16.mxu1 %v17612_v36  ;;  %13136 = vpow2.f32 %v8756_v25  ;;  %v8702_v13 = vpop.xlane.xlu0 %8701  ;;  %v13133_v39 = vpop.eup %13132 }
0x16fe   :  { %11660 = vmatprep.mubr.msk.f32.mxu1 %vm2015_vm5, %v8338_v33  ;;  %v8734_v16 = vmul.f32 1.442695, %v8723_v19  ;;  %v8758_v37 = vmul.f32 1.442695, %v8747_v4  ;;  %v8716_v6 = vmax.f32 %v8702_v13, %v8678_v56  ;;  %v8687_v45 = vpop.xlane.xlu1 %8686 }
0x16ff   :  { %v11637_v54 = vpop.f32.mrb[126].mxu1  ;;  %11661 = vmatmul.mubr.msk.f32.gmra.mrb[132].mxu1 %vm2015_vm5, %v8339_v47 }
0x1700   :  { %v8331_v63 = vadd.f32 %v11637_v54, %v17837_v28  ;;  %12233 = vmatpush3.bf16.msra.mxu1 %v17612_v36  ;;  %v8325_v51 = vpop.f32.mrb[127].mxu1  ;;  %13138 = vpow2.f32 %v8734_v16  ;;  %v8724_v20 = vsub.f32 %v17853_v17, %v8716_v6  ;;  %v8748_v31 = vsub.f32 %v8678_v56, %v8716_v6 }
0x1701   :  { %v8326_v2 = vadd.f32 %v8325_v51, %v17827_v32  ;;  %12235 = vmatprep.subr.bf16.mxu1 %v17725_v49  ;;  %13140 = vpow2.f32 %v8758_v37  ;;  %v8705_v59 = vpop.xlane.xlu0 %8704 }
0x1702   :  { %v8341_v9 = vmul.f32 %v13131_v22, %v8331_v63  ;;  %v8736_v3 = vmul.f32 1.442695, %v8724_v20  ;;  %v8760_v53 = vmul.f32 1.442695, %v8748_v31  ;;  %v8717_v28 = vmax.f32 %v8705_v59, %v8681_v8 }
0x1703   :  { %v8340_v27 = vmul.f32 %v13133_v39, %v8326_v2 }
0x1704   :  { %13142 = vpow2.f32 %v8736_v3  ;;  %v8725_v36 = vsub.f32 %v17851_v11, %v8717_v28  ;;  %v8749_v35 = vsub.f32 %v8681_v8, %v8717_v28 }
0x1705   :  { %11663 = vmatprep.mubr.msk.f32.mxu1 %vm2015_vm5, %v8340_v27  ;;  %13144 = vpow2.f32 %v8760_v53  ;;  %v8708_v17 = vpop.xlane.xlu0 %8707 }
0x1706   :  { %11664 = vmatmul.mubr.msk.f32.gmra.mrb[134].mxu1 %vm2015_vm5, %v8341_v9  ;;  %v13135_v32 = vpop.eup %13134  ;;  %v8738_v56 = vmul.f32 1.442695, %v8725_v36  ;;  %v8762_v38 = vmul.f32 1.442695, %v8749_v35  ;;  %v8718_v1 = vmax.f32 %v8708_v17, %v8684_v15  ;;  %v17999_v9 = vld [vmem:[%s19029_s23] ss:$0 sm:$0xff] }
0x1707   :  { %11710 = vmatprep.mubr.msk.f32.mxu1 %vm2015_vm5, %v17885_v14  ;;  %v17939_v41 = vpop.eup %13136  ;;  %v8774_v62 = vsel %vm2015_vm5, %v13135_v32, 0.0 }
0x1708   :  { %13146 = vpow2.f32 %v8738_v56  ;;  %v8726_v11 = vsub.f32 %v17858_v24, %v8718_v1  ;;  %v8750_v30 = vsub.f32 %v8684_v15, %v8718_v1  ;;  %8775 = vadd.xlane.f32.xlu1 %v8774_v62  ;;  %v17945_v23 = vmul.f32 %v17939_v41, %v17889_v50 }
0x1709   :  { %13148 = vpow2.f32 %v8762_v38  ;;  %v8711_v44 = vpop.xlane.xlu0 %8710 }
0x170a   :  { %11711 = vmatmul.mubr.msk.f32.vlgmr.msra.gmra.mrb[136].mxu1 %vm2015_vm5, %v17907_v0  ;;  %v13139_v14 = vpop.eup %13138  ;;  %v8740_v25 = vmul.f32 1.442695, %v8726_v11  ;;  %v8764_v47 = vmul.f32 1.442695, %v8750_v30  ;;  %v8719_v43 = vmax.f32 %v8711_v44, %v8687_v45  ;;  %v19030_v30 = vld [vmem:[#allocation61_spill] sm:$0xff] }
0x170b   :  { %11713 = vmatprep.mubr.msk.f32.mxu1 %vm2015_vm5, %v13135_v32  ;;  %12237 = vmatpush3.bf16.msra.mxu1 %v17725_v49  ;;  %v17951_v24 = vpop.eup %13140  ;;  %v8777_v33 = vsel %vm2015_vm5, %v13139_v14, 0.0 }
0x170c   :  { %12239 = vmatprep.subr.bf16.mxu1 %v17758_v48  ;;  %13150 = vpow2.f32 %v8740_v25  ;;  %v8727_v19 = vsub.f32 %v17856_v57, %v8719_v43  ;;  %v8751_v4 = vsub.f32 %v8687_v45, %v8719_v43  ;;  %8778 = vadd.xlane.f32.xlu0 %v8777_v33  ;;  %v17958_v0 = vmul.f32 %v17951_v24, %v17889_v50 }
0x170d   :  { %13152 = vpow2.f32 %v8764_v47 }
0x170e   :  { %11714 = vmatmul.mubr.msk.f32.gmra.mrb[138].mxu1 %vm2015_vm5, %v13139_v14  ;;  %v13143_v8 = vpop.eup %13142  ;;  %v8742_v49 = vmul.f32 1.442695, %v8727_v19  ;;  %v8766_v13 = vmul.f32 1.442695, %v8751_v4 }
0x170f   :  { %12241 = vmatpush3.bf16.msra.mxu1 %v17758_v48  ;;  %v17962_v16 = vpop.eup %13144  ;;  %11716 = vmatprep.mubr.msk.f32.mxu1 %vm2015_vm5, %v13143_v8  ;;  %v8780_v57 = vsel %vm2015_vm5, %v13143_v8, 0.0  ;;  %v19032_v8 = vld [vmem:[#allocation111_spill] sm:$0xff] }
0x1710   :  { %12243 = vmatprep.subr.bf16.mxu1 %v17772_v52  ;;  %13154 = vpow2.f32 %v8742_v49  ;;  %8781 = vadd.xlane.f32.xlu1 %v8780_v57  ;;  %v17969_v37 = vmul.f32 %v17962_v16, %v17889_v50 }
0x1711   :  { %13156 = vpow2.f32 %v8766_v13 }
0x1712   :  { %v13147_v6 = vpop.eup %13146 }
0x1713   :  { %12245 = vmatpush3.bf16.msra.mxu1 %v17772_v52  ;;  %v17972_v54 = vpop.eup %13148  ;;  %v8783_v48 = vsel %vm2015_vm5, %v13147_v6, 0.0 }
0x1714   :  { %11717 = vmatmul.mubr.msk.f32.gmra.mrb[140].mxu1 %vm2015_vm5, %v13147_v6  ;;  %12247 = vmatprep.subr.bf16.mxu1 %v17788_v61  ;;  %v17979_v63 = vmul.f32 %v17972_v54, %v17889_v50 }
0x1715   :  { %8784 = vadd.xlane.f32.xlu0 %v8783_v48 }
0x1716   :  { %v13151_v51 = vpop.eup %13150 }
0x1717   :  { %12249 = vmatpush3.bf16.msra.mxu1 %v17788_v61  ;;  %v17982_v22 = vpop.eup %13152  ;;  %11719 = vmatprep.mubr.msk.f32.mxu1 %vm2015_vm5, %v13151_v51  ;;  %v8786_v52 = vsel %vm2015_vm5, %v13151_v51, 0.0 }
0x1718   :  { %8787 = vadd.xlane.f32.xlu1 %v8786_v52  ;;  %v17988_v20 = vmul.f32 %v17982_v22, %v17889_v50 }
0x171a   :  { %v13155_v31 = vpop.eup %13154 }
0x171b   :  { %v17990_v2 = vpop.eup %13156  ;;  %11720 = vmatmul.mubr.msk.f32.gmra.mrb[142].mxu1 %vm2015_vm5, %v13155_v31  ;;  %v8789_v39 = vsel %vm2015_vm5, %v13155_v31, 0.0 }
0x171c   :  { %8790 = vadd.xlane.f32.xlu0 %v8789_v39  ;;  %v17996_v61 = vmul.f32 %v17990_v2, %v17889_v50 }
0x177d   :  { %v8770_v32 = vpop.xlane.xlu1 %8769 }
0x177e   :  { %v8792_v62 = vadd.f32 %v17891_v46, %v8770_v32 }
0x1785   :  { %v8773_v35 = vpop.xlane.xlu0 %8772 }
0x1786   :  { %v8793_v1 = vadd.f32 %v17909_v12, %v8773_v35  ;;  %v19031_v12 = vld [vmem:[#allocation109_spill] sm:$0xff] }
0x1788   :  { %13158 = vrcp.f32 %v8793_v1 }
0x1789   :  { %13160 = vrcp.f32 %v8792_v62 }
0x1792   :  { %v13159_v32 = vpop.eup %13158 }
0x1795   :  { %v8776_v14 = vpop.xlane.xlu1 %8775 }
0x1796   :  { %v8794_v4 = vadd.f32 %v17939_v41, %v8776_v14 }
0x1799   :  { %v8779_v11 = vpop.xlane.xlu0 %8778 }
0x179a   :  { %v8795_v46 = vadd.f32 %v17951_v24, %v8779_v11 }
0x179c   :  { %13162 = vrcp.f32 %v8795_v46 }
0x179d   :  { %v8782_v24 = vpop.xlane.xlu1 %8781  ;;  %13164 = vrcp.f32 %v8794_v4 }
0x179e   :  { %v8796_v39 = vadd.f32 %v17962_v16, %v8782_v24 }
0x17a2   :  { %v8785_v57 = vpop.xlane.xlu0 %8784 }
0x17a3   :  { %v8797_v41 = vadd.f32 %v17972_v54, %v8785_v57 }
0x17a5   :  { %13166 = vrcp.f32 %v8797_v41  ;;  %v8788_v1 = vpop.xlane.xlu1 %8787 }
0x17a6   :  { %13168 = vrcp.f32 %v8796_v39  ;;  %v19035_v39 = vld [vmem:[#allocation113_spill] sm:$0xff] }
0x17c6   :  { %v11656_v59 = vpop.f32.mrb[128].mxu1 }
0x17c7   :  { %v9093_v3 = vadd.f32 %v11656_v59, %v17999_v9  ;;  %v8432_v53 = vpop.f32.mrb[129].mxu1  ;;  %v19033_v59 = vld [vmem:[#allocation69_spill] sm:$0xff] }
0x17c8   :  { %v9092_v27 = vadd.f32 %v17999_v9, %v8432_v53  ;;  %v19034_v53 = vld [vmem:[#allocation82_spill] sm:$0xff] }
0x17c9   :  { %v18004_v28 = vadd.f32 %v9093_v3, %v16827_v21 }
0x17ca   :  { %v18007_v15 = vadd.f32 %v9092_v27, %v16821_v26 }
0x17cb   :  { %v9127_v36 = vsel %vm426_vm0, %v18004_v28, 0.0 }
0x17cc   :  { %9128 = vadd.xlane.f32.xlu0 %v9127_v36  ;;  %v9124_v50 = vsel %vm426_vm0, %v18007_v15, 0.0 }
0x17cd   :  { %9125 = vadd.xlane.f32.xlu1 %v9124_v50 }
0x17ce   :  { %v11659_v17 = vpop.f32.mrb[130].mxu1 }
0x17cf   :  { %v9095_v56 = vadd.f32 %v11659_v17, %v17999_v9  ;;  %v8442_v38 = vpop.f32.mrb[131].mxu1 }
0x17d0   :  { %v9094_v21 = vadd.f32 %v17999_v9, %v8442_v38  ;;  %v8791_v38 = vpop.xlane.xlu0 %8790 }
0x17d1   :  { %v18017_v26 = vadd.f32 %v9095_v56, %v16863_v10  ;;  %v13161_v56 = vpop.eup %13160  ;;  %v8799_v14 = vadd.f32 %v17990_v2, %v8791_v38 }
0x17d2   :  { %v18021_v45 = vadd.f32 %v9094_v21, %v19030_v30  ;;  %v11662_v44 = vpop.f32.mrb[132].mxu1 }
0x17d3   :  { %v9097_v25 = vadd.f32 %v11662_v44, %v17999_v9  ;;  %v8452_v47 = vpop.f32.mrb[133].mxu1  ;;  %v9133_v43 = vsel %vm426_vm0, %v18017_v26, 0.0  ;;  %v13163_v44 = vpop.eup %13162  ;;  %13170 = vrcp.f32 %v8799_v14 }
0x17d4   :  { %v9096_v33 = vadd.f32 %v17999_v9, %v8452_v47  ;;  %9134 = vadd.xlane.f32.xlu0 %v9133_v43  ;;  %v9130_v10 = vsel %vm426_vm0, %v18021_v45, 0.0  ;;  %v8798_v47 = vadd.f32 %v17982_v22, %v8788_v1 }
0x17d5   :  { %v18031_v19 = vadd.f32 %v9097_v25, %v19031_v12  ;;  %9131 = vadd.xlane.f32.xlu1 %v9130_v10  ;;  %v13165_v25 = vpop.eup %13164 }
0x17d6   :  { %v18035_v49 = vadd.f32 %v9096_v33, %v19032_v8  ;;  %13172 = vrcp.f32 %v8798_v47 }
0x17d7   :  { %v9139_v13 = vsel %vm426_vm0, %v18031_v19, 0.0 }
0x17d8   :  { %9140 = vadd.xlane.f32.xlu0 %v9139_v13  ;;  %v9136_v6 = vsel %vm426_vm0, %v18035_v49, 0.0 }
0x17d9   :  { %v11665_v48 = vpop.f32.mrb[134].mxu1  ;;  %9137 = vadd.xlane.f32.xlu1 %v9136_v6 }
0x17da   :  { %v9099_v51 = vadd.f32 %v11665_v48, %v17999_v9  ;;  %v8462_v52 = vpop.f32.mrb[135].mxu1 }
0x17db   :  { %v9098_v31 = vadd.f32 %v17999_v9, %v8462_v52 }
0x17dc   :  { %v18046_v3 = vadd.f32 %v9099_v51, %v19033_v59 }
0x17dd   :  { %v18049_v27 = vadd.f32 %v9098_v31, %v19034_v53  ;;  %v11712_v36 = vpop.f32.mrb[136].mxu1 }
0x17de   :  { %v8916_v50 = vadd.f32 %v11712_v36, %v17921_v5  ;;  %v8910_v35 = vpop.f32.mrb[137].mxu1  ;;  %v9145_v17 = vsel %vm426_vm0, %v18046_v3, 0.0 }
0x17df   :  { %v8911_v54 = vadd.f32 %v8910_v35, %v17897_v55  ;;  %9146 = vadd.xlane.f32.xlu0 %v9145_v17  ;;  %v9142_v16 = vsel %vm426_vm0, %v18049_v27, 0.0 }
0x17e0   :  { %v8950_v21 = vmul.f32 %v13159_v32, %v8916_v50  ;;  %9143 = vadd.xlane.f32.xlu1 %v9142_v16 }
0x17e1   :  { %v8949_v62 = vmul.f32 %v13161_v56, %v8911_v54  ;;  %v11715_v5 = vpop.f32.mrb[138].mxu1  ;;  %v19037_v54 = vld [vmem:[#allocation101_spill] sm:$0xff]  ;;  %v19038_v56 = vld [vmem:[#allocation115_spill] sm:$0xff] }
0x17e2   :  { %v8926_v11 = vadd.f32 %v11715_v5, %v17958_v0  ;;  %v8920_v30 = vpop.f32.mrb[139].mxu1 }
0x17e3   :  { %v8921_v55 = vadd.f32 %v8920_v30, %v17945_v23  ;;  %11738 = vmatprep.mubr.msk.f32.mxu1 %vm2015_vm5, %v8949_v62  ;;  %v13167_v23 = vpop.eup %13166 }
0x17e4   :  { %v8952_v43 = vmul.f32 %v13163_v44, %v8926_v11  ;;  %11739 = vmatmul.mubr.msk.f32.vlgmr.msra.gmra.mrb[144].mxu1 %vm2015_vm5, %v8950_v21  ;;  %v13169_v12 = vpop.eup %13168 }
0x17e5   :  { %v8951_v33 = vmul.f32 %v13165_v25, %v8921_v55  ;;  %v13171_v6 = vpop.eup %13170  ;;  %v19039_v55 = vld [vmem:[#allocation97_spill] sm:$0xff] }
0x17e6   :  { %v13173_v24 = vpop.eup %13172 }
0x17e7   :  { %v11718_v10 = vpop.f32.mrb[140].mxu1  ;;  %11741 = vmatprep.mubr.msk.f32.mxu1 %vm2015_vm5, %v8951_v33 }
0x17e8   :  { %v8936_v0 = vadd.f32 %v11718_v10, %v17979_v63  ;;  %v8930_v46 = vpop.f32.mrb[141].mxu1  ;;  %11742 = vmatmul.mubr.msk.f32.gmra.mrb[146].mxu1 %vm2015_vm5, %v8952_v43  ;;  %v19040_v43 = vld [vmem:[#allocation116_spill] sm:$0xff] }
0x17e9   :  { %v8931_v2 = vadd.f32 %v8930_v46, %v17969_v37 }
0x17ea   :  { %v8954_v4 = vmul.f32 %v13167_v23, %v8936_v0 }
0x17eb   :  { %v8953_v22 = vmul.f32 %v13169_v12, %v8931_v2 }
0x17ed   :  { %11744 = vmatprep.mubr.msk.f32.mxu1 %vm2015_vm5, %v8953_v22 }
0x17ee   :  { %11745 = vmatmul.mubr.msk.f32.gmra.mrb[148].mxu1 %vm2015_vm5, %v8954_v4  ;;  %v11721_v8 = vpop.f32.mrb[142].mxu1 }
0x17ef   :  { %v8946_v13 = vadd.f32 %v11721_v8, %v17996_v61  ;;  %v8940_v57 = vpop.f32.mrb[143].mxu1  ;;  %v19036_v61 = vld [vmem:[#allocation117_spill] sm:$0xff] }
0x17f0   :  { %v8941_v63 = vadd.f32 %v8940_v57, %v17988_v20 }
0x17f1   :  { %v8956_v48 = vmul.f32 %v13171_v6, %v8946_v13 }
0x17f2   :  { %v8955_v51 = vmul.f32 %v13173_v24, %v8941_v63 }
0x17f4   :  { %11747 = vmatprep.mubr.msk.f32.mxu1 %vm2015_vm5, %v8955_v51  ;;  %v19041_v51 = vld [vmem:[#allocation93_spill] sm:$0xff] }
0x17f5   :  { %11748 = vmatmul.mubr.msk.f32.gmra.mrb[150].mxu1 %vm2015_vm5, %v8956_v48 }
0x1859   :  { %v9129_v1 = vpop.xlane.xlu0 %9128 }
0x185a   :  { %v9126_v11 = vpop.xlane.xlu1 %9125  ;;  %v9173_v10 = vmul.f32 0.03125, %v9129_v1 }
0x185b   :  { %v9172_v23 = vmul.f32 0.03125, %v9126_v11 }
0x185c   :  { %v18110_v4 = vsub.f32 %v18004_v28, %v9173_v10 }
0x185d   :  { %v18114_v57 = vsub.f32 %v18007_v15, %v9172_v23 }
0x1861   :  { %v9135_v47 = vpop.xlane.xlu0 %9134 }
0x1862   :  { %v9132_v0 = vpop.xlane.xlu1 %9131  ;;  %v9175_v22 = vmul.f32 0.03125, %v9135_v47 }
0x1863   :  { %v9174_v6 = vmul.f32 0.03125, %v9132_v0 }
0x1865   :  { %v9141_v63 = vpop.xlane.xlu0 %9140 }
0x1866   :  { %v9138_v48 = vpop.xlane.xlu1 %9137 }
0x18b7   :  { %v11740_v37 = vpop.f32.mrb[144].mxu1 }
0x18b8   :  { %v9101_v52 = vadd.f32 %v11740_v37, %v17999_v9  ;;  %v9047_v41 = vpop.f32.mrb[145].mxu1 }
0x18b9   :  { %v9100_v31 = vadd.f32 %v17999_v9, %v9047_v41 }
0x18ba   :  { %v18076_v59 = vadd.f32 %v9101_v52, %v19035_v39  ;;  %v19042_v52 = vld [vmem:[#allocation71_spill] sm:$0xff]  ;;  %v9177_v39 = vmul.f32 0.03125, %v9141_v63  ;;  %v6592_v63 = vld [vmem:[#allocation12] sm:$0xff] }
0x18bb   :  { %v18079_v53 = vadd.f32 %v9100_v31, %v19036_v61  ;;  %v11743_v20 = vpop.f32.mrb[146].mxu1  ;;  %v18124_v31 = vsub.f32 %v18017_v26, %v9175_v22 }
0x18bc   :  { %v9103_v36 = vadd.f32 %v11743_v20, %v17999_v9  ;;  %v9057_v50 = vpop.f32.mrb[147].mxu1  ;;  %v9151_v35 = vsel %vm426_vm0, %v18076_v59, 0.0  ;;  %v9205_v20 = vmul.f32 %v18110_v4, %v18110_v4 }
0x18bd   :  { %v9102_v17 = vadd.f32 %v17999_v9, %v9057_v50  ;;  %9152 = vadd.xlane.f32.xlu0 %v9151_v35  ;;  %v9148_v32 = vsel %vm426_vm0, %v18079_v53, 0.0  ;;  %v9147_v50 = vpop.xlane.xlu0 %9146  ;;  %v9207_v1 = vmul.f32 %v18124_v31, %v18124_v31 }
0x18be   :  { %v18088_v16 = vadd.f32 %v9103_v36, %v19037_v54  ;;  %9149 = vadd.xlane.f32.xlu1 %v9148_v32  ;;  %v18131_v36 = vsub.f32 %v18021_v45, %v9174_v6  ;;  %v9144_v32 = vpop.xlane.xlu1 %9143  ;;  %v18138_v54 = vsub.f32 %v18031_v19, %v9177_v39 }
0x18bf   :  { %v18091_v38 = vadd.f32 %v9102_v17, %v19038_v56  ;;  %v9204_v17 = vmul.f32 %v18114_v57, %v18114_v57  ;;  %v9179_v56 = vmul.f32 0.03125, %v9147_v50 }
0x18c0   :  { %v9157_v21 = vsel %vm426_vm0, %v18088_v16, 0.0 }
0x18c1   :  { %v11746_v62 = vpop.f32.mrb[148].mxu1  ;;  %9158 = vadd.xlane.f32.xlu0 %v9157_v21  ;;  %v9154_v5 = vsel %vm426_vm0, %v18091_v38, 0.0  ;;  %v9223_v21 = vsel %vm426_vm0, %v9205_v20, 0.0  ;;  %v9220_v11 = vsel %vm426_vm0, %v9204_v17, 0.0  ;;  %v6598_v20 = vld [vmem:[#allocation12 + $0x30] sm:$0xff] }
0x18c2   :  { %v9105_v30 = vadd.f32 %v11746_v62, %v17999_v9  ;;  %v9067_v44 = vpop.f32.mrb[149].mxu1  ;;  %9155 = vadd.xlane.f32.xlu1 %v9154_v5  ;;  %v9178_v5 = vmul.f32 0.03125, %v9144_v32 }
0x18c3   :  { %v9104_v14 = vadd.f32 %v17999_v9, %v9067_v44  ;;  %v18150_v44 = vsub.f32 %v18046_v3, %v9179_v56 }
0x18c4   :  { %v18100_v25 = vadd.f32 %v9105_v30, %v19039_v55  ;;  %v9206_v30 = vmul.f32 %v18131_v36, %v18131_v36  ;;  %v9209_v55 = vmul.f32 %v18138_v54, %v18138_v54  ;;  %v18156_v47 = vsub.f32 %v18049_v27, %v9178_v5 }
0x18c5   :  { %v18103_v33 = vadd.f32 %v9104_v14, %v19040_v43  ;;  %v9229_v14 = vsel %vm426_vm0, %v9207_v1, 0.0 }
0x18c6   :  { %v9163_v46 = vsel %vm426_vm0, %v18100_v25, 0.0  ;;  %v9226_v43 = vsel %vm426_vm0, %v9206_v30, 0.0  ;;  %v9235_v0 = vsel %vm426_vm0, %v9209_v55, 0.0 }
0x18c7   :  { %9164 = vadd.xlane.f32.xlu0 %v9163_v46  ;;  %v9160_v2 = vsel %vm426_vm0, %v18103_v33, 0.0  ;;  %v9211_v46 = vmul.f32 %v18150_v44, %v18150_v44 }
0x18c8   :  { %9161 = vadd.xlane.f32.xlu1 %v9160_v2  ;;  %v11749_v12 = vpop.f32.mrb[150].mxu1  ;;  %v9210_v2 = vmul.f32 %v18156_v47, %v18156_v47 }
0x18c9   :  { %v9107_v8 = vadd.f32 %v11749_v12, %v17999_v9  ;;  %v9077_v13 = vpop.f32.mrb[151].mxu1  ;;  %v9241_v12 = vsel %vm426_vm0, %v9211_v46, 0.0 }
0x18ca   :  { %v9106_v24 = vadd.f32 %v17999_v9, %v9077_v13  ;;  %v9176_v9 = vmul.f32 0.03125, %v9138_v48  ;;  %v9238_v22 = vsel %vm426_vm0, %v9210_v2, 0.0  ;;  %v6595_v13 = vld [vmem:[#allocation12 + $0x18] sm:$0xff] }
0x18cb   :  { %v18118_v37 = vadd.f32 %v9107_v8, %v19041_v51  ;;  %v6593_v8 = vld [vmem:[#allocation12 + $0x8] sm:$0xff] }
0x18cc   :  { %v18121_v41 = vadd.f32 %v9106_v24, %v19042_v52  ;;  %v18144_v62 = vsub.f32 %v18035_v49, %v9176_v9  ;;  %v12250_v6 = vpack.c.bf16 %v6595_v13, %v6593_v8  ;;  %v6594_v24 = vld [vmem:[#allocation12 + $0x10] sm:$0xff]  ;;  %v6597_v51 = vld [vmem:[#allocation12 + $0x28] sm:$0xff]  ;;  %v6599_v52 = vld [vmem:[#allocation12 + $0x38] sm:$0xff] }
0x18cd   :  { %v9169_v61 = vsel %vm426_vm0, %v18118_v37, 0.0  ;;  %v12252_v48 = vpack.c.bf16 %v6594_v24, %v6592_v63  ;;  %v12254_v39 = vpack.c.bf16 %v6599_v52, %v6597_v51 }
0x18ce   :  { %9170 = vadd.xlane.f32.xlu0 %v9169_v61  ;;  %v9166_v35 = vsel %vm426_vm0, %v18121_v41, 0.0  ;;  %v9208_v10 = vmul.f32 %v18144_v62, %v18144_v62  ;;  %12251 = vmatprep.subr.bf16.mxu0 %v12250_v6  ;;  %v6596_v61 = vld [vmem:[#allocation12 + $0x20] sm:$0xff] }
0x18cf   :  { %9167 = vadd.xlane.f32.xlu1 %v9166_v35  ;;  %12253 = vmatpush1.bf16.msra.mxu0 %v12252_v48  ;;  %v12256_v9 = vpack.c.bf16 %v6598_v20, %v6596_v61 }
0x18d0   :  { %v9232_v23 = vsel %vm426_vm0, %v9208_v10, 0.0  ;;  %12255 = vmatprep.subr.bf16.mxu0 %v12254_v39 }
0x18d2   :  { %9224 = vadd.xlane.f32.xlu0 %v9223_v21 }
0x18d3   :  { %9221 = vadd.xlane.f32.xlu1 %v9220_v11  ;;  %12257 = vmatpush1.bf16.msra.mxu0 %v12256_v9 }
0x18d6   :  { %9230 = vadd.xlane.f32.xlu0 %v9229_v14 }
0x18d7   :  { %9227 = vadd.xlane.f32.xlu1 %v9226_v43 }
0x18da   :  { %9236 = vadd.xlane.f32.xlu0 %v9235_v0 }
0x18db   :  { %9233 = vadd.xlane.f32.xlu1 %v9232_v23 }
0x18de   :  { %9242 = vadd.xlane.f32.xlu0 %v9241_v12 }
0x18df   :  { %9239 = vadd.xlane.f32.xlu1 %v9238_v22 }
0x194a   :  { %v9153_v50 = vpop.xlane.xlu0 %9152 }
0x194b   :  { %v9181_v35 = vmul.f32 0.03125, %v9153_v50  ;;  %v9150_v17 = vpop.xlane.xlu1 %9149 }
0x194c   :  { %v9180_v32 = vmul.f32 0.03125, %v9150_v17 }
0x194d   :  { %v18170_v56 = vsub.f32 %v18076_v59, %v9181_v35 }
0x194e   :  { %v18173_v21 = vsub.f32 %v18079_v53, %v9180_v32  ;;  %v9159_v1 = vpop.xlane.xlu0 %9158 }
0x194f   :  { %v9183_v5 = vmul.f32 0.03125, %v9159_v1  ;;  %v9156_v11 = vpop.xlane.xlu1 %9155  ;;  %v9213_v30 = vmul.f32 %v18170_v56, %v18170_v56 }
0x1950   :  { %v9182_v14 = vmul.f32 0.03125, %v9156_v11  ;;  %v9212_v55 = vmul.f32 %v18173_v21, %v18173_v21 }
0x1951   :  { %v18180_v43 = vsub.f32 %v18088_v16, %v9183_v5  ;;  %v9247_v10 = vsel %vm426_vm0, %v9213_v30, 0.0 }
0x1952   :  { %v18184_v0 = vsub.f32 %v18091_v38, %v9182_v14  ;;  %9248 = vadd.xlane.f32.xlu0 %v9247_v10  ;;  %v9244_v46 = vsel %vm426_vm0, %v9212_v55, 0.0 }
0x1953   :  { %9245 = vadd.xlane.f32.xlu1 %v9244_v46  ;;  %v9215_v23 = vmul.f32 %v18180_v43, %v18180_v43 }
0x1954   :  { %v9165_v2 = vpop.xlane.xlu0 %9164  ;;  %v9214_v12 = vmul.f32 %v18184_v0, %v18184_v0 }
0x1955   :  { %v9185_v22 = vmul.f32 0.03125, %v9165_v2  ;;  %v9162_v8 = vpop.xlane.xlu1 %9161  ;;  %v9253_v13 = vsel %vm426_vm0, %v9215_v23, 0.0 }
0x1956   :  { %v9184_v6 = vmul.f32 0.03125, %v9162_v8  ;;  %9254 = vadd.xlane.f32.xlu0 %v9253_v13  ;;  %v9250_v63 = vsel %vm426_vm0, %v9214_v12, 0.0 }
0x1957   :  { %v18194_v24 = vsub.f32 %v18100_v25, %v9185_v22  ;;  %9251 = vadd.xlane.f32.xlu1 %v9250_v63 }
0x1958   :  { %v18197_v48 = vsub.f32 %v18103_v33, %v9184_v6 }
0x1959   :  { %v9217_v51 = vmul.f32 %v18194_v24, %v18194_v24 }
0x195a   :  { %v9216_v52 = vmul.f32 %v18197_v48, %v18197_v48 }
0x195b   :  { %v9259_v39 = vsel %vm426_vm0, %v9217_v51, 0.0  ;;  %v9171_v61 = vpop.xlane.xlu0 %9170 }
0x195c   :  { %9260 = vadd.xlane.f32.xlu0 %v9259_v39  ;;  %v9256_v20 = vsel %vm426_vm0, %v9216_v52, 0.0  ;;  %v9187_v9 = vmul.f32 0.03125, %v9171_v61  ;;  %v9168_v50 = vpop.xlane.xlu1 %9167 }
0x195d   :  { %9257 = vadd.xlane.f32.xlu1 %v9256_v20  ;;  %v9186_v35 = vmul.f32 0.03125, %v9168_v50 }
0x195e   :  { %v18206_v17 = vsub.f32 %v18118_v37, %v9187_v9 }
0x195f   :  { %v18209_v32 = vsub.f32 %v18121_v41, %v9186_v35  ;;  %v9225_v1 = vpop.xlane.xlu0 %9224 }
0x1960   :  { %v9269_v5 = vmul.f32 0.03125, %v9225_v1  ;;  %v9222_v11 = vpop.xlane.xlu1 %9221  ;;  %v9219_v30 = vmul.f32 %v18206_v17, %v18206_v17  ;;  %v18218_v1 = vld [vmem:[%s19043_s26] ss:$0 sm:$0xff] }
0x1961   :  { %v9268_v14 = vmul.f32 0.03125, %v9222_v11  ;;  %v9218_v55 = vmul.f32 %v18209_v32, %v18209_v32 }
0x1962   :  { %v9285_v10 = vadd.f32 1e-05, %v9269_v5  ;;  %v9265_v46 = vsel %vm426_vm0, %v9219_v30, 0.0 }
0x1963   :  { %v9284_v23 = vadd.f32 1e-05, %v9268_v14  ;;  %9266 = vadd.xlane.f32.xlu0 %v9265_v46  ;;  %v9231_v2 = vpop.xlane.xlu0 %9230  ;;  %v9262_v12 = vsel %vm426_vm0, %v9218_v55, 0.0 }
0x1964   :  { %13174 = vrsqrt.f32 %v9285_v10  ;;  %v9271_v22 = vmul.f32 0.03125, %v9231_v2  ;;  %9263 = vadd.xlane.f32.xlu1 %v9262_v12  ;;  %v9228_v8 = vpop.xlane.xlu1 %9227  ;;  %v18223_v10 = vld [vmem:[%s19044_s28] ss:$0 sm:$0xff] }
0x1965   :  { %13176 = vrsqrt.f32 %v9284_v23  ;;  %v9270_v13 = vmul.f32 0.03125, %v9228_v8 }
0x1966   :  { %v9287_v6 = vadd.f32 1e-05, %v9271_v22 }
0x1967   :  { %v9286_v63 = vadd.f32 1e-05, %v9270_v13  ;;  %v9237_v51 = vpop.xlane.xlu0 %9236 }
0x1968   :  { %v9234_v52 = vpop.xlane.xlu1 %9233  ;;  %v9273_v61 = vmul.f32 0.03125, %v9237_v51 }
0x1969   :  { %13178 = vrsqrt.f32 %v9286_v63  ;;  %v9272_v39 = vmul.f32 0.03125, %v9234_v52 }
0x196a   :  { %13180 = vrsqrt.f32 %v9287_v6  ;;  %v9289_v5 = vadd.f32 1e-05, %v9273_v61 }
0x196b   :  { %v9288_v20 = vadd.f32 1e-05, %v9272_v39  ;;  %v9243_v14 = vpop.xlane.xlu0 %9242 }
0x196c   :  { %v9240_v9 = vpop.xlane.xlu1 %9239  ;;  %v9275_v2 = vmul.f32 0.03125, %v9243_v14 }
0x196d   :  { %13182 = vrsqrt.f32 %v9288_v20  ;;  %v9274_v11 = vmul.f32 0.03125, %v9240_v9 }
0x196e   :  { %v13175_v50 = vpop.eup %13174  ;;  %13184 = vrsqrt.f32 %v9289_v5 }
0x196f   :  { %v13177_v35 = vpop.eup %13176  ;;  %v9317_v55 = vmul.f32 %v13175_v50, %v18110_v4  ;;  %v9290_v12 = vadd.f32 1e-05, %v9274_v11 }
0x1970   :  { %v9316_v30 = vmul.f32 %v13177_v35, %v18114_v57  ;;  %v9291_v57 = vadd.f32 1e-05, %v9275_v2  ;;  %v6617_v2 = vld [vmem:[%s13643_s24 + $0x80] sm:$0xff] }
0x1971   :  { %v9339_v8 = vmul.f32 %v18218_v1, %v9317_v55  ;;  %13186 = vrsqrt.f32 %v9290_v12  ;;  %v6601_v12 = vld [vmem:[%s13643_s24] sm:$0xff] }
0x1972   :  { %v9338_v46 = vmul.f32 %v18218_v1, %v9316_v30  ;;  %13188 = vrsqrt.f32 %v9291_v57 }
0x1973   :  { %v13179_v23 = vpop.eup %13178  ;;  %v9361_v4 = vadd.f32 %v18223_v10, %v9339_v8  ;;  %v6602_v8 = vld [vmem:[%s13643_s24 + $0x8] sm:$0xff] }
0x1974   :  { %v9360_v22 = vadd.f32 %v18223_v10, %v9338_v46  ;;  %v9318_v13 = vmul.f32 %v13179_v23, %v18131_v36  ;;  %v13181_v6 = vpop.eup %13180  ;;  %v12260_v57 = vpack.c.bf16 %v6602_v8, %v6601_v12  ;;  %v6612_v8 = vld [vmem:[%s13643_s24 + $0x58] sm:$0xff] }
0x1975   :  { %v9319_v51 = vmul.f32 %v13181_v6, %v18124_v31  ;;  %v6620_v6 = vld [vmem:[%s13643_s24 + $0x98] sm:$0xff] }
0x1976   :  { %10413 = vmatmul.mubr.msk.f32.vlgmr.msra.gmra.mrb[140].mxu0 %vm426_vm0, %v9360_v22  ;;  %v9340_v63 = vmul.f32 %v18218_v1, %v9318_v13  ;;  %v6619_v13 = vld [vmem:[%s13643_s24 + $0x90] sm:$0xff] }
0x1977   :  { %9505 = vmatprep.mubr.f32.mxu0 %v18957_v42  ;;  %v13183_v52 = vpop.eup %13182  ;;  %v9341_v39 = vmul.f32 %v18218_v1, %v9319_v51  ;;  %v6604_v51 = vld [vmem:[%s13643_s24 + $0x18] sm:$0xff] }
0x1978   :  { %v9362_v36 = vadd.f32 %v18223_v10, %v9340_v63  ;;  %v9320_v61 = vmul.f32 %v13183_v52, %v18144_v62  ;;  %v13185_v20 = vpop.eup %13184  ;;  %v6603_v63 = vld [vmem:[%s13643_s24 + $0x10] sm:$0xff]  ;;  %v6621_v52 = vld [vmem:[%s13643_s24 + $0xa0] sm:$0xff] }
0x1979   :  { %v9363_v9 = vadd.f32 %v18223_v10, %v9341_v39  ;;  %v9321_v50 = vmul.f32 %v13185_v20, %v18138_v54  ;;  %v12264_v39 = vpack.c.bf16 %v6604_v51, %v6603_v63  ;;  %v6605_v20 = vld [vmem:[%s13643_s24 + $0x20] sm:$0xff]  ;;  %v6614_v51 = vld [vmem:[%s13643_s24 + $0x68] sm:$0xff] }
0x197a   :  { %10414 = vmatmul.mubr.msk.f32.gmra.mrb[142].mxu0 %vm426_vm0, %v9361_v4  ;;  %v9342_v31 = vmul.f32 %v18218_v1, %v9320_v61  ;;  %v12262_v4 = vpack.c.bf16 %v6620_v6, %v6619_v13  ;;  %v6629_v6 = vld [vmem:[%s13643_s24 + $0xe0] sm:$0xff] }
0x197b   :  { %9511 = vmatprep.mubr.f32.mxu0 %v18957_v42  ;;  %v13187_v35 = vpop.eup %13186  ;;  %v9343_v62 = vmul.f32 %v18218_v1, %v9321_v50  ;;  %v6623_v50 = vld [vmem:[%s13643_s24 + $0xb0] sm:$0xff]  ;;  %v6613_v63 = vld [vmem:[%s13643_s24 + $0x60] sm:$0xff] }
0x197c   :  { %v9364_v5 = vadd.f32 %v18223_v10, %v9342_v31  ;;  %v9322_v11 = vmul.f32 %v13187_v35, %v18156_v47  ;;  %v13189_v30 = vpop.eup %13188  ;;  %v6624_v35 = vld [vmem:[%s13643_s24 + $0xb8] sm:$0xff] }
0x197d   :  { %v9365_v54 = vadd.f32 %v18223_v10, %v9343_v62  ;;  %v9323_v55 = vmul.f32 %v13189_v30, %v18150_v44  ;;  %v6618_v44 = vld [vmem:[%s13643_s24 + $0x88] sm:$0xff]  ;;  %v6607_v62 = vld [vmem:[%s13643_s24 + $0x30] sm:$0xff] }
0x197e   :  { %10415 = vmatmul.mubr.msk.f32.gmra.mrb[144].mxu0 %vm426_vm0, %v9362_v36  ;;  %v9344_v14 = vmul.f32 %v18218_v1, %v9322_v11  ;;  %v12258_v22 = vpack.c.bf16 %v6618_v44, %v6617_v2  ;;  %v6622_v36 = vld [vmem:[%s13643_s24 + $0xa8] sm:$0xff]  ;;  %v6608_v11 = vld [vmem:[%s13643_s24 + $0x38] sm:$0xff]  ;;  %v6627_v2 = vld [vmem:[%s13643_s24 + $0xd0] sm:$0xff] }
0x197f   :  { %9517 = vmatprep.mubr.f32.mxu0 %v18957_v42  ;;  %v9345_v46 = vmul.f32 %v18218_v1, %v9323_v55  ;;  %v12266_v61 = vpack.c.bf16 %v6622_v36, %v6621_v52  ;;  %v12272_v30 = vpack.c.bf16 %v6608_v11, %v6607_v62  ;;  %v6628_v44 = vld [vmem:[%s13643_s24 + $0xd8] sm:$0xff]  ;;  %v12284_v52 = vpack.c.bf16 %v6614_v51, %v6613_v63  ;;  %v6631_v36 = vld [vmem:[%s13643_s24 + $0xf0] sm:$0xff] }
0x1980   :  { %v9366_v47 = vadd.f32 %v18223_v10, %v9344_v14  ;;  %12259 = vmatprep.subr.bf16.mxu0 %v12258_v22  ;;  %12290 = vmatprep.subr.bf16.mxu1 %v12258_v22  ;;  %v6626_v14 = vld [vmem:[%s13643_s24 + $0xc8] sm:$0xff]  ;;  %v12278_v12 = vpack.c.bf16 %v6628_v44, %v6627_v2  ;;  %v6611_v22 = vld [vmem:[%s13643_s24 + $0x50] sm:$0xff] }
0x1981   :  { %v9367_v23 = vadd.f32 %v18223_v10, %v9345_v46  ;;  %12261 = vmatpush3.bf16.msra.mxu0 %v12260_v57  ;;  %12298 = vmatpush3.bf16.msra.mxu1 %v12260_v57  ;;  %v6610_v46 = vld [vmem:[%s13643_s24 + $0x48] sm:$0xff]  ;;  %v12280_v13 = vpack.c.bf16 %v6612_v8, %v6611_v22 }
0x1982   :  { %10416 = vmatmul.mubr.msk.f32.gmra.mrb[146].mxu0 %vm426_vm0, %v9363_v9  ;;  %12263 = vmatprep.subr.bf16.mxu0 %v12262_v4  ;;  %v6606_v9 = vld [vmem:[%s13643_s24 + $0x28] sm:$0xff] }
0x1983   :  { %9523 = vmatprep.mubr.f32.mxu0 %v18957_v42  ;;  %12291 = vmatprep.subr.bf16.mxu1 %v12262_v4  ;;  %v12268_v31 = vpack.c.bf16 %v6606_v9, %v6605_v20  ;;  %v6630_v57 = vld [vmem:[%s13643_s24 + $0xe8] sm:$0xff]  ;;  %v6615_v20 = vld [vmem:[%s13643_s24 + $0x70] sm:$0xff]  ;;  %v6616_v9 = vld [vmem:[%s13643_s24 + $0x78] sm:$0xff] }
0x1984   :  { %v12282_v4 = vpack.c.bf16 %v6630_v57, %v6629_v6 }
0x1985   :  { %12265 = vmatpush3.bf16.msra.mxu0 %v12264_v39  ;;  %12299 = vmatpush3.bf16.msra.mxu1 %v12264_v39  ;;  %v6632_v39 = vld [vmem:[%s13643_s24 + $0xf8] sm:$0xff] }
0x1986   :  { %10417 = vmatmul.mubr.msk.f32.gmra.mrb[148].mxu0 %vm426_vm0, %v9364_v5  ;;  %12267 = vmatprep.subr.bf16.mxu0 %v12266_v61  ;;  %v12270_v5 = vpack.c.bf16 %v6624_v35, %v6623_v50 }
0x1987   :  { %9529 = vmatprep.mubr.f32.mxu0 %v18957_v42  ;;  %12292 = vmatprep.subr.bf16.mxu1 %v12266_v61  ;;  %v12286_v61 = vpack.c.bf16 %v6632_v39, %v6631_v36 }
0x1989   :  { %12269 = vmatpush3.bf16.msra.mxu0 %v12268_v31  ;;  %12300 = vmatpush3.bf16.msra.mxu1 %v12268_v31  ;;  %v12288_v31 = vpack.c.bf16 %v6616_v9, %v6615_v20 }
0x198a   :  { %10418 = vmatmul.mubr.msk.f32.gmra.mrb[150].mxu0 %vm426_vm0, %v9365_v54  ;;  %12271 = vmatprep.subr.bf16.mxu0 %v12270_v5  ;;  %v6625_v54 = vld [vmem:[%s13643_s24 + $0xc0] sm:$0xff] }
0x198b   :  { %9535 = vmatprep.mubr.f32.mxu0 %v18957_v42  ;;  %12293 = vmatprep.subr.bf16.mxu1 %v12270_v5  ;;  %v12274_v55 = vpack.c.bf16 %v6626_v14, %v6625_v54 }
0x198d   :  { %12273 = vmatpush3.bf16.msra.mxu0 %v12272_v30  ;;  %12301 = vmatpush3.bf16.msra.mxu1 %v12272_v30 }
0x198e   :  { %10419 = vmatmul.mubr.msk.f32.gmra.mrb[152].mxu0 %vm426_vm0, %v9366_v47  ;;  %v6609_v47 = vld [vmem:[%s13643_s24 + $0x40] sm:$0xff]  ;;  %12275 = vmatprep.subr.bf16.mxu0 %v12274_v55  ;;  %s19045_s24 = sld [smem:[#allocation32_spill]] }
0x198f   :  { %9541 = vmatprep.mubr.f32.mxu0 %v18957_v42  ;;  %12294 = vmatprep.subr.bf16.mxu1 %v12274_v55 }
0x1992   :  { %10420 = vmatmul.mubr.msk.f32.gmra.mrb[154].mxu0 %vm426_vm0, %v9367_v23  ;;  %v12276_v23 = vpack.c.bf16 %v6610_v46, %v6609_v47 }
0x1993   :  { %9547 = vmatprep.mubr.f32.mxu0 %v18957_v42 }
0x1994   :  { %12277 = vmatpush3.bf16.msra.mxu0 %v12276_v23  ;;  %12302 = vmatpush3.bf16.msra.mxu1 %v12276_v23 }
0x1995   :  { %12279 = vmatprep.subr.bf16.mxu0 %v12278_v12  ;;  %12295 = vmatprep.subr.bf16.mxu1 %v12278_v12 }
0x1998   :  { %12281 = vmatpush3.bf16.msra.mxu0 %v12280_v13  ;;  %12303 = vmatpush3.bf16.msra.mxu1 %v12280_v13 }
0x1999   :  { %12283 = vmatprep.subr.bf16.mxu0 %v12282_v4  ;;  %12296 = vmatprep.subr.bf16.mxu1 %v12282_v4 }
0x199c   :  { %12285 = vmatpush3.bf16.msra.mxu0 %v12284_v52  ;;  %12304 = vmatpush3.bf16.msra.mxu1 %v12284_v52 }
0x199d   :  { %12287 = vmatprep.subr.bf16.mxu0 %v12286_v61  ;;  %12297 = vmatprep.subr.bf16.mxu1 %v12286_v61 }
0x19a0   :  { %12289 = vmatpush3.bf16.msra.mxu0 %v12288_v31  ;;  %12305 = vmatpush3.bf16.msra.mxu1 %v12288_v31 }
0x19df   :  { %v9249_v50 = vpop.xlane.xlu0 %9248 }
0x19e0   :  { %v9277_v35 = vmul.f32 0.03125, %v9249_v50  ;;  %v9246_v5 = vpop.xlane.xlu1 %9245 }
0x19e1   :  { %v9276_v62 = vmul.f32 0.03125, %v9246_v5 }
0x19e2   :  { %v9293_v11 = vadd.f32 1e-05, %v9277_v35 }
0x19e3   :  { %v9292_v30 = vadd.f32 1e-05, %v9276_v62  ;;  %v9255_v54 = vpop.xlane.xlu0 %9254 }
0x19e4   :  { %13190 = vrsqrt.f32 %v9293_v11  ;;  %v9279_v14 = vmul.f32 0.03125, %v9255_v54  ;;  %v9252_v55 = vpop.xlane.xlu1 %9251 }
0x19e5   :  { %13192 = vrsqrt.f32 %v9292_v30  ;;  %v9278_v47 = vmul.f32 0.03125, %v9252_v55 }
0x19e6   :  { %v9295_v46 = vadd.f32 1e-05, %v9279_v14 }
0x19e7   :  { %v9294_v23 = vadd.f32 1e-05, %v9278_v47 }
0x19e9   :  { %13194 = vrsqrt.f32 %v9294_v23  ;;  %v9261_v2 = vpop.xlane.xlu0 %9260 }
0x19ea   :  { %v9258_v44 = vpop.xlane.xlu1 %9257  ;;  %13196 = vrsqrt.f32 %v9295_v46  ;;  %v9281_v12 = vmul.f32 0.03125, %v9261_v2 }
0x19eb   :  { %v9280_v22 = vmul.f32 0.03125, %v9258_v44 }
0x19ec   :  { %v9297_v57 = vadd.f32 1e-05, %v9281_v12 }
0x19ed   :  { %v9296_v8 = vadd.f32 1e-05, %v9280_v22 }
0x19ee   :  { %v13191_v13 = vpop.eup %13190 }
0x19ef   :  { %v13193_v6 = vpop.eup %13192  ;;  %13198 = vrsqrt.f32 %v9296_v8  ;;  %v9325_v63 = vmul.f32 %v13191_v13, %v18170_v56 }
0x19f0   :  { %v9324_v4 = vmul.f32 %v13193_v6, %v18173_v21  ;;  %v9267_v51 = vpop.xlane.xlu0 %9266  ;;  %13200 = vrsqrt.f32 %v9297_v57  ;;  %v6600_v57 = vld [vmem:[%s19045_s24] sm:$0x3] }
0x19f1   :  { %v9264_v52 = vpop.xlane.xlu1 %9263  ;;  %v9283_v61 = vmul.f32 0.03125, %v9267_v51  ;;  %v9347_v31 = vmul.f32 %v18218_v1, %v9325_v63 }
0x19f2   :  { %v9346_v36 = vmul.f32 %v18218_v1, %v9324_v4  ;;  %v9282_v20 = vmul.f32 0.03125, %v9264_v52  ;;  %v19046_v4 = vld [vmem:[#allocation41_spill] sm:$0xff] }
0x19f3   :  { %v13195_v39 = vpop.eup %13194  ;;  %v9299_v21 = vadd.f32 1e-05, %v9283_v61  ;;  %v9369_v56 = vadd.f32 %v18223_v10, %v9347_v31  ;;  %v9383_v63 = vsub.s32 1, %v19046_v4 }
0x19f4   :  { %v9368_v9 = vadd.f32 %v18223_v10, %v9346_v36  ;;  %v9326_v50 = vmul.f32 %v13195_v39, %v18184_v0  ;;  %v13197_v35 = vpop.eup %13196  ;;  %v9298_v5 = vadd.f32 1e-05, %v9282_v20 }
0x19f5   :  { %v9327_v11 = vmul.f32 %v13197_v35, %v18180_v43  ;;  %v18339_v51 = vrot.slane %v6600_v57, %v9383_v63 }
0x19f6   :  { %10421 = vmatmul.mubr.msk.f32.gmra.mrb[156].mxu0 %vm426_vm0, %v9368_v9  ;;  %13202 = vrsqrt.f32 %v9298_v5  ;;  %v9348_v62 = vmul.f32 %v18218_v1, %v9326_v50 }
0x19f7   :  { %9553 = vmatprep.mubr.f32.mxu0 %v18957_v42  ;;  %13204 = vrsqrt.f32 %v9299_v21  ;;  %v9349_v54 = vmul.f32 %v18218_v1, %v9327_v11 }
0x19f8   :  { %v9370_v0 = vadd.f32 %v18223_v10, %v9348_v62 }
0x19f9   :  { %v13199_v30 = vpop.eup %13198  ;;  %v9371_v47 = vadd.f32 %v18223_v10, %v9349_v54 }
0x19fa   :  { %10422 = vmatmul.mubr.msk.f32.gmra.mrb[158].mxu0 %vm426_vm0, %v9369_v56  ;;  %v9328_v14 = vmul.f32 %v13199_v30, %v18197_v48  ;;  %v13201_v55 = vpop.eup %13200 }
0x19fb   :  { %9559 = vmatprep.mubr.f32.mxu0 %v18957_v42  ;;  %v9329_v46 = vmul.f32 %v13201_v55, %v18194_v24 }
0x19fc   :  { %v9350_v43 = vmul.f32 %v18218_v1, %v9328_v14 }
0x19fd   :  { %v9351_v48 = vmul.f32 %v18218_v1, %v9329_v46 }
0x19fe   :  { %10423 = vmatmul.mubr.msk.f32.gmra.mrb[160].mxu0 %vm426_vm0, %v9370_v0  ;;  %v9372_v2 = vadd.f32 %v18223_v10, %v9350_v43 }
0x19ff   :  { %9565 = vmatprep.mubr.f32.mxu0 %v18957_v42  ;;  %v9373_v22 = vadd.f32 %v18223_v10, %v9351_v48 }
0x1a00   :  { %v13203_v23 = vpop.eup %13202 }
0x1a01   :  { %v9330_v44 = vmul.f32 %v13203_v23, %v18209_v32  ;;  %v13205_v12 = vpop.eup %13204 }
0x1a02   :  { %10424 = vmatmul.mubr.msk.f32.gmra.mrb[162].mxu0 %vm426_vm0, %v9371_v47  ;;  %v9331_v8 = vmul.f32 %v13205_v12, %v18206_v17  ;;  %v18337_v17 = vrot.slane %v6600_v57, %v18999_v18 }
0x1a03   :  { %9571 = vmatprep.mubr.f32.mxu0 %v18957_v42  ;;  %v9352_v24 = vmul.f32 %v18218_v1, %v9330_v44 }
0x1a04   :  { %v9353_v6 = vmul.f32 %v18218_v1, %v9331_v8 }
0x1a05   :  { %v9374_v13 = vadd.f32 %v18223_v10, %v9352_v24 }
0x1a06   :  { %10425 = vmatmul.mubr.msk.f32.gmra.mrb[164].mxu0 %vm426_vm0, %v9372_v2  ;;  %v9375_v32 = vadd.f32 %v18223_v10, %v9353_v6 }
0x1a07   :  { %9577 = vmatprep.mubr.f32.mxu0 %v18957_v42 }
0x1a0a   :  { %10426 = vmatmul.mubr.msk.f32.gmra.mrb[166].mxu0 %vm426_vm0, %v9373_v22 }
0x1a0b   :  { %9583 = vmatprep.mubr.f32.mxu0 %v18957_v42 }
0x1a0e   :  { %10427 = vmatmul.mubr.msk.f32.gmra.mrb[168].mxu0 %vm426_vm0, %v9374_v13 }
0x1a0f   :  { %9589 = vmatprep.mubr.f32.mxu0 %v18957_v42 }
0x1a12   :  { %10428 = vmatmul.mubr.msk.f32.gmra.mrb[170].mxu0 %vm426_vm0, %v9375_v32 }
0x1a49   :  { %v9501_v52 = vpop.f32.mrb[140].mxu0 }
0x1a4a   :  { %v9502_v36 = vadd.f32 %v9501_v52, %v18337_v17  ;;  %v9503_v1 = vpop.f32.mrb[141].mxu0 }
0x1a4b   :  { %v9504_v39 = vadd.f32 %v9503_v1, %v18339_v51 }
0x1a4c   :  { %v9628_v61 = vmul.f32 0.70710677, %v9502_v36  ;;  %v9596_v24 = vmul.f32 0.5, %v9502_v36 }
0x1a4d   :  { %v9629_v42 = vmul.f32 0.70710677, %v9504_v39  ;;  %v9507_v20 = vpop.f32.mrb[142].mxu0  ;;  %v9597_v48 = vmul.f32 0.5, %v9504_v39 }
0x1a4e   :  { %13206 = verf.f32 %v9628_v61  ;;  %v9508_v10 = vadd.f32 %v9507_v20, %v18337_v17  ;;  %v9509_v9 = vpop.f32.mrb[143].mxu0 }
0x1a4f   :  { %13208 = verf.f32 %v9629_v42  ;;  %v9510_v31 = vadd.f32 %v9509_v9, %v18339_v51 }
0x1a50   :  { %v9630_v18 = vmul.f32 0.70710677, %v9508_v10  ;;  %v9598_v36 = vmul.f32 0.5, %v9508_v10 }
0x1a51   :  { %v9631_v50 = vmul.f32 0.70710677, %v9510_v31  ;;  %v9513_v35 = vpop.f32.mrb[144].mxu0  ;;  %v9599_v39 = vmul.f32 0.5, %v9510_v31 }
0x1a52   :  { %13210 = verf.f32 %v9630_v18  ;;  %v9514_v5 = vadd.f32 %v9513_v35, %v18337_v17  ;;  %v9515_v21 = vpop.f32.mrb[145].mxu0 }
0x1a53   :  { %13212 = verf.f32 %v9631_v50  ;;  %v9516_v56 = vadd.f32 %v9515_v21, %v18339_v51 }
0x1a54   :  { %v9632_v62 = vmul.f32 0.70710677, %v9514_v5  ;;  %v9600_v10 = vmul.f32 0.5, %v9514_v5 }
0x1a55   :  { %v9633_v11 = vmul.f32 0.70710677, %v9516_v56  ;;  %v9519_v30 = vpop.f32.mrb[146].mxu0 }
0x1a56   :  { %13214 = verf.f32 %v9632_v62  ;;  %v18348_v0 = vadd.f32 %v9519_v30, %v18337_v17  ;;  %v9521_v54 = vpop.f32.mrb[147].mxu0 }
0x1a57   :  { %13216 = verf.f32 %v9633_v11  ;;  %v9522_v14 = vadd.f32 %v9521_v54, %v18339_v51  ;;  %v9601_v54 = vmul.f32 0.5, %v9516_v56 }
0x1a58   :  { %v13207_v55 = vpop.eup %13206  ;;  %v9634_v47 = vmul.f32 0.70710677, %v18348_v0  ;;  %v9602_v5 = vmul.f32 0.5, %v18348_v0 }
0x1a59   :  { %v13209_v43 = vpop.eup %13208  ;;  %v9692_v46 = vadd.f32 1.0, %v13207_v55  ;;  %v9635_v23 = vmul.f32 0.70710677, %v9522_v14  ;;  %v9525_v2 = vpop.f32.mrb[148].mxu0  ;;  %v9603_v56 = vmul.f32 0.5, %v9522_v14 }
0x1a5a   :  { %v9693_v44 = vadd.f32 1.0, %v13209_v43  ;;  %13218 = verf.f32 %v9634_v47  ;;  %v18353_v12 = vadd.f32 %v9525_v2, %v18337_v17  ;;  %v9527_v22 = vpop.f32.mrb[149].mxu0 }
0x1a5b   :  { %13220 = verf.f32 %v9635_v23  ;;  %v9528_v8 = vadd.f32 %v9527_v22, %v18339_v51  ;;  %v9724_v4 = vmul.f32 %v9692_v46, %v9596_v24 }
0x1a5c   :  { %v13211_v13 = vpop.eup %13210  ;;  %v9636_v6 = vmul.f32 0.70710677, %v18353_v12  ;;  %v9725_v32 = vmul.f32 %v9693_v44, %v9597_v48 }
0x1a5d   :  { %v13213_v57 = vpop.eup %13212  ;;  %v9694_v63 = vadd.f32 1.0, %v13211_v13  ;;  %v9637_v52 = vmul.f32 0.70710677, %v9528_v8  ;;  %v9531_v1 = vpop.f32.mrb[150].mxu0  ;;  %v9605_v14 = vmul.f32 0.5, %v9528_v8 }
0x1a5e   :  { %v9695_v61 = vadd.f32 1.0, %v13213_v57  ;;  %13222 = verf.f32 %v9636_v6  ;;  %v18358_v42 = vadd.f32 %v9531_v1, %v18337_v17  ;;  %v9533_v20 = vpop.f32.mrb[151].mxu0  ;;  %9820 = vmatprep.mubr.f32.mxu0 %v9725_v32 }
0x1a5f   :  { %13224 = verf.f32 %v9637_v52  ;;  %v9534_v9 = vadd.f32 %v9533_v20, %v18339_v51  ;;  %9821 = vmatmul.mubr.f32.vlgmr.msra.gmra.mrb[172].mxu0 %v9724_v4  ;;  %v9726_v30 = vmul.f32 %v9694_v63, %v9598_v36 }
0x1a60   :  { %v13215_v18 = vpop.eup %13214  ;;  %v9638_v50 = vmul.f32 0.70710677, %v18358_v42  ;;  %v9727_v35 = vmul.f32 %v9695_v61, %v9599_v39 }
0x1a61   :  { %v13217_v21 = vpop.eup %13216  ;;  %v9696_v62 = vadd.f32 1.0, %v13215_v18  ;;  %v9639_v11 = vmul.f32 0.70710677, %v9534_v9  ;;  %v9537_v31 = vpop.f32.mrb[152].mxu0 }
0x1a62   :  { %v9697_v55 = vadd.f32 1.0, %v13217_v21  ;;  %13226 = verf.f32 %v9638_v50  ;;  %v9538_v47 = vadd.f32 %v9537_v31, %v18337_v17  ;;  %v9539_v43 = vpop.f32.mrb[153].mxu0  ;;  %9825 = vmatprep.mubr.f32.mxu0 %v9727_v35  ;;  %v9604_v35 = vmul.f32 0.5, %v18353_v12 }
0x1a63   :  { %13228 = verf.f32 %v9639_v11  ;;  %v9540_v46 = vadd.f32 %v9539_v43, %v18339_v51  ;;  %9826 = vmatmul.mubr.f32.gmra.mrb[174].mxu0 %v9726_v30  ;;  %v9728_v22 = vmul.f32 %v9696_v62, %v9600_v10  ;;  %v9607_v30 = vmul.f32 0.5, %v9534_v9 }
0x1a64   :  { %v13219_v23 = vpop.eup %13218  ;;  %v9640_v2 = vmul.f32 0.70710677, %v9538_v47  ;;  %v9729_v48 = vmul.f32 %v9697_v55, %v9601_v54  ;;  %v9606_v55 = vmul.f32 0.5, %v18358_v42 }
0x1a65   :  { %v13221_v44 = vpop.eup %13220  ;;  %v9698_v24 = vadd.f32 1.0, %v13219_v23  ;;  %v9641_v13 = vmul.f32 0.70710677, %v9540_v46  ;;  %v9543_v6 = vpop.f32.mrb[154].mxu0 }
0x1a66   :  { %v9699_v32 = vadd.f32 1.0, %v13221_v44  ;;  %13230 = verf.f32 %v9640_v2  ;;  %v9544_v57 = vadd.f32 %v9543_v6, %v18337_v17  ;;  %v9545_v4 = vpop.f32.mrb[155].mxu0  ;;  %9830 = vmatprep.mubr.f32.mxu1 %v9729_v48  ;;  %v9609_v48 = vmul.f32 0.5, %v9540_v46 }
0x1a67   :  { %13232 = verf.f32 %v9641_v13  ;;  %v9546_v63 = vadd.f32 %v9545_v4, %v18339_v51  ;;  %9831 = vmatmul.mubr.f32.vlgmr.msra.gmra.mrb[152].mxu1 %v9728_v22  ;;  %v9730_v18 = vmul.f32 %v9698_v24, %v9602_v5  ;;  %v9608_v44 = vmul.f32 0.5, %v9538_v47 }
0x1a68   :  { %v13223_v52 = vpop.eup %13222  ;;  %v9642_v1 = vmul.f32 0.70710677, %v9544_v57  ;;  %v9731_v39 = vmul.f32 %v9699_v32, %v9603_v56  ;;  %v9610_v42 = vmul.f32 0.5, %v9544_v57 }
0x1a69   :  { %v13225_v61 = vpop.eup %13224  ;;  %v9700_v20 = vadd.f32 1.0, %v13223_v52  ;;  %v9643_v36 = vmul.f32 0.70710677, %v9546_v63  ;;  %v9611_v56 = vmul.f32 0.5, %v9546_v63 }
0x1a6a   :  { %v9701_v50 = vadd.f32 1.0, %v13225_v61  ;;  %13234 = verf.f32 %v9642_v1  ;;  %9835 = vmatprep.mubr.f32.mxu1 %v9731_v39 }
0x1a6b   :  { %13236 = verf.f32 %v9643_v36  ;;  %9836 = vmatmul.mubr.f32.gmra.mrb[154].mxu1 %v9730_v18  ;;  %v9732_v31 = vmul.f32 %v9700_v20, %v9604_v35 }
0x1a6c   :  { %v13227_v0 = vpop.eup %13226  ;;  %v9733_v21 = vmul.f32 %v9701_v50, %v9605_v14 }
0x1a6d   :  { %v13229_v62 = vpop.eup %13228  ;;  %v9702_v11 = vadd.f32 1.0, %v13227_v0 }
0x1a6e   :  { %v9703_v54 = vadd.f32 1.0, %v13229_v62  ;;  %9840 = vmatprep.mubr.f32.mxu1 %v9733_v21 }
0x1a6f   :  { %9841 = vmatmul.mubr.f32.gmra.mrb[156].mxu1 %v9732_v31  ;;  %v9734_v2 = vmul.f32 %v9702_v11, %v9606_v55 }
0x1a70   :  { %v13231_v43 = vpop.eup %13230  ;;  %v9735_v8 = vmul.f32 %v9703_v54, %v9607_v30 }
0x1a71   :  { %v13233_v10 = vpop.eup %13232  ;;  %v9704_v23 = vadd.f32 1.0, %v13231_v43 }
0x1a72   :  { %v9705_v12 = vadd.f32 1.0, %v13233_v10  ;;  %9845 = vmatprep.mubr.f32.mxu1 %v9735_v8 }
0x1a73   :  { %9846 = vmatmul.mubr.f32.gmra.mrb[158].mxu1 %v9734_v2  ;;  %v9736_v9 = vmul.f32 %v9704_v23, %v9608_v44 }
0x1a74   :  { %v13235_v22 = vpop.eup %13234  ;;  %v9737_v24 = vmul.f32 %v9705_v12, %v9609_v48 }
0x1a75   :  { %v13237_v13 = vpop.eup %13236  ;;  %v9706_v6 = vadd.f32 1.0, %v13235_v22 }
0x1a76   :  { %v9707_v32 = vadd.f32 1.0, %v13237_v13  ;;  %9850 = vmatprep.mubr.f32.mxu1 %v9737_v24 }
0x1a77   :  { %9851 = vmatmul.mubr.f32.gmra.mrb[160].mxu1 %v9736_v9  ;;  %v9738_v5 = vmul.f32 %v9706_v6, %v9610_v42 }
0x1a78   :  { %v9739_v4 = vmul.f32 %v9707_v32, %v9611_v56 }
0x1a7a   :  { %9855 = vmatprep.mubr.f32.mxu1 %v9739_v4 }
0x1a7b   :  { %9856 = vmatmul.mubr.f32.gmra.mrb[162].mxu1 %v9738_v5 }
0x1ac9   :  { %v9549_v52 = vpop.f32.mrb[156].mxu0 }
0x1aca   :  { %v9550_v46 = vadd.f32 %v9549_v52, %v18337_v17  ;;  %v9551_v1 = vpop.f32.mrb[157].mxu0 }
0x1acb   :  { %v9552_v47 = vadd.f32 %v9551_v1, %v18339_v51 }
0x1acc   :  { %v9644_v39 = vmul.f32 0.70710677, %v9550_v46  ;;  %v9612_v13 = vmul.f32 0.5, %v9550_v46 }
0x1acd   :  { %v9645_v61 = vmul.f32 0.70710677, %v9552_v47  ;;  %v9555_v20 = vpop.f32.mrb[158].mxu0  ;;  %v9613_v12 = vmul.f32 0.5, %v9552_v47 }
0x1ace   :  { %13238 = verf.f32 %v9644_v39  ;;  %v9556_v63 = vadd.f32 %v9555_v20, %v18337_v17  ;;  %v9557_v36 = vpop.f32.mrb[159].mxu0 }
0x1acf   :  { %13240 = verf.f32 %v9645_v61  ;;  %v9558_v57 = vadd.f32 %v9557_v36, %v18339_v51 }
0x1ad0   :  { %v9646_v18 = vmul.f32 0.70710677, %v9556_v63  ;;  %v9614_v46 = vmul.f32 0.5, %v9556_v63 }
0x1ad1   :  { %v9647_v14 = vmul.f32 0.70710677, %v9558_v57  ;;  %v9561_v50 = vpop.f32.mrb[160].mxu0  ;;  %v9615_v47 = vmul.f32 0.5, %v9558_v57 }
0x1ad2   :  { %13242 = verf.f32 %v9646_v18  ;;  %v9562_v35 = vadd.f32 %v9561_v50, %v18337_v17  ;;  %v9563_v0 = vpop.f32.mrb[161].mxu0 }
0x1ad3   :  { %13244 = verf.f32 %v9647_v14  ;;  %v9564_v21 = vadd.f32 %v9563_v0, %v18339_v51 }
0x1ad4   :  { %v9648_v62 = vmul.f32 0.70710677, %v9562_v35  ;;  %v9616_v63 = vmul.f32 0.5, %v9562_v35 }
0x1ad5   :  { %v9649_v11 = vmul.f32 0.70710677, %v9564_v21  ;;  %v9567_v31 = vpop.f32.mrb[162].mxu0 }
0x1ad6   :  { %13246 = verf.f32 %v9648_v62  ;;  %v18376_v30 = vadd.f32 %v9567_v31, %v18337_v17  ;;  %v9569_v54 = vpop.f32.mrb[163].mxu0 }
0x1ad7   :  { %13248 = verf.f32 %v9649_v11  ;;  %v9570_v55 = vadd.f32 %v9569_v54, %v18339_v51  ;;  %v9617_v54 = vmul.f32 0.5, %v9564_v21 }
0x1ad8   :  { %v13239_v43 = vpop.eup %13238  ;;  %v9650_v8 = vmul.f32 0.70710677, %v18376_v30  ;;  %v9618_v35 = vmul.f32 0.5, %v18376_v30 }
0x1ad9   :  { %v13241_v10 = vpop.eup %13240  ;;  %v9708_v23 = vadd.f32 1.0, %v13239_v43  ;;  %v9651_v2 = vmul.f32 0.70710677, %v9570_v55  ;;  %v9573_v48 = vpop.f32.mrb[164].mxu0  ;;  %v9619_v21 = vmul.f32 0.5, %v9570_v55 }
0x1ada   :  { %v9709_v44 = vadd.f32 1.0, %v13241_v10  ;;  %13250 = verf.f32 %v9650_v8  ;;  %v18381_v22 = vadd.f32 %v9573_v48, %v18337_v17  ;;  %v9575_v24 = vpop.f32.mrb[165].mxu0 }
0x1adb   :  { %13252 = verf.f32 %v9651_v2  ;;  %v9576_v6 = vadd.f32 %v9575_v24, %v18339_v51  ;;  %v9740_v1 = vmul.f32 %v9708_v23, %v9612_v13 }
0x1adc   :  { %v13243_v9 = vpop.eup %13242  ;;  %v9652_v56 = vmul.f32 0.70710677, %v18381_v22  ;;  %v9741_v32 = vmul.f32 %v9709_v44, %v9613_v12 }
0x1add   :  { %v13245_v42 = vpop.eup %13244  ;;  %v9710_v4 = vadd.f32 1.0, %v13243_v9  ;;  %v9653_v5 = vmul.f32 0.70710677, %v9576_v6  ;;  %v9579_v52 = vpop.f32.mrb[166].mxu0  ;;  %v9621_v55 = vmul.f32 0.5, %v9576_v6 }
0x1ade   :  { %v9711_v39 = vadd.f32 1.0, %v13245_v42  ;;  %13254 = verf.f32 %v9652_v56  ;;  %v18386_v61 = vadd.f32 %v9579_v52, %v18337_v17  ;;  %v9581_v20 = vpop.f32.mrb[167].mxu0  ;;  %9860 = vmatprep.mubr.f32.mxu1 %v9741_v32 }
0x1adf   :  { %13256 = verf.f32 %v9653_v5  ;;  %v9582_v36 = vadd.f32 %v9581_v20, %v18339_v51  ;;  %9861 = vmatmul.mubr.f32.gmra.mrb[164].mxu1 %v9740_v1  ;;  %v9742_v31 = vmul.f32 %v9710_v4, %v9614_v46 }
0x1ae0   :  { %v13247_v18 = vpop.eup %13246  ;;  %v9654_v14 = vmul.f32 0.70710677, %v18386_v61  ;;  %v9743_v50 = vmul.f32 %v9711_v39, %v9615_v47 }
0x1ae1   :  { %v13249_v0 = vpop.eup %13248  ;;  %v9712_v62 = vadd.f32 1.0, %v13247_v18  ;;  %v9655_v11 = vmul.f32 0.70710677, %v9582_v36  ;;  %v9585_v57 = vpop.f32.mrb[168].mxu0 }
0x1ae2   :  { %v9713_v43 = vadd.f32 1.0, %v13249_v0  ;;  %13258 = verf.f32 %v9654_v14  ;;  %v9586_v8 = vadd.f32 %v9585_v57, %v18337_v17  ;;  %v9587_v10 = vpop.f32.mrb[169].mxu0  ;;  %9865 = vmatprep.mubr.f32.mxu1 %v9743_v50 }
0x1ae3   :  { %13260 = verf.f32 %v9655_v11  ;;  %v9588_v23 = vadd.f32 %v9587_v10, %v18339_v51  ;;  %9866 = vmatmul.mubr.f32.gmra.mrb[166].mxu1 %v9742_v31  ;;  %v9744_v56 = vmul.f32 %v9712_v62, %v9616_v63  ;;  %v9623_v11 = vmul.f32 0.5, %v9582_v36 }
0x1ae4   :  { %v13251_v2 = vpop.eup %13250  ;;  %v9656_v48 = vmul.f32 0.70710677, %v9586_v8  ;;  %v9745_v12 = vmul.f32 %v9713_v43, %v9617_v54  ;;  %v9622_v31 = vmul.f32 0.5, %v18386_v61 }
0x1ae5   :  { %v13253_v44 = vpop.eup %13252  ;;  %v9714_v24 = vadd.f32 1.0, %v13251_v2  ;;  %v9657_v13 = vmul.f32 0.70710677, %v9588_v23  ;;  %v9591_v9 = vpop.f32.mrb[170].mxu0  ;;  %v9625_v2 = vmul.f32 0.5, %v9588_v23 }
0x1ae6   :  { %v9715_v32 = vadd.f32 1.0, %v13253_v44  ;;  %13262 = verf.f32 %v9656_v48  ;;  %v9592_v42 = vadd.f32 %v9591_v9, %v18337_v17  ;;  %v9593_v4 = vpop.f32.mrb[171].mxu0  ;;  %9870 = vmatprep.mubr.f32.mxu1 %v9745_v12  ;;  %v9620_v17 = vmul.f32 0.5, %v18381_v22 }
0x1ae7   :  { %13264 = verf.f32 %v9657_v13  ;;  %v9594_v5 = vadd.f32 %v9593_v4, %v18339_v51  ;;  %9871 = vmatmul.mubr.f32.gmra.mrb[168].mxu1 %v9744_v56  ;;  %v9746_v18 = vmul.f32 %v9714_v24, %v9618_v35  ;;  %v9624_v48 = vmul.f32 0.5, %v9586_v8  ;;  %v18398_v8 = vld [vmem:[%s13648_s12] ss:$0 sm:$0xff] }
0x1ae8   :  { %v13255_v52 = vpop.eup %13254  ;;  %v9658_v1 = vmul.f32 0.70710677, %v9592_v42  ;;  %v9747_v47 = vmul.f32 %v9715_v32, %v9619_v21  ;;  %v9626_v61 = vmul.f32 0.5, %v9592_v42 }
0x1ae9   :  { %v13257_v39 = vpop.eup %13256  ;;  %v9716_v20 = vadd.f32 1.0, %v13255_v52  ;;  %v9659_v46 = vmul.f32 0.70710677, %v9594_v5  ;;  %v9627_v9 = vmul.f32 0.5, %v9594_v5 }
0x1aea   :  { %v9717_v14 = vadd.f32 1.0, %v13257_v39  ;;  %13266 = verf.f32 %v9658_v1  ;;  %9875 = vmatprep.mubr.f32.mxu1 %v9747_v47 }
0x1aeb   :  { %13268 = verf.f32 %v9659_v46  ;;  %9876 = vmatmul.mubr.f32.gmra.mrb[170].mxu1 %v9746_v18  ;;  %v9748_v62 = vmul.f32 %v9716_v20, %v9620_v17 }
0x1aec   :  { %v13259_v30 = vpop.eup %13258  ;;  %v9749_v50 = vmul.f32 %v9717_v14, %v9621_v55 }
0x1aed   :  { %v13261_v0 = vpop.eup %13260  ;;  %v9718_v51 = vadd.f32 1.0, %v13259_v30 }
0x1aee   :  { %v9719_v57 = vadd.f32 1.0, %v13261_v0  ;;  %9880 = vmatprep.mubr.f32.mxu1 %v9749_v50 }
0x1aef   :  { %9881 = vmatmul.mubr.f32.gmra.mrb[172].mxu1 %v9748_v62  ;;  %v9750_v63 = vmul.f32 %v9718_v51, %v9622_v31 }
0x1af0   :  { %v13263_v54 = vpop.eup %13262  ;;  %v9751_v6 = vmul.f32 %v9719_v57, %v9623_v11 }
0x1af1   :  { %v13265_v43 = vpop.eup %13264  ;;  %v9720_v10 = vadd.f32 1.0, %v13263_v54 }
0x1af2   :  { %v9721_v22 = vadd.f32 1.0, %v13265_v43  ;;  %9885 = vmatprep.mubr.f32.mxu1 %v9751_v6 }
0x1af3   :  { %9886 = vmatmul.mubr.f32.gmra.mrb[174].mxu1 %v9750_v63  ;;  %v9752_v13 = vmul.f32 %v9720_v10, %v9624_v48 }
0x1af4   :  { %v13267_v12 = vpop.eup %13266  ;;  %v9753_v44 = vmul.f32 %v9721_v22, %v9625_v2 }
0x1af5   :  { %v13269_v24 = vpop.eup %13268  ;;  %v9722_v36 = vadd.f32 1.0, %v13267_v12 }
0x1af6   :  { %v9723_v56 = vadd.f32 1.0, %v13269_v24  ;;  %9890 = vmatprep.mubr.f32.mxu1 %v9753_v44 }
0x1af7   :  { %9891 = vmatmul.mubr.f32.gmra.mrb[176].mxu1 %v9752_v13  ;;  %v9754_v32 = vmul.f32 %v9722_v36, %v9626_v61  ;;  %v19047_v36 = vld [vmem:[#allocation64_spill] sm:$0xff]  ;;  %v13270_v61 = vld [vmem:[%s19018_s22] ss:$0 sm:$0xff] }
0x1af8   :  { %v9755_v21 = vmul.f32 %v9723_v56, %v9627_v9  ;;  %v19048_v9 = vld [vmem:[#allocation76_spill] sm:$0xff] }
0x1af9   :  { %v6468_v56 = vadd.f32 %v17559_v60, %v19048_v9 }
0x1afa   :  { %9895 = vmatprep.mubr.f32.mxu1 %v9755_v21 }
0x1afb   :  { %9896 = vmatmul.mubr.f32.gmra.mrb[178].mxu1 %v9754_v32  ;;  %v6490_v21 = vadd.f32 %v13270_v61, %v6468_v56  ;;  %v19049_v32 = vld [vmem:[#allocation92_spill] sm:$0xff] }
0x1b32   :  { %v10916_v23 = vpop.f32.mrb[172].mxu0 }
0x1b33   :  { %v10917_v4 = vpop.f32.mrb[173].mxu0 }
0x1b34   :  { %v10918_v35 = vadd.f32 %v10917_v4, %v10916_v23  ;;  %v6469_v23 = vadd.f32 %v17565_v29, %v19049_v32  ;;  %v19050_v4 = vld [vmem:[#allocation67_spill] sm:$0xff] }
0x1b36   :  { %v9901_v52 = vadd.f32 %v10918_v35, %v18007_v15  ;;  %v10919_v1 = vpop.f32.mrb[174].mxu0  ;;  %v6491_v35 = vadd.f32 %v13270_v61, %v6469_v23 }
0x1b37   :  { %v10920_v47 = vpop.f32.mrb[175].mxu0 }
0x1b38   :  { %v9923_v39 = vadd.f32 %v18398_v8, %v9901_v52  ;;  %v10921_v5 = vadd.f32 %v10920_v47, %v10919_v1  ;;  %v19051_v52 = vld [vmem:[#allocation53_spill] sm:$0xff]  ;;  %v19052_v47 = vld [vmem:[#allocation60_spill] sm:$0xff] }
0x1b39   :  { %v6471_v1 = vadd.f32 %v17569_v40, %v19051_v52  ;;  %v6472_v60 = vadd.f32 %v17567_v34, %v19052_v47  ;;  %v19059_v52 = vld [vmem:[#allocation81_spill] sm:$0xff]  ;;  %v19063_v47 = vld [vmem:[#allocation98_spill] sm:$0xff] }
0x1b3a   :  { %v9902_v20 = vadd.f32 %v10921_v5, %v18004_v28  ;;  %v10922_v42 = vpop.f32.mrb[152].mxu1  ;;  %9939 = vxpose.xlu1.b32.start [1/8] (short) (narrow) %v9923_v39, 32 }
0x1b3b   :  { %v10923_v46 = vpop.f32.mrb[153].mxu1  ;;  %v6493_v39 = vadd.f32 %v13270_v61, %v6471_v1  ;;  %v6494_v5 = vadd.f32 %v13270_v61, %v6472_v60  ;;  %v19062_v1 = vld [vmem:[#allocation65_spill] sm:$0xff]  ;;  %v19064_v60 = vld [vmem:[#allocation114_spill] sm:$0xff] }
0x1b3c   :  { %v9924_v18 = vadd.f32 %v18398_v8, %v9902_v20  ;;  %v10924_v55 = vadd.f32 %v10923_v46, %v10922_v42  ;;  %v19053_v20 = vld [vmem:[#allocation51_spill] sm:$0xff]  ;;  %v19054_v42 = vld [vmem:[#allocation54_spill] sm:$0xff] }
0x1b3d   :  { %v6473_v29 = vadd.f32 %v19054_v42, %v19053_v20  ;;  %v19055_v46 = vld [vmem:[#allocation66_spill] sm:$0xff] }
0x1b3e   :  { %v9903_v14 = vadd.f32 %v10924_v55, %v18021_v45  ;;  %v10925_v17 = vpop.f32.mrb[154].mxu1  ;;  %9940 = vxpose.xlu1.b32.cont [2/8] (short) (narrow) %v9924_v18, 32  ;;  %v19056_v18 = vld [vmem:[#allocation84_spill] sm:$0xff] }
0x1b3f   :  { %v10926_v30 = vpop.f32.mrb[155].mxu1  ;;  %v6495_v55 = vadd.f32 %v13270_v61, %v6473_v29 }
0x1b40   :  { %v9925_v15 = vadd.f32 %v18398_v8, %v9903_v14  ;;  %v10927_v50 = vadd.f32 %v10926_v30, %v10925_v17 }
0x1b42   :  { %v9904_v0 = vadd.f32 %v10927_v50, %v18017_v26  ;;  %v10928_v51 = vpop.f32.mrb[156].mxu1  ;;  %9941 = vxpose.xlu1.b32.cont [3/8] (short) (narrow) %v9925_v15, 32 }
0x1b43   :  { %v10929_v62 = vpop.f32.mrb[157].mxu1 }
0x1b44   :  { %v9926_v28 = vadd.f32 %v18398_v8, %v9904_v0  ;;  %v10930_v11 = vadd.f32 %v10929_v62, %v10928_v51 }
0x1b46   :  { %v9905_v57 = vadd.f32 %v10930_v11, %v18035_v49  ;;  %v10931_v31 = vpop.f32.mrb[158].mxu1  ;;  %9942 = vxpose.xlu1.b32.cont [4/8] (short) (narrow) %v9926_v28, 32 }
0x1b47   :  { %v10932_v54 = vpop.f32.mrb[159].mxu1 }
0x1b48   :  { %v9927_v45 = vadd.f32 %v18398_v8, %v9905_v57  ;;  %v10933_v6 = vadd.f32 %v10932_v54, %v10931_v31 }
0x1b4a   :  { %v9906_v43 = vadd.f32 %v10933_v6, %v18031_v19  ;;  %v10934_v10 = vpop.f32.mrb[160].mxu1  ;;  %9943 = vxpose.xlu1.b32.cont [5/8] (short) (narrow) %v9927_v45, 32  ;;  %v6467_v19 = vadd.f32 %v17561_v58, %v19047_v36 }
0x1b4b   :  { %v10935_v26 = vpop.f32.mrb[161].mxu1 }
0x1b4c   :  { %v9928_v63 = vadd.f32 %v18398_v8, %v9906_v43  ;;  %v10936_v2 = vadd.f32 %v10935_v26, %v10934_v10 }
0x1b4e   :  { %v9907_v22 = vadd.f32 %v10936_v2, %v18049_v27  ;;  %v10937_v48 = vpop.f32.mrb[162].mxu1  ;;  %9944 = vxpose.xlu1.b32.cont [6/8] (short) (narrow) %v9928_v63, 32  ;;  %v6489_v27 = vadd.f32 %v13270_v61, %v6467_v19 }
0x1b4f   :  { %v10938_v49 = vpop.f32.mrb[163].mxu1 }
0x1b50   :  { %v9929_v12 = vadd.f32 %v18398_v8, %v9907_v22  ;;  %v10939_v44 = vadd.f32 %v10938_v49, %v10937_v48 }
0x1b52   :  { %v9908_v24 = vadd.f32 %v10939_v44, %v18046_v3  ;;  %9945 = vxpose.xlu1.b32.cont [7/8] (short) (narrow) %v9929_v12, 32  ;;  %v6470_v3 = vadd.f32 %v17563_v7, %v19050_v4  ;;  %v6474_v7 = vadd.f32 %v19056_v18, %v19055_v46 }
0x1b54   :  { %v9930_v13 = vadd.f32 %v18398_v8, %v9908_v24  ;;  %v6492_v58 = vadd.f32 %v13270_v61, %v6470_v3  ;;  %v6496_v14 = vadd.f32 %v13270_v61, %v6474_v7  ;;  %v19057_v3 = vld [vmem:[#allocation79_spill] sm:$0xff] }
0x1b56   :  { %9946 = vxpose.xlu1.b32.end [8/8] (short) (narrow) %v9930_v13, 32 }
0x1b5a   :  { %6531 = vxpose.xlu1.b32.start [1/8] (short) (narrow) %v6489_v27, 16 }
0x1b5e   :  { %6532 = vxpose.xlu1.b32.cont [2/8] (short) (narrow) %v6490_v21, 16 }
0x1b62   :  { %6533 = vxpose.xlu1.b32.cont [3/8] (short) (narrow) %v6491_v35, 16 }
0x1b66   :  { %6534 = vxpose.xlu1.b32.cont [4/8] (short) (narrow) %v6492_v58, 16 }
0x1b6a   :  { %6535 = vxpose.xlu1.b32.cont [5/8] (short) (narrow) %v6493_v39, 16 }
0x1b6e   :  { %6536 = vxpose.xlu1.b32.cont [6/8] (short) (narrow) %v6494_v5, 16 }
0x1b72   :  { %6537 = vxpose.xlu1.b32.cont [7/8] (short) (narrow) %v6495_v55, 16 }
0x1b76   :  { %6538 = vxpose.xlu1.b32.end [8/8] (short) (narrow) %v6496_v14, 16 }
0x1bb2   :  { %v10940_v40 = vpop.f32.mrb[164].mxu1 }
0x1bb3   :  { %v10941_v17 = vpop.f32.mrb[165].mxu1 }
0x1bb4   :  { %v10942_v30 = vadd.f32 %v10941_v17, %v10940_v40 }
0x1bb6   :  { %v9909_v34 = vadd.f32 %v10942_v30, %v18079_v53  ;;  %v10943_v15 = vpop.f32.mrb[166].mxu1 }
0x1bb7   :  { %v10944_v50 = vpop.f32.mrb[167].mxu1 }
0x1bb8   :  { %v9931_v0 = vadd.f32 %v18398_v8, %v9909_v34  ;;  %v10945_v51 = vadd.f32 %v10944_v50, %v10943_v15 }
0x1bba   :  { %v9910_v62 = vadd.f32 %v10945_v51, %v18076_v59  ;;  %9975 = vxpose.xlu0.b32.start [1/8] (short) (narrow) %v9931_v0, 32  ;;  %v10946_v28 = vpop.f32.mrb[168].mxu1  ;;  %v9955_v57 = vpop.trf.xlu1 }
0x1bbb   :  { %v10947_v11 = vpop.f32.mrb[169].mxu1  ;;  %9971 = vst.msk [vmem:[%s13658_s30] sm:$0xff] %vm2015_vm5, %v9955_v57 }
0x1bbc   :  { %v9932_v31 = vadd.f32 %v18398_v8, %v9910_v62  ;;  %v10948_v54 = vadd.f32 %v10947_v11, %v10946_v28 }
0x1bbe   :  { %v9911_v53 = vadd.f32 %v10948_v54, %v18091_v38  ;;  %9976 = vxpose.xlu0.b32.cont [2/8] (short) (narrow) %v9932_v31, 32  ;;  %v10949_v45 = vpop.f32.mrb[170].mxu1  ;;  %v9956_v43 = vpop.trf.xlu1 }
0x1bbf   :  { %v10950_v6 = vpop.f32.mrb[171].mxu1  ;;  %9972 = vst.msk [vmem:[%s13658_s30 + $0x8] sm:$0xff] %vm2015_vm5, %v9956_v43 }
0x1bc0   :  { %v9933_v10 = vadd.f32 %v18398_v8, %v9911_v53  ;;  %v10951_v26 = vadd.f32 %v10950_v6, %v10949_v45 }
0x1bc2   :  { %v9912_v59 = vadd.f32 %v10951_v26, %v18088_v16  ;;  %9977 = vxpose.xlu0.b32.cont [3/8] (short) (narrow) %v9933_v10, 32  ;;  %v10952_v63 = vpop.f32.mrb[172].mxu1  ;;  %v9957_v22 = vpop.trf.xlu1 }
0x1bc3   :  { %v10953_v2 = vpop.f32.mrb[173].mxu1  ;;  %9973 = vst.msk [vmem:[%s13658_s30 + $0x10] sm:$0xff] %vm2015_vm5, %v9957_v22 }
0x1bc4   :  { %v9934_v48 = vadd.f32 %v18398_v8, %v9912_v59  ;;  %v10954_v49 = vadd.f32 %v10953_v2, %v10952_v63 }
0x1bc6   :  { %v9913_v38 = vadd.f32 %v10954_v49, %v18103_v33  ;;  %9978 = vxpose.xlu0.b32.cont [4/8] (short) (narrow) %v9934_v48, 32  ;;  %v10955_v12 = vpop.f32.mrb[174].mxu1  ;;  %v9958_v24 = vpop.trf.xlu1 }
0x1bc7   :  { %v10956_v44 = vpop.f32.mrb[175].mxu1  ;;  %9974 = vst.msk [vmem:[%s13658_s30 + $0x18] sm:$0xff] %vm2015_vm5, %v9958_v24 }
0x1bc8   :  { %v9935_v36 = vadd.f32 %v18398_v8, %v9913_v38  ;;  %v10957_v19 = vadd.f32 %v10956_v44, %v10955_v12 }
0x1bca   :  { %v9914_v16 = vadd.f32 %v10957_v19, %v18100_v25  ;;  %9979 = vxpose.xlu0.b32.cont [5/8] (short) (narrow) %v9935_v36, 32  ;;  %v10958_v13 = vpop.f32.mrb[176].mxu1 }
0x1bcb   :  { %v10959_v9 = vpop.f32.mrb[177].mxu1 }
0x1bcc   :  { %v9936_v56 = vadd.f32 %v18398_v8, %v9914_v16  ;;  %v10960_v61 = vadd.f32 %v10959_v9, %v10958_v13 }
0x1bce   :  { %v9915_v33 = vadd.f32 %v10960_v61, %v18121_v41  ;;  %9980 = vxpose.xlu0.b32.cont [6/8] (short) (narrow) %v9936_v56, 32  ;;  %v10961_v27 = vpop.f32.mrb[178].mxu1  ;;  %v19058_v41 = vld [vmem:[#allocation118_spill] sm:$0xff] }
0x1bcf   :  { %v10962_v21 = vpop.f32.mrb[179].mxu1 }
0x1bd0   :  { %v9937_v32 = vadd.f32 %v18398_v8, %v9915_v33  ;;  %v10963_v23 = vadd.f32 %v10962_v21, %v10961_v27 }
0x1bd2   :  { %v9916_v4 = vadd.f32 %v10963_v23, %v18118_v37  ;;  %9981 = vxpose.xlu0.b32.cont [7/8] (short) (narrow) %v9937_v32, 32  ;;  %v19060_v37 = vld [vmem:[#allocation86_spill] sm:$0xff] }
0x1bd4   :  { %v9938_v25 = vadd.f32 %v18398_v8, %v9916_v4  ;;  %v19061_v8 = vld [vmem:[#allocation103_spill] sm:$0xff] }
0x1bd6   :  { %9982 = vxpose.xlu0.b32.end [8/8] (short) (narrow) %v9938_v25, 32 }
0x1bda   :  { %6497 = vxpose.xlu0.b32.start [1/8] (short) (narrow) %v19057_v3, 16  ;;  %v6547_v35 = vpop.trf.xlu1 }
0x1bdb   :  { %10316 = vst.msk [vmem:[%s13653_s3 + $0x10] sm:$0xff] %vm2015_vm5, %v6547_v35 }
0x1bde   :  { %6498 = vxpose.xlu0.b32.cont [2/8] (short) (narrow) %v19058_v41, 16  ;;  %v6548_v58 = vpop.trf.xlu1 }
0x1bdf   :  { %10317 = vst.msk [vmem:[%s13653_s3 + $0x18] sm:$0xff] %vm2015_vm5, %v6548_v58 }
0x1be2   :  { %6499 = vxpose.xlu0.b32.cont [3/8] (short) (narrow) %v19059_v52, 16 }
0x1be6   :  { %6500 = vxpose.xlu0.b32.cont [4/8] (short) (narrow) %v19060_v37, 16 }
0x1bea   :  { %6501 = vxpose.xlu0.b32.cont [5/8] (short) (narrow) %v19061_v8, 16 }
0x1bee   :  { %6502 = vxpose.xlu0.b32.cont [6/8] (short) (narrow) %v19062_v1, 16 }
0x1bf2   :  { %6503 = vxpose.xlu0.b32.cont [7/8] (short) (narrow) %v19063_v47, 16 }
0x1bf6   :  { %6504 = vxpose.xlu0.b32.end [8/8] (short) (narrow) %v19064_v60, 16 }
0x1c3a   :  { %v9991_v39 = vpop.trf.xlu0 }
0x1c3b   :  { %10430 = vst.msk [vmem:[%s13658_s30 + $0x20] sm:$0xff] %vm2015_vm5, %v9991_v39 }
0x1c3e   :  { %v9992_v5 = vpop.trf.xlu0 }
0x1c3f   :  { %10431 = vst.msk [vmem:[%s13658_s30 + $0x28] sm:$0xff] %vm2015_vm5, %v9992_v5 }
0x1c42   :  { %v9993_v20 = vpop.trf.xlu0 }
0x1c43   :  { %10432 = vst.msk [vmem:[%s13658_s30 + $0x30] sm:$0xff] %vm2015_vm5, %v9993_v20 }
0x1c46   :  { %v9994_v42 = vpop.trf.xlu0 }
0x1c47   :  { %10433 = vst.msk [vmem:[%s13658_s30 + $0x38] sm:$0xff] %vm2015_vm5, %v9994_v42 }
0x1c5a   :  { %v6513_v29 = vpop.trf.xlu0 }
0x1c5b   :  { %6529 = vst.msk [vmem:[%s13653_s3] sm:$0xff] %vm2015_vm5, %v6513_v29 }
0x1c5e   :  { %v6514_v46 = vpop.trf.xlu0 }
0x1c5f   :  { %6530 = vst.msk [vmem:[%s13653_s3 + $0x8] sm:$0xff] %vm2015_vm5, %v6514_v46 }
0x1c60   :  { %10020 = vsyncpa [#allocation3], 1 }
0x1c61   :  { %10021 = vsyncpa [#allocation5], 1 }
0x1c62   :  { %10022 = vsyncpa [#allocation8], 1 }
0x1c63   :  { %10023 = vsyncpa [#allocation11], 1 }

</bundles_post_ra>
